<compile_context>
chip_gen: v5e
topology: v5e:2x2
jax: 0.10.0
libtpu: 0.0.40
codegen_flags: <defaults>
</compile_context>

<pallas_src>
import functools

import jax
import jax.numpy as jnp
from jax.experimental import pallas as pl
from jax.experimental.pallas import tpu as pltpu


# Sub-pixel tap tables for ConvTranspose2d(kernel=4, stride=2, padding=1).
# Output row oh = 2*a + r.  For parity r the contributing kernel rows and the
# matching input-row offsets (ih = a + off) are:
_KIDX = ((1, 3), (0, 2))   # kernel index, per (parity, tap)
_KOFF = ((0, -1), (1, 0))  # input-row offset, per (parity, tap)


# --------------------------- parameter preparation --------------------------- #

def _deconv_subpixel_taps(w):
    """(Cin, Cout, 4, 4) torch ConvTranspose2d weight -> (4, 4, Cin, Cout) taps.

    dim0 = output parity class rh*2+rw, dim1 = tap th*2+tw.
    """
    rows = []
    for rh in (0, 1):
        for rw in (0, 1):
            rows.append(jnp.stack(
                [w[:, :, _KIDX[rh][th], _KIDX[rw][tw]]
                 for th in (0, 1) for tw in (0, 1)], axis=0))
    return jnp.stack(rows, axis=0)


def init_decoder_params(key, in_dim, h_dim, res_h_dim, out_chan, exp_kernel):
    """Raw parameters in PyTorch layouts (ConvTranspose2d: (Cin,Cout,kh,kw))."""
    ks = jax.random.split(key, 10)
    s = 0.1
    return {
        "exp_w": s * jax.random.normal(ks[0], (in_dim, in_dim, exp_kernel, exp_kernel), jnp.float32),
        "exp_b": s * jax.random.normal(ks[1], (in_dim,), jnp.float32),
        "ic1_w": s * jax.random.normal(ks[2], (in_dim, h_dim, 3, 3), jnp.float32),
        "ic1_b": s * jax.random.normal(ks[3], (h_dim,), jnp.float32),
        # ResidualLayer Conv2d weights are (Cout, Cin, kh, kw), bias=False
        "res_w3": s * jax.random.normal(ks[4], (res_h_dim, h_dim, 3, 3), jnp.float32),
        "res_w1": s * jax.random.normal(ks[5], (h_dim, res_h_dim, 1, 1), jnp.float32),
        "ic2_w": s * jax.random.normal(ks[6], (h_dim, h_dim // 2, 4, 4), jnp.float32),
        "ic2_b": s * jax.random.normal(ks[7], (h_dim // 2,), jnp.float32),
        "ic3_w": s * jax.random.normal(ks[8], (h_dim // 2, out_chan, 4, 4), jnp.float32),
        "ic3_b": s * jax.random.normal(ks[9], (out_chan,), jnp.float32),
    }


def prepare_params(raw):
    """One-time repacking (hoisted out of the forward): bf16 tap matrices."""
    bf16, f32 = jnp.bfloat16, jnp.float32
    in_dim = raw["exp_w"].shape[0]
    s_exp = raw["exp_w"].shape[2]
    h_dim = raw["ic1_w"].shape[1]
    res_h = raw["res_w3"].shape[0]
    c2 = raw["ic2_w"].shape[1]
    out_chan = raw["ic3_w"].shape[1]
    c3p = ((out_chan + 7) // 8) * 8  # lane-pad the final Cout

    # exp_conv: 1x1-latent ConvTranspose == per-spatial-position linear map.
    wexp = jnp.transpose(raw["exp_w"], (0, 2, 3, 1)).reshape(
        in_dim, s_exp * s_exp, in_dim).astype(f32)
    bexp = raw["exp_b"].reshape(1, in_dim).astype(f32)

    # iconv1 (ConvTranspose k3 s1 p1) as a stride-1 conv: tap (di,dj) -> W[:,:,1-di,1-dj]
    w1 = jnp.transpose(jnp.flip(raw["ic1_w"], (2, 3)), (2, 3, 0, 1)).reshape(
        9, in_dim, h_dim).astype(bf16)
    b1 = raw["ic1_b"].reshape(1, h_dim).astype(f32)

    # residual Conv2d 3x3: tap (di,dj) -> W[:, :, di+1, dj+1] laid out [ci, co]
    wr3 = jnp.transpose(raw["res_w3"], (2, 3, 1, 0)).reshape(9, h_dim, res_h).astype(bf16)
    wr1 = jnp.transpose(raw["res_w1"][:, :, 0, 0], (1, 0)).astype(bf16)  # (res_h, h_dim)

    w2 = _deconv_subpixel_taps(raw["ic2_w"]).astype(bf16)            # (4,4,h_dim,c2)
    b2 = raw["ic2_b"].reshape(1, c2).astype(f32)
    w3 = _deconv_subpixel_taps(raw["ic3_w"])                          # (4,4,c2,out_chan)
    w3 = jnp.pad(w3, ((0, 0), (0, 0), (0, 0), (0, c3p - out_chan))).astype(bf16)
    b3 = jnp.pad(raw["ic3_b"], (0, c3p - out_chan)).reshape(1, c3p).astype(f32)

    return dict(wexp=wexp, bexp=bexp, w1=w1, b1=b1, wr3=wr3, wr1=wr1,
                w2=w2, b2=b2, w3=w3, b3=b3)


# ------------------------------- fused kernel -------------------------------- #

def _decoder_kernel(z_ref, wexp_ref, bexp_ref, w1_ref, b1_ref, wr3_ref, wr1_ref,
                    w2_ref, b2_ref, w3_ref, b3_ref, out_ref,
                    pad_a, xcur, pad_rx, pad_y, *, S, n_res_layers):
    f32, bf16 = jnp.float32, jnp.bfloat16
    n = pl.program_id(0)
    S2 = S * S
    base = 2 * S                        # first interior row of the haloed buffers
    c_lat = wexp_ref.shape[0]
    c_exp = wexp_ref.shape[2]
    c1 = w1_ref.shape[2]
    cr = wr3_ref.shape[2]
    c2 = w2_ref.shape[3]
    c3p = w3_ref.shape[3]

    # Halo regions of the padded buffers must read as zero.
    pad_a[...] = jnp.zeros_like(pad_a)
    pad_rx[...] = jnp.zeros_like(pad_rx)
    pad_y[...] = jnp.zeros_like(pad_y)

    # Column-wrap masks for horizontal taps on S x S flat (row = h*S + w) images.
    col = jax.lax.broadcasted_iota(jnp.int32, (S2, 1), 0) % S
    m_left = col > 0          # rows still valid when the tap shifts left  (dj = -1)
    m_right = col < (S - 1)   # rows still valid when the tap shifts right (dj = +1)

    def tap(ref, prefix, di, dj):
        idx = prefix + (pl.ds(base + di * S + dj, S2), slice(None))
        v = ref[idx]
        if dj == -1:
            v = jnp.where(m_left, v, 0.0)
        elif dj == 1:
            v = jnp.where(m_right, v, 0.0)
        return v.astype(bf16)

    # ---- exp_conv: 1x1 latent -> S x S (outer product), + act0 ReLU ---------
    acc = jnp.zeros((S2, c_exp), f32)
    for ci in range(c_lat):
        acc = acc + z_ref[n, ci] * wexp_ref[ci]
    pad_a[pl.ds(base, S2), :] = jnp.maximum(acc + bexp_ref[...], 0.0)

    # ---- iconv1: ConvTranspose k3 s1 p1 == 3x3 stride-1 conv ----------------
    acc = jnp.zeros((S2, c1), f32)
    for di in (-1, 0, 1):
        for dj in (-1, 0, 1):
            w = w1_ref[(di + 1) * 3 + (dj + 1)]
            acc = acc + jnp.dot(tap(pad_a, (), di, dj), w,
                                preferred_element_type=f32)
    xcur[...] = acc + b1_ref[...]

    # ---- residual stack (weights shared across layers, as in the reference) -
    for _ in range(n_res_layers):
        x = xcur[...]
        pad_rx[pl.ds(base, S2), :] = jnp.maximum(x, 0.0)   # pre-ReLU applied once
        acc = jnp.zeros((S2, cr), f32)
        for di in (-1, 0, 1):
            for dj in (-1, 0, 1):
                w = wr3_ref[(di + 1) * 3 + (dj + 1)]
                acc = acc + jnp.dot(tap(pad_rx, (), di, dj), w,
                                    preferred_element_type=f32)
        t = jnp.maximum(acc, 0.0).astype(bf16)
        xcur[...] = x + jnp.dot(t, wr1_ref[...], preferred_element_type=f32)

    # Final ReLU of the residual stack feeds iconv2.
    pad_rx[pl.ds(base, S2), :] = jnp.maximum(xcur[...], 0.0)

    # ---- iconv2: ConvTranspose k4 s2 p1, sub-pixel (no zero dilation) -------
    # One 4-tap conv per output parity class (rh, rw); + bias + act1 ReLU.
    for rh in (0, 1):
        for rw in (0, 1):
            acc = jnp.zeros((S2, c2), f32)
            for th in (0, 1):
                for tw in (0, 1):
                    w = w2_ref[rh * 2 + rw, th * 2 + tw]
                    acc = acc + jnp.dot(
                        tap(pad_rx, (), _KOFF[rh][th], _KOFF[rw][tw]), w,
                        preferred_element_type=f32)
            pad_y[rh * 2 + rw, pl.ds(base, S2), :] = jnp.maximum(
                acc + b2_ref[...], 0.0)

    # ---- iconv3: ConvTranspose k4 s2 p1 on the parity sub-images ------------
    # Input row u = 2*c + e + d of iconv2's output maps to sub-image parity rp
    # and index offset delta with u = 2*(c + delta) + rp:
    def submap(e, d):
        if d == 0:
            return e, 0
        if d == 1:
            return (1, 0) if e == 0 else (0, 1)
        return (1, -1) if e == 0 else (0, 0)

    for sh in (0, 1):
        for e in (0, 1):
            for sw in (0, 1):
                for f in (0, 1):
                    acc = jnp.zeros((S2, c3p), f32)
                    for th in (0, 1):
                        for tw in (0, 1):
                            rp, da = submap(e, _KOFF[sh][th])
                            cp, db = submap(f, _KOFF[sw][tw])
                            w = w3_ref[sh * 2 + sw, th * 2 + tw]
                            acc = acc + jnp.dot(
                                tap(pad_y, (rp * 2 + cp,), da, db), w,
                                preferred_element_type=f32)
                    kk = (2 * e + sh) * 4 + (2 * f + sw)   # final parity class
                    out_ref[0, kk, :, :] = acc + b3_ref[...]


# ------------------------------ forward wrapper ------------------------------ #

def decoder_forward(x_nchw, params, *, n_res_layers, out_chan, exp_kernel):
    n, c_lat, hin, win = x_nchw.shape
    if hin != 1 or win != 1:
        # TODO(synk): fused kernel specializes exp_conv to 1x1 latents (outer product);
        # general latent spatial sizes are not supported here.
        raise NotImplementedError("fused decoder kernel expects a 1x1 latent")

    S = exp_kernel
    S2 = S * S
    c0 = params["wexp"].shape[2]
    c1 = params["w1"].shape[2]
    c2 = params["w2"].shape[3]
    c3p = params["w3"].shape[3]
    pad_rows = S2 + 4 * S

    z = x_nchw.reshape(n, c_lat).astype(jnp.float32)

    def _const_spec(a):
        zeros = (0,) * a.ndim
        return pl.BlockSpec(a.shape, lambda i, _z=zeros: _z)

    weight_keys = ("wexp", "bexp", "w1", "b1", "wr3", "wr1", "w2", "b2", "w3", "b3")
    in_specs = [pl.BlockSpec(memory_space=pltpu.MemorySpace.SMEM)]   # latent scalars
    in_specs += [_const_spec(params[k]) for k in weight_keys]

    kernel = functools.partial(_decoder_kernel, S=S, n_res_layers=n_res_layers)

    out = pl.pallas_call(
        kernel,
        out_shape=jax.ShapeDtypeStruct((n, 16, S2, c3p), jnp.float32),
        grid_spec=pltpu.PrefetchScalarGridSpec(
            num_scalar_prefetch=0,
            grid=(n,),
            in_specs=in_specs,
            out_specs=pl.BlockSpec((1, 16, S2, c3p), lambda i: (i, 0, 0, 0)),
            scratch_shapes=[
                pltpu.VMEM((pad_rows, c0), jnp.float32),      # haloed exp output
                pltpu.VMEM((S2, c1), jnp.float32),            # current rstack x
                pltpu.VMEM((pad_rows, c1), jnp.float32),      # haloed relu(x)
                pltpu.VMEM((4, pad_rows, c2), jnp.float32),   # haloed iconv2 parities
            ],
        ),
        compiler_params=pltpu.CompilerParams(dimension_semantics=("parallel",)),
    )(z, *[params[k] for k in weight_keys])

    # Interleave the 4x4 parity classes back into a dense image (tiny XLA op):
    # kernel index kk = ph*4 + pw, row = c*S + g, final pixel = (4c+ph, 4g+pw).
    out = out.reshape(n, 4, 4, S, S, c3p)
    out = out.transpose(0, 3, 1, 4, 2, 5).reshape(n, 4 * S, 4 * S, c3p)
    out = out[..., :out_chan]
    return jnp.transpose(out, (0, 3, 1, 2))   # NHWC -> NCHW


# --------------------------- pure-JAX reference ------------------------------ #

def _ref_decoder(x, raw, n_res_layers):
    hi = jax.lax.Precision.HIGHEST

    def conv_t(x, w, b, s, p):
        k = w.shape[2]
        wc = jnp.transpose(jnp.flip(w, (2, 3)), (1, 0, 2, 3))
        y = jax.lax.conv_general_dilated(
            x, wc, window_strides=(1, 1),
            padding=[(k - 1 - p, k - 1 - p)] * 2, lhs_dilation=(s, s),
            dimension_numbers=("NCHW", "OIHW", "NCHW"), precision=hi)
        return y + b.reshape(1, -1, 1, 1)

    def conv(x, w, p):
        return jax.lax.conv_general_dilated(
            x, w, window_strides=(1, 1), padding=[(p, p)] * 2,
            dimension_numbers=("NCHW", "OIHW", "NCHW"), precision=hi)

    x = jax.nn.relu(conv_t(x, raw["exp_w"], raw["exp_b"], 1, 0))
    x = conv_t(x, raw["ic1_w"], raw["ic1_b"], 1, 1)
    for _ in range(n_res_layers):
        t = conv(jax.nn.relu(x), raw["res_w3"], 1)
        x = x + conv(jax.nn.relu(t), raw["res_w1"], 0)
    x = jax.nn.relu(x)
    x = jax.nn.relu(conv_t(x, raw["ic2_w"], raw["ic2_b"], 2, 1))
    return conv_t(x, raw["ic3_w"], raw["ic3_b"], 2, 1)


# ----------------------------------- main ------------------------------------ #

if __name__ == "__main__":
    in_dim, h_dim, res_h_dim = 4, 32, 8
    n_res_layers, out_chan, exp_kernel = 2, 1, 8
    batch = 2

    key = jax.random.PRNGKey(0)
    kp, kx = jax.random.split(key)
    raw = init_decoder_params(kp, in_dim, h_dim, res_h_dim, out_chan, exp_kernel)
    params = prepare_params(raw)   # one-time weight repacking (bf16 taps)

    # latent z: NCHW (batch, in_dim, 1, 1) -> image (batch, out_chan, 32, 32)
    x = jax.random.normal(kx, (batch, in_dim, 1, 1), jnp.float32)

    fwd = jax.jit(functools.partial(
        decoder_forward, n_res_layers=n_res_layers,
        out_chan=out_chan, exp_kernel=exp_kernel))
    y = fwd(x, params)
    jax.block_until_ready(y)

    assert y.shape == (batch, out_chan, 4 * exp_kernel, 4 * exp_kernel), y.shape
    assert bool(jnp.all(jnp.isfinite(y)))

    # Numerical check against an f32 XLA reference (relaxed: kernel uses bf16 MXU).
    y_ref = _ref_decoder(x, raw, n_res_layers)
    err = float(jnp.max(jnp.abs(y - y_ref)))
    scale = float(jnp.max(jnp.abs(y_ref)))
    assert err <= 3e-2 + 3e-2 * scale, (err, scale)

    print("KERNEL_OK")
</pallas_src>

<mosaic_0001>
module attributes {stable_mosaic.version = 11 : i64} {
  func.func @_decoder_kernel(%arg0: i32, %arg1: memref<2x4xf32, #tpu.memory_space<smem>>, %arg2: memref<4x64x4xf32, #tpu.memory_space<vmem>>, %arg3: memref<1x4xf32, #tpu.memory_space<vmem>>, %arg4: memref<9x4x32xbf16, #tpu.memory_space<vmem>>, %arg5: memref<1x32xf32, #tpu.memory_space<vmem>>, %arg6: memref<9x32x8xbf16, #tpu.memory_space<vmem>>, %arg7: memref<8x32xbf16, #tpu.memory_space<vmem>>, %arg8: memref<4x4x32x16xbf16, #tpu.memory_space<vmem>>, %arg9: memref<1x16xf32, #tpu.memory_space<vmem>>, %arg10: memref<4x4x16x8xbf16, #tpu.memory_space<vmem>>, %arg11: memref<1x8xf32, #tpu.memory_space<vmem>>, %arg12: memref<1x16x64x8xf32, #tpu.memory_space<vmem>>, %arg13: memref<96x4xf32, #tpu.memory_space<vmem>>, %arg14: memref<64x32xf32, #tpu.memory_space<vmem>>, %arg15: memref<96x32xf32, #tpu.memory_space<vmem>>, %arg16: memref<4x96x16xf32, #tpu.memory_space<vmem>>) attributes {dimension_semantics = [#tpu.dimension_semantics<parallel>], iteration_bounds = array<i64: 2>, scalar_prefetch = 0 : i64, scratch_operands = 4 : i64, tpu.core_type = #tpu.core_type<tc>, window_params = [{transform_indices = @transform_0, window_bounds = array<i64: 2, 4>}, {pipeline_mode = #tpu.pipeline_mode<synchronous>, transform_indices = @transform_1, window_bounds = array<i64: 4, 64, 4>}, {pipeline_mode = #tpu.pipeline_mode<synchronous>, transform_indices = @transform_2, window_bounds = array<i64: 1, 4>}, {pipeline_mode = #tpu.pipeline_mode<synchronous>, transform_indices = @transform_3, window_bounds = array<i64: 9, 4, 32>}, {pipeline_mode = #tpu.pipeline_mode<synchronous>, transform_indices = @transform_4, window_bounds = array<i64: 1, 32>}, {pipeline_mode = #tpu.pipeline_mode<synchronous>, transform_indices = @transform_5, window_bounds = array<i64: 9, 32, 8>}, {pipeline_mode = #tpu.pipeline_mode<synchronous>, transform_indices = @transform_6, window_bounds = array<i64: 8, 32>}, {pipeline_mode = #tpu.pipeline_mode<synchronous>, transform_indices = @transform_7, window_bounds = array<i64: 4, 4, 32, 16>}, {pipeline_mode = #tpu.pipeline_mode<synchronous>, transform_indices = @transform_8, window_bounds = array<i64: 1, 16>}, {pipeline_mode = #tpu.pipeline_mode<synchronous>, transform_indices = @transform_9, window_bounds = array<i64: 4, 4, 16, 8>}, {pipeline_mode = #tpu.pipeline_mode<synchronous>, transform_indices = @transform_10, window_bounds = array<i64: 1, 8>}, {transform_indices = @transform_11, window_bounds = array<i64: 1, 16, 64, 8>}]} {
    %cst = arith.constant 0.000000e+00 : f32
    %0 = vector.broadcast %cst : f32 to vector<96x4xf32>
    %c0 = arith.constant 0 : index
    %c0_0 = arith.constant 0 : index
    %1 = vector.load %arg13[%c0, %c0_0] : memref<96x4xf32, #tpu.memory_space<vmem>>, vector<96x4xf32>
    tpu.vector_store %arg13[%c0, %c0_0], %0 {strides = array<i32>} : memref<96x4xf32, #tpu.memory_space<vmem>>, vector<96x4xf32>,
    %cst_1 = arith.constant 0.000000e+00 : f32
    %2 = vector.broadcast %cst_1 : f32 to vector<96x32xf32>
    %c0_2 = arith.constant 0 : index
    %c0_3 = arith.constant 0 : index
    %3 = vector.load %arg15[%c0_2, %c0_3] : memref<96x32xf32, #tpu.memory_space<vmem>>, vector<96x32xf32>
    tpu.vector_store %arg15[%c0_2, %c0_3], %2 {strides = array<i32>} : memref<96x32xf32, #tpu.memory_space<vmem>>, vector<96x32xf32>,
    %cst_4 = arith.constant 0.000000e+00 : f32
    %4 = vector.broadcast %cst_4 : f32 to vector<4x96x16xf32>
    %c0_5 = arith.constant 0 : index
    %c0_6 = arith.constant 0 : index
    %c0_7 = arith.constant 0 : index
    %5 = vector.load %arg16[%c0_5, %c0_6, %c0_7] : memref<4x96x16xf32, #tpu.memory_space<vmem>>, vector<4x96x16xf32>
    tpu.vector_store %arg16[%c0_5, %c0_6, %c0_7], %4 {strides = array<i32>} : memref<4x96x16xf32, #tpu.memory_space<vmem>>, vector<4x96x16xf32>,
    %6 = tpu.iota {dimensions = array<i32: 0>} : vector<64x1xi32>
    %c8_i32 = arith.constant 8 : i32
    %c0_i32 = arith.constant 0 : i32
    %7 = arith.cmpi eq, %c8_i32, %c0_i32 : i32
    %c1_i32 = arith.constant 1 : i32
    %8 = arith.select %7, %c1_i32, %c8_i32 : i32
    %9 = vector.broadcast %8 : i32 to vector<64x1xi32>
    %10 = arith.remsi %6, %9 : vector<64x1xi32>
    %c0_i32_8 = arith.constant 0 : i32
    %11 = vector.broadcast %c0_i32_8 : i32 to vector<64x1xi32>
    %12 = arith.cmpi ne, %10, %11 : vector<64x1xi32>
    %c0_i32_9 = arith.constant 0 : i32
    %13 = vector.broadcast %c0_i32_9 : i32 to vector<64x1xi32>
    %14 = arith.cmpi slt, %10, %13 : vector<64x1xi32>
    %c0_i32_10 = arith.constant 0 : i32
    %15 = arith.cmpi slt, %8, %c0_i32_10 : i32
    %16 = vector.broadcast %15 : i1 to vector<64x1xi1>
    %17 = vector.broadcast %16 : vector<64x1xi1> to vector<64x1xi1>
    %18 = arith.xori %14, %17 : vector<64x1xi1>
    %19 = arith.andi %18, %12 : vector<64x1xi1>
    %20 = vector.broadcast %8 : i32 to vector<64x1xi32>
    %21 = arith.addi %10, %20 : vector<64x1xi32>
    %22 = arith.select %19, %21, %10 : vector<64x1xi1>, vector<64x1xi32>
    %c0_i32_11 = arith.constant 0 : i32
    %23 = vector.broadcast %c0_i32_11 : i32 to vector<64x1xi32>
    %24 = arith.cmpi sgt, %22, %23 : vector<64x1xi32>
    %c7_i32 = arith.constant 7 : i32
    %25 = vector.broadcast %c7_i32 : i32 to vector<64x1xi32>
    %26 = arith.cmpi slt, %22, %25 : vector<64x1xi32>
    %cst_12 = arith.constant 0.000000e+00 : f32
    %27 = vector.broadcast %cst_12 : f32 to vector<64x4xf32>
    %28 = arith.index_cast %arg0 : i32 to index
    %c0_13 = arith.constant 0 : index
    %29 = memref.load %arg1[%28, %c0_13] : memref<2x4xf32, #tpu.memory_space<smem>>
    %c0_14 = arith.constant 0 : index
    %c0_15 = arith.constant 0 : index
    %c0_16 = arith.constant 0 : index
    %30 = vector.load %arg2[%c0_14, %c0_15, %c0_16] : memref<4x64x4xf32, #tpu.memory_space<vmem>>, vector<1x64x4xf32>
    %31 = vector.shape_cast %30 : vector<1x64x4xf32> to vector<64x4xf32>
    %32 = vector.broadcast %29 : f32 to vector<64x4xf32>
    %33 = arith.mulf %32, %31 : vector<64x4xf32>
    %34 = arith.addf %27, %33 : vector<64x4xf32>
    %35 = arith.index_cast %arg0 : i32 to index
    %c1 = arith.constant 1 : index
    %36 = memref.load %arg1[%35, %c1] : memref<2x4xf32, #tpu.memory_space<smem>>
    %c1_17 = arith.constant 1 : index
    %c0_18 = arith.constant 0 : index
    %c0_19 = arith.constant 0 : index
    %37 = vector.load %arg2[%c1_17, %c0_18, %c0_19] : memref<4x64x4xf32, #tpu.memory_space<vmem>>, vector<1x64x4xf32>
    %38 = vector.shape_cast %37 : vector<1x64x4xf32> to vector<64x4xf32>
    %39 = vector.broadcast %36 : f32 to vector<64x4xf32>
    %40 = arith.mulf %39, %38 : vector<64x4xf32>
    %41 = arith.addf %34, %40 : vector<64x4xf32>
    %42 = arith.index_cast %arg0 : i32 to index
    %c2 = arith.constant 2 : index
    %43 = memref.load %arg1[%42, %c2] : memref<2x4xf32, #tpu.memory_space<smem>>
    %c2_20 = arith.constant 2 : index
    %c0_21 = arith.constant 0 : index
    %c0_22 = arith.constant 0 : index
    %44 = vector.load %arg2[%c2_20, %c0_21, %c0_22] : memref<4x64x4xf32, #tpu.memory_space<vmem>>, vector<1x64x4xf32>
    %45 = vector.shape_cast %44 : vector<1x64x4xf32> to vector<64x4xf32>
    %46 = vector.broadcast %43 : f32 to vector<64x4xf32>
    %47 = arith.mulf %46, %45 : vector<64x4xf32>
    %48 = arith.addf %41, %47 : vector<64x4xf32>
    %49 = arith.index_cast %arg0 : i32 to index
    %c3 = arith.constant 3 : index
    %50 = memref.load %arg1[%49, %c3] : memref<2x4xf32, #tpu.memory_space<smem>>
    %c3_23 = arith.constant 3 : index
    %c0_24 = arith.constant 0 : index
    %c0_25 = arith.constant 0 : index
    %51 = vector.load %arg2[%c3_23, %c0_24, %c0_25] : memref<4x64x4xf32, #tpu.memory_space<vmem>>, vector<1x64x4xf32>
    %52 = vector.shape_cast %51 : vector<1x64x4xf32> to vector<64x4xf32>
    %53 = vector.broadcast %50 : f32 to vector<64x4xf32>
    %54 = arith.mulf %53, %52 : vector<64x4xf32>
    %55 = arith.addf %48, %54 : vector<64x4xf32>
    %c0_26 = arith.constant 0 : index
    %c0_27 = arith.constant 0 : index
    %56 = vector.load %arg3[%c0_26, %c0_27] : memref<1x4xf32, #tpu.memory_space<vmem>>, vector<1x4xf32>
    %57 = vector.broadcast %56 : vector<1x4xf32> to vector<64x4xf32>
    %58 = arith.addf %55, %57 : vector<64x4xf32>
    %cst_28 = arith.constant 0.000000e+00 : f32
    %59 = vector.broadcast %cst_28 : f32 to vector<64x4xf32>
    %60 = arith.maximumf %58, %59 : vector<64x4xf32>
    %c16 = arith.constant 16 : index
    %c0_29 = arith.constant 0 : index
    %61 = vector.load %arg13[%c16, %c0_29] : memref<96x4xf32, #tpu.memory_space<vmem>>, vector<64x4xf32>
    tpu.vector_store %arg13[%c16, %c0_29], %60 {strides = array<i32>} : memref<96x4xf32, #tpu.memory_space<vmem>>, vector<64x4xf32>,
    %cst_30 = arith.constant 0.000000e+00 : f32
    %62 = vector.broadcast %cst_30 : f32 to vector<64x32xf32>
    %c0_31 = arith.constant 0 : index
    %c0_32 = arith.constant 0 : index
    %c0_33 = arith.constant 0 : index
    %63 = vector.load %arg4[%c0_31, %c0_32, %c0_33] : memref<9x4x32xbf16, #tpu.memory_space<vmem>>, vector<1x4x32xbf16>
    %64 = vector.shape_cast %63 : vector<1x4x32xbf16> to vector<4x32xbf16>
    %c7 = arith.constant 7 : index
    %c0_34 = arith.constant 0 : index
    %65 = vector.load %arg13[%c7, %c0_34] : memref<96x4xf32, #tpu.memory_space<vmem>>, vector<64x4xf32>
    %cst_35 = arith.constant 0.000000e+00 : f32
    %66 = vector.shape_cast %24 : vector<64x1xi1> to vector<64x1xi1>
    %67 = vector.broadcast %66 : vector<64x1xi1> to vector<64x4xi1>
    %68 = vector.broadcast %cst_35 : f32 to vector<64x4xf32>
    %69 = arith.select %67, %65, %68 : vector<64x4xi1>, vector<64x4xf32>
    %70 = arith.truncf %69 : vector<64x4xf32> to vector<64x4xbf16>
    %cst_36 = arith.constant dense<0.000000e+00> : vector<64x32xf32>
    %71 = tpu.matmul %70, %64, %cst_36 {dimension_numbers = #tpu.dot_dimension_numbers<[1], [0], [0], [1], [0, 0, 1, 1], [], []>} : vector<64x4xbf16>, vector<4x32xbf16>, vector<64x32xf32> -> vector<64x32xf32>
    %72 = arith.addf %62, %71 : vector<64x32xf32>
    %c1_37 = arith.constant 1 : index
    %c0_38 = arith.constant 0 : index
    %c0_39 = arith.constant 0 : index
    %73 = vector.load %arg4[%c1_37, %c0_38, %c0_39] : memref<9x4x32xbf16, #tpu.memory_space<vmem>>, vector<1x4x32xbf16>
    %74 = vector.shape_cast %73 : vector<1x4x32xbf16> to vector<4x32xbf16>
    %c8 = arith.constant 8 : index
    %c0_40 = arith.constant 0 : index
    %75 = vector.load %arg13[%c8, %c0_40] : memref<96x4xf32, #tpu.memory_space<vmem>>, vector<64x4xf32>
    %76 = arith.truncf %75 : vector<64x4xf32> to vector<64x4xbf16>
    %cst_41 = arith.constant dense<0.000000e+00> : vector<64x32xf32>
    %77 = tpu.matmul %76, %74, %cst_41 {dimension_numbers = #tpu.dot_dimension_numbers<[1], [0], [0], [1], [0, 0, 1, 1], [], []>} : vector<64x4xbf16>, vector<4x32xbf16>, vector<64x32xf32> -> vector<64x32xf32>
    %78 = arith.addf %72, %77 : vector<64x32xf32>
    %c2_42 = arith.constant 2 : index
    %c0_43 = arith.constant 0 : index
    %c0_44 = arith.constant 0 : index
    %79 = vector.load %arg4[%c2_42, %c0_43, %c0_44] : memref<9x4x32xbf16, #tpu.memory_space<vmem>>, vector<1x4x32xbf16>
    %80 = vector.shape_cast %79 : vector<1x4x32xbf16> to vector<4x32xbf16>
    %c9 = arith.constant 9 : index
    %c0_45 = arith.constant 0 : index
    %81 = vector.load %arg13[%c9, %c0_45] : memref<96x4xf32, #tpu.memory_space<vmem>>, vector<64x4xf32>
    %cst_46 = arith.constant 0.000000e+00 : f32
    %82 = vector.shape_cast %26 : vector<64x1xi1> to vector<64x1xi1>
    %83 = vector.broadcast %82 : vector<64x1xi1> to vector<64x4xi1>
    %84 = vector.broadcast %cst_46 : f32 to vector<64x4xf32>
    %85 = arith.select %83, %81, %84 : vector<64x4xi1>, vector<64x4xf32>
    %86 = arith.truncf %85 : vector<64x4xf32> to vector<64x4xbf16>
    %cst_47 = arith.constant dense<0.000000e+00> : vector<64x32xf32>
    %87 = tpu.matmul %86, %80, %cst_47 {dimension_numbers = #tpu.dot_dimension_numbers<[1], [0], [0], [1], [0, 0, 1, 1], [], []>} : vector<64x4xbf16>, vector<4x32xbf16>, vector<64x32xf32> -> vector<64x32xf32>
    %88 = arith.addf %78, %87 : vector<64x32xf32>
    %c3_48 = arith.constant 3 : index
    %c0_49 = arith.constant 0 : index
    %c0_50 = arith.constant 0 : index
    %89 = vector.load %arg4[%c3_48, %c0_49, %c0_50] : memref<9x4x32xbf16, #tpu.memory_space<vmem>>, vector<1x4x32xbf16>
    %90 = vector.shape_cast %89 : vector<1x4x32xbf16> to vector<4x32xbf16>
    %c15 = arith.constant 15 : index
    %c0_51 = arith.constant 0 : index
    %91 = vector.load %arg13[%c15, %c0_51] : memref<96x4xf32, #tpu.memory_space<vmem>>, vector<64x4xf32>
    %cst_52 = arith.constant 0.000000e+00 : f32
    %92 = vector.shape_cast %24 : vector<64x1xi1> to vector<64x1xi1>
    %93 = vector.broadcast %92 : vector<64x1xi1> to vector<64x4xi1>
    %94 = vector.broadcast %cst_52 : f32 to vector<64x4xf32>
    %95 = arith.select %93, %91, %94 : vector<64x4xi1>, vector<64x4xf32>
    %96 = arith.truncf %95 : vector<64x4xf32> to vector<64x4xbf16>
    %cst_53 = arith.constant dense<0.000000e+00> : vector<64x32xf32>
    %97 = tpu.matmul %96, %90, %cst_53 {dimension_numbers = #tpu.dot_dimension_numbers<[1], [0], [0], [1], [0, 0, 1, 1], [], []>} : vector<64x4xbf16>, vector<4x32xbf16>, vector<64x32xf32> -> vector<64x32xf32>
    %98 = arith.addf %88, %97 : vector<64x32xf32>
    %c4 = arith.constant 4 : index
    %c0_54 = arith.constant 0 : index
    %c0_55 = arith.constant 0 : index
    %99 = vector.load %arg4[%c4, %c0_54, %c0_55] : memref<9x4x32xbf16, #tpu.memory_space<vmem>>, vector<1x4x32xbf16>
    %100 = vector.shape_cast %99 : vector<1x4x32xbf16> to vector<4x32xbf16>
    %c16_56 = arith.constant 16 : index
    %c0_57 = arith.constant 0 : index
    %101 = vector.load %arg13[%c16_56, %c0_57] : memref<96x4xf32, #tpu.memory_space<vmem>>, vector<64x4xf32>
    %102 = arith.truncf %101 : vector<64x4xf32> to vector<64x4xbf16>
    %cst_58 = arith.constant dense<0.000000e+00> : vector<64x32xf32>
    %103 = tpu.matmul %102, %100, %cst_58 {dimension_numbers = #tpu.dot_dimension_numbers<[1], [0], [0], [1], [0, 0, 1, 1], [], []>} : vector<64x4xbf16>, vector<4x32xbf16>, vector<64x32xf32> -> vector<64x32xf32>
    %104 = arith.addf %98, %103 : vector<64x32xf32>
    %c5 = arith.constant 5 : index
    %c0_59 = arith.constant 0 : index
    %c0_60 = arith.constant 0 : index
    %105 = vector.load %arg4[%c5, %c0_59, %c0_60] : memref<9x4x32xbf16, #tpu.memory_space<vmem>>, vector<1x4x32xbf16>
    %106 = vector.shape_cast %105 : vector<1x4x32xbf16> to vector<4x32xbf16>
    %c17 = arith.constant 17 : index
    %c0_61 = arith.constant 0 : index
    %107 = vector.load %arg13[%c17, %c0_61] : memref<96x4xf32, #tpu.memory_space<vmem>>, vector<64x4xf32>
    %cst_62 = arith.constant 0.000000e+00 : f32
    %108 = vector.shape_cast %26 : vector<64x1xi1> to vector<64x1xi1>
    %109 = vector.broadcast %108 : vector<64x1xi1> to vector<64x4xi1>
    %110 = vector.broadcast %cst_62 : f32 to vector<64x4xf32>
    %111 = arith.select %109, %107, %110 : vector<64x4xi1>, vector<64x4xf32>
    %112 = arith.truncf %111 : vector<64x4xf32> to vector<64x4xbf16>
    %cst_63 = arith.constant dense<0.000000e+00> : vector<64x32xf32>
    %113 = tpu.matmul %112, %106, %cst_63 {dimension_numbers = #tpu.dot_dimension_numbers<[1], [0], [0], [1], [0, 0, 1, 1], [], []>} : vector<64x4xbf16>, vector<4x32xbf16>, vector<64x32xf32> -> vector<64x32xf32>
    %114 = arith.addf %104, %113 : vector<64x32xf32>
    %c6 = arith.constant 6 : index
    %c0_64 = arith.constant 0 : index
    %c0_65 = arith.constant 0 : index
    %115 = vector.load %arg4[%c6, %c0_64, %c0_65] : memref<9x4x32xbf16, #tpu.memory_space<vmem>>, vector<1x4x32xbf16>
    %116 = vector.shape_cast %115 : vector<1x4x32xbf16> to vector<4x32xbf16>
    %c23 = arith.constant 23 : index
    %c0_66 = arith.constant 0 : index
    %117 = vector.load %arg13[%c23, %c0_66] : memref<96x4xf32, #tpu.memory_space<vmem>>, vector<64x4xf32>
    %cst_67 = arith.constant 0.000000e+00 : f32
    %118 = vector.shape_cast %24 : vector<64x1xi1> to vector<64x1xi1>
    %119 = vector.broadcast %118 : vector<64x1xi1> to vector<64x4xi1>
    %120 = vector.broadcast %cst_67 : f32 to vector<64x4xf32>
    %121 = arith.select %119, %117, %120 : vector<64x4xi1>, vector<64x4xf32>
    %122 = arith.truncf %121 : vector<64x4xf32> to vector<64x4xbf16>
    %cst_68 = arith.constant dense<0.000000e+00> : vector<64x32xf32>
    %123 = tpu.matmul %122, %116, %cst_68 {dimension_numbers = #tpu.dot_dimension_numbers<[1], [0], [0], [1], [0, 0, 1, 1], [], []>} : vector<64x4xbf16>, vector<4x32xbf16>, vector<64x32xf32> -> vector<64x32xf32>
    %124 = arith.addf %114, %123 : vector<64x32xf32>
    %c7_69 = arith.constant 7 : index
    %c0_70 = arith.constant 0 : index
    %c0_71 = arith.constant 0 : index
    %125 = vector.load %arg4[%c7_69, %c0_70, %c0_71] : memref<9x4x32xbf16, #tpu.memory_space<vmem>>, vector<1x4x32xbf16>
    %126 = vector.shape_cast %125 : vector<1x4x32xbf16> to vector<4x32xbf16>
    %c24 = arith.constant 24 : index
    %c0_72 = arith.constant 0 : index
    %127 = vector.load %arg13[%c24, %c0_72] : memref<96x4xf32, #tpu.memory_space<vmem>>, vector<64x4xf32>
    %128 = arith.truncf %127 : vector<64x4xf32> to vector<64x4xbf16>
    %cst_73 = arith.constant dense<0.000000e+00> : vector<64x32xf32>
    %129 = tpu.matmul %128, %126, %cst_73 {dimension_numbers = #tpu.dot_dimension_numbers<[1], [0], [0], [1], [0, 0, 1, 1], [], []>} : vector<64x4xbf16>, vector<4x32xbf16>, vector<64x32xf32> -> vector<64x32xf32>
    %130 = arith.addf %124, %129 : vector<64x32xf32>
    %c8_74 = arith.constant 8 : index
    %c0_75 = arith.constant 0 : index
    %c0_76 = arith.constant 0 : index
    %131 = vector.load %arg4[%c8_74, %c0_75, %c0_76] : memref<9x4x32xbf16, #tpu.memory_space<vmem>>, vector<1x4x32xbf16>
    %132 = vector.shape_cast %131 : vector<1x4x32xbf16> to vector<4x32xbf16>
    %c25 = arith.constant 25 : index
    %c0_77 = arith.constant 0 : index
    %133 = vector.load %arg13[%c25, %c0_77] : memref<96x4xf32, #tpu.memory_space<vmem>>, vector<64x4xf32>
    %cst_78 = arith.constant 0.000000e+00 : f32
    %134 = vector.shape_cast %26 : vector<64x1xi1> to vector<64x1xi1>
    %135 = vector.broadcast %134 : vector<64x1xi1> to vector<64x4xi1>
    %136 = vector.broadcast %cst_78 : f32 to vector<64x4xf32>
    %137 = arith.select %135, %133, %136 : vector<64x4xi1>, vector<64x4xf32>
    %138 = arith.truncf %137 : vector<64x4xf32> to vector<64x4xbf16>
    %cst_79 = arith.constant dense<0.000000e+00> : vector<64x32xf32>
    %139 = tpu.matmul %138, %132, %cst_79 {dimension_numbers = #tpu.dot_dimension_numbers<[1], [0], [0], [1], [0, 0, 1, 1], [], []>} : vector<64x4xbf16>, vector<4x32xbf16>, vector<64x32xf32> -> vector<64x32xf32>
    %140 = arith.addf %130, %139 : vector<64x32xf32>
    %c0_80 = arith.constant 0 : index
    %c0_81 = arith.constant 0 : index
    %141 = vector.load %arg5[%c0_80, %c0_81] : memref<1x32xf32, #tpu.memory_space<vmem>>, vector<1x32xf32>
    %142 = vector.broadcast %141 : vector<1x32xf32> to vector<64x32xf32>
    %143 = arith.addf %140, %142 : vector<64x32xf32>
    %c0_82 = arith.constant 0 : index
    %c0_83 = arith.constant 0 : index
    %144 = vector.load %arg14[%c0_82, %c0_83] : memref<64x32xf32, #tpu.memory_space<vmem>>, vector<64x32xf32>
    tpu.vector_store %arg14[%c0_82, %c0_83], %143 {strides = array<i32>} : memref<64x32xf32, #tpu.memory_space<vmem>>, vector<64x32xf32>,
    %c0_84 = arith.constant 0 : index
    %c0_85 = arith.constant 0 : index
    %145 = vector.load %arg14[%c0_84, %c0_85] : memref<64x32xf32, #tpu.memory_space<vmem>>, vector<64x32xf32>
    %cst_86 = arith.constant 0.000000e+00 : f32
    %146 = vector.broadcast %cst_86 : f32 to vector<64x32xf32>
    %147 = arith.maximumf %145, %146 : vector<64x32xf32>
    %c16_87 = arith.constant 16 : index
    %c0_88 = arith.constant 0 : index
    %148 = vector.load %arg15[%c16_87, %c0_88] : memref<96x32xf32, #tpu.memory_space<vmem>>, vector<64x32xf32>
    tpu.vector_store %arg15[%c16_87, %c0_88], %147 {strides = array<i32>} : memref<96x32xf32, #tpu.memory_space<vmem>>, vector<64x32xf32>,
    %cst_89 = arith.constant 0.000000e+00 : f32
    %149 = vector.broadcast %cst_89 : f32 to vector<64x8xf32>
    %c0_90 = arith.constant 0 : index
    %c0_91 = arith.constant 0 : index
    %c0_92 = arith.constant 0 : index
    %150 = vector.load %arg6[%c0_90, %c0_91, %c0_92] : memref<9x32x8xbf16, #tpu.memory_space<vmem>>, vector<1x32x8xbf16>
    %151 = vector.shape_cast %150 : vector<1x32x8xbf16> to vector<32x8xbf16>
    %c7_93 = arith.constant 7 : index
    %c0_94 = arith.constant 0 : index
    %152 = vector.load %arg15[%c7_93, %c0_94] : memref<96x32xf32, #tpu.memory_space<vmem>>, vector<64x32xf32>
    %cst_95 = arith.constant 0.000000e+00 : f32
    %153 = vector.shape_cast %24 : vector<64x1xi1> to vector<64x1xi1>
    %154 = vector.broadcast %153 : vector<64x1xi1> to vector<64x32xi1>
    %155 = vector.broadcast %cst_95 : f32 to vector<64x32xf32>
    %156 = arith.select %154, %152, %155 : vector<64x32xi1>, vector<64x32xf32>
    %157 = arith.truncf %156 : vector<64x32xf32> to vector<64x32xbf16>
    %cst_96 = arith.constant dense<0.000000e+00> : vector<64x8xf32>
    %158 = tpu.matmul %157, %151, %cst_96 {dimension_numbers = #tpu.dot_dimension_numbers<[1], [0], [0], [1], [0, 0, 1, 1], [], []>} : vector<64x32xbf16>, vector<32x8xbf16>, vector<64x8xf32> -> vector<64x8xf32>
    %159 = arith.addf %149, %158 : vector<64x8xf32>
    %c1_97 = arith.constant 1 : index
    %c0_98 = arith.constant 0 : index
    %c0_99 = arith.constant 0 : index
    %160 = vector.load %arg6[%c1_97, %c0_98, %c0_99] : memref<9x32x8xbf16, #tpu.memory_space<vmem>>, vector<1x32x8xbf16>
    %161 = vector.shape_cast %160 : vector<1x32x8xbf16> to vector<32x8xbf16>
    %c8_100 = arith.constant 8 : index
    %c0_101 = arith.constant 0 : index
    %162 = vector.load %arg15[%c8_100, %c0_101] : memref<96x32xf32, #tpu.memory_space<vmem>>, vector<64x32xf32>
    %163 = arith.truncf %162 : vector<64x32xf32> to vector<64x32xbf16>
    %cst_102 = arith.constant dense<0.000000e+00> : vector<64x8xf32>
    %164 = tpu.matmul %163, %161, %cst_102 {dimension_numbers = #tpu.dot_dimension_numbers<[1], [0], [0], [1], [0, 0, 1, 1], [], []>} : vector<64x32xbf16>, vector<32x8xbf16>, vector<64x8xf32> -> vector<64x8xf32>
    %165 = arith.addf %159, %164 : vector<64x8xf32>
    %c2_103 = arith.constant 2 : index
    %c0_104 = arith.constant 0 : index
    %c0_105 = arith.constant 0 : index
    %166 = vector.load %arg6[%c2_103, %c0_104, %c0_105] : memref<9x32x8xbf16, #tpu.memory_space<vmem>>, vector<1x32x8xbf16>
    %167 = vector.shape_cast %166 : vector<1x32x8xbf16> to vector<32x8xbf16>
    %c9_106 = arith.constant 9 : index
    %c0_107 = arith.constant 0 : index
    %168 = vector.load %arg15[%c9_106, %c0_107] : memref<96x32xf32, #tpu.memory_space<vmem>>, vector<64x32xf32>
    %cst_108 = arith.constant 0.000000e+00 : f32
    %169 = vector.shape_cast %26 : vector<64x1xi1> to vector<64x1xi1>
    %170 = vector.broadcast %169 : vector<64x1xi1> to vector<64x32xi1>
    %171 = vector.broadcast %cst_108 : f32 to vector<64x32xf32>
    %172 = arith.select %170, %168, %171 : vector<64x32xi1>, vector<64x32xf32>
    %173 = arith.truncf %172 : vector<64x32xf32> to vector<64x32xbf16>
    %cst_109 = arith.constant dense<0.000000e+00> : vector<64x8xf32>
    %174 = tpu.matmul %173, %167, %cst_109 {dimension_numbers = #tpu.dot_dimension_numbers<[1], [0], [0], [1], [0, 0, 1, 1], [], []>} : vector<64x32xbf16>, vector<32x8xbf16>, vector<64x8xf32> -> vector<64x8xf32>
    %175 = arith.addf %165, %174 : vector<64x8xf32>
    %c3_110 = arith.constant 3 : index
    %c0_111 = arith.constant 0 : index
    %c0_112 = arith.constant 0 : index
    %176 = vector.load %arg6[%c3_110, %c0_111, %c0_112] : memref<9x32x8xbf16, #tpu.memory_space<vmem>>, vector<1x32x8xbf16>
    %177 = vector.shape_cast %176 : vector<1x32x8xbf16> to vector<32x8xbf16>
    %c15_113 = arith.constant 15 : index
    %c0_114 = arith.constant 0 : index
    %178 = vector.load %arg15[%c15_113, %c0_114] : memref<96x32xf32, #tpu.memory_space<vmem>>, vector<64x32xf32>
    %cst_115 = arith.constant 0.000000e+00 : f32
    %179 = vector.shape_cast %24 : vector<64x1xi1> to vector<64x1xi1>
    %180 = vector.broadcast %179 : vector<64x1xi1> to vector<64x32xi1>
    %181 = vector.broadcast %cst_115 : f32 to vector<64x32xf32>
    %182 = arith.select %180, %178, %181 : vector<64x32xi1>, vector<64x32xf32>
    %183 = arith.truncf %182 : vector<64x32xf32> to vector<64x32xbf16>
    %cst_116 = arith.constant dense<0.000000e+00> : vector<64x8xf32>
    %184 = tpu.matmul %183, %177, %cst_116 {dimension_numbers = #tpu.dot_dimension_numbers<[1], [0], [0], [1], [0, 0, 1, 1], [], []>} : vector<64x32xbf16>, vector<32x8xbf16>, vector<64x8xf32> -> vector<64x8xf32>
    %185 = arith.addf %175, %184 : vector<64x8xf32>
    %c4_117 = arith.constant 4 : index
    %c0_118 = arith.constant 0 : index
    %c0_119 = arith.constant 0 : index
    %186 = vector.load %arg6[%c4_117, %c0_118, %c0_119] : memref<9x32x8xbf16, #tpu.memory_space<vmem>>, vector<1x32x8xbf16>
    %187 = vector.shape_cast %186 : vector<1x32x8xbf16> to vector<32x8xbf16>
    %c16_120 = arith.constant 16 : index
    %c0_121 = arith.constant 0 : index
    %188 = vector.load %arg15[%c16_120, %c0_121] : memref<96x32xf32, #tpu.memory_space<vmem>>, vector<64x32xf32>
    %189 = arith.truncf %188 : vector<64x32xf32> to vector<64x32xbf16>
    %cst_122 = arith.constant dense<0.000000e+00> : vector<64x8xf32>
    %190 = tpu.matmul %189, %187, %cst_122 {dimension_numbers = #tpu.dot_dimension_numbers<[1], [0], [0], [1], [0, 0, 1, 1], [], []>} : vector<64x32xbf16>, vector<32x8xbf16>, vector<64x8xf32> -> vector<64x8xf32>
    %191 = arith.addf %185, %190 : vector<64x8xf32>
    %c5_123 = arith.constant 5 : index
    %c0_124 = arith.constant 0 : index
    %c0_125 = arith.constant 0 : index
    %192 = vector.load %arg6[%c5_123, %c0_124, %c0_125] : memref<9x32x8xbf16, #tpu.memory_space<vmem>>, vector<1x32x8xbf16>
    %193 = vector.shape_cast %192 : vector<1x32x8xbf16> to vector<32x8xbf16>
    %c17_126 = arith.constant 17 : index
    %c0_127 = arith.constant 0 : index
    %194 = vector.load %arg15[%c17_126, %c0_127] : memref<96x32xf32, #tpu.memory_space<vmem>>, vector<64x32xf32>
    %cst_128 = arith.constant 0.000000e+00 : f32
    %195 = vector.shape_cast %26 : vector<64x1xi1> to vector<64x1xi1>
    %196 = vector.broadcast %195 : vector<64x1xi1> to vector<64x32xi1>
    %197 = vector.broadcast %cst_128 : f32 to vector<64x32xf32>
    %198 = arith.select %196, %194, %197 : vector<64x32xi1>, vector<64x32xf32>
    %199 = arith.truncf %198 : vector<64x32xf32> to vector<64x32xbf16>
    %cst_129 = arith.constant dense<0.000000e+00> : vector<64x8xf32>
    %200 = tpu.matmul %199, %193, %cst_129 {dimension_numbers = #tpu.dot_dimension_numbers<[1], [0], [0], [1], [0, 0, 1, 1], [], []>} : vector<64x32xbf16>, vector<32x8xbf16>, vector<64x8xf32> -> vector<64x8xf32>
    %201 = arith.addf %191, %200 : vector<64x8xf32>
    %c6_130 = arith.constant 6 : index
    %c0_131 = arith.constant 0 : index
    %c0_132 = arith.constant 0 : index
    %202 = vector.load %arg6[%c6_130, %c0_131, %c0_132] : memref<9x32x8xbf16, #tpu.memory_space<vmem>>, vector<1x32x8xbf16>
    %203 = vector.shape_cast %202 : vector<1x32x8xbf16> to vector<32x8xbf16>
    %c23_133 = arith.constant 23 : index
    %c0_134 = arith.constant 0 : index
    %204 = vector.load %arg15[%c23_133, %c0_134] : memref<96x32xf32, #tpu.memory_space<vmem>>, vector<64x32xf32>
    %cst_135 = arith.constant 0.000000e+00 : f32
    %205 = vector.shape_cast %24 : vector<64x1xi1> to vector<64x1xi1>
    %206 = vector.broadcast %205 : vector<64x1xi1> to vector<64x32xi1>
    %207 = vector.broadcast %cst_135 : f32 to vector<64x32xf32>
    %208 = arith.select %206, %204, %207 : vector<64x32xi1>, vector<64x32xf32>
    %209 = arith.truncf %208 : vector<64x32xf32> to vector<64x32xbf16>
    %cst_136 = arith.constant dense<0.000000e+00> : vector<64x8xf32>
    %210 = tpu.matmul %209, %203, %cst_136 {dimension_numbers = #tpu.dot_dimension_numbers<[1], [0], [0], [1], [0, 0, 1, 1], [], []>} : vector<64x32xbf16>, vector<32x8xbf16>, vector<64x8xf32> -> vector<64x8xf32>
    %211 = arith.addf %201, %210 : vector<64x8xf32>
    %c7_137 = arith.constant 7 : index
    %c0_138 = arith.constant 0 : index
    %c0_139 = arith.constant 0 : index
    %212 = vector.load %arg6[%c7_137, %c0_138, %c0_139] : memref<9x32x8xbf16, #tpu.memory_space<vmem>>, vector<1x32x8xbf16>
    %213 = vector.shape_cast %212 : vector<1x32x8xbf16> to vector<32x8xbf16>
    %c24_140 = arith.constant 24 : index
    %c0_141 = arith.constant 0 : index
    %214 = vector.load %arg15[%c24_140, %c0_141] : memref<96x32xf32, #tpu.memory_space<vmem>>, vector<64x32xf32>
    %215 = arith.truncf %214 : vector<64x32xf32> to vector<64x32xbf16>
    %cst_142 = arith.constant dense<0.000000e+00> : vector<64x8xf32>
    %216 = tpu.matmul %215, %213, %cst_142 {dimension_numbers = #tpu.dot_dimension_numbers<[1], [0], [0], [1], [0, 0, 1, 1], [], []>} : vector<64x32xbf16>, vector<32x8xbf16>, vector<64x8xf32> -> vector<64x8xf32>
    %217 = arith.addf %211, %216 : vector<64x8xf32>
    %c8_143 = arith.constant 8 : index
    %c0_144 = arith.constant 0 : index
    %c0_145 = arith.constant 0 : index
    %218 = vector.load %arg6[%c8_143, %c0_144, %c0_145] : memref<9x32x8xbf16, #tpu.memory_space<vmem>>, vector<1x32x8xbf16>
    %219 = vector.shape_cast %218 : vector<1x32x8xbf16> to vector<32x8xbf16>
    %c25_146 = arith.constant 25 : index
    %c0_147 = arith.constant 0 : index
    %220 = vector.load %arg15[%c25_146, %c0_147] : memref<96x32xf32, #tpu.memory_space<vmem>>, vector<64x32xf32>
    %cst_148 = arith.constant 0.000000e+00 : f32
    %221 = vector.shape_cast %26 : vector<64x1xi1> to vector<64x1xi1>
    %222 = vector.broadcast %221 : vector<64x1xi1> to vector<64x32xi1>
    %223 = vector.broadcast %cst_148 : f32 to vector<64x32xf32>
    %224 = arith.select %222, %220, %223 : vector<64x32xi1>, vector<64x32xf32>
    %225 = arith.truncf %224 : vector<64x32xf32> to vector<64x32xbf16>
    %cst_149 = arith.constant dense<0.000000e+00> : vector<64x8xf32>
    %226 = tpu.matmul %225, %219, %cst_149 {dimension_numbers = #tpu.dot_dimension_numbers<[1], [0], [0], [1], [0, 0, 1, 1], [], []>} : vector<64x32xbf16>, vector<32x8xbf16>, vector<64x8xf32> -> vector<64x8xf32>
    %227 = arith.addf %217, %226 : vector<64x8xf32>
    %cst_150 = arith.constant 0.000000e+00 : f32
    %228 = vector.broadcast %cst_150 : f32 to vector<64x8xf32>
    %229 = arith.maximumf %227, %228 : vector<64x8xf32>
    %230 = arith.truncf %229 : vector<64x8xf32> to vector<64x8xbf16>
    %c0_151 = arith.constant 0 : index
    %c0_152 = arith.constant 0 : index
    %231 = vector.load %arg7[%c0_151, %c0_152] : memref<8x32xbf16, #tpu.memory_space<vmem>>, vector<8x32xbf16>
    %cst_153 = arith.constant dense<0.000000e+00> : vector<64x32xf32>
    %232 = tpu.matmul %230, %231, %cst_153 {dimension_numbers = #tpu.dot_dimension_numbers<[1], [0], [0], [1], [0, 0, 1, 1], [], []>} : vector<64x8xbf16>, vector<8x32xbf16>, vector<64x32xf32> -> vector<64x32xf32>
    %233 = arith.addf %145, %232 : vector<64x32xf32>
    %c0_154 = arith.constant 0 : index
    %c0_155 = arith.constant 0 : index
    %234 = vector.load %arg14[%c0_154, %c0_155] : memref<64x32xf32, #tpu.memory_space<vmem>>, vector<64x32xf32>
    tpu.vector_store %arg14[%c0_154, %c0_155], %233 {strides = array<i32>} : memref<64x32xf32, #tpu.memory_space<vmem>>, vector<64x32xf32>,
    %c0_156 = arith.constant 0 : index
    %c0_157 = arith.constant 0 : index
    %235 = vector.load %arg14[%c0_156, %c0_157] : memref<64x32xf32, #tpu.memory_space<vmem>>, vector<64x32xf32>
    %cst_158 = arith.constant 0.000000e+00 : f32
    %236 = vector.broadcast %cst_158 : f32 to vector<64x32xf32>
    %237 = arith.maximumf %235, %236 : vector<64x32xf32>
    %c16_159 = arith.constant 16 : index
    %c0_160 = arith.constant 0 : index
    %238 = vector.load %arg15[%c16_159, %c0_160] : memref<96x32xf32, #tpu.memory_space<vmem>>, vector<64x32xf32>
    tpu.vector_store %arg15[%c16_159, %c0_160], %237 {strides = array<i32>} : memref<96x32xf32, #tpu.memory_space<vmem>>, vector<64x32xf32>,
    %cst_161 = arith.constant 0.000000e+00 : f32
    %239 = vector.broadcast %cst_161 : f32 to vector<64x8xf32>
    %c0_162 = arith.constant 0 : index
    %c0_163 = arith.constant 0 : index
    %c0_164 = arith.constant 0 : index
    %240 = vector.load %arg6[%c0_162, %c0_163, %c0_164] : memref<9x32x8xbf16, #tpu.memory_space<vmem>>, vector<1x32x8xbf16>
    %241 = vector.shape_cast %240 : vector<1x32x8xbf16> to vector<32x8xbf16>
    %c7_165 = arith.constant 7 : index
    %c0_166 = arith.constant 0 : index
    %242 = vector.load %arg15[%c7_165, %c0_166] : memref<96x32xf32, #tpu.memory_space<vmem>>, vector<64x32xf32>
    %cst_167 = arith.constant 0.000000e+00 : f32
    %243 = vector.shape_cast %24 : vector<64x1xi1> to vector<64x1xi1>
    %244 = vector.broadcast %243 : vector<64x1xi1> to vector<64x32xi1>
    %245 = vector.broadcast %cst_167 : f32 to vector<64x32xf32>
    %246 = arith.select %244, %242, %245 : vector<64x32xi1>, vector<64x32xf32>
    %247 = arith.truncf %246 : vector<64x32xf32> to vector<64x32xbf16>
    %cst_168 = arith.constant dense<0.000000e+00> : vector<64x8xf32>
    %248 = tpu.matmul %247, %241, %cst_168 {dimension_numbers = #tpu.dot_dimension_numbers<[1], [0], [0], [1], [0, 0, 1, 1], [], []>} : vector<64x32xbf16>, vector<32x8xbf16>, vector<64x8xf32> -> vector<64x8xf32>
    %249 = arith.addf %239, %248 : vector<64x8xf32>
    %c1_169 = arith.constant 1 : index
    %c0_170 = arith.constant 0 : index
    %c0_171 = arith.constant 0 : index
    %250 = vector.load %arg6[%c1_169, %c0_170, %c0_171] : memref<9x32x8xbf16, #tpu.memory_space<vmem>>, vector<1x32x8xbf16>
    %251 = vector.shape_cast %250 : vector<1x32x8xbf16> to vector<32x8xbf16>
    %c8_172 = arith.constant 8 : index
    %c0_173 = arith.constant 0 : index
    %252 = vector.load %arg15[%c8_172, %c0_173] : memref<96x32xf32, #tpu.memory_space<vmem>>, vector<64x32xf32>
    %253 = arith.truncf %252 : vector<64x32xf32> to vector<64x32xbf16>
    %cst_174 = arith.constant dense<0.000000e+00> : vector<64x8xf32>
    %254 = tpu.matmul %253, %251, %cst_174 {dimension_numbers = #tpu.dot_dimension_numbers<[1], [0], [0], [1], [0, 0, 1, 1], [], []>} : vector<64x32xbf16>, vector<32x8xbf16>, vector<64x8xf32> -> vector<64x8xf32>
    %255 = arith.addf %249, %254 : vector<64x8xf32>
    %c2_175 = arith.constant 2 : index
    %c0_176 = arith.constant 0 : index
    %c0_177 = arith.constant 0 : index
    %256 = vector.load %arg6[%c2_175, %c0_176, %c0_177] : memref<9x32x8xbf16, #tpu.memory_space<vmem>>, vector<1x32x8xbf16>
    %257 = vector.shape_cast %256 : vector<1x32x8xbf16> to vector<32x8xbf16>
    %c9_178 = arith.constant 9 : index
    %c0_179 = arith.constant 0 : index
    %258 = vector.load %arg15[%c9_178, %c0_179] : memref<96x32xf32, #tpu.memory_space<vmem>>, vector<64x32xf32>
    %cst_180 = arith.constant 0.000000e+00 : f32
    %259 = vector.shape_cast %26 : vector<64x1xi1> to vector<64x1xi1>
    %260 = vector.broadcast %259 : vector<64x1xi1> to vector<64x32xi1>
    %261 = vector.broadcast %cst_180 : f32 to vector<64x32xf32>
    %262 = arith.select %260, %258, %261 : vector<64x32xi1>, vector<64x32xf32>
    %263 = arith.truncf %262 : vector<64x32xf32> to vector<64x32xbf16>
    %cst_181 = arith.constant dense<0.000000e+00> : vector<64x8xf32>
    %264 = tpu.matmul %263, %257, %cst_181 {dimension_numbers = #tpu.dot_dimension_numbers<[1], [0], [0], [1], [0, 0, 1, 1], [], []>} : vector<64x32xbf16>, vector<32x8xbf16>, vector<64x8xf32> -> vector<64x8xf32>
    %265 = arith.addf %255, %264 : vector<64x8xf32>
    %c3_182 = arith.constant 3 : index
    %c0_183 = arith.constant 0 : index
    %c0_184 = arith.constant 0 : index
    %266 = vector.load %arg6[%c3_182, %c0_183, %c0_184] : memref<9x32x8xbf16, #tpu.memory_space<vmem>>, vector<1x32x8xbf16>
    %267 = vector.shape_cast %266 : vector<1x32x8xbf16> to vector<32x8xbf16>
    %c15_185 = arith.constant 15 : index
    %c0_186 = arith.constant 0 : index
    %268 = vector.load %arg15[%c15_185, %c0_186] : memref<96x32xf32, #tpu.memory_space<vmem>>, vector<64x32xf32>
    %cst_187 = arith.constant 0.000000e+00 : f32
    %269 = vector.shape_cast %24 : vector<64x1xi1> to vector<64x1xi1>
    %270 = vector.broadcast %269 : vector<64x1xi1> to vector<64x32xi1>
    %271 = vector.broadcast %cst_187 : f32 to vector<64x32xf32>
    %272 = arith.select %270, %268, %271 : vector<64x32xi1>, vector<64x32xf32>
    %273 = arith.truncf %272 : vector<64x32xf32> to vector<64x32xbf16>
    %cst_188 = arith.constant dense<0.000000e+00> : vector<64x8xf32>
    %274 = tpu.matmul %273, %267, %cst_188 {dimension_numbers = #tpu.dot_dimension_numbers<[1], [0], [0], [1], [0, 0, 1, 1], [], []>} : vector<64x32xbf16>, vector<32x8xbf16>, vector<64x8xf32> -> vector<64x8xf32>
    %275 = arith.addf %265, %274 : vector<64x8xf32>
    %c4_189 = arith.constant 4 : index
    %c0_190 = arith.constant 0 : index
    %c0_191 = arith.constant 0 : index
    %276 = vector.load %arg6[%c4_189, %c0_190, %c0_191] : memref<9x32x8xbf16, #tpu.memory_space<vmem>>, vector<1x32x8xbf16>
    %277 = vector.shape_cast %276 : vector<1x32x8xbf16> to vector<32x8xbf16>
    %c16_192 = arith.constant 16 : index
    %c0_193 = arith.constant 0 : index
    %278 = vector.load %arg15[%c16_192, %c0_193] : memref<96x32xf32, #tpu.memory_space<vmem>>, vector<64x32xf32>
    %279 = arith.truncf %278 : vector<64x32xf32> to vector<64x32xbf16>
    %cst_194 = arith.constant dense<0.000000e+00> : vector<64x8xf32>
    %280 = tpu.matmul %279, %277, %cst_194 {dimension_numbers = #tpu.dot_dimension_numbers<[1], [0], [0], [1], [0, 0, 1, 1], [], []>} : vector<64x32xbf16>, vector<32x8xbf16>, vector<64x8xf32> -> vector<64x8xf32>
    %281 = arith.addf %275, %280 : vector<64x8xf32>
    %c5_195 = arith.constant 5 : index
    %c0_196 = arith.constant 0 : index
    %c0_197 = arith.constant 0 : index
    %282 = vector.load %arg6[%c5_195, %c0_196, %c0_197] : memref<9x32x8xbf16, #tpu.memory_space<vmem>>, vector<1x32x8xbf16>
    %283 = vector.shape_cast %282 : vector<1x32x8xbf16> to vector<32x8xbf16>
    %c17_198 = arith.constant 17 : index
    %c0_199 = arith.constant 0 : index
    %284 = vector.load %arg15[%c17_198, %c0_199] : memref<96x32xf32, #tpu.memory_space<vmem>>, vector<64x32xf32>
    %cst_200 = arith.constant 0.000000e+00 : f32
    %285 = vector.shape_cast %26 : vector<64x1xi1> to vector<64x1xi1>
    %286 = vector.broadcast %285 : vector<64x1xi1> to vector<64x32xi1>
    %287 = vector.broadcast %cst_200 : f32 to vector<64x32xf32>
    %288 = arith.select %286, %284, %287 : vector<64x32xi1>, vector<64x32xf32>
    %289 = arith.truncf %288 : vector<64x32xf32> to vector<64x32xbf16>
    %cst_201 = arith.constant dense<0.000000e+00> : vector<64x8xf32>
    %290 = tpu.matmul %289, %283, %cst_201 {dimension_numbers = #tpu.dot_dimension_numbers<[1], [0], [0], [1], [0, 0, 1, 1], [], []>} : vector<64x32xbf16>, vector<32x8xbf16>, vector<64x8xf32> -> vector<64x8xf32>
    %291 = arith.addf %281, %290 : vector<64x8xf32>
    %c6_202 = arith.constant 6 : index
    %c0_203 = arith.constant 0 : index
    %c0_204 = arith.constant 0 : index
    %292 = vector.load %arg6[%c6_202, %c0_203, %c0_204] : memref<9x32x8xbf16, #tpu.memory_space<vmem>>, vector<1x32x8xbf16>
    %293 = vector.shape_cast %292 : vector<1x32x8xbf16> to vector<32x8xbf16>
    %c23_205 = arith.constant 23 : index
    %c0_206 = arith.constant 0 : index
    %294 = vector.load %arg15[%c23_205, %c0_206] : memref<96x32xf32, #tpu.memory_space<vmem>>, vector<64x32xf32>
    %cst_207 = arith.constant 0.000000e+00 : f32
    %295 = vector.shape_cast %24 : vector<64x1xi1> to vector<64x1xi1>
    %296 = vector.broadcast %295 : vector<64x1xi1> to vector<64x32xi1>
    %297 = vector.broadcast %cst_207 : f32 to vector<64x32xf32>
    %298 = arith.select %296, %294, %297 : vector<64x32xi1>, vector<64x32xf32>
    %299 = arith.truncf %298 : vector<64x32xf32> to vector<64x32xbf16>
    %cst_208 = arith.constant dense<0.000000e+00> : vector<64x8xf32>
    %300 = tpu.matmul %299, %293, %cst_208 {dimension_numbers = #tpu.dot_dimension_numbers<[1], [0], [0], [1], [0, 0, 1, 1], [], []>} : vector<64x32xbf16>, vector<32x8xbf16>, vector<64x8xf32> -> vector<64x8xf32>
    %301 = arith.addf %291, %300 : vector<64x8xf32>
    %c7_209 = arith.constant 7 : index
    %c0_210 = arith.constant 0 : index
    %c0_211 = arith.constant 0 : index
    %302 = vector.load %arg6[%c7_209, %c0_210, %c0_211] : memref<9x32x8xbf16, #tpu.memory_space<vmem>>, vector<1x32x8xbf16>
    %303 = vector.shape_cast %302 : vector<1x32x8xbf16> to vector<32x8xbf16>
    %c24_212 = arith.constant 24 : index
    %c0_213 = arith.constant 0 : index
    %304 = vector.load %arg15[%c24_212, %c0_213] : memref<96x32xf32, #tpu.memory_space<vmem>>, vector<64x32xf32>
    %305 = arith.truncf %304 : vector<64x32xf32> to vector<64x32xbf16>
    %cst_214 = arith.constant dense<0.000000e+00> : vector<64x8xf32>
    %306 = tpu.matmul %305, %303, %cst_214 {dimension_numbers = #tpu.dot_dimension_numbers<[1], [0], [0], [1], [0, 0, 1, 1], [], []>} : vector<64x32xbf16>, vector<32x8xbf16>, vector<64x8xf32> -> vector<64x8xf32>
    %307 = arith.addf %301, %306 : vector<64x8xf32>
    %c8_215 = arith.constant 8 : index
    %c0_216 = arith.constant 0 : index
    %c0_217 = arith.constant 0 : index
    %308 = vector.load %arg6[%c8_215, %c0_216, %c0_217] : memref<9x32x8xbf16, #tpu.memory_space<vmem>>, vector<1x32x8xbf16>
    %309 = vector.shape_cast %308 : vector<1x32x8xbf16> to vector<32x8xbf16>
    %c25_218 = arith.constant 25 : index
    %c0_219 = arith.constant 0 : index
    %310 = vector.load %arg15[%c25_218, %c0_219] : memref<96x32xf32, #tpu.memory_space<vmem>>, vector<64x32xf32>
    %cst_220 = arith.constant 0.000000e+00 : f32
    %311 = vector.shape_cast %26 : vector<64x1xi1> to vector<64x1xi1>
    %312 = vector.broadcast %311 : vector<64x1xi1> to vector<64x32xi1>
    %313 = vector.broadcast %cst_220 : f32 to vector<64x32xf32>
    %314 = arith.select %312, %310, %313 : vector<64x32xi1>, vector<64x32xf32>
    %315 = arith.truncf %314 : vector<64x32xf32> to vector<64x32xbf16>
    %cst_221 = arith.constant dense<0.000000e+00> : vector<64x8xf32>
    %316 = tpu.matmul %315, %309, %cst_221 {dimension_numbers = #tpu.dot_dimension_numbers<[1], [0], [0], [1], [0, 0, 1, 1], [], []>} : vector<64x32xbf16>, vector<32x8xbf16>, vector<64x8xf32> -> vector<64x8xf32>
    %317 = arith.addf %307, %316 : vector<64x8xf32>
    %cst_222 = arith.constant 0.000000e+00 : f32
    %318 = vector.broadcast %cst_222 : f32 to vector<64x8xf32>
    %319 = arith.maximumf %317, %318 : vector<64x8xf32>
    %320 = arith.truncf %319 : vector<64x8xf32> to vector<64x8xbf16>
    %c0_223 = arith.constant 0 : index
    %c0_224 = arith.constant 0 : index
    %321 = vector.load %arg7[%c0_223, %c0_224] : memref<8x32xbf16, #tpu.memory_space<vmem>>, vector<8x32xbf16>
    %cst_225 = arith.constant dense<0.000000e+00> : vector<64x32xf32>
    %322 = tpu.matmul %320, %321, %cst_225 {dimension_numbers = #tpu.dot_dimension_numbers<[1], [0], [0], [1], [0, 0, 1, 1], [], []>} : vector<64x8xbf16>, vector<8x32xbf16>, vector<64x32xf32> -> vector<64x32xf32>
    %323 = arith.addf %235, %322 : vector<64x32xf32>
    %c0_226 = arith.constant 0 : index
    %c0_227 = arith.constant 0 : index
    %324 = vector.load %arg14[%c0_226, %c0_227] : memref<64x32xf32, #tpu.memory_space<vmem>>, vector<64x32xf32>
    tpu.vector_store %arg14[%c0_226, %c0_227], %323 {strides = array<i32>} : memref<64x32xf32, #tpu.memory_space<vmem>>, vector<64x32xf32>,
    %c0_228 = arith.constant 0 : index
    %c0_229 = arith.constant 0 : index
    %325 = vector.load %arg14[%c0_228, %c0_229] : memref<64x32xf32, #tpu.memory_space<vmem>>, vector<64x32xf32>
    %cst_230 = arith.constant 0.000000e+00 : f32
    %326 = vector.broadcast %cst_230 : f32 to vector<64x32xf32>
    %327 = arith.maximumf %325, %326 : vector<64x32xf32>
    %c16_231 = arith.constant 16 : index
    %c0_232 = arith.constant 0 : index
    %328 = vector.load %arg15[%c16_231, %c0_232] : memref<96x32xf32, #tpu.memory_space<vmem>>, vector<64x32xf32>
    tpu.vector_store %arg15[%c16_231, %c0_232], %327 {strides = array<i32>} : memref<96x32xf32, #tpu.memory_space<vmem>>, vector<64x32xf32>,
    %cst_233 = arith.constant 0.000000e+00 : f32
    %329 = vector.broadcast %cst_233 : f32 to vector<64x16xf32>
    %c0_234 = arith.constant 0 : index
    %c0_235 = arith.constant 0 : index
    %c0_236 = arith.constant 0 : index
    %c0_237 = arith.constant 0 : index
    %330 = vector.load %arg8[%c0_234, %c0_235, %c0_236, %c0_237] : memref<4x4x32x16xbf16, #tpu.memory_space<vmem>>, vector<1x1x32x16xbf16>
    %331 = vector.shape_cast %330 : vector<1x1x32x16xbf16> to vector<32x16xbf16>
    %c16_238 = arith.constant 16 : index
    %c0_239 = arith.constant 0 : index
    %332 = vector.load %arg15[%c16_238, %c0_239] : memref<96x32xf32, #tpu.memory_space<vmem>>, vector<64x32xf32>
    %333 = arith.truncf %332 : vector<64x32xf32> to vector<64x32xbf16>
    %cst_240 = arith.constant dense<0.000000e+00> : vector<64x16xf32>
    %334 = tpu.matmul %333, %331, %cst_240 {dimension_numbers = #tpu.dot_dimension_numbers<[1], [0], [0], [1], [0, 0, 1, 1], [], []>} : vector<64x32xbf16>, vector<32x16xbf16>, vector<64x16xf32> -> vector<64x16xf32>
    %335 = arith.addf %329, %334 : vector<64x16xf32>
    %c0_241 = arith.constant 0 : index
    %c1_242 = arith.constant 1 : index
    %c0_243 = arith.constant 0 : index
    %c0_244 = arith.constant 0 : index
    %336 = vector.load %arg8[%c0_241, %c1_242, %c0_243, %c0_244] : memref<4x4x32x16xbf16, #tpu.memory_space<vmem>>, vector<1x1x32x16xbf16>
    %337 = vector.shape_cast %336 : vector<1x1x32x16xbf16> to vector<32x16xbf16>
    %c15_245 = arith.constant 15 : index
    %c0_246 = arith.constant 0 : index
    %338 = vector.load %arg15[%c15_245, %c0_246] : memref<96x32xf32, #tpu.memory_space<vmem>>, vector<64x32xf32>
    %cst_247 = arith.constant 0.000000e+00 : f32
    %339 = vector.shape_cast %24 : vector<64x1xi1> to vector<64x1xi1>
    %340 = vector.broadcast %339 : vector<64x1xi1> to vector<64x32xi1>
    %341 = vector.broadcast %cst_247 : f32 to vector<64x32xf32>
    %342 = arith.select %340, %338, %341 : vector<64x32xi1>, vector<64x32xf32>
    %343 = arith.truncf %342 : vector<64x32xf32> to vector<64x32xbf16>
    %cst_248 = arith.constant dense<0.000000e+00> : vector<64x16xf32>
    %344 = tpu.matmul %343, %337, %cst_248 {dimension_numbers = #tpu.dot_dimension_numbers<[1], [0], [0], [1], [0, 0, 1, 1], [], []>} : vector<64x32xbf16>, vector<32x16xbf16>, vector<64x16xf32> -> vector<64x16xf32>
    %345 = arith.addf %335, %344 : vector<64x16xf32>
    %c0_249 = arith.constant 0 : index
    %c2_250 = arith.constant 2 : index
    %c0_251 = arith.constant 0 : index
    %c0_252 = arith.constant 0 : index
    %346 = vector.load %arg8[%c0_249, %c2_250, %c0_251, %c0_252] : memref<4x4x32x16xbf16, #tpu.memory_space<vmem>>, vector<1x1x32x16xbf16>
    %347 = vector.shape_cast %346 : vector<1x1x32x16xbf16> to vector<32x16xbf16>
    %c8_253 = arith.constant 8 : index
    %c0_254 = arith.constant 0 : index
    %348 = vector.load %arg15[%c8_253, %c0_254] : memref<96x32xf32, #tpu.memory_space<vmem>>, vector<64x32xf32>
    %349 = arith.truncf %348 : vector<64x32xf32> to vector<64x32xbf16>
    %cst_255 = arith.constant dense<0.000000e+00> : vector<64x16xf32>
    %350 = tpu.matmul %349, %347, %cst_255 {dimension_numbers = #tpu.dot_dimension_numbers<[1], [0], [0], [1], [0, 0, 1, 1], [], []>} : vector<64x32xbf16>, vector<32x16xbf16>, vector<64x16xf32> -> vector<64x16xf32>
    %351 = arith.addf %345, %350 : vector<64x16xf32>
    %c0_256 = arith.constant 0 : index
    %c3_257 = arith.constant 3 : index
    %c0_258 = arith.constant 0 : index
    %c0_259 = arith.constant 0 : index
    %352 = vector.load %arg8[%c0_256, %c3_257, %c0_258, %c0_259] : memref<4x4x32x16xbf16, #tpu.memory_space<vmem>>, vector<1x1x32x16xbf16>
    %353 = vector.shape_cast %352 : vector<1x1x32x16xbf16> to vector<32x16xbf16>
    %c7_260 = arith.constant 7 : index
    %c0_261 = arith.constant 0 : index
    %354 = vector.load %arg15[%c7_260, %c0_261] : memref<96x32xf32, #tpu.memory_space<vmem>>, vector<64x32xf32>
    %cst_262 = arith.constant 0.000000e+00 : f32
    %355 = vector.shape_cast %24 : vector<64x1xi1> to vector<64x1xi1>
    %356 = vector.broadcast %355 : vector<64x1xi1> to vector<64x32xi1>
    %357 = vector.broadcast %cst_262 : f32 to vector<64x32xf32>
    %358 = arith.select %356, %354, %357 : vector<64x32xi1>, vector<64x32xf32>
    %359 = arith.truncf %358 : vector<64x32xf32> to vector<64x32xbf16>
    %cst_263 = arith.constant dense<0.000000e+00> : vector<64x16xf32>
    %360 = tpu.matmul %359, %353, %cst_263 {dimension_numbers = #tpu.dot_dimension_numbers<[1], [0], [0], [1], [0, 0, 1, 1], [], []>} : vector<64x32xbf16>, vector<32x16xbf16>, vector<64x16xf32> -> vector<64x16xf32>
    %361 = arith.addf %351, %360 : vector<64x16xf32>
    %c0_264 = arith.constant 0 : index
    %c0_265 = arith.constant 0 : index
    %362 = vector.load %arg9[%c0_264, %c0_265] : memref<1x16xf32, #tpu.memory_space<vmem>>, vector<1x16xf32>
    %363 = vector.broadcast %362 : vector<1x16xf32> to vector<64x16xf32>
    %364 = arith.addf %361, %363 : vector<64x16xf32>
    %cst_266 = arith.constant 0.000000e+00 : f32
    %365 = vector.broadcast %cst_266 : f32 to vector<64x16xf32>
    %366 = arith.maximumf %364, %365 : vector<64x16xf32>
    %c0_267 = arith.constant 0 : index
    %c16_268 = arith.constant 16 : index
    %c0_269 = arith.constant 0 : index
    %367 = vector.load %arg16[%c0_267, %c16_268, %c0_269] : memref<4x96x16xf32, #tpu.memory_space<vmem>>, vector<1x64x16xf32>
    %368 = vector.shape_cast %367 : vector<1x64x16xf32> to vector<64x16xf32>
    %369 = vector.shape_cast %366 : vector<64x16xf32> to vector<1x64x16xf32>
    tpu.vector_store %arg16[%c0_267, %c16_268, %c0_269], %369 {strides = array<i32>} : memref<4x96x16xf32, #tpu.memory_space<vmem>>, vector<1x64x16xf32>,
    %cst_270 = arith.constant 0.000000e+00 : f32
    %370 = vector.broadcast %cst_270 : f32 to vector<64x16xf32>
    %c1_271 = arith.constant 1 : index
    %c0_272 = arith.constant 0 : index
    %c0_273 = arith.constant 0 : index
    %c0_274 = arith.constant 0 : index
    %371 = vector.load %arg8[%c1_271, %c0_272, %c0_273, %c0_274] : memref<4x4x32x16xbf16, #tpu.memory_space<vmem>>, vector<1x1x32x16xbf16>
    %372 = vector.shape_cast %371 : vector<1x1x32x16xbf16> to vector<32x16xbf16>
    %c17_275 = arith.constant 17 : index
    %c0_276 = arith.constant 0 : index
    %373 = vector.load %arg15[%c17_275, %c0_276] : memref<96x32xf32, #tpu.memory_space<vmem>>, vector<64x32xf32>
    %cst_277 = arith.constant 0.000000e+00 : f32
    %374 = vector.shape_cast %26 : vector<64x1xi1> to vector<64x1xi1>
    %375 = vector.broadcast %374 : vector<64x1xi1> to vector<64x32xi1>
    %376 = vector.broadcast %cst_277 : f32 to vector<64x32xf32>
    %377 = arith.select %375, %373, %376 : vector<64x32xi1>, vector<64x32xf32>
    %378 = arith.truncf %377 : vector<64x32xf32> to vector<64x32xbf16>
    %cst_278 = arith.constant dense<0.000000e+00> : vector<64x16xf32>
    %379 = tpu.matmul %378, %372, %cst_278 {dimension_numbers = #tpu.dot_dimension_numbers<[1], [0], [0], [1], [0, 0, 1, 1], [], []>} : vector<64x32xbf16>, vector<32x16xbf16>, vector<64x16xf32> -> vector<64x16xf32>
    %380 = arith.addf %370, %379 : vector<64x16xf32>
    %c1_279 = arith.constant 1 : index
    %c1_280 = arith.constant 1 : index
    %c0_281 = arith.constant 0 : index
    %c0_282 = arith.constant 0 : index
    %381 = vector.load %arg8[%c1_279, %c1_280, %c0_281, %c0_282] : memref<4x4x32x16xbf16, #tpu.memory_space<vmem>>, vector<1x1x32x16xbf16>
    %382 = vector.shape_cast %381 : vector<1x1x32x16xbf16> to vector<32x16xbf16>
    %c16_283 = arith.constant 16 : index
    %c0_284 = arith.constant 0 : index
    %383 = vector.load %arg15[%c16_283, %c0_284] : memref<96x32xf32, #tpu.memory_space<vmem>>, vector<64x32xf32>
    %384 = arith.truncf %383 : vector<64x32xf32> to vector<64x32xbf16>
    %cst_285 = arith.constant dense<0.000000e+00> : vector<64x16xf32>
    %385 = tpu.matmul %384, %382, %cst_285 {dimension_numbers = #tpu.dot_dimension_numbers<[1], [0], [0], [1], [0, 0, 1, 1], [], []>} : vector<64x32xbf16>, vector<32x16xbf16>, vector<64x16xf32> -> vector<64x16xf32>
    %386 = arith.addf %380, %385 : vector<64x16xf32>
    %c1_286 = arith.constant 1 : index
    %c2_287 = arith.constant 2 : index
    %c0_288 = arith.constant 0 : index
    %c0_289 = arith.constant 0 : index
    %387 = vector.load %arg8[%c1_286, %c2_287, %c0_288, %c0_289] : memref<4x4x32x16xbf16, #tpu.memory_space<vmem>>, vector<1x1x32x16xbf16>
    %388 = vector.shape_cast %387 : vector<1x1x32x16xbf16> to vector<32x16xbf16>
    %c9_290 = arith.constant 9 : index
    %c0_291 = arith.constant 0 : index
    %389 = vector.load %arg15[%c9_290, %c0_291] : memref<96x32xf32, #tpu.memory_space<vmem>>, vector<64x32xf32>
    %cst_292 = arith.constant 0.000000e+00 : f32
    %390 = vector.shape_cast %26 : vector<64x1xi1> to vector<64x1xi1>
    %391 = vector.broadcast %390 : vector<64x1xi1> to vector<64x32xi1>
    %392 = vector.broadcast %cst_292 : f32 to vector<64x32xf32>
    %393 = arith.select %391, %389, %392 : vector<64x32xi1>, vector<64x32xf32>
    %394 = arith.truncf %393 : vector<64x32xf32> to vector<64x32xbf16>
    %cst_293 = arith.constant dense<0.000000e+00> : vector<64x16xf32>
    %395 = tpu.matmul %394, %388, %cst_293 {dimension_numbers = #tpu.dot_dimension_numbers<[1], [0], [0], [1], [0, 0, 1, 1], [], []>} : vector<64x32xbf16>, vector<32x16xbf16>, vector<64x16xf32> -> vector<64x16xf32>
    %396 = arith.addf %386, %395 : vector<64x16xf32>
    %c1_294 = arith.constant 1 : index
    %c3_295 = arith.constant 3 : index
    %c0_296 = arith.constant 0 : index
    %c0_297 = arith.constant 0 : index
    %397 = vector.load %arg8[%c1_294, %c3_295, %c0_296, %c0_297] : memref<4x4x32x16xbf16, #tpu.memory_space<vmem>>, vector<1x1x32x16xbf16>
    %398 = vector.shape_cast %397 : vector<1x1x32x16xbf16> to vector<32x16xbf16>
    %c8_298 = arith.constant 8 : index
    %c0_299 = arith.constant 0 : index
    %399 = vector.load %arg15[%c8_298, %c0_299] : memref<96x32xf32, #tpu.memory_space<vmem>>, vector<64x32xf32>
    %400 = arith.truncf %399 : vector<64x32xf32> to vector<64x32xbf16>
    %cst_300 = arith.constant dense<0.000000e+00> : vector<64x16xf32>
    %401 = tpu.matmul %400, %398, %cst_300 {dimension_numbers = #tpu.dot_dimension_numbers<[1], [0], [0], [1], [0, 0, 1, 1], [], []>} : vector<64x32xbf16>, vector<32x16xbf16>, vector<64x16xf32> -> vector<64x16xf32>
    %402 = arith.addf %396, %401 : vector<64x16xf32>
    %c0_301 = arith.constant 0 : index
    %c0_302 = arith.constant 0 : index
    %403 = vector.load %arg9[%c0_301, %c0_302] : memref<1x16xf32, #tpu.memory_space<vmem>>, vector<1x16xf32>
    %404 = vector.broadcast %403 : vector<1x16xf32> to vector<64x16xf32>
    %405 = arith.addf %402, %404 : vector<64x16xf32>
    %cst_303 = arith.constant 0.000000e+00 : f32
    %406 = vector.broadcast %cst_303 : f32 to vector<64x16xf32>
    %407 = arith.maximumf %405, %406 : vector<64x16xf32>
    %c1_304 = arith.constant 1 : index
    %c16_305 = arith.constant 16 : index
    %c0_306 = arith.constant 0 : index
    %408 = vector.load %arg16[%c1_304, %c16_305, %c0_306] : memref<4x96x16xf32, #tpu.memory_space<vmem>>, vector<1x64x16xf32>
    %409 = vector.shape_cast %408 : vector<1x64x16xf32> to vector<64x16xf32>
    %410 = vector.shape_cast %407 : vector<64x16xf32> to vector<1x64x16xf32>
    tpu.vector_store %arg16[%c1_304, %c16_305, %c0_306], %410 {strides = array<i32>} : memref<4x96x16xf32, #tpu.memory_space<vmem>>, vector<1x64x16xf32>,
    %cst_307 = arith.constant 0.000000e+00 : f32
    %411 = vector.broadcast %cst_307 : f32 to vector<64x16xf32>
    %c2_308 = arith.constant 2 : index
    %c0_309 = arith.constant 0 : index
    %c0_310 = arith.constant 0 : index
    %c0_311 = arith.constant 0 : index
    %412 = vector.load %arg8[%c2_308, %c0_309, %c0_310, %c0_311] : memref<4x4x32x16xbf16, #tpu.memory_space<vmem>>, vector<1x1x32x16xbf16>
    %413 = vector.shape_cast %412 : vector<1x1x32x16xbf16> to vector<32x16xbf16>
    %c24_312 = arith.constant 24 : index
    %c0_313 = arith.constant 0 : index
    %414 = vector.load %arg15[%c24_312, %c0_313] : memref<96x32xf32, #tpu.memory_space<vmem>>, vector<64x32xf32>
    %415 = arith.truncf %414 : vector<64x32xf32> to vector<64x32xbf16>
    %cst_314 = arith.constant dense<0.000000e+00> : vector<64x16xf32>
    %416 = tpu.matmul %415, %413, %cst_314 {dimension_numbers = #tpu.dot_dimension_numbers<[1], [0], [0], [1], [0, 0, 1, 1], [], []>} : vector<64x32xbf16>, vector<32x16xbf16>, vector<64x16xf32> -> vector<64x16xf32>
    %417 = arith.addf %411, %416 : vector<64x16xf32>
    %c2_315 = arith.constant 2 : index
    %c1_316 = arith.constant 1 : index
    %c0_317 = arith.constant 0 : index
    %c0_318 = arith.constant 0 : index
    %418 = vector.load %arg8[%c2_315, %c1_316, %c0_317, %c0_318] : memref<4x4x32x16xbf16, #tpu.memory_space<vmem>>, vector<1x1x32x16xbf16>
    %419 = vector.shape_cast %418 : vector<1x1x32x16xbf16> to vector<32x16xbf16>
    %c23_319 = arith.constant 23 : index
    %c0_320 = arith.constant 0 : index
    %420 = vector.load %arg15[%c23_319, %c0_320] : memref<96x32xf32, #tpu.memory_space<vmem>>, vector<64x32xf32>
    %cst_321 = arith.constant 0.000000e+00 : f32
    %421 = vector.shape_cast %24 : vector<64x1xi1> to vector<64x1xi1>
    %422 = vector.broadcast %421 : vector<64x1xi1> to vector<64x32xi1>
    %423 = vector.broadcast %cst_321 : f32 to vector<64x32xf32>
    %424 = arith.select %422, %420, %423 : vector<64x32xi1>, vector<64x32xf32>
    %425 = arith.truncf %424 : vector<64x32xf32> to vector<64x32xbf16>
    %cst_322 = arith.constant dense<0.000000e+00> : vector<64x16xf32>
    %426 = tpu.matmul %425, %419, %cst_322 {dimension_numbers = #tpu.dot_dimension_numbers<[1], [0], [0], [1], [0, 0, 1, 1], [], []>} : vector<64x32xbf16>, vector<32x16xbf16>, vector<64x16xf32> -> vector<64x16xf32>
    %427 = arith.addf %417, %426 : vector<64x16xf32>
    %c2_323 = arith.constant 2 : index
    %c2_324 = arith.constant 2 : index
    %c0_325 = arith.constant 0 : index
    %c0_326 = arith.constant 0 : index
    %428 = vector.load %arg8[%c2_323, %c2_324, %c0_325, %c0_326] : memref<4x4x32x16xbf16, #tpu.memory_space<vmem>>, vector<1x1x32x16xbf16>
    %429 = vector.shape_cast %428 : vector<1x1x32x16xbf16> to vector<32x16xbf16>
    %c16_327 = arith.constant 16 : index
    %c0_328 = arith.constant 0 : index
    %430 = vector.load %arg15[%c16_327, %c0_328] : memref<96x32xf32, #tpu.memory_space<vmem>>, vector<64x32xf32>
    %431 = arith.truncf %430 : vector<64x32xf32> to vector<64x32xbf16>
    %cst_329 = arith.constant dense<0.000000e+00> : vector<64x16xf32>
    %432 = tpu.matmul %431, %429, %cst_329 {dimension_numbers = #tpu.dot_dimension_numbers<[1], [0], [0], [1], [0, 0, 1, 1], [], []>} : vector<64x32xbf16>, vector<32x16xbf16>, vector<64x16xf32> -> vector<64x16xf32>
    %433 = arith.addf %427, %432 : vector<64x16xf32>
    %c2_330 = arith.constant 2 : index
    %c3_331 = arith.constant 3 : index
    %c0_332 = arith.constant 0 : index
    %c0_333 = arith.constant 0 : index
    %434 = vector.load %arg8[%c2_330, %c3_331, %c0_332, %c0_333] : memref<4x4x32x16xbf16, #tpu.memory_space<vmem>>, vector<1x1x32x16xbf16>
    %435 = vector.shape_cast %434 : vector<1x1x32x16xbf16> to vector<32x16xbf16>
    %c15_334 = arith.constant 15 : index
    %c0_335 = arith.constant 0 : index
    %436 = vector.load %arg15[%c15_334, %c0_335] : memref<96x32xf32, #tpu.memory_space<vmem>>, vector<64x32xf32>
    %cst_336 = arith.constant 0.000000e+00 : f32
    %437 = vector.shape_cast %24 : vector<64x1xi1> to vector<64x1xi1>
    %438 = vector.broadcast %437 : vector<64x1xi1> to vector<64x32xi1>
    %439 = vector.broadcast %cst_336 : f32 to vector<64x32xf32>
    %440 = arith.select %438, %436, %439 : vector<64x32xi1>, vector<64x32xf32>
    %441 = arith.truncf %440 : vector<64x32xf32> to vector<64x32xbf16>
    %cst_337 = arith.constant dense<0.000000e+00> : vector<64x16xf32>
    %442 = tpu.matmul %441, %435, %cst_337 {dimension_numbers = #tpu.dot_dimension_numbers<[1], [0], [0], [1], [0, 0, 1, 1], [], []>} : vector<64x32xbf16>, vector<32x16xbf16>, vector<64x16xf32> -> vector<64x16xf32>
    %443 = arith.addf %433, %442 : vector<64x16xf32>
    %c0_338 = arith.constant 0 : index
    %c0_339 = arith.constant 0 : index
    %444 = vector.load %arg9[%c0_338, %c0_339] : memref<1x16xf32, #tpu.memory_space<vmem>>, vector<1x16xf32>
    %445 = vector.broadcast %444 : vector<1x16xf32> to vector<64x16xf32>
    %446 = arith.addf %443, %445 : vector<64x16xf32>
    %cst_340 = arith.constant 0.000000e+00 : f32
    %447 = vector.broadcast %cst_340 : f32 to vector<64x16xf32>
    %448 = arith.maximumf %446, %447 : vector<64x16xf32>
    %c2_341 = arith.constant 2 : index
    %c16_342 = arith.constant 16 : index
    %c0_343 = arith.constant 0 : index
    %449 = vector.load %arg16[%c2_341, %c16_342, %c0_343] : memref<4x96x16xf32, #tpu.memory_space<vmem>>, vector<1x64x16xf32>
    %450 = vector.shape_cast %449 : vector<1x64x16xf32> to vector<64x16xf32>
    %451 = vector.shape_cast %448 : vector<64x16xf32> to vector<1x64x16xf32>
    tpu.vector_store %arg16[%c2_341, %c16_342, %c0_343], %451 {strides = array<i32>} : memref<4x96x16xf32, #tpu.memory_space<vmem>>, vector<1x64x16xf32>,
    %cst_344 = arith.constant 0.000000e+00 : f32
    %452 = vector.broadcast %cst_344 : f32 to vector<64x16xf32>
    %c3_345 = arith.constant 3 : index
    %c0_346 = arith.constant 0 : index
    %c0_347 = arith.constant 0 : index
    %c0_348 = arith.constant 0 : index
    %453 = vector.load %arg8[%c3_345, %c0_346, %c0_347, %c0_348] : memref<4x4x32x16xbf16, #tpu.memory_space<vmem>>, vector<1x1x32x16xbf16>
    %454 = vector.shape_cast %453 : vector<1x1x32x16xbf16> to vector<32x16xbf16>
    %c25_349 = arith.constant 25 : index
    %c0_350 = arith.constant 0 : index
    %455 = vector.load %arg15[%c25_349, %c0_350] : memref<96x32xf32, #tpu.memory_space<vmem>>, vector<64x32xf32>
    %cst_351 = arith.constant 0.000000e+00 : f32
    %456 = vector.shape_cast %26 : vector<64x1xi1> to vector<64x1xi1>
    %457 = vector.broadcast %456 : vector<64x1xi1> to vector<64x32xi1>
    %458 = vector.broadcast %cst_351 : f32 to vector<64x32xf32>
    %459 = arith.select %457, %455, %458 : vector<64x32xi1>, vector<64x32xf32>
    %460 = arith.truncf %459 : vector<64x32xf32> to vector<64x32xbf16>
    %cst_352 = arith.constant dense<0.000000e+00> : vector<64x16xf32>
    %461 = tpu.matmul %460, %454, %cst_352 {dimension_numbers = #tpu.dot_dimension_numbers<[1], [0], [0], [1], [0, 0, 1, 1], [], []>} : vector<64x32xbf16>, vector<32x16xbf16>, vector<64x16xf32> -> vector<64x16xf32>
    %462 = arith.addf %452, %461 : vector<64x16xf32>
    %c3_353 = arith.constant 3 : index
    %c1_354 = arith.constant 1 : index
    %c0_355 = arith.constant 0 : index
    %c0_356 = arith.constant 0 : index
    %463 = vector.load %arg8[%c3_353, %c1_354, %c0_355, %c0_356] : memref<4x4x32x16xbf16, #tpu.memory_space<vmem>>, vector<1x1x32x16xbf16>
    %464 = vector.shape_cast %463 : vector<1x1x32x16xbf16> to vector<32x16xbf16>
    %c24_357 = arith.constant 24 : index
    %c0_358 = arith.constant 0 : index
    %465 = vector.load %arg15[%c24_357, %c0_358] : memref<96x32xf32, #tpu.memory_space<vmem>>, vector<64x32xf32>
    %466 = arith.truncf %465 : vector<64x32xf32> to vector<64x32xbf16>
    %cst_359 = arith.constant dense<0.000000e+00> : vector<64x16xf32>
    %467 = tpu.matmul %466, %464, %cst_359 {dimension_numbers = #tpu.dot_dimension_numbers<[1], [0], [0], [1], [0, 0, 1, 1], [], []>} : vector<64x32xbf16>, vector<32x16xbf16>, vector<64x16xf32> -> vector<64x16xf32>
    %468 = arith.addf %462, %467 : vector<64x16xf32>
    %c3_360 = arith.constant 3 : index
    %c2_361 = arith.constant 2 : index
    %c0_362 = arith.constant 0 : index
    %c0_363 = arith.constant 0 : index
    %469 = vector.load %arg8[%c3_360, %c2_361, %c0_362, %c0_363] : memref<4x4x32x16xbf16, #tpu.memory_space<vmem>>, vector<1x1x32x16xbf16>
    %470 = vector.shape_cast %469 : vector<1x1x32x16xbf16> to vector<32x16xbf16>
    %c17_364 = arith.constant 17 : index
    %c0_365 = arith.constant 0 : index
    %471 = vector.load %arg15[%c17_364, %c0_365] : memref<96x32xf32, #tpu.memory_space<vmem>>, vector<64x32xf32>
    %cst_366 = arith.constant 0.000000e+00 : f32
    %472 = vector.shape_cast %26 : vector<64x1xi1> to vector<64x1xi1>
    %473 = vector.broadcast %472 : vector<64x1xi1> to vector<64x32xi1>
    %474 = vector.broadcast %cst_366 : f32 to vector<64x32xf32>
    %475 = arith.select %473, %471, %474 : vector<64x32xi1>, vector<64x32xf32>
    %476 = arith.truncf %475 : vector<64x32xf32> to vector<64x32xbf16>
    %cst_367 = arith.constant dense<0.000000e+00> : vector<64x16xf32>
    %477 = tpu.matmul %476, %470, %cst_367 {dimension_numbers = #tpu.dot_dimension_numbers<[1], [0], [0], [1], [0, 0, 1, 1], [], []>} : vector<64x32xbf16>, vector<32x16xbf16>, vector<64x16xf32> -> vector<64x16xf32>
    %478 = arith.addf %468, %477 : vector<64x16xf32>
    %c3_368 = arith.constant 3 : index
    %c3_369 = arith.constant 3 : index
    %c0_370 = arith.constant 0 : index
    %c0_371 = arith.constant 0 : index
    %479 = vector.load %arg8[%c3_368, %c3_369, %c0_370, %c0_371] : memref<4x4x32x16xbf16, #tpu.memory_space<vmem>>, vector<1x1x32x16xbf16>
    %480 = vector.shape_cast %479 : vector<1x1x32x16xbf16> to vector<32x16xbf16>
    %c16_372 = arith.constant 16 : index
    %c0_373 = arith.constant 0 : index
    %481 = vector.load %arg15[%c16_372, %c0_373] : memref<96x32xf32, #tpu.memory_space<vmem>>, vector<64x32xf32>
    %482 = arith.truncf %481 : vector<64x32xf32> to vector<64x32xbf16>
    %cst_374 = arith.constant dense<0.000000e+00> : vector<64x16xf32>
    %483 = tpu.matmul %482, %480, %cst_374 {dimension_numbers = #tpu.dot_dimension_numbers<[1], [0], [0], [1], [0, 0, 1, 1], [], []>} : vector<64x32xbf16>, vector<32x16xbf16>, vector<64x16xf32> -> vector<64x16xf32>
    %484 = arith.addf %478, %483 : vector<64x16xf32>
    %c0_375 = arith.constant 0 : index
    %c0_376 = arith.constant 0 : index
    %485 = vector.load %arg9[%c0_375, %c0_376] : memref<1x16xf32, #tpu.memory_space<vmem>>, vector<1x16xf32>
    %486 = vector.broadcast %485 : vector<1x16xf32> to vector<64x16xf32>
    %487 = arith.addf %484, %486 : vector<64x16xf32>
    %cst_377 = arith.constant 0.000000e+00 : f32
    %488 = vector.broadcast %cst_377 : f32 to vector<64x16xf32>
    %489 = arith.maximumf %487, %488 : vector<64x16xf32>
    %c3_378 = arith.constant 3 : index
    %c16_379 = arith.constant 16 : index
    %c0_380 = arith.constant 0 : index
    %490 = vector.load %arg16[%c3_378, %c16_379, %c0_380] : memref<4x96x16xf32, #tpu.memory_space<vmem>>, vector<1x64x16xf32>
    %491 = vector.shape_cast %490 : vector<1x64x16xf32> to vector<64x16xf32>
    %492 = vector.shape_cast %489 : vector<64x16xf32> to vector<1x64x16xf32>
    tpu.vector_store %arg16[%c3_378, %c16_379, %c0_380], %492 {strides = array<i32>} : memref<4x96x16xf32, #tpu.memory_space<vmem>>, vector<1x64x16xf32>,
    %cst_381 = arith.constant 0.000000e+00 : f32
    %493 = vector.broadcast %cst_381 : f32 to vector<64x8xf32>
    %c0_382 = arith.constant 0 : index
    %c0_383 = arith.constant 0 : index
    %c0_384 = arith.constant 0 : index
    %c0_385 = arith.constant 0 : index
    %494 = vector.load %arg10[%c0_382, %c0_383, %c0_384, %c0_385] : memref<4x4x16x8xbf16, #tpu.memory_space<vmem>>, vector<1x1x16x8xbf16>
    %495 = vector.shape_cast %494 : vector<1x1x16x8xbf16> to vector<16x8xbf16>
    %c0_386 = arith.constant 0 : index
    %c16_387 = arith.constant 16 : index
    %c0_388 = arith.constant 0 : index
    %496 = vector.load %arg16[%c0_386, %c16_387, %c0_388] : memref<4x96x16xf32, #tpu.memory_space<vmem>>, vector<1x64x16xf32>
    %497 = vector.shape_cast %496 : vector<1x64x16xf32> to vector<64x16xf32>
    %498 = arith.truncf %497 : vector<64x16xf32> to vector<64x16xbf16>
    %cst_389 = arith.constant dense<0.000000e+00> : vector<64x8xf32>
    %499 = tpu.matmul %498, %495, %cst_389 {dimension_numbers = #tpu.dot_dimension_numbers<[1], [0], [0], [1], [0, 0, 1, 1], [], []>} : vector<64x16xbf16>, vector<16x8xbf16>, vector<64x8xf32> -> vector<64x8xf32>
    %500 = arith.addf %493, %499 : vector<64x8xf32>
    %c0_390 = arith.constant 0 : index
    %c1_391 = arith.constant 1 : index
    %c0_392 = arith.constant 0 : index
    %c0_393 = arith.constant 0 : index
    %501 = vector.load %arg10[%c0_390, %c1_391, %c0_392, %c0_393] : memref<4x4x16x8xbf16, #tpu.memory_space<vmem>>, vector<1x1x16x8xbf16>
    %502 = vector.shape_cast %501 : vector<1x1x16x8xbf16> to vector<16x8xbf16>
    %c1_394 = arith.constant 1 : index
    %c15_395 = arith.constant 15 : index
    %c0_396 = arith.constant 0 : index
    %503 = vector.load %arg16[%c1_394, %c15_395, %c0_396] : memref<4x96x16xf32, #tpu.memory_space<vmem>>, vector<1x64x16xf32>
    %504 = vector.shape_cast %503 : vector<1x64x16xf32> to vector<64x16xf32>
    %cst_397 = arith.constant 0.000000e+00 : f32
    %505 = vector.shape_cast %24 : vector<64x1xi1> to vector<64x1xi1>
    %506 = vector.broadcast %505 : vector<64x1xi1> to vector<64x16xi1>
    %507 = vector.broadcast %cst_397 : f32 to vector<64x16xf32>
    %508 = arith.select %506, %504, %507 : vector<64x16xi1>, vector<64x16xf32>
    %509 = arith.truncf %508 : vector<64x16xf32> to vector<64x16xbf16>
    %cst_398 = arith.constant dense<0.000000e+00> : vector<64x8xf32>
    %510 = tpu.matmul %509, %502, %cst_398 {dimension_numbers = #tpu.dot_dimension_numbers<[1], [0], [0], [1], [0, 0, 1, 1], [], []>} : vector<64x16xbf16>, vector<16x8xbf16>, vector<64x8xf32> -> vector<64x8xf32>
    %511 = arith.addf %500, %510 : vector<64x8xf32>
    %c0_399 = arith.constant 0 : index
    %c2_400 = arith.constant 2 : index
    %c0_401 = arith.constant 0 : index
    %c0_402 = arith.constant 0 : index
    %512 = vector.load %arg10[%c0_399, %c2_400, %c0_401, %c0_402] : memref<4x4x16x8xbf16, #tpu.memory_space<vmem>>, vector<1x1x16x8xbf16>
    %513 = vector.shape_cast %512 : vector<1x1x16x8xbf16> to vector<16x8xbf16>
    %c2_403 = arith.constant 2 : index
    %c8_404 = arith.constant 8 : index
    %c0_405 = arith.constant 0 : index
    %514 = vector.load %arg16[%c2_403, %c8_404, %c0_405] : memref<4x96x16xf32, #tpu.memory_space<vmem>>, vector<1x64x16xf32>
    %515 = vector.shape_cast %514 : vector<1x64x16xf32> to vector<64x16xf32>
    %516 = arith.truncf %515 : vector<64x16xf32> to vector<64x16xbf16>
    %cst_406 = arith.constant dense<0.000000e+00> : vector<64x8xf32>
    %517 = tpu.matmul %516, %513, %cst_406 {dimension_numbers = #tpu.dot_dimension_numbers<[1], [0], [0], [1], [0, 0, 1, 1], [], []>} : vector<64x16xbf16>, vector<16x8xbf16>, vector<64x8xf32> -> vector<64x8xf32>
    %518 = arith.addf %511, %517 : vector<64x8xf32>
    %c0_407 = arith.constant 0 : index
    %c3_408 = arith.constant 3 : index
    %c0_409 = arith.constant 0 : index
    %c0_410 = arith.constant 0 : index
    %519 = vector.load %arg10[%c0_407, %c3_408, %c0_409, %c0_410] : memref<4x4x16x8xbf16, #tpu.memory_space<vmem>>, vector<1x1x16x8xbf16>
    %520 = vector.shape_cast %519 : vector<1x1x16x8xbf16> to vector<16x8xbf16>
    %c3_411 = arith.constant 3 : index
    %c7_412 = arith.constant 7 : index
    %c0_413 = arith.constant 0 : index
    %521 = vector.load %arg16[%c3_411, %c7_412, %c0_413] : memref<4x96x16xf32, #tpu.memory_space<vmem>>, vector<1x64x16xf32>
    %522 = vector.shape_cast %521 : vector<1x64x16xf32> to vector<64x16xf32>
    %cst_414 = arith.constant 0.000000e+00 : f32
    %523 = vector.shape_cast %24 : vector<64x1xi1> to vector<64x1xi1>
    %524 = vector.broadcast %523 : vector<64x1xi1> to vector<64x16xi1>
    %525 = vector.broadcast %cst_414 : f32 to vector<64x16xf32>
    %526 = arith.select %524, %522, %525 : vector<64x16xi1>, vector<64x16xf32>
    %527 = arith.truncf %526 : vector<64x16xf32> to vector<64x16xbf16>
    %cst_415 = arith.constant dense<0.000000e+00> : vector<64x8xf32>
    %528 = tpu.matmul %527, %520, %cst_415 {dimension_numbers = #tpu.dot_dimension_numbers<[1], [0], [0], [1], [0, 0, 1, 1], [], []>} : vector<64x16xbf16>, vector<16x8xbf16>, vector<64x8xf32> -> vector<64x8xf32>
    %529 = arith.addf %518, %528 : vector<64x8xf32>
    %c0_416 = arith.constant 0 : index
    %c0_417 = arith.constant 0 : index
    %530 = vector.load %arg11[%c0_416, %c0_417] : memref<1x8xf32, #tpu.memory_space<vmem>>, vector<1x8xf32>
    %531 = vector.broadcast %530 : vector<1x8xf32> to vector<64x8xf32>
    %532 = arith.addf %529, %531 : vector<64x8xf32>
    %c0_418 = arith.constant 0 : index
    %c0_419 = arith.constant 0 : index
    %c0_420 = arith.constant 0 : index
    %c0_421 = arith.constant 0 : index
    %533 = vector.load %arg12[%c0_418, %c0_419, %c0_420, %c0_421] : memref<1x16x64x8xf32, #tpu.memory_space<vmem>>, vector<1x1x64x8xf32>
    %534 = vector.shape_cast %533 : vector<1x1x64x8xf32> to vector<64x8xf32>
    %535 = vector.shape_cast %532 : vector<64x8xf32> to vector<1x1x64x8xf32>
    tpu.vector_store %arg12[%c0_418, %c0_419, %c0_420, %c0_421], %535 {strides = array<i32>} : memref<1x16x64x8xf32, #tpu.memory_space<vmem>>, vector<1x1x64x8xf32>,
    %cst_422 = arith.constant 0.000000e+00 : f32
    %536 = vector.broadcast %cst_422 : f32 to vector<64x8xf32>
    %c0_423 = arith.constant 0 : index
    %c0_424 = arith.constant 0 : index
    %c0_425 = arith.constant 0 : index
    %c0_426 = arith.constant 0 : index
    %537 = vector.load %arg10[%c0_423, %c0_424, %c0_425, %c0_426] : memref<4x4x16x8xbf16, #tpu.memory_space<vmem>>, vector<1x1x16x8xbf16>
    %538 = vector.shape_cast %537 : vector<1x1x16x8xbf16> to vector<16x8xbf16>
    %c1_427 = arith.constant 1 : index
    %c16_428 = arith.constant 16 : index
    %c0_429 = arith.constant 0 : index
    %539 = vector.load %arg16[%c1_427, %c16_428, %c0_429] : memref<4x96x16xf32, #tpu.memory_space<vmem>>, vector<1x64x16xf32>
    %540 = vector.shape_cast %539 : vector<1x64x16xf32> to vector<64x16xf32>
    %541 = arith.truncf %540 : vector<64x16xf32> to vector<64x16xbf16>
    %cst_430 = arith.constant dense<0.000000e+00> : vector<64x8xf32>
    %542 = tpu.matmul %541, %538, %cst_430 {dimension_numbers = #tpu.dot_dimension_numbers<[1], [0], [0], [1], [0, 0, 1, 1], [], []>} : vector<64x16xbf16>, vector<16x8xbf16>, vector<64x8xf32> -> vector<64x8xf32>
    %543 = arith.addf %536, %542 : vector<64x8xf32>
    %c0_431 = arith.constant 0 : index
    %c1_432 = arith.constant 1 : index
    %c0_433 = arith.constant 0 : index
    %c0_434 = arith.constant 0 : index
    %544 = vector.load %arg10[%c0_431, %c1_432, %c0_433, %c0_434] : memref<4x4x16x8xbf16, #tpu.memory_space<vmem>>, vector<1x1x16x8xbf16>
    %545 = vector.shape_cast %544 : vector<1x1x16x8xbf16> to vector<16x8xbf16>
    %c0_435 = arith.constant 0 : index
    %c16_436 = arith.constant 16 : index
    %c0_437 = arith.constant 0 : index
    %546 = vector.load %arg16[%c0_435, %c16_436, %c0_437] : memref<4x96x16xf32, #tpu.memory_space<vmem>>, vector<1x64x16xf32>
    %547 = vector.shape_cast %546 : vector<1x64x16xf32> to vector<64x16xf32>
    %548 = arith.truncf %547 : vector<64x16xf32> to vector<64x16xbf16>
    %cst_438 = arith.constant dense<0.000000e+00> : vector<64x8xf32>
    %549 = tpu.matmul %548, %545, %cst_438 {dimension_numbers = #tpu.dot_dimension_numbers<[1], [0], [0], [1], [0, 0, 1, 1], [], []>} : vector<64x16xbf16>, vector<16x8xbf16>, vector<64x8xf32> -> vector<64x8xf32>
    %550 = arith.addf %543, %549 : vector<64x8xf32>
    %c0_439 = arith.constant 0 : index
    %c2_440 = arith.constant 2 : index
    %c0_441 = arith.constant 0 : index
    %c0_442 = arith.constant 0 : index
    %551 = vector.load %arg10[%c0_439, %c2_440, %c0_441, %c0_442] : memref<4x4x16x8xbf16, #tpu.memory_space<vmem>>, vector<1x1x16x8xbf16>
    %552 = vector.shape_cast %551 : vector<1x1x16x8xbf16> to vector<16x8xbf16>
    %c3_443 = arith.constant 3 : index
    %c8_444 = arith.constant 8 : index
    %c0_445 = arith.constant 0 : index
    %553 = vector.load %arg16[%c3_443, %c8_444, %c0_445] : memref<4x96x16xf32, #tpu.memory_space<vmem>>, vector<1x64x16xf32>
    %554 = vector.shape_cast %553 : vector<1x64x16xf32> to vector<64x16xf32>
    %555 = arith.truncf %554 : vector<64x16xf32> to vector<64x16xbf16>
    %cst_446 = arith.constant dense<0.000000e+00> : vector<64x8xf32>
    %556 = tpu.matmul %555, %552, %cst_446 {dimension_numbers = #tpu.dot_dimension_numbers<[1], [0], [0], [1], [0, 0, 1, 1], [], []>} : vector<64x16xbf16>, vector<16x8xbf16>, vector<64x8xf32> -> vector<64x8xf32>
    %557 = arith.addf %550, %556 : vector<64x8xf32>
    %c0_447 = arith.constant 0 : index
    %c3_448 = arith.constant 3 : index
    %c0_449 = arith.constant 0 : index
    %c0_450 = arith.constant 0 : index
    %558 = vector.load %arg10[%c0_447, %c3_448, %c0_449, %c0_450] : memref<4x4x16x8xbf16, #tpu.memory_space<vmem>>, vector<1x1x16x8xbf16>
    %559 = vector.shape_cast %558 : vector<1x1x16x8xbf16> to vector<16x8xbf16>
    %c2_451 = arith.constant 2 : index
    %c8_452 = arith.constant 8 : index
    %c0_453 = arith.constant 0 : index
    %560 = vector.load %arg16[%c2_451, %c8_452, %c0_453] : memref<4x96x16xf32, #tpu.memory_space<vmem>>, vector<1x64x16xf32>
    %561 = vector.shape_cast %560 : vector<1x64x16xf32> to vector<64x16xf32>
    %562 = arith.truncf %561 : vector<64x16xf32> to vector<64x16xbf16>
    %cst_454 = arith.constant dense<0.000000e+00> : vector<64x8xf32>
    %563 = tpu.matmul %562, %559, %cst_454 {dimension_numbers = #tpu.dot_dimension_numbers<[1], [0], [0], [1], [0, 0, 1, 1], [], []>} : vector<64x16xbf16>, vector<16x8xbf16>, vector<64x8xf32> -> vector<64x8xf32>
    %564 = arith.addf %557, %563 : vector<64x8xf32>
    %c0_455 = arith.constant 0 : index
    %c0_456 = arith.constant 0 : index
    %565 = vector.load %arg11[%c0_455, %c0_456] : memref<1x8xf32, #tpu.memory_space<vmem>>, vector<1x8xf32>
    %566 = vector.broadcast %565 : vector<1x8xf32> to vector<64x8xf32>
    %567 = arith.addf %564, %566 : vector<64x8xf32>
    %c0_457 = arith.constant 0 : index
    %c2_458 = arith.constant 2 : index
    %c0_459 = arith.constant 0 : index
    %c0_460 = arith.constant 0 : index
    %568 = vector.load %arg12[%c0_457, %c2_458, %c0_459, %c0_460] : memref<1x16x64x8xf32, #tpu.memory_space<vmem>>, vector<1x1x64x8xf32>
    %569 = vector.shape_cast %568 : vector<1x1x64x8xf32> to vector<64x8xf32>
    %570 = vector.shape_cast %567 : vector<64x8xf32> to vector<1x1x64x8xf32>
    tpu.vector_store %arg12[%c0_457, %c2_458, %c0_459, %c0_460], %570 {strides = array<i32>} : memref<1x16x64x8xf32, #tpu.memory_space<vmem>>, vector<1x1x64x8xf32>,
    %cst_461 = arith.constant 0.000000e+00 : f32
    %571 = vector.broadcast %cst_461 : f32 to vector<64x8xf32>
    %c1_462 = arith.constant 1 : index
    %c0_463 = arith.constant 0 : index
    %c0_464 = arith.constant 0 : index
    %c0_465 = arith.constant 0 : index
    %572 = vector.load %arg10[%c1_462, %c0_463, %c0_464, %c0_465] : memref<4x4x16x8xbf16, #tpu.memory_space<vmem>>, vector<1x1x16x8xbf16>
    %573 = vector.shape_cast %572 : vector<1x1x16x8xbf16> to vector<16x8xbf16>
    %c1_466 = arith.constant 1 : index
    %c16_467 = arith.constant 16 : index
    %c0_468 = arith.constant 0 : index
    %574 = vector.load %arg16[%c1_466, %c16_467, %c0_468] : memref<4x96x16xf32, #tpu.memory_space<vmem>>, vector<1x64x16xf32>
    %575 = vector.shape_cast %574 : vector<1x64x16xf32> to vector<64x16xf32>
    %576 = arith.truncf %575 : vector<64x16xf32> to vector<64x16xbf16>
    %cst_469 = arith.constant dense<0.000000e+00> : vector<64x8xf32>
    %577 = tpu.matmul %576, %573, %cst_469 {dimension_numbers = #tpu.dot_dimension_numbers<[1], [0], [0], [1], [0, 0, 1, 1], [], []>} : vector<64x16xbf16>, vector<16x8xbf16>, vector<64x8xf32> -> vector<64x8xf32>
    %578 = arith.addf %571, %577 : vector<64x8xf32>
    %c1_470 = arith.constant 1 : index
    %c1_471 = arith.constant 1 : index
    %c0_472 = arith.constant 0 : index
    %c0_473 = arith.constant 0 : index
    %579 = vector.load %arg10[%c1_470, %c1_471, %c0_472, %c0_473] : memref<4x4x16x8xbf16, #tpu.memory_space<vmem>>, vector<1x1x16x8xbf16>
    %580 = vector.shape_cast %579 : vector<1x1x16x8xbf16> to vector<16x8xbf16>
    %c0_474 = arith.constant 0 : index
    %c16_475 = arith.constant 16 : index
    %c0_476 = arith.constant 0 : index
    %581 = vector.load %arg16[%c0_474, %c16_475, %c0_476] : memref<4x96x16xf32, #tpu.memory_space<vmem>>, vector<1x64x16xf32>
    %582 = vector.shape_cast %581 : vector<1x64x16xf32> to vector<64x16xf32>
    %583 = arith.truncf %582 : vector<64x16xf32> to vector<64x16xbf16>
    %cst_477 = arith.constant dense<0.000000e+00> : vector<64x8xf32>
    %584 = tpu.matmul %583, %580, %cst_477 {dimension_numbers = #tpu.dot_dimension_numbers<[1], [0], [0], [1], [0, 0, 1, 1], [], []>} : vector<64x16xbf16>, vector<16x8xbf16>, vector<64x8xf32> -> vector<64x8xf32>
    %585 = arith.addf %578, %584 : vector<64x8xf32>
    %c1_478 = arith.constant 1 : index
    %c2_479 = arith.constant 2 : index
    %c0_480 = arith.constant 0 : index
    %c0_481 = arith.constant 0 : index
    %586 = vector.load %arg10[%c1_478, %c2_479, %c0_480, %c0_481] : memref<4x4x16x8xbf16, #tpu.memory_space<vmem>>, vector<1x1x16x8xbf16>
    %587 = vector.shape_cast %586 : vector<1x1x16x8xbf16> to vector<16x8xbf16>
    %c3_482 = arith.constant 3 : index
    %c8_483 = arith.constant 8 : index
    %c0_484 = arith.constant 0 : index
    %588 = vector.load %arg16[%c3_482, %c8_483, %c0_484] : memref<4x96x16xf32, #tpu.memory_space<vmem>>, vector<1x64x16xf32>
    %589 = vector.shape_cast %588 : vector<1x64x16xf32> to vector<64x16xf32>
    %590 = arith.truncf %589 : vector<64x16xf32> to vector<64x16xbf16>
    %cst_485 = arith.constant dense<0.000000e+00> : vector<64x8xf32>
    %591 = tpu.matmul %590, %587, %cst_485 {dimension_numbers = #tpu.dot_dimension_numbers<[1], [0], [0], [1], [0, 0, 1, 1], [], []>} : vector<64x16xbf16>, vector<16x8xbf16>, vector<64x8xf32> -> vector<64x8xf32>
    %592 = arith.addf %585, %591 : vector<64x8xf32>
    %c1_486 = arith.constant 1 : index
    %c3_487 = arith.constant 3 : index
    %c0_488 = arith.constant 0 : index
    %c0_489 = arith.constant 0 : index
    %593 = vector.load %arg10[%c1_486, %c3_487, %c0_488, %c0_489] : memref<4x4x16x8xbf16, #tpu.memory_space<vmem>>, vector<1x1x16x8xbf16>
    %594 = vector.shape_cast %593 : vector<1x1x16x8xbf16> to vector<16x8xbf16>
    %c2_490 = arith.constant 2 : index
    %c8_491 = arith.constant 8 : index
    %c0_492 = arith.constant 0 : index
    %595 = vector.load %arg16[%c2_490, %c8_491, %c0_492] : memref<4x96x16xf32, #tpu.memory_space<vmem>>, vector<1x64x16xf32>
    %596 = vector.shape_cast %595 : vector<1x64x16xf32> to vector<64x16xf32>
    %597 = arith.truncf %596 : vector<64x16xf32> to vector<64x16xbf16>
    %cst_493 = arith.constant dense<0.000000e+00> : vector<64x8xf32>
    %598 = tpu.matmul %597, %594, %cst_493 {dimension_numbers = #tpu.dot_dimension_numbers<[1], [0], [0], [1], [0, 0, 1, 1], [], []>} : vector<64x16xbf16>, vector<16x8xbf16>, vector<64x8xf32> -> vector<64x8xf32>
    %599 = arith.addf %592, %598 : vector<64x8xf32>
    %c0_494 = arith.constant 0 : index
    %c0_495 = arith.constant 0 : index
    %600 = vector.load %arg11[%c0_494, %c0_495] : memref<1x8xf32, #tpu.memory_space<vmem>>, vector<1x8xf32>
    %601 = vector.broadcast %600 : vector<1x8xf32> to vector<64x8xf32>
    %602 = arith.addf %599, %601 : vector<64x8xf32>
    %c0_496 = arith.constant 0 : index
    %c1_497 = arith.constant 1 : index
    %c0_498 = arith.constant 0 : index
    %c0_499 = arith.constant 0 : index
    %603 = vector.load %arg12[%c0_496, %c1_497, %c0_498, %c0_499] : memref<1x16x64x8xf32, #tpu.memory_space<vmem>>, vector<1x1x64x8xf32>
    %604 = vector.shape_cast %603 : vector<1x1x64x8xf32> to vector<64x8xf32>
    %605 = vector.shape_cast %602 : vector<64x8xf32> to vector<1x1x64x8xf32>
    tpu.vector_store %arg12[%c0_496, %c1_497, %c0_498, %c0_499], %605 {strides = array<i32>} : memref<1x16x64x8xf32, #tpu.memory_space<vmem>>, vector<1x1x64x8xf32>,
    %cst_500 = arith.constant 0.000000e+00 : f32
    %606 = vector.broadcast %cst_500 : f32 to vector<64x8xf32>
    %c1_501 = arith.constant 1 : index
    %c0_502 = arith.constant 0 : index
    %c0_503 = arith.constant 0 : index
    %c0_504 = arith.constant 0 : index
    %607 = vector.load %arg10[%c1_501, %c0_502, %c0_503, %c0_504] : memref<4x4x16x8xbf16, #tpu.memory_space<vmem>>, vector<1x1x16x8xbf16>
    %608 = vector.shape_cast %607 : vector<1x1x16x8xbf16> to vector<16x8xbf16>
    %c0_505 = arith.constant 0 : index
    %c17_506 = arith.constant 17 : index
    %c0_507 = arith.constant 0 : index
    %609 = vector.load %arg16[%c0_505, %c17_506, %c0_507] : memref<4x96x16xf32, #tpu.memory_space<vmem>>, vector<1x64x16xf32>
    %610 = vector.shape_cast %609 : vector<1x64x16xf32> to vector<64x16xf32>
    %cst_508 = arith.constant 0.000000e+00 : f32
    %611 = vector.shape_cast %26 : vector<64x1xi1> to vector<64x1xi1>
    %612 = vector.broadcast %611 : vector<64x1xi1> to vector<64x16xi1>
    %613 = vector.broadcast %cst_508 : f32 to vector<64x16xf32>
    %614 = arith.select %612, %610, %613 : vector<64x16xi1>, vector<64x16xf32>
    %615 = arith.truncf %614 : vector<64x16xf32> to vector<64x16xbf16>
    %cst_509 = arith.constant dense<0.000000e+00> : vector<64x8xf32>
    %616 = tpu.matmul %615, %608, %cst_509 {dimension_numbers = #tpu.dot_dimension_numbers<[1], [0], [0], [1], [0, 0, 1, 1], [], []>} : vector<64x16xbf16>, vector<16x8xbf16>, vector<64x8xf32> -> vector<64x8xf32>
    %617 = arith.addf %606, %616 : vector<64x8xf32>
    %c1_510 = arith.constant 1 : index
    %c1_511 = arith.constant 1 : index
    %c0_512 = arith.constant 0 : index
    %c0_513 = arith.constant 0 : index
    %618 = vector.load %arg10[%c1_510, %c1_511, %c0_512, %c0_513] : memref<4x4x16x8xbf16, #tpu.memory_space<vmem>>, vector<1x1x16x8xbf16>
    %619 = vector.shape_cast %618 : vector<1x1x16x8xbf16> to vector<16x8xbf16>
    %c1_514 = arith.constant 1 : index
    %c16_515 = arith.constant 16 : index
    %c0_516 = arith.constant 0 : index
    %620 = vector.load %arg16[%c1_514, %c16_515, %c0_516] : memref<4x96x16xf32, #tpu.memory_space<vmem>>, vector<1x64x16xf32>
    %621 = vector.shape_cast %620 : vector<1x64x16xf32> to vector<64x16xf32>
    %622 = arith.truncf %621 : vector<64x16xf32> to vector<64x16xbf16>
    %cst_517 = arith.constant dense<0.000000e+00> : vector<64x8xf32>
    %623 = tpu.matmul %622, %619, %cst_517 {dimension_numbers = #tpu.dot_dimension_numbers<[1], [0], [0], [1], [0, 0, 1, 1], [], []>} : vector<64x16xbf16>, vector<16x8xbf16>, vector<64x8xf32> -> vector<64x8xf32>
    %624 = arith.addf %617, %623 : vector<64x8xf32>
    %c1_518 = arith.constant 1 : index
    %c2_519 = arith.constant 2 : index
    %c0_520 = arith.constant 0 : index
    %c0_521 = arith.constant 0 : index
    %625 = vector.load %arg10[%c1_518, %c2_519, %c0_520, %c0_521] : memref<4x4x16x8xbf16, #tpu.memory_space<vmem>>, vector<1x1x16x8xbf16>
    %626 = vector.shape_cast %625 : vector<1x1x16x8xbf16> to vector<16x8xbf16>
    %c2_522 = arith.constant 2 : index
    %c9_523 = arith.constant 9 : index
    %c0_524 = arith.constant 0 : index
    %627 = vector.load %arg16[%c2_522, %c9_523, %c0_524] : memref<4x96x16xf32, #tpu.memory_space<vmem>>, vector<1x64x16xf32>
    %628 = vector.shape_cast %627 : vector<1x64x16xf32> to vector<64x16xf32>
    %cst_525 = arith.constant 0.000000e+00 : f32
    %629 = vector.shape_cast %26 : vector<64x1xi1> to vector<64x1xi1>
    %630 = vector.broadcast %629 : vector<64x1xi1> to vector<64x16xi1>
    %631 = vector.broadcast %cst_525 : f32 to vector<64x16xf32>
    %632 = arith.select %630, %628, %631 : vector<64x16xi1>, vector<64x16xf32>
    %633 = arith.truncf %632 : vector<64x16xf32> to vector<64x16xbf16>
    %cst_526 = arith.constant dense<0.000000e+00> : vector<64x8xf32>
    %634 = tpu.matmul %633, %626, %cst_526 {dimension_numbers = #tpu.dot_dimension_numbers<[1], [0], [0], [1], [0, 0, 1, 1], [], []>} : vector<64x16xbf16>, vector<16x8xbf16>, vector<64x8xf32> -> vector<64x8xf32>
    %635 = arith.addf %624, %634 : vector<64x8xf32>
    %c1_527 = arith.constant 1 : index
    %c3_528 = arith.constant 3 : index
    %c0_529 = arith.constant 0 : index
    %c0_530 = arith.constant 0 : index
    %636 = vector.load %arg10[%c1_527, %c3_528, %c0_529, %c0_530] : memref<4x4x16x8xbf16, #tpu.memory_space<vmem>>, vector<1x1x16x8xbf16>
    %637 = vector.shape_cast %636 : vector<1x1x16x8xbf16> to vector<16x8xbf16>
    %c3_531 = arith.constant 3 : index
    %c8_532 = arith.constant 8 : index
    %c0_533 = arith.constant 0 : index
    %638 = vector.load %arg16[%c3_531, %c8_532, %c0_533] : memref<4x96x16xf32, #tpu.memory_space<vmem>>, vector<1x64x16xf32>
    %639 = vector.shape_cast %638 : vector<1x64x16xf32> to vector<64x16xf32>
    %640 = arith.truncf %639 : vector<64x16xf32> to vector<64x16xbf16>
    %cst_534 = arith.constant dense<0.000000e+00> : vector<64x8xf32>
    %641 = tpu.matmul %640, %637, %cst_534 {dimension_numbers = #tpu.dot_dimension_numbers<[1], [0], [0], [1], [0, 0, 1, 1], [], []>} : vector<64x16xbf16>, vector<16x8xbf16>, vector<64x8xf32> -> vector<64x8xf32>
    %642 = arith.addf %635, %641 : vector<64x8xf32>
    %c0_535 = arith.constant 0 : index
    %c0_536 = arith.constant 0 : index
    %643 = vector.load %arg11[%c0_535, %c0_536] : memref<1x8xf32, #tpu.memory_space<vmem>>, vector<1x8xf32>
    %644 = vector.broadcast %643 : vector<1x8xf32> to vector<64x8xf32>
    %645 = arith.addf %642, %644 : vector<64x8xf32>
    %c0_537 = arith.constant 0 : index
    %c3_538 = arith.constant 3 : index
    %c0_539 = arith.constant 0 : index
    %c0_540 = arith.constant 0 : index
    %646 = vector.load %arg12[%c0_537, %c3_538, %c0_539, %c0_540] : memref<1x16x64x8xf32, #tpu.memory_space<vmem>>, vector<1x1x64x8xf32>
    %647 = vector.shape_cast %646 : vector<1x1x64x8xf32> to vector<64x8xf32>
    %648 = vector.shape_cast %645 : vector<64x8xf32> to vector<1x1x64x8xf32>
    tpu.vector_store %arg12[%c0_537, %c3_538, %c0_539, %c0_540], %648 {strides = array<i32>} : memref<1x16x64x8xf32, #tpu.memory_space<vmem>>, vector<1x1x64x8xf32>,
    %cst_541 = arith.constant 0.000000e+00 : f32
    %649 = vector.broadcast %cst_541 : f32 to vector<64x8xf32>
    %c0_542 = arith.constant 0 : index
    %c0_543 = arith.constant 0 : index
    %c0_544 = arith.constant 0 : index
    %c0_545 = arith.constant 0 : index
    %650 = vector.load %arg10[%c0_542, %c0_543, %c0_544, %c0_545] : memref<4x4x16x8xbf16, #tpu.memory_space<vmem>>, vector<1x1x16x8xbf16>
    %651 = vector.shape_cast %650 : vector<1x1x16x8xbf16> to vector<16x8xbf16>
    %c2_546 = arith.constant 2 : index
    %c16_547 = arith.constant 16 : index
    %c0_548 = arith.constant 0 : index
    %652 = vector.load %arg16[%c2_546, %c16_547, %c0_548] : memref<4x96x16xf32, #tpu.memory_space<vmem>>, vector<1x64x16xf32>
    %653 = vector.shape_cast %652 : vector<1x64x16xf32> to vector<64x16xf32>
    %654 = arith.truncf %653 : vector<64x16xf32> to vector<64x16xbf16>
    %cst_549 = arith.constant dense<0.000000e+00> : vector<64x8xf32>
    %655 = tpu.matmul %654, %651, %cst_549 {dimension_numbers = #tpu.dot_dimension_numbers<[1], [0], [0], [1], [0, 0, 1, 1], [], []>} : vector<64x16xbf16>, vector<16x8xbf16>, vector<64x8xf32> -> vector<64x8xf32>
    %656 = arith.addf %649, %655 : vector<64x8xf32>
    %c0_550 = arith.constant 0 : index
    %c1_551 = arith.constant 1 : index
    %c0_552 = arith.constant 0 : index
    %c0_553 = arith.constant 0 : index
    %657 = vector.load %arg10[%c0_550, %c1_551, %c0_552, %c0_553] : memref<4x4x16x8xbf16, #tpu.memory_space<vmem>>, vector<1x1x16x8xbf16>
    %658 = vector.shape_cast %657 : vector<1x1x16x8xbf16> to vector<16x8xbf16>
    %c3_554 = arith.constant 3 : index
    %c15_555 = arith.constant 15 : index
    %c0_556 = arith.constant 0 : index
    %659 = vector.load %arg16[%c3_554, %c15_555, %c0_556] : memref<4x96x16xf32, #tpu.memory_space<vmem>>, vector<1x64x16xf32>
    %660 = vector.shape_cast %659 : vector<1x64x16xf32> to vector<64x16xf32>
    %cst_557 = arith.constant 0.000000e+00 : f32
    %661 = vector.shape_cast %24 : vector<64x1xi1> to vector<64x1xi1>
    %662 = vector.broadcast %661 : vector<64x1xi1> to vector<64x16xi1>
    %663 = vector.broadcast %cst_557 : f32 to vector<64x16xf32>
    %664 = arith.select %662, %660, %663 : vector<64x16xi1>, vector<64x16xf32>
    %665 = arith.truncf %664 : vector<64x16xf32> to vector<64x16xbf16>
    %cst_558 = arith.constant dense<0.000000e+00> : vector<64x8xf32>
    %666 = tpu.matmul %665, %658, %cst_558 {dimension_numbers = #tpu.dot_dimension_numbers<[1], [0], [0], [1], [0, 0, 1, 1], [], []>} : vector<64x16xbf16>, vector<16x8xbf16>, vector<64x8xf32> -> vector<64x8xf32>
    %667 = arith.addf %656, %666 : vector<64x8xf32>
    %c0_559 = arith.constant 0 : index
    %c2_560 = arith.constant 2 : index
    %c0_561 = arith.constant 0 : index
    %c0_562 = arith.constant 0 : index
    %668 = vector.load %arg10[%c0_559, %c2_560, %c0_561, %c0_562] : memref<4x4x16x8xbf16, #tpu.memory_space<vmem>>, vector<1x1x16x8xbf16>
    %669 = vector.shape_cast %668 : vector<1x1x16x8xbf16> to vector<16x8xbf16>
    %c0_563 = arith.constant 0 : index
    %c16_564 = arith.constant 16 : index
    %c0_565 = arith.constant 0 : index
    %670 = vector.load %arg16[%c0_563, %c16_564, %c0_565] : memref<4x96x16xf32, #tpu.memory_space<vmem>>, vector<1x64x16xf32>
    %671 = vector.shape_cast %670 : vector<1x64x16xf32> to vector<64x16xf32>
    %672 = arith.truncf %671 : vector<64x16xf32> to vector<64x16xbf16>
    %cst_566 = arith.constant dense<0.000000e+00> : vector<64x8xf32>
    %673 = tpu.matmul %672, %669, %cst_566 {dimension_numbers = #tpu.dot_dimension_numbers<[1], [0], [0], [1], [0, 0, 1, 1], [], []>} : vector<64x16xbf16>, vector<16x8xbf16>, vector<64x8xf32> -> vector<64x8xf32>
    %674 = arith.addf %667, %673 : vector<64x8xf32>
    %c0_567 = arith.constant 0 : index
    %c3_568 = arith.constant 3 : index
    %c0_569 = arith.constant 0 : index
    %c0_570 = arith.constant 0 : index
    %675 = vector.load %arg10[%c0_567, %c3_568, %c0_569, %c0_570] : memref<4x4x16x8xbf16, #tpu.memory_space<vmem>>, vector<1x1x16x8xbf16>
    %676 = vector.shape_cast %675 : vector<1x1x16x8xbf16> to vector<16x8xbf16>
    %c1_571 = arith.constant 1 : index
    %c15_572 = arith.constant 15 : index
    %c0_573 = arith.constant 0 : index
    %677 = vector.load %arg16[%c1_571, %c15_572, %c0_573] : memref<4x96x16xf32, #tpu.memory_space<vmem>>, vector<1x64x16xf32>
    %678 = vector.shape_cast %677 : vector<1x64x16xf32> to vector<64x16xf32>
    %cst_574 = arith.constant 0.000000e+00 : f32
    %679 = vector.shape_cast %24 : vector<64x1xi1> to vector<64x1xi1>
    %680 = vector.broadcast %679 : vector<64x1xi1> to vector<64x16xi1>
    %681 = vector.broadcast %cst_574 : f32 to vector<64x16xf32>
    %682 = arith.select %680, %678, %681 : vector<64x16xi1>, vector<64x16xf32>
    %683 = arith.truncf %682 : vector<64x16xf32> to vector<64x16xbf16>
    %cst_575 = arith.constant dense<0.000000e+00> : vector<64x8xf32>
    %684 = tpu.matmul %683, %676, %cst_575 {dimension_numbers = #tpu.dot_dimension_numbers<[1], [0], [0], [1], [0, 0, 1, 1], [], []>} : vector<64x16xbf16>, vector<16x8xbf16>, vector<64x8xf32> -> vector<64x8xf32>
    %685 = arith.addf %674, %684 : vector<64x8xf32>
    %c0_576 = arith.constant 0 : index
    %c0_577 = arith.constant 0 : index
    %686 = vector.load %arg11[%c0_576, %c0_577] : memref<1x8xf32, #tpu.memory_space<vmem>>, vector<1x8xf32>
    %687 = vector.broadcast %686 : vector<1x8xf32> to vector<64x8xf32>
    %688 = arith.addf %685, %687 : vector<64x8xf32>
    %c0_578 = arith.constant 0 : index
    %c8_579 = arith.constant 8 : index
    %c0_580 = arith.constant 0 : index
    %c0_581 = arith.constant 0 : index
    %689 = vector.load %arg12[%c0_578, %c8_579, %c0_580, %c0_581] : memref<1x16x64x8xf32, #tpu.memory_space<vmem>>, vector<1x1x64x8xf32>
    %690 = vector.shape_cast %689 : vector<1x1x64x8xf32> to vector<64x8xf32>
    %691 = vector.shape_cast %688 : vector<64x8xf32> to vector<1x1x64x8xf32>
    tpu.vector_store %arg12[%c0_578, %c8_579, %c0_580, %c0_581], %691 {strides = array<i32>} : memref<1x16x64x8xf32, #tpu.memory_space<vmem>>, vector<1x1x64x8xf32>,
    %cst_582 = arith.constant 0.000000e+00 : f32
    %692 = vector.broadcast %cst_582 : f32 to vector<64x8xf32>
    %c0_583 = arith.constant 0 : index
    %c0_584 = arith.constant 0 : index
    %c0_585 = arith.constant 0 : index
    %c0_586 = arith.constant 0 : index
    %693 = vector.load %arg10[%c0_583, %c0_584, %c0_585, %c0_586] : memref<4x4x16x8xbf16, #tpu.memory_space<vmem>>, vector<1x1x16x8xbf16>
    %694 = vector.shape_cast %693 : vector<1x1x16x8xbf16> to vector<16x8xbf16>
    %c3_587 = arith.constant 3 : index
    %c16_588 = arith.constant 16 : index
    %c0_589 = arith.constant 0 : index
    %695 = vector.load %arg16[%c3_587, %c16_588, %c0_589] : memref<4x96x16xf32, #tpu.memory_space<vmem>>, vector<1x64x16xf32>
    %696 = vector.shape_cast %695 : vector<1x64x16xf32> to vector<64x16xf32>
    %697 = arith.truncf %696 : vector<64x16xf32> to vector<64x16xbf16>
    %cst_590 = arith.constant dense<0.000000e+00> : vector<64x8xf32>
    %698 = tpu.matmul %697, %694, %cst_590 {dimension_numbers = #tpu.dot_dimension_numbers<[1], [0], [0], [1], [0, 0, 1, 1], [], []>} : vector<64x16xbf16>, vector<16x8xbf16>, vector<64x8xf32> -> vector<64x8xf32>
    %699 = arith.addf %692, %698 : vector<64x8xf32>
    %c0_591 = arith.constant 0 : index
    %c1_592 = arith.constant 1 : index
    %c0_593 = arith.constant 0 : index
    %c0_594 = arith.constant 0 : index
    %700 = vector.load %arg10[%c0_591, %c1_592, %c0_593, %c0_594] : memref<4x4x16x8xbf16, #tpu.memory_space<vmem>>, vector<1x1x16x8xbf16>
    %701 = vector.shape_cast %700 : vector<1x1x16x8xbf16> to vector<16x8xbf16>
    %c2_595 = arith.constant 2 : index
    %c16_596 = arith.constant 16 : index
    %c0_597 = arith.constant 0 : index
    %702 = vector.load %arg16[%c2_595, %c16_596, %c0_597] : memref<4x96x16xf32, #tpu.memory_space<vmem>>, vector<1x64x16xf32>
    %703 = vector.shape_cast %702 : vector<1x64x16xf32> to vector<64x16xf32>
    %704 = arith.truncf %703 : vector<64x16xf32> to vector<64x16xbf16>
    %cst_598 = arith.constant dense<0.000000e+00> : vector<64x8xf32>
    %705 = tpu.matmul %704, %701, %cst_598 {dimension_numbers = #tpu.dot_dimension_numbers<[1], [0], [0], [1], [0, 0, 1, 1], [], []>} : vector<64x16xbf16>, vector<16x8xbf16>, vector<64x8xf32> -> vector<64x8xf32>
    %706 = arith.addf %699, %705 : vector<64x8xf32>
    %c0_599 = arith.constant 0 : index
    %c2_600 = arith.constant 2 : index
    %c0_601 = arith.constant 0 : index
    %c0_602 = arith.constant 0 : index
    %707 = vector.load %arg10[%c0_599, %c2_600, %c0_601, %c0_602] : memref<4x4x16x8xbf16, #tpu.memory_space<vmem>>, vector<1x1x16x8xbf16>
    %708 = vector.shape_cast %707 : vector<1x1x16x8xbf16> to vector<16x8xbf16>
    %c1_603 = arith.constant 1 : index
    %c16_604 = arith.constant 16 : index
    %c0_605 = arith.constant 0 : index
    %709 = vector.load %arg16[%c1_603, %c16_604, %c0_605] : memref<4x96x16xf32, #tpu.memory_space<vmem>>, vector<1x64x16xf32>
    %710 = vector.shape_cast %709 : vector<1x64x16xf32> to vector<64x16xf32>
    %711 = arith.truncf %710 : vector<64x16xf32> to vector<64x16xbf16>
    %cst_606 = arith.constant dense<0.000000e+00> : vector<64x8xf32>
    %712 = tpu.matmul %711, %708, %cst_606 {dimension_numbers = #tpu.dot_dimension_numbers<[1], [0], [0], [1], [0, 0, 1, 1], [], []>} : vector<64x16xbf16>, vector<16x8xbf16>, vector<64x8xf32> -> vector<64x8xf32>
    %713 = arith.addf %706, %712 : vector<64x8xf32>
    %c0_607 = arith.constant 0 : index
    %c3_608 = arith.constant 3 : index
    %c0_609 = arith.constant 0 : index
    %c0_610 = arith.constant 0 : index
    %714 = vector.load %arg10[%c0_607, %c3_608, %c0_609, %c0_610] : memref<4x4x16x8xbf16, #tpu.memory_space<vmem>>, vector<1x1x16x8xbf16>
    %715 = vector.shape_cast %714 : vector<1x1x16x8xbf16> to vector<16x8xbf16>
    %c0_611 = arith.constant 0 : index
    %c16_612 = arith.constant 16 : index
    %c0_613 = arith.constant 0 : index
    %716 = vector.load %arg16[%c0_611, %c16_612, %c0_613] : memref<4x96x16xf32, #tpu.memory_space<vmem>>, vector<1x64x16xf32>
    %717 = vector.shape_cast %716 : vector<1x64x16xf32> to vector<64x16xf32>
    %718 = arith.truncf %717 : vector<64x16xf32> to vector<64x16xbf16>
    %cst_614 = arith.constant dense<0.000000e+00> : vector<64x8xf32>
    %719 = tpu.matmul %718, %715, %cst_614 {dimension_numbers = #tpu.dot_dimension_numbers<[1], [0], [0], [1], [0, 0, 1, 1], [], []>} : vector<64x16xbf16>, vector<16x8xbf16>, vector<64x8xf32> -> vector<64x8xf32>
    %720 = arith.addf %713, %719 : vector<64x8xf32>
    %c0_615 = arith.constant 0 : index
    %c0_616 = arith.constant 0 : index
    %721 = vector.load %arg11[%c0_615, %c0_616] : memref<1x8xf32, #tpu.memory_space<vmem>>, vector<1x8xf32>
    %722 = vector.broadcast %721 : vector<1x8xf32> to vector<64x8xf32>
    %723 = arith.addf %720, %722 : vector<64x8xf32>
    %c0_617 = arith.constant 0 : index
    %c10 = arith.constant 10 : index
    %c0_618 = arith.constant 0 : index
    %c0_619 = arith.constant 0 : index
    %724 = vector.load %arg12[%c0_617, %c10, %c0_618, %c0_619] : memref<1x16x64x8xf32, #tpu.memory_space<vmem>>, vector<1x1x64x8xf32>
    %725 = vector.shape_cast %724 : vector<1x1x64x8xf32> to vector<64x8xf32>
    %726 = vector.shape_cast %723 : vector<64x8xf32> to vector<1x1x64x8xf32>
    tpu.vector_store %arg12[%c0_617, %c10, %c0_618, %c0_619], %726 {strides = array<i32>} : memref<1x16x64x8xf32, #tpu.memory_space<vmem>>, vector<1x1x64x8xf32>,
    %cst_620 = arith.constant 0.000000e+00 : f32
    %727 = vector.broadcast %cst_620 : f32 to vector<64x8xf32>
    %c1_621 = arith.constant 1 : index
    %c0_622 = arith.constant 0 : index
    %c0_623 = arith.constant 0 : index
    %c0_624 = arith.constant 0 : index
    %728 = vector.load %arg10[%c1_621, %c0_622, %c0_623, %c0_624] : memref<4x4x16x8xbf16, #tpu.memory_space<vmem>>, vector<1x1x16x8xbf16>
    %729 = vector.shape_cast %728 : vector<1x1x16x8xbf16> to vector<16x8xbf16>
    %c3_625 = arith.constant 3 : index
    %c16_626 = arith.constant 16 : index
    %c0_627 = arith.constant 0 : index
    %730 = vector.load %arg16[%c3_625, %c16_626, %c0_627] : memref<4x96x16xf32, #tpu.memory_space<vmem>>, vector<1x64x16xf32>
    %731 = vector.shape_cast %730 : vector<1x64x16xf32> to vector<64x16xf32>
    %732 = arith.truncf %731 : vector<64x16xf32> to vector<64x16xbf16>
    %cst_628 = arith.constant dense<0.000000e+00> : vector<64x8xf32>
    %733 = tpu.matmul %732, %729, %cst_628 {dimension_numbers = #tpu.dot_dimension_numbers<[1], [0], [0], [1], [0, 0, 1, 1], [], []>} : vector<64x16xbf16>, vector<16x8xbf16>, vector<64x8xf32> -> vector<64x8xf32>
    %734 = arith.addf %727, %733 : vector<64x8xf32>
    %c1_629 = arith.constant 1 : index
    %c1_630 = arith.constant 1 : index
    %c0_631 = arith.constant 0 : index
    %c0_632 = arith.constant 0 : index
    %735 = vector.load %arg10[%c1_629, %c1_630, %c0_631, %c0_632] : memref<4x4x16x8xbf16, #tpu.memory_space<vmem>>, vector<1x1x16x8xbf16>
    %736 = vector.shape_cast %735 : vector<1x1x16x8xbf16> to vector<16x8xbf16>
    %c2_633 = arith.constant 2 : index
    %c16_634 = arith.constant 16 : index
    %c0_635 = arith.constant 0 : index
    %737 = vector.load %arg16[%c2_633, %c16_634, %c0_635] : memref<4x96x16xf32, #tpu.memory_space<vmem>>, vector<1x64x16xf32>
    %738 = vector.shape_cast %737 : vector<1x64x16xf32> to vector<64x16xf32>
    %739 = arith.truncf %738 : vector<64x16xf32> to vector<64x16xbf16>
    %cst_636 = arith.constant dense<0.000000e+00> : vector<64x8xf32>
    %740 = tpu.matmul %739, %736, %cst_636 {dimension_numbers = #tpu.dot_dimension_numbers<[1], [0], [0], [1], [0, 0, 1, 1], [], []>} : vector<64x16xbf16>, vector<16x8xbf16>, vector<64x8xf32> -> vector<64x8xf32>
    %741 = arith.addf %734, %740 : vector<64x8xf32>
    %c1_637 = arith.constant 1 : index
    %c2_638 = arith.constant 2 : index
    %c0_639 = arith.constant 0 : index
    %c0_640 = arith.constant 0 : index
    %742 = vector.load %arg10[%c1_637, %c2_638, %c0_639, %c0_640] : memref<4x4x16x8xbf16, #tpu.memory_space<vmem>>, vector<1x1x16x8xbf16>
    %743 = vector.shape_cast %742 : vector<1x1x16x8xbf16> to vector<16x8xbf16>
    %c1_641 = arith.constant 1 : index
    %c16_642 = arith.constant 16 : index
    %c0_643 = arith.constant 0 : index
    %744 = vector.load %arg16[%c1_641, %c16_642, %c0_643] : memref<4x96x16xf32, #tpu.memory_space<vmem>>, vector<1x64x16xf32>
    %745 = vector.shape_cast %744 : vector<1x64x16xf32> to vector<64x16xf32>
    %746 = arith.truncf %745 : vector<64x16xf32> to vector<64x16xbf16>
    %cst_644 = arith.constant dense<0.000000e+00> : vector<64x8xf32>
    %747 = tpu.matmul %746, %743, %cst_644 {dimension_numbers = #tpu.dot_dimension_numbers<[1], [0], [0], [1], [0, 0, 1, 1], [], []>} : vector<64x16xbf16>, vector<16x8xbf16>, vector<64x8xf32> -> vector<64x8xf32>
    %748 = arith.addf %741, %747 : vector<64x8xf32>
    %c1_645 = arith.constant 1 : index
    %c3_646 = arith.constant 3 : index
    %c0_647 = arith.constant 0 : index
    %c0_648 = arith.constant 0 : index
    %749 = vector.load %arg10[%c1_645, %c3_646, %c0_647, %c0_648] : memref<4x4x16x8xbf16, #tpu.memory_space<vmem>>, vector<1x1x16x8xbf16>
    %750 = vector.shape_cast %749 : vector<1x1x16x8xbf16> to vector<16x8xbf16>
    %c0_649 = arith.constant 0 : index
    %c16_650 = arith.constant 16 : index
    %c0_651 = arith.constant 0 : index
    %751 = vector.load %arg16[%c0_649, %c16_650, %c0_651] : memref<4x96x16xf32, #tpu.memory_space<vmem>>, vector<1x64x16xf32>
    %752 = vector.shape_cast %751 : vector<1x64x16xf32> to vector<64x16xf32>
    %753 = arith.truncf %752 : vector<64x16xf32> to vector<64x16xbf16>
    %cst_652 = arith.constant dense<0.000000e+00> : vector<64x8xf32>
    %754 = tpu.matmul %753, %750, %cst_652 {dimension_numbers = #tpu.dot_dimension_numbers<[1], [0], [0], [1], [0, 0, 1, 1], [], []>} : vector<64x16xbf16>, vector<16x8xbf16>, vector<64x8xf32> -> vector<64x8xf32>
    %755 = arith.addf %748, %754 : vector<64x8xf32>
    %c0_653 = arith.constant 0 : index
    %c0_654 = arith.constant 0 : index
    %756 = vector.load %arg11[%c0_653, %c0_654] : memref<1x8xf32, #tpu.memory_space<vmem>>, vector<1x8xf32>
    %757 = vector.broadcast %756 : vector<1x8xf32> to vector<64x8xf32>
    %758 = arith.addf %755, %757 : vector<64x8xf32>
    %c0_655 = arith.constant 0 : index
    %c9_656 = arith.constant 9 : index
    %c0_657 = arith.constant 0 : index
    %c0_658 = arith.constant 0 : index
    %759 = vector.load %arg12[%c0_655, %c9_656, %c0_657, %c0_658] : memref<1x16x64x8xf32, #tpu.memory_space<vmem>>, vector<1x1x64x8xf32>
    %760 = vector.shape_cast %759 : vector<1x1x64x8xf32> to vector<64x8xf32>
    %761 = vector.shape_cast %758 : vector<64x8xf32> to vector<1x1x64x8xf32>
    tpu.vector_store %arg12[%c0_655, %c9_656, %c0_657, %c0_658], %761 {strides = array<i32>} : memref<1x16x64x8xf32, #tpu.memory_space<vmem>>, vector<1x1x64x8xf32>,
    %cst_659 = arith.constant 0.000000e+00 : f32
    %762 = vector.broadcast %cst_659 : f32 to vector<64x8xf32>
    %c1_660 = arith.constant 1 : index
    %c0_661 = arith.constant 0 : index
    %c0_662 = arith.constant 0 : index
    %c0_663 = arith.constant 0 : index
    %763 = vector.load %arg10[%c1_660, %c0_661, %c0_662, %c0_663] : memref<4x4x16x8xbf16, #tpu.memory_space<vmem>>, vector<1x1x16x8xbf16>
    %764 = vector.shape_cast %763 : vector<1x1x16x8xbf16> to vector<16x8xbf16>
    %c2_664 = arith.constant 2 : index
    %c17_665 = arith.constant 17 : index
    %c0_666 = arith.constant 0 : index
    %765 = vector.load %arg16[%c2_664, %c17_665, %c0_666] : memref<4x96x16xf32, #tpu.memory_space<vmem>>, vector<1x64x16xf32>
    %766 = vector.shape_cast %765 : vector<1x64x16xf32> to vector<64x16xf32>
    %cst_667 = arith.constant 0.000000e+00 : f32
    %767 = vector.shape_cast %26 : vector<64x1xi1> to vector<64x1xi1>
    %768 = vector.broadcast %767 : vector<64x1xi1> to vector<64x16xi1>
    %769 = vector.broadcast %cst_667 : f32 to vector<64x16xf32>
    %770 = arith.select %768, %766, %769 : vector<64x16xi1>, vector<64x16xf32>
    %771 = arith.truncf %770 : vector<64x16xf32> to vector<64x16xbf16>
    %cst_668 = arith.constant dense<0.000000e+00> : vector<64x8xf32>
    %772 = tpu.matmul %771, %764, %cst_668 {dimension_numbers = #tpu.dot_dimension_numbers<[1], [0], [0], [1], [0, 0, 1, 1], [], []>} : vector<64x16xbf16>, vector<16x8xbf16>, vector<64x8xf32> -> vector<64x8xf32>
    %773 = arith.addf %762, %772 : vector<64x8xf32>
    %c1_669 = arith.constant 1 : index
    %c1_670 = arith.constant 1 : index
    %c0_671 = arith.constant 0 : index
    %c0_672 = arith.constant 0 : index
    %774 = vector.load %arg10[%c1_669, %c1_670, %c0_671, %c0_672] : memref<4x4x16x8xbf16, #tpu.memory_space<vmem>>, vector<1x1x16x8xbf16>
    %775 = vector.shape_cast %774 : vector<1x1x16x8xbf16> to vector<16x8xbf16>
    %c3_673 = arith.constant 3 : index
    %c16_674 = arith.constant 16 : index
    %c0_675 = arith.constant 0 : index
    %776 = vector.load %arg16[%c3_673, %c16_674, %c0_675] : memref<4x96x16xf32, #tpu.memory_space<vmem>>, vector<1x64x16xf32>
    %777 = vector.shape_cast %776 : vector<1x64x16xf32> to vector<64x16xf32>
    %778 = arith.truncf %777 : vector<64x16xf32> to vector<64x16xbf16>
    %cst_676 = arith.constant dense<0.000000e+00> : vector<64x8xf32>
    %779 = tpu.matmul %778, %775, %cst_676 {dimension_numbers = #tpu.dot_dimension_numbers<[1], [0], [0], [1], [0, 0, 1, 1], [], []>} : vector<64x16xbf16>, vector<16x8xbf16>, vector<64x8xf32> -> vector<64x8xf32>
    %780 = arith.addf %773, %779 : vector<64x8xf32>
    %c1_677 = arith.constant 1 : index
    %c2_678 = arith.constant 2 : index
    %c0_679 = arith.constant 0 : index
    %c0_680 = arith.constant 0 : index
    %781 = vector.load %arg10[%c1_677, %c2_678, %c0_679, %c0_680] : memref<4x4x16x8xbf16, #tpu.memory_space<vmem>>, vector<1x1x16x8xbf16>
    %782 = vector.shape_cast %781 : vector<1x1x16x8xbf16> to vector<16x8xbf16>
    %c0_681 = arith.constant 0 : index
    %c17_682 = arith.constant 17 : index
    %c0_683 = arith.constant 0 : index
    %783 = vector.load %arg16[%c0_681, %c17_682, %c0_683] : memref<4x96x16xf32, #tpu.memory_space<vmem>>, vector<1x64x16xf32>
    %784 = vector.shape_cast %783 : vector<1x64x16xf32> to vector<64x16xf32>
    %cst_684 = arith.constant 0.000000e+00 : f32
    %785 = vector.shape_cast %26 : vector<64x1xi1> to vector<64x1xi1>
    %786 = vector.broadcast %785 : vector<64x1xi1> to vector<64x16xi1>
    %787 = vector.broadcast %cst_684 : f32 to vector<64x16xf32>
    %788 = arith.select %786, %784, %787 : vector<64x16xi1>, vector<64x16xf32>
    %789 = arith.truncf %788 : vector<64x16xf32> to vector<64x16xbf16>
    %cst_685 = arith.constant dense<0.000000e+00> : vector<64x8xf32>
    %790 = tpu.matmul %789, %782, %cst_685 {dimension_numbers = #tpu.dot_dimension_numbers<[1], [0], [0], [1], [0, 0, 1, 1], [], []>} : vector<64x16xbf16>, vector<16x8xbf16>, vector<64x8xf32> -> vector<64x8xf32>
    %791 = arith.addf %780, %790 : vector<64x8xf32>
    %c1_686 = arith.constant 1 : index
    %c3_687 = arith.constant 3 : index
    %c0_688 = arith.constant 0 : index
    %c0_689 = arith.constant 0 : index
    %792 = vector.load %arg10[%c1_686, %c3_687, %c0_688, %c0_689] : memref<4x4x16x8xbf16, #tpu.memory_space<vmem>>, vector<1x1x16x8xbf16>
    %793 = vector.shape_cast %792 : vector<1x1x16x8xbf16> to vector<16x8xbf16>
    %c1_690 = arith.constant 1 : index
    %c16_691 = arith.constant 16 : index
    %c0_692 = arith.constant 0 : index
    %794 = vector.load %arg16[%c1_690, %c16_691, %c0_692] : memref<4x96x16xf32, #tpu.memory_space<vmem>>, vector<1x64x16xf32>
    %795 = vector.shape_cast %794 : vector<1x64x16xf32> to vector<64x16xf32>
    %796 = arith.truncf %795 : vector<64x16xf32> to vector<64x16xbf16>
    %cst_693 = arith.constant dense<0.000000e+00> : vector<64x8xf32>
    %797 = tpu.matmul %796, %793, %cst_693 {dimension_numbers = #tpu.dot_dimension_numbers<[1], [0], [0], [1], [0, 0, 1, 1], [], []>} : vector<64x16xbf16>, vector<16x8xbf16>, vector<64x8xf32> -> vector<64x8xf32>
    %798 = arith.addf %791, %797 : vector<64x8xf32>
    %c0_694 = arith.constant 0 : index
    %c0_695 = arith.constant 0 : index
    %799 = vector.load %arg11[%c0_694, %c0_695] : memref<1x8xf32, #tpu.memory_space<vmem>>, vector<1x8xf32>
    %800 = vector.broadcast %799 : vector<1x8xf32> to vector<64x8xf32>
    %801 = arith.addf %798, %800 : vector<64x8xf32>
    %c0_696 = arith.constant 0 : index
    %c11 = arith.constant 11 : index
    %c0_697 = arith.constant 0 : index
    %c0_698 = arith.constant 0 : index
    %802 = vector.load %arg12[%c0_696, %c11, %c0_697, %c0_698] : memref<1x16x64x8xf32, #tpu.memory_space<vmem>>, vector<1x1x64x8xf32>
    %803 = vector.shape_cast %802 : vector<1x1x64x8xf32> to vector<64x8xf32>
    %804 = vector.shape_cast %801 : vector<64x8xf32> to vector<1x1x64x8xf32>
    tpu.vector_store %arg12[%c0_696, %c11, %c0_697, %c0_698], %804 {strides = array<i32>} : memref<1x16x64x8xf32, #tpu.memory_space<vmem>>, vector<1x1x64x8xf32>,
    %cst_699 = arith.constant 0.000000e+00 : f32
    %805 = vector.broadcast %cst_699 : f32 to vector<64x8xf32>
    %c2_700 = arith.constant 2 : index
    %c0_701 = arith.constant 0 : index
    %c0_702 = arith.constant 0 : index
    %c0_703 = arith.constant 0 : index
    %806 = vector.load %arg10[%c2_700, %c0_701, %c0_702, %c0_703] : memref<4x4x16x8xbf16, #tpu.memory_space<vmem>>, vector<1x1x16x8xbf16>
    %807 = vector.shape_cast %806 : vector<1x1x16x8xbf16> to vector<16x8xbf16>
    %c2_704 = arith.constant 2 : index
    %c16_705 = arith.constant 16 : index
    %c0_706 = arith.constant 0 : index
    %808 = vector.load %arg16[%c2_704, %c16_705, %c0_706] : memref<4x96x16xf32, #tpu.memory_space<vmem>>, vector<1x64x16xf32>
    %809 = vector.shape_cast %808 : vector<1x64x16xf32> to vector<64x16xf32>
    %810 = arith.truncf %809 : vector<64x16xf32> to vector<64x16xbf16>
    %cst_707 = arith.constant dense<0.000000e+00> : vector<64x8xf32>
    %811 = tpu.matmul %810, %807, %cst_707 {dimension_numbers = #tpu.dot_dimension_numbers<[1], [0], [0], [1], [0, 0, 1, 1], [], []>} : vector<64x16xbf16>, vector<16x8xbf16>, vector<64x8xf32> -> vector<64x8xf32>
    %812 = arith.addf %805, %811 : vector<64x8xf32>
    %c2_708 = arith.constant 2 : index
    %c1_709 = arith.constant 1 : index
    %c0_710 = arith.constant 0 : index
    %c0_711 = arith.constant 0 : index
    %813 = vector.load %arg10[%c2_708, %c1_709, %c0_710, %c0_711] : memref<4x4x16x8xbf16, #tpu.memory_space<vmem>>, vector<1x1x16x8xbf16>
    %814 = vector.shape_cast %813 : vector<1x1x16x8xbf16> to vector<16x8xbf16>
    %c3_712 = arith.constant 3 : index
    %c15_713 = arith.constant 15 : index
    %c0_714 = arith.constant 0 : index
    %815 = vector.load %arg16[%c3_712, %c15_713, %c0_714] : memref<4x96x16xf32, #tpu.memory_space<vmem>>, vector<1x64x16xf32>
    %816 = vector.shape_cast %815 : vector<1x64x16xf32> to vector<64x16xf32>
    %cst_715 = arith.constant 0.000000e+00 : f32
    %817 = vector.shape_cast %24 : vector<64x1xi1> to vector<64x1xi1>
    %818 = vector.broadcast %817 : vector<64x1xi1> to vector<64x16xi1>
    %819 = vector.broadcast %cst_715 : f32 to vector<64x16xf32>
    %820 = arith.select %818, %816, %819 : vector<64x16xi1>, vector<64x16xf32>
    %821 = arith.truncf %820 : vector<64x16xf32> to vector<64x16xbf16>
    %cst_716 = arith.constant dense<0.000000e+00> : vector<64x8xf32>
    %822 = tpu.matmul %821, %814, %cst_716 {dimension_numbers = #tpu.dot_dimension_numbers<[1], [0], [0], [1], [0, 0, 1, 1], [], []>} : vector<64x16xbf16>, vector<16x8xbf16>, vector<64x8xf32> -> vector<64x8xf32>
    %823 = arith.addf %812, %822 : vector<64x8xf32>
    %c2_717 = arith.constant 2 : index
    %c2_718 = arith.constant 2 : index
    %c0_719 = arith.constant 0 : index
    %c0_720 = arith.constant 0 : index
    %824 = vector.load %arg10[%c2_717, %c2_718, %c0_719, %c0_720] : memref<4x4x16x8xbf16, #tpu.memory_space<vmem>>, vector<1x1x16x8xbf16>
    %825 = vector.shape_cast %824 : vector<1x1x16x8xbf16> to vector<16x8xbf16>
    %c0_721 = arith.constant 0 : index
    %c16_722 = arith.constant 16 : index
    %c0_723 = arith.constant 0 : index
    %826 = vector.load %arg16[%c0_721, %c16_722, %c0_723] : memref<4x96x16xf32, #tpu.memory_space<vmem>>, vector<1x64x16xf32>
    %827 = vector.shape_cast %826 : vector<1x64x16xf32> to vector<64x16xf32>
    %828 = arith.truncf %827 : vector<64x16xf32> to vector<64x16xbf16>
    %cst_724 = arith.constant dense<0.000000e+00> : vector<64x8xf32>
    %829 = tpu.matmul %828, %825, %cst_724 {dimension_numbers = #tpu.dot_dimension_numbers<[1], [0], [0], [1], [0, 0, 1, 1], [], []>} : vector<64x16xbf16>, vector<16x8xbf16>, vector<64x8xf32> -> vector<64x8xf32>
    %830 = arith.addf %823, %829 : vector<64x8xf32>
    %c2_725 = arith.constant 2 : index
    %c3_726 = arith.constant 3 : index
    %c0_727 = arith.constant 0 : index
    %c0_728 = arith.constant 0 : index
    %831 = vector.load %arg10[%c2_725, %c3_726, %c0_727, %c0_728] : memref<4x4x16x8xbf16, #tpu.memory_space<vmem>>, vector<1x1x16x8xbf16>
    %832 = vector.shape_cast %831 : vector<1x1x16x8xbf16> to vector<16x8xbf16>
    %c1_729 = arith.constant 1 : index
    %c15_730 = arith.constant 15 : index
    %c0_731 = arith.constant 0 : index
    %833 = vector.load %arg16[%c1_729, %c15_730, %c0_731] : memref<4x96x16xf32, #tpu.memory_space<vmem>>, vector<1x64x16xf32>
    %834 = vector.shape_cast %833 : vector<1x64x16xf32> to vector<64x16xf32>
    %cst_732 = arith.constant 0.000000e+00 : f32
    %835 = vector.shape_cast %24 : vector<64x1xi1> to vector<64x1xi1>
    %836 = vector.broadcast %835 : vector<64x1xi1> to vector<64x16xi1>
    %837 = vector.broadcast %cst_732 : f32 to vector<64x16xf32>
    %838 = arith.select %836, %834, %837 : vector<64x16xi1>, vector<64x16xf32>
    %839 = arith.truncf %838 : vector<64x16xf32> to vector<64x16xbf16>
    %cst_733 = arith.constant dense<0.000000e+00> : vector<64x8xf32>
    %840 = tpu.matmul %839, %832, %cst_733 {dimension_numbers = #tpu.dot_dimension_numbers<[1], [0], [0], [1], [0, 0, 1, 1], [], []>} : vector<64x16xbf16>, vector<16x8xbf16>, vector<64x8xf32> -> vector<64x8xf32>
    %841 = arith.addf %830, %840 : vector<64x8xf32>
    %c0_734 = arith.constant 0 : index
    %c0_735 = arith.constant 0 : index
    %842 = vector.load %arg11[%c0_734, %c0_735] : memref<1x8xf32, #tpu.memory_space<vmem>>, vector<1x8xf32>
    %843 = vector.broadcast %842 : vector<1x8xf32> to vector<64x8xf32>
    %844 = arith.addf %841, %843 : vector<64x8xf32>
    %c0_736 = arith.constant 0 : index
    %c4_737 = arith.constant 4 : index
    %c0_738 = arith.constant 0 : index
    %c0_739 = arith.constant 0 : index
    %845 = vector.load %arg12[%c0_736, %c4_737, %c0_738, %c0_739] : memref<1x16x64x8xf32, #tpu.memory_space<vmem>>, vector<1x1x64x8xf32>
    %846 = vector.shape_cast %845 : vector<1x1x64x8xf32> to vector<64x8xf32>
    %847 = vector.shape_cast %844 : vector<64x8xf32> to vector<1x1x64x8xf32>
    tpu.vector_store %arg12[%c0_736, %c4_737, %c0_738, %c0_739], %847 {strides = array<i32>} : memref<1x16x64x8xf32, #tpu.memory_space<vmem>>, vector<1x1x64x8xf32>,
    %cst_740 = arith.constant 0.000000e+00 : f32
    %848 = vector.broadcast %cst_740 : f32 to vector<64x8xf32>
    %c2_741 = arith.constant 2 : index
    %c0_742 = arith.constant 0 : index
    %c0_743 = arith.constant 0 : index
    %c0_744 = arith.constant 0 : index
    %849 = vector.load %arg10[%c2_741, %c0_742, %c0_743, %c0_744] : memref<4x4x16x8xbf16, #tpu.memory_space<vmem>>, vector<1x1x16x8xbf16>
    %850 = vector.shape_cast %849 : vector<1x1x16x8xbf16> to vector<16x8xbf16>
    %c3_745 = arith.constant 3 : index
    %c16_746 = arith.constant 16 : index
    %c0_747 = arith.constant 0 : index
    %851 = vector.load %arg16[%c3_745, %c16_746, %c0_747] : memref<4x96x16xf32, #tpu.memory_space<vmem>>, vector<1x64x16xf32>
    %852 = vector.shape_cast %851 : vector<1x64x16xf32> to vector<64x16xf32>
    %853 = arith.truncf %852 : vector<64x16xf32> to vector<64x16xbf16>
    %cst_748 = arith.constant dense<0.000000e+00> : vector<64x8xf32>
    %854 = tpu.matmul %853, %850, %cst_748 {dimension_numbers = #tpu.dot_dimension_numbers<[1], [0], [0], [1], [0, 0, 1, 1], [], []>} : vector<64x16xbf16>, vector<16x8xbf16>, vector<64x8xf32> -> vector<64x8xf32>
    %855 = arith.addf %848, %854 : vector<64x8xf32>
    %c2_749 = arith.constant 2 : index
    %c1_750 = arith.constant 1 : index
    %c0_751 = arith.constant 0 : index
    %c0_752 = arith.constant 0 : index
    %856 = vector.load %arg10[%c2_749, %c1_750, %c0_751, %c0_752] : memref<4x4x16x8xbf16, #tpu.memory_space<vmem>>, vector<1x1x16x8xbf16>
    %857 = vector.shape_cast %856 : vector<1x1x16x8xbf16> to vector<16x8xbf16>
    %c2_753 = arith.constant 2 : index
    %c16_754 = arith.constant 16 : index
    %c0_755 = arith.constant 0 : index
    %858 = vector.load %arg16[%c2_753, %c16_754, %c0_755] : memref<4x96x16xf32, #tpu.memory_space<vmem>>, vector<1x64x16xf32>
    %859 = vector.shape_cast %858 : vector<1x64x16xf32> to vector<64x16xf32>
    %860 = arith.truncf %859 : vector<64x16xf32> to vector<64x16xbf16>
    %cst_756 = arith.constant dense<0.000000e+00> : vector<64x8xf32>
    %861 = tpu.matmul %860, %857, %cst_756 {dimension_numbers = #tpu.dot_dimension_numbers<[1], [0], [0], [1], [0, 0, 1, 1], [], []>} : vector<64x16xbf16>, vector<16x8xbf16>, vector<64x8xf32> -> vector<64x8xf32>
    %862 = arith.addf %855, %861 : vector<64x8xf32>
    %c2_757 = arith.constant 2 : index
    %c2_758 = arith.constant 2 : index
    %c0_759 = arith.constant 0 : index
    %c0_760 = arith.constant 0 : index
    %863 = vector.load %arg10[%c2_757, %c2_758, %c0_759, %c0_760] : memref<4x4x16x8xbf16, #tpu.memory_space<vmem>>, vector<1x1x16x8xbf16>
    %864 = vector.shape_cast %863 : vector<1x1x16x8xbf16> to vector<16x8xbf16>
    %c1_761 = arith.constant 1 : index
    %c16_762 = arith.constant 16 : index
    %c0_763 = arith.constant 0 : index
    %865 = vector.load %arg16[%c1_761, %c16_762, %c0_763] : memref<4x96x16xf32, #tpu.memory_space<vmem>>, vector<1x64x16xf32>
    %866 = vector.shape_cast %865 : vector<1x64x16xf32> to vector<64x16xf32>
    %867 = arith.truncf %866 : vector<64x16xf32> to vector<64x16xbf16>
    %cst_764 = arith.constant dense<0.000000e+00> : vector<64x8xf32>
    %868 = tpu.matmul %867, %864, %cst_764 {dimension_numbers = #tpu.dot_dimension_numbers<[1], [0], [0], [1], [0, 0, 1, 1], [], []>} : vector<64x16xbf16>, vector<16x8xbf16>, vector<64x8xf32> -> vector<64x8xf32>
    %869 = arith.addf %862, %868 : vector<64x8xf32>
    %c2_765 = arith.constant 2 : index
    %c3_766 = arith.constant 3 : index
    %c0_767 = arith.constant 0 : index
    %c0_768 = arith.constant 0 : index
    %870 = vector.load %arg10[%c2_765, %c3_766, %c0_767, %c0_768] : memref<4x4x16x8xbf16, #tpu.memory_space<vmem>>, vector<1x1x16x8xbf16>
    %871 = vector.shape_cast %870 : vector<1x1x16x8xbf16> to vector<16x8xbf16>
    %c0_769 = arith.constant 0 : index
    %c16_770 = arith.constant 16 : index
    %c0_771 = arith.constant 0 : index
    %872 = vector.load %arg16[%c0_769, %c16_770, %c0_771] : memref<4x96x16xf32, #tpu.memory_space<vmem>>, vector<1x64x16xf32>
    %873 = vector.shape_cast %872 : vector<1x64x16xf32> to vector<64x16xf32>
    %874 = arith.truncf %873 : vector<64x16xf32> to vector<64x16xbf16>
    %cst_772 = arith.constant dense<0.000000e+00> : vector<64x8xf32>
    %875 = tpu.matmul %874, %871, %cst_772 {dimension_numbers = #tpu.dot_dimension_numbers<[1], [0], [0], [1], [0, 0, 1, 1], [], []>} : vector<64x16xbf16>, vector<16x8xbf16>, vector<64x8xf32> -> vector<64x8xf32>
    %876 = arith.addf %869, %875 : vector<64x8xf32>
    %c0_773 = arith.constant 0 : index
    %c0_774 = arith.constant 0 : index
    %877 = vector.load %arg11[%c0_773, %c0_774] : memref<1x8xf32, #tpu.memory_space<vmem>>, vector<1x8xf32>
    %878 = vector.broadcast %877 : vector<1x8xf32> to vector<64x8xf32>
    %879 = arith.addf %876, %878 : vector<64x8xf32>
    %c0_775 = arith.constant 0 : index
    %c6_776 = arith.constant 6 : index
    %c0_777 = arith.constant 0 : index
    %c0_778 = arith.constant 0 : index
    %880 = vector.load %arg12[%c0_775, %c6_776, %c0_777, %c0_778] : memref<1x16x64x8xf32, #tpu.memory_space<vmem>>, vector<1x1x64x8xf32>
    %881 = vector.shape_cast %880 : vector<1x1x64x8xf32> to vector<64x8xf32>
    %882 = vector.shape_cast %879 : vector<64x8xf32> to vector<1x1x64x8xf32>
    tpu.vector_store %arg12[%c0_775, %c6_776, %c0_777, %c0_778], %882 {strides = array<i32>} : memref<1x16x64x8xf32, #tpu.memory_space<vmem>>, vector<1x1x64x8xf32>,
    %cst_779 = arith.constant 0.000000e+00 : f32
    %883 = vector.broadcast %cst_779 : f32 to vector<64x8xf32>
    %c3_780 = arith.constant 3 : index
    %c0_781 = arith.constant 0 : index
    %c0_782 = arith.constant 0 : index
    %c0_783 = arith.constant 0 : index
    %884 = vector.load %arg10[%c3_780, %c0_781, %c0_782, %c0_783] : memref<4x4x16x8xbf16, #tpu.memory_space<vmem>>, vector<1x1x16x8xbf16>
    %885 = vector.shape_cast %884 : vector<1x1x16x8xbf16> to vector<16x8xbf16>
    %c3_784 = arith.constant 3 : index
    %c16_785 = arith.constant 16 : index
    %c0_786 = arith.constant 0 : index
    %886 = vector.load %arg16[%c3_784, %c16_785, %c0_786] : memref<4x96x16xf32, #tpu.memory_space<vmem>>, vector<1x64x16xf32>
    %887 = vector.shape_cast %886 : vector<1x64x16xf32> to vector<64x16xf32>
    %888 = arith.truncf %887 : vector<64x16xf32> to vector<64x16xbf16>
    %cst_787 = arith.constant dense<0.000000e+00> : vector<64x8xf32>
    %889 = tpu.matmul %888, %885, %cst_787 {dimension_numbers = #tpu.dot_dimension_numbers<[1], [0], [0], [1], [0, 0, 1, 1], [], []>} : vector<64x16xbf16>, vector<16x8xbf16>, vector<64x8xf32> -> vector<64x8xf32>
    %890 = arith.addf %883, %889 : vector<64x8xf32>
    %c3_788 = arith.constant 3 : index
    %c1_789 = arith.constant 1 : index
    %c0_790 = arith.constant 0 : index
    %c0_791 = arith.constant 0 : index
    %891 = vector.load %arg10[%c3_788, %c1_789, %c0_790, %c0_791] : memref<4x4x16x8xbf16, #tpu.memory_space<vmem>>, vector<1x1x16x8xbf16>
    %892 = vector.shape_cast %891 : vector<1x1x16x8xbf16> to vector<16x8xbf16>
    %c2_792 = arith.constant 2 : index
    %c16_793 = arith.constant 16 : index
    %c0_794 = arith.constant 0 : index
    %893 = vector.load %arg16[%c2_792, %c16_793, %c0_794] : memref<4x96x16xf32, #tpu.memory_space<vmem>>, vector<1x64x16xf32>
    %894 = vector.shape_cast %893 : vector<1x64x16xf32> to vector<64x16xf32>
    %895 = arith.truncf %894 : vector<64x16xf32> to vector<64x16xbf16>
    %cst_795 = arith.constant dense<0.000000e+00> : vector<64x8xf32>
    %896 = tpu.matmul %895, %892, %cst_795 {dimension_numbers = #tpu.dot_dimension_numbers<[1], [0], [0], [1], [0, 0, 1, 1], [], []>} : vector<64x16xbf16>, vector<16x8xbf16>, vector<64x8xf32> -> vector<64x8xf32>
    %897 = arith.addf %890, %896 : vector<64x8xf32>
    %c3_796 = arith.constant 3 : index
    %c2_797 = arith.constant 2 : index
    %c0_798 = arith.constant 0 : index
    %c0_799 = arith.constant 0 : index
    %898 = vector.load %arg10[%c3_796, %c2_797, %c0_798, %c0_799] : memref<4x4x16x8xbf16, #tpu.memory_space<vmem>>, vector<1x1x16x8xbf16>
    %899 = vector.shape_cast %898 : vector<1x1x16x8xbf16> to vector<16x8xbf16>
    %c1_800 = arith.constant 1 : index
    %c16_801 = arith.constant 16 : index
    %c0_802 = arith.constant 0 : index
    %900 = vector.load %arg16[%c1_800, %c16_801, %c0_802] : memref<4x96x16xf32, #tpu.memory_space<vmem>>, vector<1x64x16xf32>
    %901 = vector.shape_cast %900 : vector<1x64x16xf32> to vector<64x16xf32>
    %902 = arith.truncf %901 : vector<64x16xf32> to vector<64x16xbf16>
    %cst_803 = arith.constant dense<0.000000e+00> : vector<64x8xf32>
    %903 = tpu.matmul %902, %899, %cst_803 {dimension_numbers = #tpu.dot_dimension_numbers<[1], [0], [0], [1], [0, 0, 1, 1], [], []>} : vector<64x16xbf16>, vector<16x8xbf16>, vector<64x8xf32> -> vector<64x8xf32>
    %904 = arith.addf %897, %903 : vector<64x8xf32>
    %c3_804 = arith.constant 3 : index
    %c3_805 = arith.constant 3 : index
    %c0_806 = arith.constant 0 : index
    %c0_807 = arith.constant 0 : index
    %905 = vector.load %arg10[%c3_804, %c3_805, %c0_806, %c0_807] : memref<4x4x16x8xbf16, #tpu.memory_space<vmem>>, vector<1x1x16x8xbf16>
    %906 = vector.shape_cast %905 : vector<1x1x16x8xbf16> to vector<16x8xbf16>
    %c0_808 = arith.constant 0 : index
    %c16_809 = arith.constant 16 : index
    %c0_810 = arith.constant 0 : index
    %907 = vector.load %arg16[%c0_808, %c16_809, %c0_810] : memref<4x96x16xf32, #tpu.memory_space<vmem>>, vector<1x64x16xf32>
    %908 = vector.shape_cast %907 : vector<1x64x16xf32> to vector<64x16xf32>
    %909 = arith.truncf %908 : vector<64x16xf32> to vector<64x16xbf16>
    %cst_811 = arith.constant dense<0.000000e+00> : vector<64x8xf32>
    %910 = tpu.matmul %909, %906, %cst_811 {dimension_numbers = #tpu.dot_dimension_numbers<[1], [0], [0], [1], [0, 0, 1, 1], [], []>} : vector<64x16xbf16>, vector<16x8xbf16>, vector<64x8xf32> -> vector<64x8xf32>
    %911 = arith.addf %904, %910 : vector<64x8xf32>
    %c0_812 = arith.constant 0 : index
    %c0_813 = arith.constant 0 : index
    %912 = vector.load %arg11[%c0_812, %c0_813] : memref<1x8xf32, #tpu.memory_space<vmem>>, vector<1x8xf32>
    %913 = vector.broadcast %912 : vector<1x8xf32> to vector<64x8xf32>
    %914 = arith.addf %911, %913 : vector<64x8xf32>
    %c0_814 = arith.constant 0 : index
    %c5_815 = arith.constant 5 : index
    %c0_816 = arith.constant 0 : index
    %c0_817 = arith.constant 0 : index
    %915 = vector.load %arg12[%c0_814, %c5_815, %c0_816, %c0_817] : memref<1x16x64x8xf32, #tpu.memory_space<vmem>>, vector<1x1x64x8xf32>
    %916 = vector.shape_cast %915 : vector<1x1x64x8xf32> to vector<64x8xf32>
    %917 = vector.shape_cast %914 : vector<64x8xf32> to vector<1x1x64x8xf32>
    tpu.vector_store %arg12[%c0_814, %c5_815, %c0_816, %c0_817], %917 {strides = array<i32>} : memref<1x16x64x8xf32, #tpu.memory_space<vmem>>, vector<1x1x64x8xf32>,
    %cst_818 = arith.constant 0.000000e+00 : f32
    %918 = vector.broadcast %cst_818 : f32 to vector<64x8xf32>
    %c3_819 = arith.constant 3 : index
    %c0_820 = arith.constant 0 : index
    %c0_821 = arith.constant 0 : index
    %c0_822 = arith.constant 0 : index
    %919 = vector.load %arg10[%c3_819, %c0_820, %c0_821, %c0_822] : memref<4x4x16x8xbf16, #tpu.memory_space<vmem>>, vector<1x1x16x8xbf16>
    %920 = vector.shape_cast %919 : vector<1x1x16x8xbf16> to vector<16x8xbf16>
    %c2_823 = arith.constant 2 : index
    %c17_824 = arith.constant 17 : index
    %c0_825 = arith.constant 0 : index
    %921 = vector.load %arg16[%c2_823, %c17_824, %c0_825] : memref<4x96x16xf32, #tpu.memory_space<vmem>>, vector<1x64x16xf32>
    %922 = vector.shape_cast %921 : vector<1x64x16xf32> to vector<64x16xf32>
    %cst_826 = arith.constant 0.000000e+00 : f32
    %923 = vector.shape_cast %26 : vector<64x1xi1> to vector<64x1xi1>
    %924 = vector.broadcast %923 : vector<64x1xi1> to vector<64x16xi1>
    %925 = vector.broadcast %cst_826 : f32 to vector<64x16xf32>
    %926 = arith.select %924, %922, %925 : vector<64x16xi1>, vector<64x16xf32>
    %927 = arith.truncf %926 : vector<64x16xf32> to vector<64x16xbf16>
    %cst_827 = arith.constant dense<0.000000e+00> : vector<64x8xf32>
    %928 = tpu.matmul %927, %920, %cst_827 {dimension_numbers = #tpu.dot_dimension_numbers<[1], [0], [0], [1], [0, 0, 1, 1], [], []>} : vector<64x16xbf16>, vector<16x8xbf16>, vector<64x8xf32> -> vector<64x8xf32>
    %929 = arith.addf %918, %928 : vector<64x8xf32>
    %c3_828 = arith.constant 3 : index
    %c1_829 = arith.constant 1 : index
    %c0_830 = arith.constant 0 : index
    %c0_831 = arith.constant 0 : index
    %930 = vector.load %arg10[%c3_828, %c1_829, %c0_830, %c0_831] : memref<4x4x16x8xbf16, #tpu.memory_space<vmem>>, vector<1x1x16x8xbf16>
    %931 = vector.shape_cast %930 : vector<1x1x16x8xbf16> to vector<16x8xbf16>
    %c3_832 = arith.constant 3 : index
    %c16_833 = arith.constant 16 : index
    %c0_834 = arith.constant 0 : index
    %932 = vector.load %arg16[%c3_832, %c16_833, %c0_834] : memref<4x96x16xf32, #tpu.memory_space<vmem>>, vector<1x64x16xf32>
    %933 = vector.shape_cast %932 : vector<1x64x16xf32> to vector<64x16xf32>
    %934 = arith.truncf %933 : vector<64x16xf32> to vector<64x16xbf16>
    %cst_835 = arith.constant dense<0.000000e+00> : vector<64x8xf32>
    %935 = tpu.matmul %934, %931, %cst_835 {dimension_numbers = #tpu.dot_dimension_numbers<[1], [0], [0], [1], [0, 0, 1, 1], [], []>} : vector<64x16xbf16>, vector<16x8xbf16>, vector<64x8xf32> -> vector<64x8xf32>
    %936 = arith.addf %929, %935 : vector<64x8xf32>
    %c3_836 = arith.constant 3 : index
    %c2_837 = arith.constant 2 : index
    %c0_838 = arith.constant 0 : index
    %c0_839 = arith.constant 0 : index
    %937 = vector.load %arg10[%c3_836, %c2_837, %c0_838, %c0_839] : memref<4x4x16x8xbf16, #tpu.memory_space<vmem>>, vector<1x1x16x8xbf16>
    %938 = vector.shape_cast %937 : vector<1x1x16x8xbf16> to vector<16x8xbf16>
    %c0_840 = arith.constant 0 : index
    %c17_841 = arith.constant 17 : index
    %c0_842 = arith.constant 0 : index
    %939 = vector.load %arg16[%c0_840, %c17_841, %c0_842] : memref<4x96x16xf32, #tpu.memory_space<vmem>>, vector<1x64x16xf32>
    %940 = vector.shape_cast %939 : vector<1x64x16xf32> to vector<64x16xf32>
    %cst_843 = arith.constant 0.000000e+00 : f32
    %941 = vector.shape_cast %26 : vector<64x1xi1> to vector<64x1xi1>
    %942 = vector.broadcast %941 : vector<64x1xi1> to vector<64x16xi1>
    %943 = vector.broadcast %cst_843 : f32 to vector<64x16xf32>
    %944 = arith.select %942, %940, %943 : vector<64x16xi1>, vector<64x16xf32>
    %945 = arith.truncf %944 : vector<64x16xf32> to vector<64x16xbf16>
    %cst_844 = arith.constant dense<0.000000e+00> : vector<64x8xf32>
    %946 = tpu.matmul %945, %938, %cst_844 {dimension_numbers = #tpu.dot_dimension_numbers<[1], [0], [0], [1], [0, 0, 1, 1], [], []>} : vector<64x16xbf16>, vector<16x8xbf16>, vector<64x8xf32> -> vector<64x8xf32>
    %947 = arith.addf %936, %946 : vector<64x8xf32>
    %c3_845 = arith.constant 3 : index
    %c3_846 = arith.constant 3 : index
    %c0_847 = arith.constant 0 : index
    %c0_848 = arith.constant 0 : index
    %948 = vector.load %arg10[%c3_845, %c3_846, %c0_847, %c0_848] : memref<4x4x16x8xbf16, #tpu.memory_space<vmem>>, vector<1x1x16x8xbf16>
    %949 = vector.shape_cast %948 : vector<1x1x16x8xbf16> to vector<16x8xbf16>
    %c1_849 = arith.constant 1 : index
    %c16_850 = arith.constant 16 : index
    %c0_851 = arith.constant 0 : index
    %950 = vector.load %arg16[%c1_849, %c16_850, %c0_851] : memref<4x96x16xf32, #tpu.memory_space<vmem>>, vector<1x64x16xf32>
    %951 = vector.shape_cast %950 : vector<1x64x16xf32> to vector<64x16xf32>
    %952 = arith.truncf %951 : vector<64x16xf32> to vector<64x16xbf16>
    %cst_852 = arith.constant dense<0.000000e+00> : vector<64x8xf32>
    %953 = tpu.matmul %952, %949, %cst_852 {dimension_numbers = #tpu.dot_dimension_numbers<[1], [0], [0], [1], [0, 0, 1, 1], [], []>} : vector<64x16xbf16>, vector<16x8xbf16>, vector<64x8xf32> -> vector<64x8xf32>
    %954 = arith.addf %947, %953 : vector<64x8xf32>
    %c0_853 = arith.constant 0 : index
    %c0_854 = arith.constant 0 : index
    %955 = vector.load %arg11[%c0_853, %c0_854] : memref<1x8xf32, #tpu.memory_space<vmem>>, vector<1x8xf32>
    %956 = vector.broadcast %955 : vector<1x8xf32> to vector<64x8xf32>
    %957 = arith.addf %954, %956 : vector<64x8xf32>
    %c0_855 = arith.constant 0 : index
    %c7_856 = arith.constant 7 : index
    %c0_857 = arith.constant 0 : index
    %c0_858 = arith.constant 0 : index
    %958 = vector.load %arg12[%c0_855, %c7_856, %c0_857, %c0_858] : memref<1x16x64x8xf32, #tpu.memory_space<vmem>>, vector<1x1x64x8xf32>
    %959 = vector.shape_cast %958 : vector<1x1x64x8xf32> to vector<64x8xf32>
    %960 = vector.shape_cast %957 : vector<64x8xf32> to vector<1x1x64x8xf32>
    tpu.vector_store %arg12[%c0_855, %c7_856, %c0_857, %c0_858], %960 {strides = array<i32>} : memref<1x16x64x8xf32, #tpu.memory_space<vmem>>, vector<1x1x64x8xf32>,
    %cst_859 = arith.constant 0.000000e+00 : f32
    %961 = vector.broadcast %cst_859 : f32 to vector<64x8xf32>
    %c2_860 = arith.constant 2 : index
    %c0_861 = arith.constant 0 : index
    %c0_862 = arith.constant 0 : index
    %c0_863 = arith.constant 0 : index
    %962 = vector.load %arg10[%c2_860, %c0_861, %c0_862, %c0_863] : memref<4x4x16x8xbf16, #tpu.memory_space<vmem>>, vector<1x1x16x8xbf16>
    %963 = vector.shape_cast %962 : vector<1x1x16x8xbf16> to vector<16x8xbf16>
    %c0_864 = arith.constant 0 : index
    %c24_865 = arith.constant 24 : index
    %c0_866 = arith.constant 0 : index
    %964 = vector.load %arg16[%c0_864, %c24_865, %c0_866] : memref<4x96x16xf32, #tpu.memory_space<vmem>>, vector<1x64x16xf32>
    %965 = vector.shape_cast %964 : vector<1x64x16xf32> to vector<64x16xf32>
    %966 = arith.truncf %965 : vector<64x16xf32> to vector<64x16xbf16>
    %cst_867 = arith.constant dense<0.000000e+00> : vector<64x8xf32>
    %967 = tpu.matmul %966, %963, %cst_867 {dimension_numbers = #tpu.dot_dimension_numbers<[1], [0], [0], [1], [0, 0, 1, 1], [], []>} : vector<64x16xbf16>, vector<16x8xbf16>, vector<64x8xf32> -> vector<64x8xf32>
    %968 = arith.addf %961, %967 : vector<64x8xf32>
    %c2_868 = arith.constant 2 : index
    %c1_869 = arith.constant 1 : index
    %c0_870 = arith.constant 0 : index
    %c0_871 = arith.constant 0 : index
    %969 = vector.load %arg10[%c2_868, %c1_869, %c0_870, %c0_871] : memref<4x4x16x8xbf16, #tpu.memory_space<vmem>>, vector<1x1x16x8xbf16>
    %970 = vector.shape_cast %969 : vector<1x1x16x8xbf16> to vector<16x8xbf16>
    %c1_872 = arith.constant 1 : index
    %c23_873 = arith.constant 23 : index
    %c0_874 = arith.constant 0 : index
    %971 = vector.load %arg16[%c1_872, %c23_873, %c0_874] : memref<4x96x16xf32, #tpu.memory_space<vmem>>, vector<1x64x16xf32>
    %972 = vector.shape_cast %971 : vector<1x64x16xf32> to vector<64x16xf32>
    %cst_875 = arith.constant 0.000000e+00 : f32
    %973 = vector.shape_cast %24 : vector<64x1xi1> to vector<64x1xi1>
    %974 = vector.broadcast %973 : vector<64x1xi1> to vector<64x16xi1>
    %975 = vector.broadcast %cst_875 : f32 to vector<64x16xf32>
    %976 = arith.select %974, %972, %975 : vector<64x16xi1>, vector<64x16xf32>
    %977 = arith.truncf %976 : vector<64x16xf32> to vector<64x16xbf16>
    %cst_876 = arith.constant dense<0.000000e+00> : vector<64x8xf32>
    %978 = tpu.matmul %977, %970, %cst_876 {dimension_numbers = #tpu.dot_dimension_numbers<[1], [0], [0], [1], [0, 0, 1, 1], [], []>} : vector<64x16xbf16>, vector<16x8xbf16>, vector<64x8xf32> -> vector<64x8xf32>
    %979 = arith.addf %968, %978 : vector<64x8xf32>
    %c2_877 = arith.constant 2 : index
    %c2_878 = arith.constant 2 : index
    %c0_879 = arith.constant 0 : index
    %c0_880 = arith.constant 0 : index
    %980 = vector.load %arg10[%c2_877, %c2_878, %c0_879, %c0_880] : memref<4x4x16x8xbf16, #tpu.memory_space<vmem>>, vector<1x1x16x8xbf16>
    %981 = vector.shape_cast %980 : vector<1x1x16x8xbf16> to vector<16x8xbf16>
    %c2_881 = arith.constant 2 : index
    %c16_882 = arith.constant 16 : index
    %c0_883 = arith.constant 0 : index
    %982 = vector.load %arg16[%c2_881, %c16_882, %c0_883] : memref<4x96x16xf32, #tpu.memory_space<vmem>>, vector<1x64x16xf32>
    %983 = vector.shape_cast %982 : vector<1x64x16xf32> to vector<64x16xf32>
    %984 = arith.truncf %983 : vector<64x16xf32> to vector<64x16xbf16>
    %cst_884 = arith.constant dense<0.000000e+00> : vector<64x8xf32>
    %985 = tpu.matmul %984, %981, %cst_884 {dimension_numbers = #tpu.dot_dimension_numbers<[1], [0], [0], [1], [0, 0, 1, 1], [], []>} : vector<64x16xbf16>, vector<16x8xbf16>, vector<64x8xf32> -> vector<64x8xf32>
    %986 = arith.addf %979, %985 : vector<64x8xf32>
    %c2_885 = arith.constant 2 : index
    %c3_886 = arith.constant 3 : index
    %c0_887 = arith.constant 0 : index
    %c0_888 = arith.constant 0 : index
    %987 = vector.load %arg10[%c2_885, %c3_886, %c0_887, %c0_888] : memref<4x4x16x8xbf16, #tpu.memory_space<vmem>>, vector<1x1x16x8xbf16>
    %988 = vector.shape_cast %987 : vector<1x1x16x8xbf16> to vector<16x8xbf16>
    %c3_889 = arith.constant 3 : index
    %c15_890 = arith.constant 15 : index
    %c0_891 = arith.constant 0 : index
    %989 = vector.load %arg16[%c3_889, %c15_890, %c0_891] : memref<4x96x16xf32, #tpu.memory_space<vmem>>, vector<1x64x16xf32>
    %990 = vector.shape_cast %989 : vector<1x64x16xf32> to vector<64x16xf32>
    %cst_892 = arith.constant 0.000000e+00 : f32
    %991 = vector.shape_cast %24 : vector<64x1xi1> to vector<64x1xi1>
    %992 = vector.broadcast %991 : vector<64x1xi1> to vector<64x16xi1>
    %993 = vector.broadcast %cst_892 : f32 to vector<64x16xf32>
    %994 = arith.select %992, %990, %993 : vector<64x16xi1>, vector<64x16xf32>
    %995 = arith.truncf %994 : vector<64x16xf32> to vector<64x16xbf16>
    %cst_893 = arith.constant dense<0.000000e+00> : vector<64x8xf32>
    %996 = tpu.matmul %995, %988, %cst_893 {dimension_numbers = #tpu.dot_dimension_numbers<[1], [0], [0], [1], [0, 0, 1, 1], [], []>} : vector<64x16xbf16>, vector<16x8xbf16>, vector<64x8xf32> -> vector<64x8xf32>
    %997 = arith.addf %986, %996 : vector<64x8xf32>
    %c0_894 = arith.constant 0 : index
    %c0_895 = arith.constant 0 : index
    %998 = vector.load %arg11[%c0_894, %c0_895] : memref<1x8xf32, #tpu.memory_space<vmem>>, vector<1x8xf32>
    %999 = vector.broadcast %998 : vector<1x8xf32> to vector<64x8xf32>
    %1000 = arith.addf %997, %999 : vector<64x8xf32>
    %c0_896 = arith.constant 0 : index
    %c12 = arith.constant 12 : index
    %c0_897 = arith.constant 0 : index
    %c0_898 = arith.constant 0 : index
    %1001 = vector.load %arg12[%c0_896, %c12, %c0_897, %c0_898] : memref<1x16x64x8xf32, #tpu.memory_space<vmem>>, vector<1x1x64x8xf32>
    %1002 = vector.shape_cast %1001 : vector<1x1x64x8xf32> to vector<64x8xf32>
    %1003 = vector.shape_cast %1000 : vector<64x8xf32> to vector<1x1x64x8xf32>
    tpu.vector_store %arg12[%c0_896, %c12, %c0_897, %c0_898], %1003 {strides = array<i32>} : memref<1x16x64x8xf32, #tpu.memory_space<vmem>>, vector<1x1x64x8xf32>,
    %cst_899 = arith.constant 0.000000e+00 : f32
    %1004 = vector.broadcast %cst_899 : f32 to vector<64x8xf32>
    %c2_900 = arith.constant 2 : index
    %c0_901 = arith.constant 0 : index
    %c0_902 = arith.constant 0 : index
    %c0_903 = arith.constant 0 : index
    %1005 = vector.load %arg10[%c2_900, %c0_901, %c0_902, %c0_903] : memref<4x4x16x8xbf16, #tpu.memory_space<vmem>>, vector<1x1x16x8xbf16>
    %1006 = vector.shape_cast %1005 : vector<1x1x16x8xbf16> to vector<16x8xbf16>
    %c1_904 = arith.constant 1 : index
    %c24_905 = arith.constant 24 : index
    %c0_906 = arith.constant 0 : index
    %1007 = vector.load %arg16[%c1_904, %c24_905, %c0_906] : memref<4x96x16xf32, #tpu.memory_space<vmem>>, vector<1x64x16xf32>
    %1008 = vector.shape_cast %1007 : vector<1x64x16xf32> to vector<64x16xf32>
    %1009 = arith.truncf %1008 : vector<64x16xf32> to vector<64x16xbf16>
    %cst_907 = arith.constant dense<0.000000e+00> : vector<64x8xf32>
    %1010 = tpu.matmul %1009, %1006, %cst_907 {dimension_numbers = #tpu.dot_dimension_numbers<[1], [0], [0], [1], [0, 0, 1, 1], [], []>} : vector<64x16xbf16>, vector<16x8xbf16>, vector<64x8xf32> -> vector<64x8xf32>
    %1011 = arith.addf %1004, %1010 : vector<64x8xf32>
    %c2_908 = arith.constant 2 : index
    %c1_909 = arith.constant 1 : index
    %c0_910 = arith.constant 0 : index
    %c0_911 = arith.constant 0 : index
    %1012 = vector.load %arg10[%c2_908, %c1_909, %c0_910, %c0_911] : memref<4x4x16x8xbf16, #tpu.memory_space<vmem>>, vector<1x1x16x8xbf16>
    %1013 = vector.shape_cast %1012 : vector<1x1x16x8xbf16> to vector<16x8xbf16>
    %c0_912 = arith.constant 0 : index
    %c24_913 = arith.constant 24 : index
    %c0_914 = arith.constant 0 : index
    %1014 = vector.load %arg16[%c0_912, %c24_913, %c0_914] : memref<4x96x16xf32, #tpu.memory_space<vmem>>, vector<1x64x16xf32>
    %1015 = vector.shape_cast %1014 : vector<1x64x16xf32> to vector<64x16xf32>
    %1016 = arith.truncf %1015 : vector<64x16xf32> to vector<64x16xbf16>
    %cst_915 = arith.constant dense<0.000000e+00> : vector<64x8xf32>
    %1017 = tpu.matmul %1016, %1013, %cst_915 {dimension_numbers = #tpu.dot_dimension_numbers<[1], [0], [0], [1], [0, 0, 1, 1], [], []>} : vector<64x16xbf16>, vector<16x8xbf16>, vector<64x8xf32> -> vector<64x8xf32>
    %1018 = arith.addf %1011, %1017 : vector<64x8xf32>
    %c2_916 = arith.constant 2 : index
    %c2_917 = arith.constant 2 : index
    %c0_918 = arith.constant 0 : index
    %c0_919 = arith.constant 0 : index
    %1019 = vector.load %arg10[%c2_916, %c2_917, %c0_918, %c0_919] : memref<4x4x16x8xbf16, #tpu.memory_space<vmem>>, vector<1x1x16x8xbf16>
    %1020 = vector.shape_cast %1019 : vector<1x1x16x8xbf16> to vector<16x8xbf16>
    %c3_920 = arith.constant 3 : index
    %c16_921 = arith.constant 16 : index
    %c0_922 = arith.constant 0 : index
    %1021 = vector.load %arg16[%c3_920, %c16_921, %c0_922] : memref<4x96x16xf32, #tpu.memory_space<vmem>>, vector<1x64x16xf32>
    %1022 = vector.shape_cast %1021 : vector<1x64x16xf32> to vector<64x16xf32>
    %1023 = arith.truncf %1022 : vector<64x16xf32> to vector<64x16xbf16>
    %cst_923 = arith.constant dense<0.000000e+00> : vector<64x8xf32>
    %1024 = tpu.matmul %1023, %1020, %cst_923 {dimension_numbers = #tpu.dot_dimension_numbers<[1], [0], [0], [1], [0, 0, 1, 1], [], []>} : vector<64x16xbf16>, vector<16x8xbf16>, vector<64x8xf32> -> vector<64x8xf32>
    %1025 = arith.addf %1018, %1024 : vector<64x8xf32>
    %c2_924 = arith.constant 2 : index
    %c3_925 = arith.constant 3 : index
    %c0_926 = arith.constant 0 : index
    %c0_927 = arith.constant 0 : index
    %1026 = vector.load %arg10[%c2_924, %c3_925, %c0_926, %c0_927] : memref<4x4x16x8xbf16, #tpu.memory_space<vmem>>, vector<1x1x16x8xbf16>
    %1027 = vector.shape_cast %1026 : vector<1x1x16x8xbf16> to vector<16x8xbf16>
    %c2_928 = arith.constant 2 : index
    %c16_929 = arith.constant 16 : index
    %c0_930 = arith.constant 0 : index
    %1028 = vector.load %arg16[%c2_928, %c16_929, %c0_930] : memref<4x96x16xf32, #tpu.memory_space<vmem>>, vector<1x64x16xf32>
    %1029 = vector.shape_cast %1028 : vector<1x64x16xf32> to vector<64x16xf32>
    %1030 = arith.truncf %1029 : vector<64x16xf32> to vector<64x16xbf16>
    %cst_931 = arith.constant dense<0.000000e+00> : vector<64x8xf32>
    %1031 = tpu.matmul %1030, %1027, %cst_931 {dimension_numbers = #tpu.dot_dimension_numbers<[1], [0], [0], [1], [0, 0, 1, 1], [], []>} : vector<64x16xbf16>, vector<16x8xbf16>, vector<64x8xf32> -> vector<64x8xf32>
    %1032 = arith.addf %1025, %1031 : vector<64x8xf32>
    %c0_932 = arith.constant 0 : index
    %c0_933 = arith.constant 0 : index
    %1033 = vector.load %arg11[%c0_932, %c0_933] : memref<1x8xf32, #tpu.memory_space<vmem>>, vector<1x8xf32>
    %1034 = vector.broadcast %1033 : vector<1x8xf32> to vector<64x8xf32>
    %1035 = arith.addf %1032, %1034 : vector<64x8xf32>
    %c0_934 = arith.constant 0 : index
    %c14 = arith.constant 14 : index
    %c0_935 = arith.constant 0 : index
    %c0_936 = arith.constant 0 : index
    %1036 = vector.load %arg12[%c0_934, %c14, %c0_935, %c0_936] : memref<1x16x64x8xf32, #tpu.memory_space<vmem>>, vector<1x1x64x8xf32>
    %1037 = vector.shape_cast %1036 : vector<1x1x64x8xf32> to vector<64x8xf32>
    %1038 = vector.shape_cast %1035 : vector<64x8xf32> to vector<1x1x64x8xf32>
    tpu.vector_store %arg12[%c0_934, %c14, %c0_935, %c0_936], %1038 {strides = array<i32>} : memref<1x16x64x8xf32, #tpu.memory_space<vmem>>, vector<1x1x64x8xf32>,
    %cst_937 = arith.constant 0.000000e+00 : f32
    %1039 = vector.broadcast %cst_937 : f32 to vector<64x8xf32>
    %c3_938 = arith.constant 3 : index
    %c0_939 = arith.constant 0 : index
    %c0_940 = arith.constant 0 : index
    %c0_941 = arith.constant 0 : index
    %1040 = vector.load %arg10[%c3_938, %c0_939, %c0_940, %c0_941] : memref<4x4x16x8xbf16, #tpu.memory_space<vmem>>, vector<1x1x16x8xbf16>
    %1041 = vector.shape_cast %1040 : vector<1x1x16x8xbf16> to vector<16x8xbf16>
    %c1_942 = arith.constant 1 : index
    %c24_943 = arith.constant 24 : index
    %c0_944 = arith.constant 0 : index
    %1042 = vector.load %arg16[%c1_942, %c24_943, %c0_944] : memref<4x96x16xf32, #tpu.memory_space<vmem>>, vector<1x64x16xf32>
    %1043 = vector.shape_cast %1042 : vector<1x64x16xf32> to vector<64x16xf32>
    %1044 = arith.truncf %1043 : vector<64x16xf32> to vector<64x16xbf16>
    %cst_945 = arith.constant dense<0.000000e+00> : vector<64x8xf32>
    %1045 = tpu.matmul %1044, %1041, %cst_945 {dimension_numbers = #tpu.dot_dimension_numbers<[1], [0], [0], [1], [0, 0, 1, 1], [], []>} : vector<64x16xbf16>, vector<16x8xbf16>, vector<64x8xf32> -> vector<64x8xf32>
    %1046 = arith.addf %1039, %1045 : vector<64x8xf32>
    %c3_946 = arith.constant 3 : index
    %c1_947 = arith.constant 1 : index
    %c0_948 = arith.constant 0 : index
    %c0_949 = arith.constant 0 : index
    %1047 = vector.load %arg10[%c3_946, %c1_947, %c0_948, %c0_949] : memref<4x4x16x8xbf16, #tpu.memory_space<vmem>>, vector<1x1x16x8xbf16>
    %1048 = vector.shape_cast %1047 : vector<1x1x16x8xbf16> to vector<16x8xbf16>
    %c0_950 = arith.constant 0 : index
    %c24_951 = arith.constant 24 : index
    %c0_952 = arith.constant 0 : index
    %1049 = vector.load %arg16[%c0_950, %c24_951, %c0_952] : memref<4x96x16xf32, #tpu.memory_space<vmem>>, vector<1x64x16xf32>
    %1050 = vector.shape_cast %1049 : vector<1x64x16xf32> to vector<64x16xf32>
    %1051 = arith.truncf %1050 : vector<64x16xf32> to vector<64x16xbf16>
    %cst_953 = arith.constant dense<0.000000e+00> : vector<64x8xf32>
    %1052 = tpu.matmul %1051, %1048, %cst_953 {dimension_numbers = #tpu.dot_dimension_numbers<[1], [0], [0], [1], [0, 0, 1, 1], [], []>} : vector<64x16xbf16>, vector<16x8xbf16>, vector<64x8xf32> -> vector<64x8xf32>
    %1053 = arith.addf %1046, %1052 : vector<64x8xf32>
    %c3_954 = arith.constant 3 : index
    %c2_955 = arith.constant 2 : index
    %c0_956 = arith.constant 0 : index
    %c0_957 = arith.constant 0 : index
    %1054 = vector.load %arg10[%c3_954, %c2_955, %c0_956, %c0_957] : memref<4x4x16x8xbf16, #tpu.memory_space<vmem>>, vector<1x1x16x8xbf16>
    %1055 = vector.shape_cast %1054 : vector<1x1x16x8xbf16> to vector<16x8xbf16>
    %c3_958 = arith.constant 3 : index
    %c16_959 = arith.constant 16 : index
    %c0_960 = arith.constant 0 : index
    %1056 = vector.load %arg16[%c3_958, %c16_959, %c0_960] : memref<4x96x16xf32, #tpu.memory_space<vmem>>, vector<1x64x16xf32>
    %1057 = vector.shape_cast %1056 : vector<1x64x16xf32> to vector<64x16xf32>
    %1058 = arith.truncf %1057 : vector<64x16xf32> to vector<64x16xbf16>
    %cst_961 = arith.constant dense<0.000000e+00> : vector<64x8xf32>
    %1059 = tpu.matmul %1058, %1055, %cst_961 {dimension_numbers = #tpu.dot_dimension_numbers<[1], [0], [0], [1], [0, 0, 1, 1], [], []>} : vector<64x16xbf16>, vector<16x8xbf16>, vector<64x8xf32> -> vector<64x8xf32>
    %1060 = arith.addf %1053, %1059 : vector<64x8xf32>
    %c3_962 = arith.constant 3 : index
    %c3_963 = arith.constant 3 : index
    %c0_964 = arith.constant 0 : index
    %c0_965 = arith.constant 0 : index
    %1061 = vector.load %arg10[%c3_962, %c3_963, %c0_964, %c0_965] : memref<4x4x16x8xbf16, #tpu.memory_space<vmem>>, vector<1x1x16x8xbf16>
    %1062 = vector.shape_cast %1061 : vector<1x1x16x8xbf16> to vector<16x8xbf16>
    %c2_966 = arith.constant 2 : index
    %c16_967 = arith.constant 16 : index
    %c0_968 = arith.constant 0 : index
    %1063 = vector.load %arg16[%c2_966, %c16_967, %c0_968] : memref<4x96x16xf32, #tpu.memory_space<vmem>>, vector<1x64x16xf32>
    %1064 = vector.shape_cast %1063 : vector<1x64x16xf32> to vector<64x16xf32>
    %1065 = arith.truncf %1064 : vector<64x16xf32> to vector<64x16xbf16>
    %cst_969 = arith.constant dense<0.000000e+00> : vector<64x8xf32>
    %1066 = tpu.matmul %1065, %1062, %cst_969 {dimension_numbers = #tpu.dot_dimension_numbers<[1], [0], [0], [1], [0, 0, 1, 1], [], []>} : vector<64x16xbf16>, vector<16x8xbf16>, vector<64x8xf32> -> vector<64x8xf32>
    %1067 = arith.addf %1060, %1066 : vector<64x8xf32>
    %c0_970 = arith.constant 0 : index
    %c0_971 = arith.constant 0 : index
    %1068 = vector.load %arg11[%c0_970, %c0_971] : memref<1x8xf32, #tpu.memory_space<vmem>>, vector<1x8xf32>
    %1069 = vector.broadcast %1068 : vector<1x8xf32> to vector<64x8xf32>
    %1070 = arith.addf %1067, %1069 : vector<64x8xf32>
    %c0_972 = arith.constant 0 : index
    %c13 = arith.constant 13 : index
    %c0_973 = arith.constant 0 : index
    %c0_974 = arith.constant 0 : index
    %1071 = vector.load %arg12[%c0_972, %c13, %c0_973, %c0_974] : memref<1x16x64x8xf32, #tpu.memory_space<vmem>>, vector<1x1x64x8xf32>
    %1072 = vector.shape_cast %1071 : vector<1x1x64x8xf32> to vector<64x8xf32>
    %1073 = vector.shape_cast %1070 : vector<64x8xf32> to vector<1x1x64x8xf32>
    tpu.vector_store %arg12[%c0_972, %c13, %c0_973, %c0_974], %1073 {strides = array<i32>} : memref<1x16x64x8xf32, #tpu.memory_space<vmem>>, vector<1x1x64x8xf32>,
    %cst_975 = arith.constant 0.000000e+00 : f32
    %1074 = vector.broadcast %cst_975 : f32 to vector<64x8xf32>
    %c3_976 = arith.constant 3 : index
    %c0_977 = arith.constant 0 : index
    %c0_978 = arith.constant 0 : index
    %c0_979 = arith.constant 0 : index
    %1075 = vector.load %arg10[%c3_976, %c0_977, %c0_978, %c0_979] : memref<4x4x16x8xbf16, #tpu.memory_space<vmem>>, vector<1x1x16x8xbf16>
    %1076 = vector.shape_cast %1075 : vector<1x1x16x8xbf16> to vector<16x8xbf16>
    %c0_980 = arith.constant 0 : index
    %c25_981 = arith.constant 25 : index
    %c0_982 = arith.constant 0 : index
    %1077 = vector.load %arg16[%c0_980, %c25_981, %c0_982] : memref<4x96x16xf32, #tpu.memory_space<vmem>>, vector<1x64x16xf32>
    %1078 = vector.shape_cast %1077 : vector<1x64x16xf32> to vector<64x16xf32>
    %cst_983 = arith.constant 0.000000e+00 : f32
    %1079 = vector.shape_cast %26 : vector<64x1xi1> to vector<64x1xi1>
    %1080 = vector.broadcast %1079 : vector<64x1xi1> to vector<64x16xi1>
    %1081 = vector.broadcast %cst_983 : f32 to vector<64x16xf32>
    %1082 = arith.select %1080, %1078, %1081 : vector<64x16xi1>, vector<64x16xf32>
    %1083 = arith.truncf %1082 : vector<64x16xf32> to vector<64x16xbf16>
    %cst_984 = arith.constant dense<0.000000e+00> : vector<64x8xf32>
    %1084 = tpu.matmul %1083, %1076, %cst_984 {dimension_numbers = #tpu.dot_dimension_numbers<[1], [0], [0], [1], [0, 0, 1, 1], [], []>} : vector<64x16xbf16>, vector<16x8xbf16>, vector<64x8xf32> -> vector<64x8xf32>
    %1085 = arith.addf %1074, %1084 : vector<64x8xf32>
    %c3_985 = arith.constant 3 : index
    %c1_986 = arith.constant 1 : index
    %c0_987 = arith.constant 0 : index
    %c0_988 = arith.constant 0 : index
    %1086 = vector.load %arg10[%c3_985, %c1_986, %c0_987, %c0_988] : memref<4x4x16x8xbf16, #tpu.memory_space<vmem>>, vector<1x1x16x8xbf16>
    %1087 = vector.shape_cast %1086 : vector<1x1x16x8xbf16> to vector<16x8xbf16>
    %c1_989 = arith.constant 1 : index
    %c24_990 = arith.constant 24 : index
    %c0_991 = arith.constant 0 : index
    %1088 = vector.load %arg16[%c1_989, %c24_990, %c0_991] : memref<4x96x16xf32, #tpu.memory_space<vmem>>, vector<1x64x16xf32>
    %1089 = vector.shape_cast %1088 : vector<1x64x16xf32> to vector<64x16xf32>
    %1090 = arith.truncf %1089 : vector<64x16xf32> to vector<64x16xbf16>
    %cst_992 = arith.constant dense<0.000000e+00> : vector<64x8xf32>
    %1091 = tpu.matmul %1090, %1087, %cst_992 {dimension_numbers = #tpu.dot_dimension_numbers<[1], [0], [0], [1], [0, 0, 1, 1], [], []>} : vector<64x16xbf16>, vector<16x8xbf16>, vector<64x8xf32> -> vector<64x8xf32>
    %1092 = arith.addf %1085, %1091 : vector<64x8xf32>
    %c3_993 = arith.constant 3 : index
    %c2_994 = arith.constant 2 : index
    %c0_995 = arith.constant 0 : index
    %c0_996 = arith.constant 0 : index
    %1093 = vector.load %arg10[%c3_993, %c2_994, %c0_995, %c0_996] : memref<4x4x16x8xbf16, #tpu.memory_space<vmem>>, vector<1x1x16x8xbf16>
    %1094 = vector.shape_cast %1093 : vector<1x1x16x8xbf16> to vector<16x8xbf16>
    %c2_997 = arith.constant 2 : index
    %c17_998 = arith.constant 17 : index
    %c0_999 = arith.constant 0 : index
    %1095 = vector.load %arg16[%c2_997, %c17_998, %c0_999] : memref<4x96x16xf32, #tpu.memory_space<vmem>>, vector<1x64x16xf32>
    %1096 = vector.shape_cast %1095 : vector<1x64x16xf32> to vector<64x16xf32>
    %cst_1000 = arith.constant 0.000000e+00 : f32
    %1097 = vector.shape_cast %26 : vector<64x1xi1> to vector<64x1xi1>
    %1098 = vector.broadcast %1097 : vector<64x1xi1> to vector<64x16xi1>
    %1099 = vector.broadcast %cst_1000 : f32 to vector<64x16xf32>
    %1100 = arith.select %1098, %1096, %1099 : vector<64x16xi1>, vector<64x16xf32>
    %1101 = arith.truncf %1100 : vector<64x16xf32> to vector<64x16xbf16>
    %cst_1001 = arith.constant dense<0.000000e+00> : vector<64x8xf32>
    %1102 = tpu.matmul %1101, %1094, %cst_1001 {dimension_numbers = #tpu.dot_dimension_numbers<[1], [0], [0], [1], [0, 0, 1, 1], [], []>} : vector<64x16xbf16>, vector<16x8xbf16>, vector<64x8xf32> -> vector<64x8xf32>
    %1103 = arith.addf %1092, %1102 : vector<64x8xf32>
    %c3_1002 = arith.constant 3 : index
    %c3_1003 = arith.constant 3 : index
    %c0_1004 = arith.constant 0 : index
    %c0_1005 = arith.constant 0 : index
    %1104 = vector.load %arg10[%c3_1002, %c3_1003, %c0_1004, %c0_1005] : memref<4x4x16x8xbf16, #tpu.memory_space<vmem>>, vector<1x1x16x8xbf16>
    %1105 = vector.shape_cast %1104 : vector<1x1x16x8xbf16> to vector<16x8xbf16>
    %c3_1006 = arith.constant 3 : index
    %c16_1007 = arith.constant 16 : index
    %c0_1008 = arith.constant 0 : index
    %1106 = vector.load %arg16[%c3_1006, %c16_1007, %c0_1008] : memref<4x96x16xf32, #tpu.memory_space<vmem>>, vector<1x64x16xf32>
    %1107 = vector.shape_cast %1106 : vector<1x64x16xf32> to vector<64x16xf32>
    %1108 = arith.truncf %1107 : vector<64x16xf32> to vector<64x16xbf16>
    %cst_1009 = arith.constant dense<0.000000e+00> : vector<64x8xf32>
    %1109 = tpu.matmul %1108, %1105, %cst_1009 {dimension_numbers = #tpu.dot_dimension_numbers<[1], [0], [0], [1], [0, 0, 1, 1], [], []>} : vector<64x16xbf16>, vector<16x8xbf16>, vector<64x8xf32> -> vector<64x8xf32>
    %1110 = arith.addf %1103, %1109 : vector<64x8xf32>
    %c0_1010 = arith.constant 0 : index
    %c0_1011 = arith.constant 0 : index
    %1111 = vector.load %arg11[%c0_1010, %c0_1011] : memref<1x8xf32, #tpu.memory_space<vmem>>, vector<1x8xf32>
    %1112 = vector.broadcast %1111 : vector<1x8xf32> to vector<64x8xf32>
    %1113 = arith.addf %1110, %1112 : vector<64x8xf32>
    %c0_1012 = arith.constant 0 : index
    %c15_1013 = arith.constant 15 : index
    %c0_1014 = arith.constant 0 : index
    %c0_1015 = arith.constant 0 : index
    %1114 = vector.load %arg12[%c0_1012, %c15_1013, %c0_1014, %c0_1015] : memref<1x16x64x8xf32, #tpu.memory_space<vmem>>, vector<1x1x64x8xf32>
    %1115 = vector.shape_cast %1114 : vector<1x1x64x8xf32> to vector<64x8xf32>
    %1116 = vector.shape_cast %1113 : vector<64x8xf32> to vector<1x1x64x8xf32>
    tpu.vector_store %arg12[%c0_1012, %c15_1013, %c0_1014, %c0_1015], %1116 {strides = array<i32>} : memref<1x16x64x8xf32, #tpu.memory_space<vmem>>, vector<1x1x64x8xf32>,
    return
  }
  func.func @transform_0(%arg0: i32) -> (i32, i32) {
    %c0_i32 = arith.constant 0 : i32
    %c0_i32_0 = arith.constant 0 : i32
    %c0_i32_1 = arith.constant 0 : i32
    return %c0_i32, %c0_i32_0 : i32, i32
  }
  func.func @transform_1(%arg0: i32) -> (i32, i32, i32) {
    %c0_i32 = arith.constant 0 : i32
    %c0_i32_0 = arith.constant 0 : i32
    %c0_i32_1 = arith.constant 0 : i32
    %c0_i32_2 = arith.constant 0 : i32
    return %c0_i32, %c0_i32_0, %c0_i32_1 : i32, i32, i32
  }
  func.func @transform_2(%arg0: i32) -> (i32, i32) {
    %c0_i32 = arith.constant 0 : i32
    %c0_i32_0 = arith.constant 0 : i32
    %c0_i32_1 = arith.constant 0 : i32
    return %c0_i32, %c0_i32_0 : i32, i32
  }
  func.func @transform_3(%arg0: i32) -> (i32, i32, i32) {
    %c0_i32 = arith.constant 0 : i32
    %c0_i32_0 = arith.constant 0 : i32
    %c0_i32_1 = arith.constant 0 : i32
    %c0_i32_2 = arith.constant 0 : i32
    return %c0_i32, %c0_i32_0, %c0_i32_1 : i32, i32, i32
  }
  func.func @transform_4(%arg0: i32) -> (i32, i32) {
    %c0_i32 = arith.constant 0 : i32
    %c0_i32_0 = arith.constant 0 : i32
    %c0_i32_1 = arith.constant 0 : i32
    return %c0_i32, %c0_i32_0 : i32, i32
  }
  func.func @transform_5(%arg0: i32) -> (i32, i32, i32) {
    %c0_i32 = arith.constant 0 : i32
    %c0_i32_0 = arith.constant 0 : i32
    %c0_i32_1 = arith.constant 0 : i32
    %c0_i32_2 = arith.constant 0 : i32
    return %c0_i32, %c0_i32_0, %c0_i32_1 : i32, i32, i32
  }
  func.func @transform_6(%arg0: i32) -> (i32, i32) {
    %c0_i32 = arith.constant 0 : i32
    %c0_i32_0 = arith.constant 0 : i32
    %c0_i32_1 = arith.constant 0 : i32
    return %c0_i32, %c0_i32_0 : i32, i32
  }
  func.func @transform_7(%arg0: i32) -> (i32, i32, i32, i32) {
    %c0_i32 = arith.constant 0 : i32
    %c0_i32_0 = arith.constant 0 : i32
    %c0_i32_1 = arith.constant 0 : i32
    %c0_i32_2 = arith.constant 0 : i32
    %c0_i32_3 = arith.constant 0 : i32
    return %c0_i32, %c0_i32_0, %c0_i32_1, %c0_i32_2 : i32, i32, i32, i32
  }
  func.func @transform_8(%arg0: i32) -> (i32, i32) {
    %c0_i32 = arith.constant 0 : i32
    %c0_i32_0 = arith.constant 0 : i32
    %c0_i32_1 = arith.constant 0 : i32
    return %c0_i32, %c0_i32_0 : i32, i32
  }
  func.func @transform_9(%arg0: i32) -> (i32, i32, i32, i32) {
    %c0_i32 = arith.constant 0 : i32
    %c0_i32_0 = arith.constant 0 : i32
    %c0_i32_1 = arith.constant 0 : i32
    %c0_i32_2 = arith.constant 0 : i32
    %c0_i32_3 = arith.constant 0 : i32
    return %c0_i32, %c0_i32_0, %c0_i32_1, %c0_i32_2 : i32, i32, i32, i32
  }
  func.func @transform_10(%arg0: i32) -> (i32, i32) {
    %c0_i32 = arith.constant 0 : i32
    %c0_i32_0 = arith.constant 0 : i32
    %c0_i32_1 = arith.constant 0 : i32
    return %c0_i32, %c0_i32_0 : i32, i32
  }
  func.func @transform_11(%arg0: i32) -> (i32, i32, i32, i32) {
    %c0_i32 = arith.constant 0 : i32
    %c0_i32_0 = arith.constant 0 : i32
    %c0_i32_1 = arith.constant 0 : i32
    %c0_i32_2 = arith.constant 0 : i32
    return %arg0, %c0_i32, %c0_i32_0, %c0_i32_1 : i32, i32, i32, i32
  }
}

</mosaic_0001>

<bundles_post_ra>
// kernel: decoder_forward.1
= control target key start
LH: loop header
LB: loop body
LE: loop exit
PB: predicated region body
PF: predicated region fallthrough
CT: control target
= control target key end

     0   :  { %16 = vsyncpa [#allocation7], 0  ;;  %s10772_s17 = smov 0   ;;  %s15332_s0 = inlined_call_operand.vmem [shape: f32[2,4], index: 0, kind: input, shape index: {}]   ;;  %s15333_s1 = inlined_call_operand.vmem [shape: f32[4,64,4], index: 1, kind: input, shape index: {}]   ;;  %s15334_s2 = inlined_call_operand.vmem [shape: f32[1,4], index: 2, kind: input, shape index: {}]   ;;  %s15335_s3 = inlined_call_operand.vmem [shape: bf16[9,4,32], index: 3, kind: input, shape index: {}]   ;;  %s15336_s4 = inlined_call_operand.vmem [shape: f32[1,32], index: 4, kind: input, shape index: {}]   ;;  %s15337_s5 = inlined_call_operand.vmem [shape: bf16[9,32,8], index: 5, kind: input, shape index: {}]   ;;  %s15338_s6 = inlined_call_operand.vmem [shape: bf16[8,32], index: 6, kind: input, shape index: {}]   ;;  %s15339_s7 = inlined_call_operand.vmem [shape: bf16[4,4,32,16], index: 7, kind: input, shape index: {}]   ;;  %s15340_s8 = inlined_call_operand.vmem [shape: f32[1,16], index: 8, kind: input, shape index: {}]   ;;  %s15341_s9 = inlined_call_operand.vmem [shape: bf16[4,4,16,8], index: 9, kind: input, shape index: {}]   ;;  %s15342_s10 = inlined_call_operand.vmem [shape: f32[1,8], index: 10, kind: input, shape index: {}]   ;;  %s15343_s11 = inlined_call_operand.vmem [shape: f32[2,16,64,8], index: 11, kind: output, shape index: {}]  }
   0x1 LB: > { %s10778_s18 = sadd.s32 4294967295, %s10708_s17   ;;  %p9130_p0 = scmp.ge.s32.totalorder %s10708_s17, 1  ;;  %s10708_s17 = sphi %s10772_s17, %s22_s17  }
   0x2   : > { %p284_p1 = scmp.lt.s32.totalorder %s10708_s17, 3  ;;  %s296_s21 = sshll.u32 %s15332_s0, 4  ;;  %s297_s21 = int_to_ptr.vmem [resolvable:$true] %s296_s21 }
   0x3   : > { %p10643_p3 = scmp.eq.s32.totalorder %s10778_s18, 0  ;;  %s10710_s22 = smov [#allocation6]  }
   0x4   : > { %p285_p2 = pnand %p9130_p0, %p284_p1 }
   0x6   : > { %p10639_p4 = pneg %p285_p2  ;;  %339 = sbr.rel (%p285_p2) target bundleno = 2635 (0xa4b), region = 64 }
   0x8   : > { %p10640_p5 = pnand %p10643_p3, %p10639_p4 }
   0xa   : > { %10642 = dma.vmem_to_smem (!%p10640_p5), %s297_s21, 32, %s10710_s22, [#allocation7]  }
   0xb   : > { %10703 = dma.done.wait (%p10643_p3), [#allocation7], 32  }
   0xc   : > { %10705 = vsyncadd (%p10643_p3), [#allocation7], 4294967264 }
   0xd   : > { %346 = sfence }
   0xe   : > { %v9161_v0 = vld [vmem:[%s15335_s3 + $0x2] sm:$0x3]  ;;  %vm780_vm0 = vcmask 1041408   ;;  %vm382_vm1 = vcmask 31744   ;;  %s9136_s25 = sshll.u32 %s10778_s18, 7  ;;  %v15348_v2 = vmov 0.0  }
   0xf   : > { %v782_v1 = vsel %vm780_vm0, %v9161_v0, 0  ;;  %386 = vst.msk [vmem:[#allocation2 + $0x18] sm:$0xff] %vm382_vm1, %v15348_v2  ;;  %s579_s26 = sld [smem:[#allocation6 + %s9136_s25]]  ;;  %s605_s27 = sadd.s32 1, %s9136_s25  ;;  %v581_v3 = vld [vmem:[%s15333_s1 + $0x8] sm:$0xff]  ;;  %v582_v4 = vld [vmem:[%s15333_s1 + $0x10] sm:$0xff] }
  0x10   : > { %10632 = vmatpush.bf16.msra.mxu1 %v782_v1  ;;  %10633 = vmatpush.bf16.msra.mxu2 %v782_v1  ;;  %387 = vst.msk [vmem:[#allocation2 + $0x20] sm:$0xff] %vm382_vm1, %v15348_v2  ;;  %s606_s28 = sld [smem:[#allocation6 + %s605_s27]]  ;;  %s633_s29 = sadd.s32 2, %s9136_s25  ;;  %v583_v5 = vld [vmem:[%s15333_s1 + $0x18] sm:$0xff]  ;;  %v9138_v6 = vld [vmem:[%s15333_s1 + $0x48] sm:$0xff]  ;;  %v9139_v7 = vld [vmem:[%s15333_s1 + $0x50] sm:$0xff] }
  0x11   : > { %10634 = vmatpush.bf16.msra.mxu3 %v782_v1  ;;  %791 = vmatpush.bf16.msra.mxu0 %v782_v1  ;;  %s634_s30 = sld [smem:[#allocation6 + %s633_s29]]  ;;  %s661_s12 = sadd.s32 3, %s9136_s25  ;;  %383 = vst.msk [vmem:[#allocation2] sm:$0xff] %vm382_vm1, %v15348_v2  ;;  %v584_v8 = vld [vmem:[%s15333_s1 + $0x20] sm:$0xff]  ;;  %v9146_v10 = vld [vmem:[%s15333_s1 + $0x88] sm:$0xff]  ;;  %v9147_v11 = vld [vmem:[%s15333_s1 + $0x90] sm:$0xff] }
  0x12   : > { %s10797_s13 = sld [smem:[#allocation6 + %s661_s12]]  ;;  %384 = vst.msk [vmem:[#allocation2 + $0x8] sm:$0xff] %vm382_vm1, %v15348_v2  ;;  %v9140_v12 = vld [vmem:[%s15333_s1 + $0x58] sm:$0xff]  ;;  %v9154_v16 = vld [vmem:[%s15333_s1 + $0xc8] sm:$0xff]  ;;  %v9155_v17 = vld [vmem:[%s15333_s1 + $0xd0] sm:$0xff]  ;;  %p376_p6 = scmp.lt.s32.totalorder %s10778_s18, 1 }
  0x13   : > { %385 = vst.msk [vmem:[#allocation2 + $0x10] sm:$0xff] %vm382_vm1, %v15348_v2  ;;  %v9141_v23 = vld [vmem:[%s15333_s1 + $0x60] sm:$0xff]  ;;  %v9148_v24 = vld [vmem:[%s15333_s1 + $0x98] sm:$0xff]  ;;  %v585_v37 = vld [vmem:[%s15333_s1 + $0x28] sm:$0xff] }
  0x14   : > { %388 = vst.msk [vmem:[#allocation2 + $0x28] sm:$0xff] %vm382_vm1, %v15348_v2  ;;  %v9149_v25 = vld [vmem:[%s15333_s1 + $0xa0] sm:$0xff]  ;;  %v9156_v30 = vld [vmem:[%s15333_s1 + $0xd8] sm:$0xff]  ;;  %v586_v38 = vld [vmem:[%s15333_s1 + $0x30] sm:$0xff]  ;;  %s15900_s18 = smov (!%p376_p6, %s10778_s18), 1 }
  0x15   : > { %v10823_v9 = vstv %s579_s26  ;;  %389 = vst.msk [vmem:[#allocation2 + $0x30] sm:$0xff] %vm382_vm1, %v15348_v2  ;;  %v9157_v31 = vld [vmem:[%s15333_s1 + $0xe0] sm:$0xff]  ;;  %v9142_v39 = vld [vmem:[%s15333_s1 + $0x68] sm:$0xff]  ;;  %v9143_v44 = vld [vmem:[%s15333_s1 + $0x70] sm:$0xff]  ;;  %s10499_s29 = sshll.u32 %s15900_s18, 10 }
  0x16   : > { %v590_v13 = vmul.f32 %v10823_v9, %v581_v3  ;;  %v591_v14 = vmul.f32 %v10823_v9, %v582_v4  ;;  %v10838_v15 = vstv %s606_s28  ;;  %390 = vst.msk [vmem:[#allocation2 + $0x38] sm:$0xff] %vm382_vm1, %v15348_v2  ;;  %v592_v18 = vmul.f32 %v10823_v9, %v583_v5  ;;  %v10884_v36 = vld [vmem:[%s15334_s2] ss:$0 sm:$0xff]  ;;  %v9150_v45 = vld [vmem:[%s15333_s1 + $0xa8] sm:$0xff]  ;;  %v9151_v46 = vld [vmem:[%s15333_s1 + $0xb0] sm:$0xff]  ;;  %s13123_s16 = scalar_lea.vmem %s15343_s11, %s10499_s29 }
  0x17   : > { %v618_v19 = vmul.f32 %v9138_v6, %v10838_v15  ;;  %v619_v20 = vmul.f32 %v9139_v7, %v10838_v15  ;;  %v10851_v21 = vstv %s634_s30  ;;  %391 = vst.msk [vmem:[#allocation2 + $0x40] sm:$0xff] %vm382_vm1, %v15348_v2  ;;  %v593_v22 = vmul.f32 %v10823_v9, %v584_v8  ;;  %v9158_v51 = vld [vmem:[%s15333_s1 + $0xe8] sm:$0xff]  ;;  %v9159_v52 = vld [vmem:[%s15333_s1 + $0xf0] sm:$0xff]  ;;  %v9170_v61 = vld [vmem:[%s15335_s3 + $0x4] sm:$0x3] }
  0x18   : > { %v646_v26 = vmul.f32 %v9146_v10, %v10851_v21  ;;  %v647_v27 = vmul.f32 %v9147_v11, %v10851_v21  ;;  %v10868_v28 = vstv %s10797_s13  ;;  %392 = vst.msk [vmem:[#allocation2 + $0x48] sm:$0xff] %vm382_vm1, %v15348_v2  ;;  %v620_v29 = vmul.f32 %v9140_v12, %v10838_v15  ;;  %v580_v62 = vld [vmem:[%s15333_s1] sm:$0xff] }
  0x19   : > { %v626_v32 = vadd.f32 %v618_v19, %v590_v13  ;;  %v627_v33 = vadd.f32 %v619_v20, %v591_v14  ;;  %v674_v34 = vmul.f32 %v9154_v16, %v10868_v28  ;;  %v675_v35 = vmul.f32 %v9155_v17, %v10868_v28  ;;  %393 = vst.msk [vmem:[#allocation2 + $0x50] sm:$0xff] %vm382_vm1, %v15348_v2  ;;  %v9137_v4 = vld [vmem:[%s15333_s1 + $0x40] sm:$0xff]  ;;  %v9180_v19 = vld [vmem:[%s15335_s3 + $0x8] sm:$0x3] }
  0x1a   : > { %394 = vst.msk [vmem:[#allocation2 + $0x58] sm:$0xff] %vm382_vm1, %v15348_v2  ;;  %v621_v40 = vmul.f32 %v9141_v23, %v10838_v15  ;;  %v628_v41 = vadd.f32 %v620_v29, %v592_v18  ;;  %v648_v42 = vmul.f32 %v9148_v24, %v10851_v21  ;;  %v649_v43 = vmul.f32 %v9149_v25, %v10851_v21  ;;  %v9175_v5 = vld [vmem:[%s15335_s3 + $0x6] sm:$0x3]  ;;  %v717_v13 = vld [vmem:[%s15335_s3] sm:$0x3] }
  0x1b   : > { %v654_v47 = vadd.f32 %v646_v26, %v626_v32  ;;  %v655_v48 = vadd.f32 %v647_v27, %v627_v33  ;;  %v676_v49 = vmul.f32 %v9156_v30, %v10868_v28  ;;  %v677_v50 = vmul.f32 %v9157_v31, %v10868_v28  ;;  %v9145_v11 = vld [vmem:[%s15333_s1 + $0x80] sm:$0xff] }
  0x1c   : > { %v629_v53 = vadd.f32 %v621_v40, %v593_v22  ;;  %v656_v54 = vadd.f32 %v648_v42, %v628_v41  ;;  %v594_v55 = vmul.f32 %v10823_v9, %v585_v37  ;;  %v595_v56 = vmul.f32 %v10823_v9, %v586_v38  ;;  %v9153_v12 = vld [vmem:[%s15333_s1 + $0xc0] sm:$0xff] }
  0x1d   : > { %v682_v57 = vadd.f32 %v674_v34, %v654_v47  ;;  %v683_v58 = vadd.f32 %v675_v35, %v655_v48  ;;  %v622_v59 = vmul.f32 %v9142_v39, %v10838_v15  ;;  %v623_v60 = vmul.f32 %v9143_v44, %v10838_v15 }
  0x1e   : > { %v657_v63 = vadd.f32 %v649_v43, %v629_v53  ;;  %v684_v0 = vadd.f32 %v676_v49, %v656_v54  ;;  %v650_v1 = vmul.f32 %v9150_v45, %v10851_v21  ;;  %v651_v3 = vmul.f32 %v9151_v46, %v10851_v21  ;;  %v9185_v49 = vld [vmem:[%s15335_s3 + $0xa] sm:$0x3]  ;;  %v9190_v53 = vld [vmem:[%s15335_s3 + $0xc] sm:$0x3] }
  0x1f   : > { %v694_v6 = vadd.f32 %v10884_v36, %v682_v57  ;;  %v695_v7 = vadd.f32 %v10884_v36, %v683_v58  ;;  %v630_v8 = vadd.f32 %v622_v59, %v594_v55  ;;  %v631_v10 = vadd.f32 %v623_v60, %v595_v56 }
  0x20   : > { %v685_v14 = vadd.f32 %v677_v50, %v657_v63  ;;  %v696_v16 = vadd.f32 %v10884_v36, %v684_v0  ;;  %v678_v17 = vmul.f32 %v9158_v51, %v10868_v28  ;;  %v679_v18 = vmul.f32 %v9159_v52, %v10868_v28 }
  0x21   : > { %v702_v20 = vmax.f32 %v694_v6, 0.0  ;;  %v703_v22 = vmax.f32 %v695_v7, 0.0  ;;  %v658_v23 = vadd.f32 %v650_v1, %v630_v8  ;;  %v659_v24 = vadd.f32 %v651_v3, %v631_v10  ;;  %v756_v6 = vld [vmem:[#allocation2 + $0x8] sm:$0xff] }
  0x22   : > { %v697_v25 = vadd.f32 %v10884_v36, %v685_v14  ;;  %v704_v26 = vmax.f32 %v696_v16, 0.0  ;;  %v908_v27 = vsel %vm780_vm0, %v9170_v61, 0  ;;  %v589_v29 = vmul.f32 %v10823_v9, %v580_v62  ;;  %v9195_v62 = vld [vmem:[%s15335_s3 + $0xe] sm:$0x3] }
  0x23   : > { %710 = vst.msk [vmem:[#allocation2 + $0x18] sm:$0xff] %vm382_vm1, %v702_v20  ;;  %v686_v30 = vadd.f32 %v678_v17, %v658_v23  ;;  %v687_v31 = vadd.f32 %v679_v18, %v659_v24  ;;  %917 = vmatpush.bf16.msrb.mxu2 %v908_v27  ;;  %v617_v32 = vmul.f32 %v9137_v4, %v10838_v15  ;;  %v982_v33 = vsel %vm780_vm0, %v9175_v5, 0  ;;  %v718_v10 = vld [vmem:[#allocation2 + $0x7] sm:$0xff] }
  0x24   : > { %711 = vst.msk [vmem:[#allocation2 + $0x20] sm:$0xff] %vm382_vm1, %v703_v22  ;;  %v705_v34 = vmax.f32 %v697_v25, 0.0  ;;  %v645_v35 = vmul.f32 %v9145_v11, %v10851_v21  ;;  %v673_v37 = vmul.f32 %v9153_v12, %v10868_v28  ;;  %991 = vmatpush.bf16.msrb.mxu3 %v982_v33  ;;  %v826_v38 = vsel %vm780_vm0, %v717_v13, 0  ;;  %v9200_v11 = vld [vmem:[%s15335_s3 + $0x10] sm:$0x3] }
  0x25   : > { %712 = vst.msk [vmem:[#allocation2 + $0x28] sm:$0xff] %vm382_vm1, %v704_v26  ;;  %v698_v39 = vadd.f32 %v10884_v36, %v686_v30  ;;  %v699_v40 = vadd.f32 %v10884_v36, %v687_v31  ;;  %v625_v41 = vadd.f32 %v617_v32, %v589_v29  ;;  %835 = vmatpush.bf16.msrb.mxu1 %v826_v38  ;;  %v1048_v42 = vsel %vm780_vm0, %v9180_v19, 0 }
  0x26   : > { %713 = vst.msk [vmem:[#allocation2 + $0x30] sm:$0xff] %vm382_vm1, %v705_v34  ;;  %1057 = vmatpush.bf16.msrb.mxu0 %v1048_v42  ;;  %v457_v43 = vlaneseq  ;;  %v1122_v57 = vsel %vm780_vm0, %v9185_v49, 0  ;;  %v1196_v61 = vsel %vm780_vm0, %v9190_v53, 0  ;;  %v1262_v5 = vsel %vm780_vm0, %v9195_v62, 0  ;;  %v587_v34 = vld [vmem:[%s15333_s1 + $0x38] sm:$0xff] }
  0x27   : > { %v706_v44 = vmax.f32 %v698_v39, 0.0  ;;  %v707_v45 = vmax.f32 %v699_v40, 0.0  ;;  %v653_v46 = vadd.f32 %v645_v35, %v625_v41  ;;  %v15461_v7 = vmov 0  ;;  %v9144_v35 = vld [vmem:[%s15333_s1 + $0x78] sm:$0xff] }
  0x28   : > { %v10969_v47 = vshrl.u32 %v457_v43, 7  ;;  %v15464_v8 = vmov 0  ;;  %v15467_v14 = vmov 0  ;;  %v15470_v16 = vmov 0  ;;  %v9152_v42 = vld [vmem:[%s15333_s1 + $0xb8] sm:$0xff] }
  0x29   : > { %714 = vst.msk [vmem:[#allocation2 + $0x38] sm:$0xff] %vm382_vm1, %v706_v44  ;;  %v681_v48 = vadd.f32 %v673_v37, %v653_v46  ;;  %v1336_v23 = vsel %vm780_vm0, %v9200_v11, 0  ;;  %v596_v40 = vmul.f32 %v10823_v9, %v587_v34  ;;  %v624_v41 = vmul.f32 %v9144_v35, %v10838_v15 }
  0x2a   : > { %v10975_v50 = vld [vmem:[#allocation2 + $0x18] sm:$0xff]  ;;  %715 = vst.msk [vmem:[#allocation2 + $0x40] sm:$0xff] %vm382_vm1, %v707_v45  ;;  %v459_v56 = vadd.s32 8, %v10969_v47  ;;  %v470_v0 = vand.u32 7, %v10969_v47  ;;  %v460_v30 = vadd.s32 16, %v10969_v47  ;;  %v461_v31 = vadd.s32 24, %v10969_v47 }
  0x2b   : > { %v10978_v51 = vld [vmem:[#allocation2 + $0x20] sm:$0xff]  ;;  %v693_v52 = vadd.f32 %v10884_v36, %v681_v48  ;;  %v652_v43 = vmul.f32 %v9152_v42, %v10851_v21  ;;  %v632_v44 = vadd.f32 %v624_v41, %v596_v40  ;;  %v9160_v45 = vld [vmem:[%s15333_s1 + $0xf8] sm:$0xff]  ;;  %v15473_v46 = vmov 0 }
  0x2c   : > { %v10986_v54 = vpack.c.bf16 %v10978_v51, %v10975_v50  ;;  %v10988_v55 = vld [vmem:[#allocation2 + $0x28] sm:$0xff]  ;;  %v477_v1 = vand.u32 7, %v459_v56  ;;  %vm11019_vm2 = vcmp.gt.s32.totalorder %v470_v0, 0  ;;  %vm11030_vm4 = vcmp.lt.s32.totalorder %v470_v0, 7  ;;  %v11086_v15 = vld [vmem:[#allocation2 + $0x1f] sm:$0xff] }
  0x2d   : > { %v10992_v58 = vld [vmem:[#allocation2 + $0x30] sm:$0xff]  ;;  %v701_v59 = vmax.f32 %v693_v52, 0.0  ;;  %v15462_v7 = vsel %vm11019_vm2, 4294967295, %v15461_v7  ;;  %v15468_v14 = vsel %vm11030_vm4, 4294967295, %v15467_v14  ;;  %v742_v19 = vsel %vm11019_vm2, %v718_v10, 0.0  ;;  %v11098_v56 = vld [vmem:[#allocation2 + $0x19] sm:$0xff] }
  0x2e   : > { %9163 = vmatmul.msk.bf16.vlgmr.msra.gmra.mxu1 %vm382_vm1, %v10986_v54  ;;  %v10998_v60 = vpack.c.bf16 %v10992_v58, %v10988_v55  ;;  %15463 = vst [vmem:[#allocation9_spill] sm:$0xff] %v15462_v7  ;;  %vm11023_vm3 = vcmp.gt.s32.totalorder %v477_v1, 0  ;;  %vm11034_vm5 = vcmp.lt.s32.totalorder %v477_v1, 7  ;;  %v484_v38 = vand.u32 7, %v460_v30  ;;  %v11150_v30 = vld [vmem:[#allocation2 + $0x29] sm:$0xff] }
  0x2f   : > { %709 = vst.msk [vmem:[#allocation2 + $0x10] sm:$0xff] %vm382_vm1, %v701_v59  ;;  %1131 = vmatpush.bf16.msra.mxu1 %v1122_v57  ;;  %v15465_v8 = vsel %vm11023_vm3, 4294967295, %v15464_v8  ;;  %v15471_v16 = vsel %vm11034_vm5, 4294967295, %v15470_v16  ;;  %v491_v39 = vand.u32 7, %v461_v31  ;;  %v15476_v9 = vmov 0  ;;  %v11100_v57 = vld [vmem:[#allocation2 + $0x21] sm:$0xff] }
  0x30   : > { %9164 = vmatmul.msk.bf16.vlgmr.msra.gmra.mxu2 %vm382_vm1, %v10998_v60  ;;  %v11007_v63 = vld [vmem:[#allocation2 + $0x38] sm:$0xff]  ;;  %15466 = vst [vmem:[#allocation10_spill] sm:$0xff] %v15465_v8  ;;  %vm11078_vm6 = vcmp.gt.s32.totalorder %v484_v38, 0  ;;  %v680_v48 = vmul.f32 %v9160_v45, %v10868_v28  ;;  %v660_v49 = vadd.f32 %v652_v43, %v632_v44  ;;  %vm11090_vm8 = vcmp.lt.s32.totalorder %v484_v38, 7 }
  0x31   : > { %v11010_v3 = vld [vmem:[#allocation2 + $0x40] sm:$0xff]  ;;  %1205 = vmatpush.bf16.msra.mxu2 %v1196_v61  ;;  %15469 = vst [vmem:[#allocation11_spill] sm:$0xff] %v15468_v14  ;;  %v15474_v46 = vsel %vm11078_vm6, 4294967295, %v15473_v46  ;;  %vm11082_vm7 = vcmp.gt.s32.totalorder %v491_v39, 0  ;;  %v15479_v52 = vmov 0  ;;  %vm11094_vm9 = vcmp.lt.s32.totalorder %v491_v39, 7 }
  0x32   : > { %v11014_v4 = vpack.c.bf16 %v11010_v3, %v11007_v63  ;;  %15472 = vst [vmem:[#allocation12_spill] sm:$0xff] %v15471_v16  ;;  %v15477_v9 = vsel %vm11082_vm7, 4294967295, %v15476_v9  ;;  %v15480_v52 = vsel %vm11090_vm8, 4294967295, %v15479_v52  ;;  %v15482_v53 = vmov 0  ;;  %v11152_v31 = vld [vmem:[#allocation2 + $0x31] sm:$0xff] }
  0x33   : > { %15475 = vst [vmem:[#allocation13_spill] sm:$0xff] %v15474_v46  ;;  %v15483_v53 = vsel %vm11094_vm9, 4294967295, %v15482_v53  ;;  %v745_v28 = vsel %vm11082_vm7, %v11086_v15, 0.0  ;;  %v885_v61 = vsel %vm11090_vm8, %v11098_v56, 0.0  ;;  %v886_v62 = vsel %vm11094_vm9, %v11100_v57, 0.0  ;;  %v11167_v35 = vld [vmem:[#allocation2 + $0x37] sm:$0xff] }
  0x34   : > { %9165 = vmatmul.msk.bf16.vlgmr.msra.gmra.mxu3 %vm382_vm1, %v11014_v4  ;;  %15478 = vst [vmem:[#allocation14_spill] sm:$0xff] %v15477_v9  ;;  %v892_v10 = vpack.c.bf16 %v886_v62, %v885_v61  ;;  %v462_v11 = vadd.s32 32, %v10969_v47  ;;  %v464_v38 = vadd.s32 48, %v10969_v47  ;;  %v465_v39 = vadd.s32 56, %v10969_v47 }
  0x35   : > { %1271 = vmatpush.bf16.msra.mxu3 %v1262_v5  ;;  %15481 = vst [vmem:[#allocation15_spill] sm:$0xff] %v15480_v52  ;;  %v11116_v5 = vld [vmem:[#allocation2 + $0x27] sm:$0xff]  ;;  %v15496_v45 = vmov 0 }
  0x36   : > { %v757_v12 = vld [vmem:[#allocation2 + $0x10] sm:$0xff]  ;;  %v512_v43 = vand.u32 7, %v464_v38  ;;  %v519_v44 = vand.u32 7, %v465_v39 }
  0x37   : > { %v719_v13 = vld [vmem:[#allocation2 + $0xf] sm:$0xff]  ;;  %v764_v18 = vpack.c.bf16 %v757_v12, %v756_v6  ;;  %v11051_v27 = vld [vmem:[#allocation2 + $0x17] sm:$0xff]  ;;  %v1031_v21 = vpack.c.bf16 %v10975_v50, %v757_v12  ;;  %v688_v50 = vadd.f32 %v680_v48, %v660_v49  ;;  %v463_v12 = vadd.s32 40, %v10969_v47  ;;  %v725_v48 = vld [vmem:[#allocation2 + $0x3f] sm:$0xff] }
  0x38   : > { %v859_v17 = vld [vmem:[#allocation2 + $0x9] sm:$0xff]  ;;  %v743_v20 = vsel %vm11023_vm3, %v719_v13, 0.0  ;;  %v11042_v22 = vld [vmem:[#allocation2 + $0x11] sm:$0xff]  ;;  %v957_v32 = vsel %vm11019_vm2, %v719_v13, 0.0  ;;  %v958_v33 = vsel %vm11023_vm3, %v11051_v27, 0.0  ;;  %v744_v59 = vsel %vm11078_vm6, %v11051_v27, 0.0 }
  0x39   : > { %9162 = vmatmul.msk.bf16.vlgmr.msra.gmra.mxu0 %vm382_vm1, %v764_v18  ;;  %v883_v24 = vsel %vm11030_vm4, %v859_v17, 0.0  ;;  %v884_v25 = vsel %vm11034_vm5, %v11042_v22, 0.0  ;;  %v750_v26 = vpack.c.bf16 %v743_v20, %v742_v19  ;;  %v965_v37 = vpack.c.bf16 %v958_v33, %v957_v32 }
  0x3a   : > { %1345 = vmatpush.bf16.msra.mxu0 %v1336_v23  ;;  %v891_v29 = vpack.c.bf16 %v884_v25, %v883_v24  ;;  %v700_v0 = vadd.f32 %v10884_v36, %v688_v50  ;;  %v751_v1 = vpack.c.bf16 %v745_v28, %v744_v59  ;;  %v959_v13 = vsel %vm11078_vm6, %v11086_v15, 0.0  ;;  %v11138_v24 = vld [vmem:[#allocation2 + $0x2f] sm:$0xff]  ;;  %v865_v28 = vld [vmem:[#allocation2 + $0x39] sm:$0xff] }
  0x3b   : > { %v960_v17 = vsel %vm11082_vm7, %v11116_v5, 0.0  ;;  %v498_v18 = vand.u32 7, %v462_v11  ;;  %v505_v19 = vand.u32 7, %v463_v12  ;;  %v15484_v20 = vmov 0 }
  0x3c   : > { %v708_v6 = vmax.f32 %v700_v0, 0.0  ;;  %v966_v36 = vpack.c.bf16 %v960_v17, %v959_v13  ;;  %v15487_v23 = vmov 0  ;;  %v1032_v25 = vpack.c.bf16 %v10988_v55, %v10978_v51 }
  0x3d   : > { %vm11130_vm10 = vcmp.gt.s32.totalorder %v498_v18, 0  ;;  %vm11134_vm11 = vcmp.gt.s32.totalorder %v505_v19, 0  ;;  %vm11142_vm12 = vcmp.lt.s32.totalorder %v498_v18, 7  ;;  %vm11146_vm13 = vcmp.lt.s32.totalorder %v505_v19, 7 }
  0x3e   : > { %9166 = vmatmul.msk.bf16.vlgmr.msrb.gmra.mxu1 %vm382_vm1, %v750_v26  ;;  %716 = vst.msk [vmem:[#allocation2 + $0x48] sm:$0xff] %vm382_vm1, %v708_v6  ;;  %v15485_v20 = vsel %vm11130_vm10, 4294967295, %v15484_v20  ;;  %v15488_v23 = vsel %vm11134_vm11, 4294967295, %v15487_v23  ;;  %v15490_v26 = vmov 0  ;;  %v746_v32 = vsel %vm11130_vm10, %v11116_v5, 0.0 }
  0x3f   : > { %15486 = vst [vmem:[#allocation16_spill] sm:$0xff] %v15485_v20  ;;  %v15491_v26 = vsel %vm11142_vm12, 4294967295, %v15490_v26  ;;  %v747_v51 = vsel %vm11134_vm11, %v11138_v24, 0.0  ;;  %v887_v55 = vsel %vm11142_vm12, %v11150_v30, 0.0  ;;  %v888_v33 = vsel %vm11146_vm13, %v11152_v31, 0.0 }
  0x40   : > { %9171 = vmatmul.msk.bf16.vlgmr.msrb.gmra.mxu2 %vm382_vm1, %v891_v29  ;;  %15489 = vst [vmem:[#allocation17_spill] sm:$0xff] %v15488_v23  ;;  %v15493_v29 = vmov 0  ;;  %v752_v34 = vpack.c.bf16 %v747_v51, %v746_v32  ;;  %v961_v40 = vsel %vm11130_vm10, %v11138_v24, 0.0  ;;  %v962_v41 = vsel %vm11134_vm11, %v11167_v35, 0.0 }
  0x41   : > { %15492 = vst [vmem:[#allocation18_spill] sm:$0xff] %v15491_v26  ;;  %v15494_v29 = vsel %vm11146_vm13, 4294967295, %v15493_v29  ;;  %v967_v42 = vpack.c.bf16 %v962_v41, %v961_v40  ;;  %vm11180_vm14 = vcmp.gt.s32.totalorder %v512_v43, 0  ;;  %vm11184_vm15 = vcmp.gt.s32.totalorder %v519_v44, 0 }
  0x42   : > { %15495 = vst [vmem:[#allocation19_spill] sm:$0xff] %v15494_v29  ;;  %v15497_v45 = vsel %vm11180_vm14, 4294967295, %v15496_v45  ;;  %v15499_v47 = vmov 0  ;;  %vm11190_vm0 = vcmp.lt.s32.totalorder %v512_v43, 7  ;;  %v15502_v49 = vmov 0 }
  0x43   : > { %15498 = vst [vmem:[#allocation20_spill] sm:$0xff] %v15497_v45  ;;  %v15500_v47 = vsel %vm11184_vm15, 4294967295, %v15499_v47  ;;  %v15503_v49 = vsel %vm11190_vm0, 4294967295, %v15502_v49  ;;  %vm11194_vm11 = vcmp.lt.s32.totalorder %v519_v44, 7  ;;  %v15505_v59 = vmov 0 }
  0x44   : > { %9176 = vmatmul.msk.bf16.vlgmr.msrb.gmra.mxu3 %vm382_vm1, %v965_v37  ;;  %v893_v37 = vpack.c.bf16 %v888_v33, %v887_v55  ;;  %15501 = vst [vmem:[#allocation21_spill] sm:$0xff] %v15500_v47  ;;  %v15506_v59 = vsel %vm11194_vm11, 4294967295, %v15505_v59  ;;  %v748_v61 = vsel %vm11180_vm14, %v11167_v35, 0.0  ;;  %v749_v62 = vsel %vm11184_vm15, %v725_v48, 0.0 }
  0x45   : > { %15504 = vst [vmem:[#allocation22_spill] sm:$0xff] %v15503_v49  ;;  %v11198_v50 = vld [vmem:[#allocation2 + $0x41] sm:$0xff]  ;;  %v753_v0 = vpack.c.bf16 %v749_v62, %v748_v61  ;;  %v1098_v18 = vsel %vm11034_vm5, %v11098_v56, 0.0  ;;  %v1171_v19 = vsel %vm11019_vm2, %v11051_v27, 0.0  ;;  %v1312_v51 = vsel %vm11034_vm5, %v11100_v57, 0.0  ;;  %v1170_v43 = vld [vmem:[#allocation2 + $0x4f] sm:$0xff] }
  0x46   : > { %15507 = vst [vmem:[#allocation23_spill] sm:$0xff] %v15506_v59  ;;  %v1030_v13 = vld [vmem:[#allocation2 + $0x48] sm:$0xff]  ;;  %v1100_v55 = vsel %vm11094_vm9, %v11150_v30, 0.0  ;;  %v1174_v33 = vsel %vm11082_vm7, %v11138_v24, 0.0  ;;  %v1101_v24 = vsel %vm11142_vm12, %v11152_v31, 0.0  ;;  %v1102_v38 = vsel %vm11146_vm13, %v865_v28, 0.0 }
  0x47   : > { %v1034_v17 = vpack.c.bf16 %v1030_v13, %v11010_v3  ;;  %v1107_v40 = vpack.c.bf16 %v1102_v38, %v1101_v24  ;;  %v1103_v44 = vsel %vm11190_vm0, %v11198_v50, 0.0 }
  0x49   : > { %9181 = vmatmul.msk.bf16.vlgmr.msrb.gmra.mxu0 %vm382_vm1, %v1031_v21  ;;  %v1033_v21 = vpack.c.bf16 %v11007_v63, %v10992_v58  ;;  %v889_v58 = vsel %vm11190_vm0, %v865_v28, 0.0  ;;  %v890_v63 = vsel %vm11194_vm11, %v11198_v50, 0.0 }
  0x4a   : > { %v894_v6 = vpack.c.bf16 %v890_v63, %v889_v58  ;;  %v1244_v58 = vld [vmem:[#allocation2 + $0x50] sm:$0xff] }
  0x4b   : > { %v1310_v63 = vld [vmem:[#allocation2 + $0x51] sm:$0xff] }
  0x4e   : > { %9167 = vmatmul.msk.bf16.gmra.mxu1 %vm382_vm1, %v751_v1  ;;  %v956_v1 = vld [vmem:[#allocation2 + $0x47] sm:$0xff] }
  0x4f   : > { %v964_v11 = vsel %vm11184_vm15, %v956_v1, 0.0 }
  0x50   : > { %9172 = vmatmul.msk.bf16.gmra.mxu2 %vm382_vm1, %v892_v10  ;;  %v963_v10 = vsel %vm11180_vm14, %v725_v48, 0.0 }
  0x51   : > { %v968_v12 = vpack.c.bf16 %v964_v11, %v963_v10 }
  0x54   : > { %9177 = vmatmul.msk.bf16.gmra.mxu3 %vm382_vm1, %v966_v36  ;;  %v1097_v36 = vsel %vm11030_vm4, %v11042_v22, 0.0  ;;  %v1311_v22 = vsel %vm11030_vm4, %v11098_v56, 0.0  ;;  %v1173_v56 = vsel %vm11078_vm6, %v11116_v5, 0.0 }
  0x55   : > { %v1105_v32 = vpack.c.bf16 %v1098_v18, %v1097_v36  ;;  %v1319_v27 = vpack.c.bf16 %v1312_v51, %v1311_v22  ;;  %v10503_v22 = vld [vmem:[%s15337_s5 + $0x18] sm:$0xff] }
  0x56   : > { %1490 = vmatpush.bf16.msrb.mxu1 %v10503_v22  ;;  %v10501_v22 = vld [vmem:[%s15337_s5 + $0x8] sm:$0xff] }
  0x57   : > { %1543 = vmatpush.bf16.msrb.mxu2 %v10501_v22 }
  0x59   : > { %9182 = vmatmul.msk.bf16.gmra.mxu0 %vm382_vm1, %v1032_v25  ;;  %v1172_v25 = vsel %vm11023_vm3, %v11086_v15, 0.0  ;;  %v1099_v15 = vsel %vm11090_vm8, %v11100_v57, 0.0  ;;  %v1313_v57 = vsel %vm11090_vm8, %v11150_v30, 0.0  ;;  %v1175_v30 = vsel %vm11130_vm10, %v11167_v35, 0.0  ;;  %v1096_v35 = vld [vmem:[#allocation2 + $0x49] sm:$0xff] }
  0x5a   : > { %v1179_v3 = vpack.c.bf16 %v1172_v25, %v1171_v19  ;;  %vm15508_vm8 = vnez %v15488_v23 }
  0x5b   : > { %v1176_v39 = vsel %vm15508_vm8, %v725_v48, 0.0  ;;  %v1104_v48 = vsel %vm11194_vm11, %v1096_v35, 0.0 }
  0x5c   : > { %v1181_v41 = vpack.c.bf16 %v1176_v39, %v1175_v30  ;;  %v1108_v61 = vpack.c.bf16 %v1104_v48, %v1103_v44 }
  0x5e   : > { %9168 = vmatmul.msk.bf16.gmra.mxu1 %vm382_vm1, %v752_v34  ;;  %v1180_v34 = vpack.c.bf16 %v1174_v33, %v1173_v56 }
  0x60   : > { %9173 = vmatmul.msk.bf16.gmra.mxu2 %vm382_vm1, %v893_v37  ;;  %v1314_v37 = vsel %vm11094_vm9, %v11152_v31, 0.0  ;;  %v1316_v31 = vsel %vm11146_vm13, %v11198_v50, 0.0  ;;  %v1248_v50 = vpack.c.bf16 %v1244_v58, %v1030_v13 }
  0x61   : > { %v1320_v5 = vpack.c.bf16 %v1314_v37, %v1313_v57 }
  0x64   : > { %9178 = vmatmul.msk.bf16.gmra.mxu3 %vm382_vm1, %v967_v42 }
  0x69   : > { %9183 = vmatmul.msk.bf16.gmra.mxu0 %vm382_vm1, %v1033_v21  ;;  %v1177_v21 = vsel %vm11180_vm14, %v956_v1, 0.0  ;;  %v1318_v1 = vsel %vm11194_vm11, %v1310_v63, 0.0 }
  0x6e   : > { %9169 = vmatmul.msk.bf16.gmra.mxu1 %vm382_vm1, %v753_v0  ;;  %v1317_v0 = vsel %vm11190_vm0, %v1096_v35, 0.0 }
  0x6f   : > { %v1322_v11 = vpack.c.bf16 %v1318_v1, %v1317_v0 }
  0x70   : > { %9174 = vmatmul.msk.bf16.gmra.mxu2 %vm382_vm1, %v894_v6 }
  0x74   : > { %9179 = vmatmul.msk.bf16.gmra.mxu3 %vm382_vm1, %v968_v12 }
  0x79   : > { %9184 = vmatmul.msk.bf16.gmra.mxu0 %vm382_vm1, %v1034_v17 }
  0x7e   : > { %9186 = vmatmul.msk.bf16.vlgmr.msra.gmra.mxu1 %vm382_vm1, %v1105_v32 }
  0x80   : > { %9191 = vmatmul.msk.bf16.vlgmr.msra.gmra.mxu2 %vm382_vm1, %v1179_v3 }
  0x84   : > { %9196 = vmatmul.msk.bf16.vlgmr.msra.gmra.mxu3 %vm382_vm1, %v10986_v54  ;;  %v1106_v54 = vpack.c.bf16 %v1100_v55, %v1099_v15 }
  0x89   : > { %9201 = vmatmul.msk.bf16.vlgmr.msra.gmra.mxu0 %vm382_vm1, %v1319_v27 }
  0x8e   : > { %9187 = vmatmul.msk.bf16.gmra.mxu1 %vm382_vm1, %v1106_v54 }
  0x90   : > { %9192 = vmatmul.msk.bf16.gmra.mxu2 %vm382_vm1, %v1180_v34 }
  0x94   : > { %9197 = vmatmul.msk.bf16.gmra.mxu3 %vm382_vm1, %v10998_v60  ;;  %v1315_v60 = vsel %vm11142_vm12, %v865_v28, 0.0  ;;  %v1178_v28 = vsel %vm11184_vm15, %v1170_v43, 0.0 }
  0x95   : > { %v1321_v42 = vpack.c.bf16 %v1316_v31, %v1315_v60  ;;  %v1182_v62 = vpack.c.bf16 %v1178_v28, %v1177_v21 }
  0x99   : > { %9202 = vmatmul.msk.bf16.gmra.mxu0 %vm382_vm1, %v1320_v5 }
  0x9e   : > { %9188 = vmatmul.msk.bf16.gmra.mxu1 %vm382_vm1, %v1107_v40 }
  0xa0   : > { %9193 = vmatmul.msk.bf16.gmra.mxu2 %vm382_vm1, %v1181_v41  ;;  %v10502_v41 = vld [vmem:[%s15337_s5 + $0x10] sm:$0xff] }
  0xa1   : > { %1491 = vmatpush.bf16.msrb.mxu1 %v10502_v41 }
  0xa4   : > { %9198 = vmatmul.msk.bf16.gmra.mxu3 %vm382_vm1, %v11014_v4 }
  0xa9   : > { %9203 = vmatmul.msk.bf16.gmra.mxu0 %vm382_vm1, %v1321_v42 }
  0xab   : > { %v11295_v4 = vpop.f32.mrf.mxu1 }
  0xae   : > { %9189 = vmatmul.msk.bf16.gmra.mxu1 %vm382_vm1, %v1108_v61 }
  0xb0   : > { %9194 = vmatmul.msk.bf16.gmra.mxu2 %vm382_vm1, %v1182_v62 }
  0xb3   : > { %v11303_v6 = vpop.f32.mrf.mxu2  ;;  %v11305_v10 = vpop.f32.mrf.mxu1 }
  0xb4   : > { %9199 = vmatmul.msk.bf16.gmra.mxu3 %vm382_vm1, %v1248_v50 }
  0xb6   : > { %v793_v12 = vpop.f32.mrf.mxu0 }
  0xb7   : > { %v11308_v17 = vpop.f32.mrf.mxu3 }
  0xb9   : > { %9204 = vmatmul.msk.bf16.gmra.mxu0 %vm382_vm1, %v1322_v11  ;;  %vm15357_vm1 = vcmask 261120  }
  0xba   : > { %396 = vst.msk [vmem:[#allocation4] sm:$0xff] %vm15357_vm1, %v15348_v2 }
  0xbb   : > { %v11311_v36 = vpop.f32.mrf.mxu2  ;;  %v837_v13 = vpop.f32.mrf.mxu1  ;;  %397 = vst.msk [vmem:[#allocation4 + $0x8] sm:$0xff] %vm15357_vm1, %v15348_v2 }
  0xbc   : > { %398 = vst.msk [vmem:[#allocation4 + $0x10] sm:$0xff] %vm15357_vm1, %v15348_v2  ;;  %v838_v21 = vadd.f32 %v837_v13, %v793_v12 }
  0xbd   : > { %399 = vst.msk [vmem:[#allocation4 + $0x18] sm:$0xff] %vm15357_vm1, %v15348_v2 }
  0xbe   : > { %v795_v18 = vpop.f32.mrf.mxu0  ;;  %400 = vst.msk [vmem:[#allocation4 + $0x20] sm:$0xff] %vm15357_vm1, %v15348_v2 }
  0xbf   : > { %v11313_v19 = vpop.f32.mrf.mxu3  ;;  %401 = vst.msk [vmem:[#allocation4 + $0x28] sm:$0xff] %vm15357_vm1, %v15348_v2 }
  0xc0   : > { %402 = vst.msk [vmem:[#allocation4 + $0x30] sm:$0xff] %vm15357_vm1, %v15348_v2 }
  0xc1   : > { %403 = vst.msk [vmem:[#allocation4 + $0x38] sm:$0xff] %vm15357_vm1, %v15348_v2 }
  0xc2   : > { %404 = vst.msk [vmem:[#allocation4 + $0x40] sm:$0xff] %vm15357_vm1, %v15348_v2 }
  0xc3   : > { %v919_v25 = vpop.f32.mrf.mxu2  ;;  %v839_v32 = vpop.f32.mrf.mxu1  ;;  %405 = vst.msk [vmem:[#allocation4 + $0x48] sm:$0xff] %vm15357_vm1, %v15348_v2 }
  0xc4   : > { %406 = vst.msk [vmem:[#allocation4 + $0x50] sm:$0xff] %vm15357_vm1, %v15348_v2  ;;  %v939_v62 = vadd.f32 %v919_v25, %v838_v21  ;;  %v840_v0 = vadd.f32 %v839_v32, %v795_v18  ;;  %v10500_v25 = vld [vmem:[%s15337_s5] sm:$0xff] }
  0xc5   : > { %407 = vst.msk [vmem:[#allocation4 + $0x58] sm:$0xff] %vm15357_vm1, %v15348_v2  ;;  %1544 = vmatpush.bf16.msrb.mxu2 %v10500_v25 }
  0xc6   : > { %v1059_v3 = vpop.f32.mrf.mxu0 }
  0xc7   : > { %v993_v51 = vpop.f32.mrf.mxu3 }
  0xc8   : > { %v1013_v50 = vadd.f32 %v993_v51, %v939_v62 }
  0xca   : > { %v1079_v12 = vadd.f32 %v1059_v3, %v1013_v50  ;;  %v10507_v3 = vld [vmem:[%s15337_s5 + $0x38] sm:$0xff] }
  0xcb   : > { %v921_v27 = vpop.f32.mrf.mxu2  ;;  %v842_v15 = vpop.f32.mrf.mxu1  ;;  %1707 = vmatpush.bf16.msrb.mxu0 %v10507_v3 }
  0xcc   : > { %v940_v41 = vadd.f32 %v921_v27, %v840_v0  ;;  %v843_v32 = vadd.f32 %v842_v15, %v11295_v4  ;;  %v10505_v27 = vld [vmem:[%s15337_s5 + $0x28] sm:$0xff] }
  0xcd   : > { %1621 = vmatpush.bf16.msrb.mxu3 %v10505_v27 }
  0xce   : > { %v11318_v55 = vpop.f32.mrf.mxu0 }
  0xcf   : > { %v995_v56 = vpop.f32.mrf.mxu3 }
  0xd0   : > { %v1014_v51 = vadd.f32 %v995_v56, %v940_v41  ;;  %v11407_v56 = vld [vmem:[%s15336_s4] ss:$0 sm:$0xff] }
  0xd1   : > { %v10504_v41 = vld [vmem:[%s15337_s5 + $0x20] sm:$0xff] }
  0xd2   : > { %1622 = vmatpush.bf16.msrb.mxu3 %v10504_v41 }
  0xd3   : > { %v924_v33 = vpop.f32.mrf.mxu2  ;;  %v11320_v54 = vpop.f32.mrf.mxu1 }
  0xd6   : > { %v11322_v34 = vpop.f32.mrf.mxu0 }
  0xd7   : > { %v11324_v57 = vpop.f32.mrf.mxu3 }
  0xdb   : > { %v11326_v37 = vpop.f32.mrf.mxu2  ;;  %v11328_v5 = vpop.f32.mrf.mxu1 }
  0xde   : > { %v11330_v24 = vpop.f32.mrf.mxu0 }
  0xdf   : > { %v11332_v38 = vpop.f32.mrf.mxu3 }
  0xe3   : > { %v11334_v30 = vpop.f32.mrf.mxu2  ;;  %v11336_v39 = vpop.f32.mrf.mxu1 }
  0xe6   : > { %v11338_v40 = vpop.f32.mrf.mxu0 }
  0xe7   : > { %v11343_v60 = vpop.f32.mrf.mxu3 }
  0xeb   : > { %v11353_v31 = vpop.f32.mrf.mxu2  ;;  %v11355_v35 = vpop.f32.mrf.mxu1 }
  0xee   : > { %v11363_v42 = vpop.f32.mrf.mxu0 }
  0xef   : > { %v11367_v43 = vpop.f32.mrf.mxu3 }
  0xf3   : > { %v11377_v44 = vpop.f32.mrf.mxu2  ;;  %v11379_v48 = vpop.f32.mrf.mxu1 }
  0xf6   : > { %v11381_v28 = vpop.f32.mrf.mxu0 }
  0xf7   : > { %v11383_v61 = vpop.f32.mrf.mxu3 }
  0xfb   : > { %v11385_v58 = vpop.f32.mrf.mxu2  ;;  %v1133_v63 = vpop.f32.mrf.mxu1 }
  0xfc   : > { %v1153_v13 = vadd.f32 %v1133_v63, %v1079_v12  ;;  %v941_v63 = vadd.f32 %v924_v33, %v843_v32  ;;  %v10506_v33 = vld [vmem:[%s15337_s5 + $0x30] sm:$0xff] }
  0xfd   : > { %1708 = vmatpush.bf16.msrb.mxu0 %v10506_v33 }
  0xfe   : > { %v11387_v1 = vpop.f32.mrf.mxu0  ;;  %v1015_v12 = vadd.f32 %v11324_v57, %v941_v63  ;;  %v10509_v57 = vld [vmem:[%s15337_s5 + $0x48] sm:$0xff] }
  0xff   : > { %v11389_v11 = vpop.f32.mrf.mxu3  ;;  %1785 = vmatpush.bf16.msra.mxu1 %v10509_v57 }
 0x103   : > { %v1207_v2 = vpop.f32.mrf.mxu2  ;;  %v1135_v59 = vpop.f32.mrf.mxu1 }
 0x104   : > { %v1227_v18 = vadd.f32 %v1207_v2, %v1153_v13  ;;  %v1080_v2 = vadd.f32 %v11318_v55, %v1014_v51 }
 0x106   : > { %v1347_v21 = vpop.f32.mrf.mxu0  ;;  %v1154_v15 = vadd.f32 %v1135_v59, %v1080_v2  ;;  %v845_v59 = vadd.f32 %v11320_v54, %v11305_v10 }
 0x107   : > { %v1273_v62 = vpop.f32.mrf.mxu3 }
 0x108   : > { %v1293_v50 = vadd.f32 %v1273_v62, %v1227_v18  ;;  %v942_v18 = vadd.f32 %v11326_v37, %v845_v59  ;;  %v848_v37 = vadd.f32 %v11328_v5, %v11303_v6 }
 0x10a   : > { %v1367_v4 = vadd.f32 %v1347_v21, %v1293_v50  ;;  %v1081_v21 = vadd.f32 %v11322_v34, %v1015_v12  ;;  %v1016_v10 = vadd.f32 %v11332_v38, %v942_v18 }
 0x10b   : > { %v1209_v0 = vpop.f32.mrf.mxu2  ;;  %v1138_v22 = vpop.f32.mrf.mxu1 }
 0x10c   : > { %v1379_v13 = vadd.f32 %v11407_v56, %v1367_v4  ;;  %v1228_v25 = vadd.f32 %v1209_v0, %v1154_v15  ;;  %v1155_v27 = vadd.f32 %v1138_v22, %v1081_v21  ;;  %v943_v0 = vadd.f32 %v11334_v30, %v848_v37  ;;  %v11443_v30 = vld [vmem:[#allocation4 + $0x8] sm:$0xff] }
 0x10d   : > { %v1082_v38 = vadd.f32 %v11330_v24, %v1016_v10 }
 0x10e   : > { %1387 = vst.msk [vmem:[#allocation3] sm:$0xff] %vm15357_vm1, %v1379_v13  ;;  %v1349_v55 = vpop.f32.mrf.mxu0  ;;  %v1017_v6 = vadd.f32 %v11343_v60, %v943_v0 }
 0x10f   : > { %v1275_v51 = vpop.f32.mrf.mxu3 }
 0x110   : > { %v1294_v32 = vadd.f32 %v1275_v51, %v1228_v25  ;;  %v1423_v25 = vld [vmem:[#allocation4 + $0x7] sm:$0xff] }
 0x112   : > { %v1368_v62 = vadd.f32 %v1349_v55, %v1294_v32  ;;  %v850_v55 = vadd.f32 %v11336_v39, %v11311_v36  ;;  %v11449_v32 = vsel %vm11019_vm2, %v1423_v25, 0.0  ;;  %v1083_v39 = vadd.f32 %v11338_v40, %v1017_v6 }
 0x113   : > { %v1212_v3 = vpop.f32.mrf.mxu2  ;;  %v1140_v63 = vpop.f32.mrf.mxu1 }
 0x114   : > { %v1380_v54 = vadd.f32 %v11407_v56, %v1368_v62  ;;  %v1229_v50 = vadd.f32 %v1212_v3, %v1155_v27  ;;  %v1156_v33 = vadd.f32 %v1140_v63, %v1082_v38  ;;  %v944_v60 = vadd.f32 %v11353_v31, %v850_v55 }
 0x115   : > { %v11428_v2 = vld [vmem:[#allocation3] sm:$0xff] }
 0x116   : > { %v1403_v34 = vmax.f32 %v11428_v2, 0.0  ;;  %1388 = vst.msk [vmem:[#allocation3 + $0x8] sm:$0xff] %vm15357_vm1, %v1380_v54  ;;  %v1352_v4 = vpop.f32.mrf.mxu0  ;;  %v1018_v31 = vadd.f32 %v11367_v43, %v944_v60 }
 0x117   : > { %v1278_v15 = vpop.f32.mrf.mxu3 }
 0x118   : > { %1411 = vst.msk [vmem:[#allocation4 + $0x10] sm:$0xff] %vm15357_vm1, %v1403_v34  ;;  %v1295_v22 = vadd.f32 %v1278_v15, %v1229_v50  ;;  %v853_v15 = vadd.f32 %v11355_v35, %v11308_v17 }
 0x11a   : > { %v1369_v41 = vadd.f32 %v1352_v4, %v1295_v22  ;;  %v945_v43 = vadd.f32 %v11377_v44, %v853_v15 }
 0x11b   : > { %v1214_v12 = vpop.f32.mrf.mxu2  ;;  %v1143_v13 = vpop.f32.mrf.mxu1 }
 0x11c   : > { %v1381_v5 = vadd.f32 %v11407_v56, %v1369_v41  ;;  %v1230_v59 = vadd.f32 %v1214_v12, %v1156_v33  ;;  %v1157_v54 = vadd.f32 %v1143_v13, %v1083_v39  ;;  %v1084_v33 = vadd.f32 %v11363_v42, %v1018_v31 }
 0x11d   : > { %v11441_v51 = vld [vmem:[#allocation3 + $0x8] sm:$0xff] }
 0x11e   : > { %v1404_v18 = vmax.f32 %v11441_v51, 0.0  ;;  %1389 = vst.msk [vmem:[#allocation3 + $0x10] sm:$0xff] %vm15357_vm1, %v1381_v5  ;;  %v1354_v24 = vpop.f32.mrf.mxu0 }
 0x11f   : > { %v1280_v21 = vpop.f32.mrf.mxu3  ;;  %v11452_v57 = vld [vmem:[#allocation4 + $0x10] sm:$0xff] }
 0x120   : > { %v1424_v62 = vld [vmem:[#allocation4 + $0xf] sm:$0xff]  ;;  %1412 = vst.msk [vmem:[#allocation4 + $0x18] sm:$0xff] %vm15357_vm1, %v1404_v18  ;;  %v1296_v36 = vadd.f32 %v1280_v21, %v1230_v59  ;;  %v1456_v27 = vpack.c.bf16 %v11452_v57, %v11443_v30  ;;  %v1019_v18 = vadd.f32 %v11383_v61, %v945_v43 }
 0x121   : > { %v1432_v3 = vsel %vm11023_vm3, %v1424_v62, 0.0  ;;  %v1571_v4 = vld [vmem:[#allocation4 + $0x9] sm:$0xff]  ;;  %v1665_v44 = vsel %vm11019_vm2, %v1424_v62, 0.0  ;;  %v855_v62 = vadd.f32 %v11379_v48, %v11313_v19  ;;  %vm15509_vm2 = vnez %v15480_v52 }
 0x122   : > { %v1439_v63 = vpack.c.bf16 %v1432_v3, %v11449_v32  ;;  %v1370_v10 = vadd.f32 %v1354_v24, %v1296_v36  ;;  %9217 = vmatmul.msk.bf16.vlgmr.msrb.gmra.mxu1 %vm15357_vm1, %v1456_v27  ;;  %v1579_v13 = vsel %vm11030_vm4, %v1571_v4, 0.0  ;;  %v10513_v43 = vld [vmem:[%s15337_s5 + $0x68] sm:$0xff] }
 0x123   : > { %v1217_v50 = vpop.f32.mrf.mxu2  ;;  %v1145_v37 = vpop.f32.mrf.mxu1  ;;  %v946_v61 = vadd.f32 %v11385_v58, %v855_v62  ;;  %1957 = vmatpush.bf16.msra.mxu3 %v10513_v43 }
 0x124   : > { %9229 = vmatmul.msk.bf16.vlgmr.msrb.gmra.mxu2 %vm15357_vm1, %v1439_v63  ;;  %v1382_v40 = vadd.f32 %v11407_v56, %v1370_v10  ;;  %v1231_v34 = vadd.f32 %v1217_v50, %v1157_v54  ;;  %v1158_v55 = vadd.f32 %v1145_v37, %v1084_v33  ;;  %v1085_v10 = vadd.f32 %v11381_v28, %v1019_v18  ;;  %v10508_v37 = vld [vmem:[%s15337_s5 + $0x40] sm:$0xff] }
 0x125   : > { %v11467_v0 = vld [vmem:[#allocation3 + $0x10] sm:$0xff]  ;;  %v1020_v15 = vadd.f32 %v11389_v11, %v946_v61  ;;  %1786 = vmatpush.bf16.msra.mxu1 %v10508_v37 }
 0x126   : > { %v1405_v22 = vmax.f32 %v11467_v0, 0.0  ;;  %1390 = vst.msk [vmem:[#allocation3 + $0x18] sm:$0xff] %vm15357_vm1, %v1382_v40  ;;  %v1357_v38 = vpop.f32.mrf.mxu0  ;;  %v10510_v61 = vld [vmem:[%s15337_s5 + $0x50] sm:$0xff] }
 0x127   : > { %v1283_v41 = vpop.f32.mrf.mxu3  ;;  %v11473_v12 = vld [vmem:[#allocation4 + $0x11] sm:$0xff] }
 0x128   : > { %v11477_v25 = vld [vmem:[#allocation4 + $0x17] sm:$0xff]  ;;  %1413 = vst.msk [vmem:[#allocation4 + $0x20] sm:$0xff] %vm15357_vm1, %v1405_v22  ;;  %v1297_v17 = vadd.f32 %v1283_v41, %v1231_v34  ;;  %v1580_v35 = vsel %vm11034_vm5, %v11473_v12, 0.0 }
 0x129   : > { %v1666_v42 = vsel %vm11023_vm3, %v11477_v25, 0.0  ;;  %v1587_v6 = vpack.c.bf16 %v1580_v35, %v1579_v13  ;;  %v11500_v54 = vld [vmem:[#allocation4 + $0x18] sm:$0xff]  ;;  %v1433_v58 = vsel %vm11078_vm6, %v11477_v25, 0.0 }
 0x12a   : > { %v1673_v5 = vpack.c.bf16 %v1666_v42, %v1665_v44  ;;  %v1371_v59 = vadd.f32 %v1357_v38, %v1297_v17  ;;  %v10511_v38 = vld [vmem:[%s15337_s5 + $0x58] sm:$0xff] }
 0x12b   : > { %9245 = vmatmul.msk.bf16.vlgmr.msrb.gmra.mxu3 %vm15357_vm1, %v1587_v6  ;;  %v1219_v24 = vpop.f32.mrf.mxu2  ;;  %v1148_v36 = vpop.f32.mrf.mxu1  ;;  %1871 = vmatpush.bf16.msra.mxu2 %v10511_v38  ;;  %v1086_v6 = vadd.f32 %v11387_v1, %v1020_v15 }
 0x12c   : > { %9261 = vmatmul.msk.bf16.vlgmr.msrb.gmra.mxu0 %vm15357_vm1, %v1673_v5  ;;  %v1383_v60 = vadd.f32 %v11407_v56, %v1371_v59  ;;  %v1232_v21 = vadd.f32 %v1219_v24, %v1158_v55  ;;  %v1159_v4 = vadd.f32 %v1148_v36, %v1085_v10 }
 0x12d   : > { %v11494_v39 = vld [vmem:[#allocation3 + $0x18] sm:$0xff] }
 0x12e   : > { %v1406_v27 = vmax.f32 %v11494_v39, 0.0  ;;  %1391 = vst.msk [vmem:[#allocation3 + $0x20] sm:$0xff] %vm15357_vm1, %v1383_v60  ;;  %v1359_v3 = vpop.f32.mrf.mxu0 }
 0x12f   : > { %v1285_v63 = vpop.f32.mrf.mxu3  ;;  %v11502_v31 = vld [vmem:[#allocation4 + $0x20] sm:$0xff]  ;;  %1872 = vmatpush.bf16.msra.mxu2 %v10510_v61 }
 0x130   : > { %v11504_v50 = vld [vmem:[#allocation4 + $0x1f] sm:$0xff]  ;;  %1414 = vst.msk [vmem:[#allocation4 + $0x28] sm:$0xff] %vm15357_vm1, %v1406_v27  ;;  %v1298_v19 = vadd.f32 %v1285_v63, %v1232_v21  ;;  %v11509_v48 = vpack.c.bf16 %v11502_v31, %v11500_v54 }
 0x131   : > { %v1434_v28 = vsel %vm11082_vm7, %v11504_v50, 0.0  ;;  %v11531_v13 = vld [vmem:[#allocation4 + $0x19] sm:$0xff]  ;;  %v1667_v60 = vsel %vm11078_vm6, %v11504_v50, 0.0 }
 0x132   : > { %v1440_v40 = vpack.c.bf16 %v1434_v28, %v1433_v58  ;;  %v1372_v34 = vadd.f32 %v1359_v3, %v1298_v19  ;;  %9218 = vmatmul.msk.bf16.gmra.mxu1 %vm15357_vm1, %v11509_v48  ;;  %v1581_v59 = vsel %vm15509_vm2, %v11531_v13, 0.0  ;;  %v10515_v63 = vld [vmem:[%s15337_s5 + $0x78] sm:$0xff] }
 0x133   : > { %v1222_v22 = vpop.f32.mrf.mxu2  ;;  %v1150_v35 = vpop.f32.mrf.mxu1  ;;  %2035 = vmatpush.bf16.msra.mxu0 %v10515_v63 }
 0x134   : > { %9230 = vmatmul.msk.bf16.gmra.mxu2 %vm15357_vm1, %v1440_v40  ;;  %v1384_v41 = vadd.f32 %v11407_v56, %v1372_v34  ;;  %v1233_v33 = vadd.f32 %v1222_v22, %v1159_v4  ;;  %v1160_v27 = vadd.f32 %v1150_v35, %v1086_v6  ;;  %v10517_v35 = vld [vmem:[%s15337_s5 + $0x88] sm:$0xff] }
 0x135   : > { %v11533_v17 = vld [vmem:[#allocation3 + $0x20] sm:$0xff]  ;;  %2121 = vmatpush.bf16.msrb.mxu1 %v10517_v35 }
 0x136   : > { %v1407_v11 = vmax.f32 %v11533_v17, 0.0  ;;  %1392 = vst.msk [vmem:[#allocation3 + $0x28] sm:$0xff] %vm15357_vm1, %v1384_v41  ;;  %v1362_v44 = vpop.f32.mrf.mxu0 }
 0x137   : > { %v1288_v42 = vpop.f32.mrf.mxu3  ;;  %v11538_v5 = vld [vmem:[#allocation4 + $0x21] sm:$0xff] }
 0x138   : > { %v11543_v55 = vld [vmem:[#allocation4 + $0x27] sm:$0xff]  ;;  %1415 = vst.msk [vmem:[#allocation4 + $0x30] sm:$0xff] %vm15357_vm1, %v1407_v11  ;;  %v1299_v18 = vadd.f32 %v1288_v42, %v1233_v33  ;;  %v1582_v24 = vsel %vm11094_vm9, %v11538_v5, 0.0  ;;  %v10514_v42 = vld [vmem:[%s15337_s5 + $0x70] sm:$0xff] }
 0x139   : > { %v1668_v1 = vsel %vm11082_vm7, %v11543_v55, 0.0  ;;  %v1588_v21 = vpack.c.bf16 %v1582_v24, %v1581_v59  ;;  %v11568_v40 = vld [vmem:[#allocation4 + $0x28] sm:$0xff]  ;;  %v1435_v38 = vsel %vm11130_vm10, %v11543_v55, 0.0  ;;  %2036 = vmatpush.bf16.msra.mxu0 %v10514_v42 }
 0x13a   : > { %v1674_v36 = vpack.c.bf16 %v1668_v1, %v1667_v60  ;;  %v1373_v62 = vadd.f32 %v1362_v44, %v1299_v18  ;;  %v10512_v44 = vld [vmem:[%s15337_s5 + $0x60] sm:$0xff] }
 0x13b   : > { %9246 = vmatmul.msk.bf16.gmra.mxu3 %vm15357_vm1, %v1588_v21  ;;  %v1224_v3 = vpop.f32.mrf.mxu2 }
 0x13c   : > { %9262 = vmatmul.msk.bf16.gmra.mxu0 %vm15357_vm1, %v1674_v36  ;;  %v1385_v10 = vadd.f32 %v11407_v56, %v1373_v62  ;;  %v1234_v19 = vadd.f32 %v1224_v3, %v1160_v27  ;;  %1958 = vmatpush.bf16.msra.mxu3 %v10512_v44 }
 0x13d   : > { %v11564_v58 = vld [vmem:[#allocation3 + $0x28] sm:$0xff] }
 0x13e   : > { %v1408_v28 = vmax.f32 %v11564_v58, 0.0  ;;  %1393 = vst.msk [vmem:[#allocation3 + $0x30] sm:$0xff] %vm15357_vm1, %v1385_v10  ;;  %v1364_v41 = vpop.f32.mrf.mxu0 }
 0x13f   : > { %v1290_v37 = vpop.f32.mrf.mxu3  ;;  %v11570_v34 = vld [vmem:[#allocation4 + $0x30] sm:$0xff] }
 0x140   : > { %v11572_v4 = vld [vmem:[#allocation4 + $0x2f] sm:$0xff]  ;;  %1416 = vst.msk [vmem:[#allocation4 + $0x38] sm:$0xff] %vm15357_vm1, %v1408_v28  ;;  %v1300_v15 = vadd.f32 %v1290_v37, %v1234_v19  ;;  %v11577_v22 = vpack.c.bf16 %v11570_v34, %v11568_v40 }
 0x141   : > { %v1436_v43 = vsel %vm15508_vm8, %v11572_v4, 0.0  ;;  %v11600_v18 = vld [vmem:[#allocation4 + $0x29] sm:$0xff]  ;;  %v1669_v36 = vsel %vm11130_vm10, %v11572_v4, 0.0 }
 0x142   : > { %v1441_v33 = vpack.c.bf16 %v1436_v43, %v1435_v38  ;;  %v1374_v11 = vadd.f32 %v1364_v41, %v1300_v15  ;;  %9219 = vmatmul.msk.bf16.gmra.mxu1 %vm15357_vm1, %v11577_v22 }
 0x144   : > { %9231 = vmatmul.msk.bf16.gmra.mxu2 %vm15357_vm1, %v1441_v33  ;;  %v1386_v6 = vadd.f32 %v11407_v56, %v1374_v11  ;;  %v1583_v56 = vsel %vm11142_vm12, %v11600_v18, 0.0 }
 0x145   : > { %v11598_v59 = vld [vmem:[#allocation3 + $0x30] sm:$0xff] }
 0x146   : > { %v1409_v24 = vmax.f32 %v11598_v59, 0.0  ;;  %1394 = vst.msk [vmem:[#allocation3 + $0x38] sm:$0xff] %vm15357_vm1, %v1386_v6 }
 0x147   : > { %v11604_v60 = vld [vmem:[#allocation4 + $0x31] sm:$0xff] }
 0x148   : > { %v11606_v1 = vld [vmem:[#allocation4 + $0x37] sm:$0xff]  ;;  %1417 = vst.msk [vmem:[#allocation4 + $0x40] sm:$0xff] %vm15357_vm1, %v1409_v24  ;;  %v1584_v21 = vsel %vm11146_vm13, %v11604_v60, 0.0 }
 0x149   : > { %v1670_v62 = vsel %vm15508_vm8, %v11606_v1, 0.0  ;;  %v1589_v27 = vpack.c.bf16 %v1584_v21, %v1583_v56  ;;  %v1454_v10 = vld [vmem:[#allocation4 + $0x38] sm:$0xff]  ;;  %v1437_v15 = vsel %vm11180_vm14, %v11606_v1, 0.0 }
 0x14a   : > { %v1675_v3 = vpack.c.bf16 %v1670_v62, %v1669_v36  ;;  %v1830_v36 = vsel %vm11034_vm5, %v11531_v13, 0.0  ;;  %v1751_v62 = vpack.c.bf16 %v11500_v54, %v11452_v57  ;;  %vm15512_vm5 = vnez %v15462_v7 }
 0x14b   : > { %9247 = vmatmul.msk.bf16.gmra.mxu3 %vm15357_vm1, %v1589_v27  ;;  %v1829_v27 = vsel %vm11030_vm4, %v11473_v12, 0.0  ;;  %v1915_v57 = vsel %vm15512_vm5, %v11477_v25, 0.0  ;;  %v1832_v12 = vsel %vm11094_vm9, %v11600_v18, 0.0  ;;  %v1918_v25 = vsel %vm11082_vm7, %v11572_v4, 0.0 }
 0x14c   : > { %9263 = vmatmul.msk.bf16.gmra.mxu0 %vm15357_vm1, %v1675_v3  ;;  %v1837_v3 = vpack.c.bf16 %v1830_v36, %v1829_v27  ;;  %v1833_v4 = vsel %vm11142_vm12, %v11604_v60, 0.0 }
 0x14d   : > { %v11623_v61 = vld [vmem:[#allocation3 + $0x38] sm:$0xff] }
 0x14e   : > { %15510 = vst [vmem:[#allocation24_spill] sm:$0xff] %v11623_v61  ;;  %v1410_v63 = vmax.f32 %v11623_v61, 0.0 }
 0x14f   : > { %v1455_v19 = vld [vmem:[#allocation4 + $0x40] sm:$0xff] }
 0x150   : > { %v1430_v28 = vld [vmem:[#allocation4 + $0x3f] sm:$0xff]  ;;  %1418 = vst.msk [vmem:[#allocation4 + $0x48] sm:$0xff] %vm15357_vm1, %v1410_v63  ;;  %v1459_v37 = vpack.c.bf16 %v1455_v19, %v1454_v10 }
 0x151   : > { %v1438_v38 = vsel %vm11184_vm15, %v1430_v28, 0.0  ;;  %v11634_v41 = vld [vmem:[#allocation4 + $0x39] sm:$0xff]  ;;  %v1671_v6 = vsel %vm11180_vm14, %v1430_v28, 0.0 }
 0x152   : > { %v1442_v43 = vpack.c.bf16 %v1438_v38, %v1437_v15  ;;  %9220 = vmatmul.msk.bf16.gmra.mxu1 %vm15357_vm1, %v1459_v37  ;;  %v1585_v35 = vsel %vm11190_vm0, %v11634_v41, 0.0  ;;  %v10516_v63 = vld [vmem:[%s15337_s5 + $0x80] sm:$0xff]  ;;  %v1916_v15 = vsel %vm11023_vm3, %v11504_v50, 0.0  ;;  %v1752_v38 = vpack.c.bf16 %v11568_v40, %v11502_v31 }
 0x153   : > { %2122 = vmatpush.bf16.msrb.mxu1 %v10516_v63  ;;  %v1923_v54 = vpack.c.bf16 %v1916_v15, %v1915_v57  ;;  %v1831_v50 = vsel %vm15509_vm2, %v11538_v5, 0.0  ;;  %v1834_v31 = vsel %vm11146_vm13, %v11634_v41, 0.0  ;;  %v1753_v40 = vpack.c.bf16 %v1454_v10, %v11570_v34 }
 0x154   : > { %9232 = vmatmul.msk.bf16.gmra.mxu2 %vm15357_vm1, %v1442_v43  ;;  %v1838_v43 = vpack.c.bf16 %v1832_v12, %v1831_v50  ;;  %v2082_v50 = vsel %vm11094_vm9, %v11604_v60, 0.0 }
 0x157   : > { %v11636_v33 = vld [vmem:[#allocation4 + $0x41] sm:$0xff]  ;;  %v11707_v34 = vld [vmem:[#allocation4 + $0x49] sm:$0xff] }
 0x158   : > { %v1664_v11 = vld [vmem:[#allocation4 + $0x47] sm:$0xff]  ;;  %v1586_v42 = vsel %vm11194_vm11, %v11636_v33, 0.0 }
 0x159   : > { %v1672_v24 = vsel %vm11184_vm15, %v1664_v11, 0.0  ;;  %v1590_v56 = vpack.c.bf16 %v1586_v42, %v1585_v35  ;;  %v1839_v42 = vpack.c.bf16 %v1834_v31, %v1833_v4  ;;  %v1750_v10 = vld [vmem:[#allocation4 + $0x48] sm:$0xff] }
 0x15a   : > { %v1676_v21 = vpack.c.bf16 %v1672_v24, %v1671_v6  ;;  %v1835_v24 = vsel %vm11190_vm0, %v11636_v33, 0.0 }
 0x15b   : > { %9248 = vmatmul.msk.bf16.gmra.mxu3 %vm15357_vm1, %v1590_v56  ;;  %v1754_v56 = vpack.c.bf16 %v1750_v10, %v1455_v19 }
 0x15c   : > { %9264 = vmatmul.msk.bf16.gmra.mxu0 %vm15357_vm1, %v1676_v21 }
 0x162   : > { %9277 = vmatmul.msk.bf16.vlgmr.msra.gmra.mxu1 %vm15357_vm1, %v1751_v62  ;;  %v11721_v62 = vld [vmem:[#allocation4 + $0x50] sm:$0xff] }
 0x163   : > { %15513 = vst [vmem:[#allocation25_spill] sm:$0xff] %v11721_v62 }
 0x164   : > { %9293 = vmatmul.msk.bf16.vlgmr.msra.gmra.mxu2 %vm15357_vm1, %v1837_v3  ;;  %v2004_v3 = vpack.c.bf16 %v11721_v62, %v1750_v10 }
 0x16b   : > { %9309 = vmatmul.msk.bf16.vlgmr.msra.gmra.mxu3 %vm15357_vm1, %v1923_v54 }
 0x16c   : > { %9325 = vmatmul.msk.bf16.vlgmr.msra.gmra.mxu0 %vm15357_vm1, %v11509_v48  ;;  %v1917_v48 = vsel %vm11078_vm6, %v11543_v55, 0.0  ;;  %v1920_v55 = vsel %vm15508_vm8, %v1430_v28, 0.0  ;;  %v1836_v28 = vsel %vm11194_vm11, %v11707_v34, 0.0  ;;  %vm15514_vm8 = vnez %v15471_v16 }
 0x16d   : > { %v1924_v35 = vpack.c.bf16 %v1918_v25, %v1917_v48  ;;  %v1840_v21 = vpack.c.bf16 %v1836_v28, %v1835_v24  ;;  %v2080_v19 = vsel %vm15514_vm8, %v11538_v5, 0.0 }
 0x172   : > { %9278 = vmatmul.msk.bf16.gmra.mxu1 %vm15357_vm1, %v1752_v38 }
 0x174   : > { %9294 = vmatmul.msk.bf16.gmra.mxu2 %vm15357_vm1, %v1838_v43 }
 0x17b   : > { %9310 = vmatmul.msk.bf16.gmra.mxu3 %vm15357_vm1, %v1924_v35 }
 0x17c   : > { %9326 = vmatmul.msk.bf16.gmra.mxu0 %vm15357_vm1, %v11577_v22  ;;  %v1919_v22 = vsel %vm11130_vm10, %v11606_v1, 0.0  ;;  %v1914_v1 = vld [vmem:[#allocation4 + $0x4f] sm:$0xff] }
 0x17d   : > { %v1925_v6 = vpack.c.bf16 %v1920_v55, %v1919_v22  ;;  %v1922_v36 = vsel %vm11184_vm15, %v1914_v1, 0.0 }
 0x182   : > { %9279 = vmatmul.msk.bf16.gmra.mxu1 %vm15357_vm1, %v1753_v40 }
 0x184   : > { %9295 = vmatmul.msk.bf16.gmra.mxu2 %vm15357_vm1, %v1839_v42 }
 0x18b   : > { %9311 = vmatmul.msk.bf16.gmra.mxu3 %vm15357_vm1, %v1925_v6  ;;  %v2084_v6 = vsel %vm11146_vm13, %v11636_v33, 0.0 }
 0x18c   : > { %9327 = vmatmul.msk.bf16.gmra.mxu0 %vm15357_vm1, %v1459_v37  ;;  %v1921_v37 = vsel %vm11180_vm14, %v1664_v11, 0.0  ;;  %v2079_v11 = vsel %vm11030_vm4, %v11531_v13, 0.0  ;;  %v2081_v13 = vsel %vm15509_vm2, %v11600_v18, 0.0 }
 0x18d   : > { %v1926_v27 = vpack.c.bf16 %v1922_v36, %v1921_v37  ;;  %v2087_v15 = vpack.c.bf16 %v2080_v19, %v2079_v11  ;;  %v2088_v31 = vpack.c.bf16 %v2082_v50, %v2081_v13  ;;  %v2078_v19 = vld [vmem:[#allocation4 + $0x51] sm:$0xff]  ;;  %v2085_v11 = vsel %vm11190_vm0, %v11707_v34, 0.0  ;;  %v2164_v50 = vld [vmem:[%s15338_s6] sm:$0xf] }
 0x18e   : > { %vm15516_vm0 = vcmask 261120  }
 0x192   : > { %9280 = vmatmul.msk.bf16.gmra.mxu1 %vm15357_vm1, %v1754_v56  ;;  %v2083_v56 = vsel %vm11142_vm12, %v11634_v41, 0.0  ;;  %v11770_v41 = vsel %vm11194_vm11, %v2078_v19, 0.0 }
 0x193   : > { %15515 = vst [vmem:[#allocation26_spill] sm:$0xff] %v11770_v41 }
 0x194   : > { %9296 = vmatmul.msk.bf16.gmra.mxu2 %vm15357_vm1, %v1840_v21  ;;  %v2089_v21 = vpack.c.bf16 %v2084_v6, %v2083_v56 }
 0x19b   : > { %9312 = vmatmul.msk.bf16.gmra.mxu3 %vm15357_vm1, %v1926_v27 }
 0x19c   : > { %9328 = vmatmul.msk.bf16.gmra.mxu0 %vm15357_vm1, %v2004_v3 }
 0x19f   : > { %v1493_v63 = vpop.f32.mrf.mxu1 }
 0x1a2   : > { %9341 = vmatmul.msk.bf16.vlgmr.msrb.gmra.mxu1 %vm15357_vm1, %v2087_v15 }
 0x1a7   : > { %v1546_v57 = vpop.f32.mrf.mxu2  ;;  %v11733_v12 = vpop.f32.mrf.mxu1 }
 0x1a8   : > { %v1547_v54 = vadd.f32 %v1546_v57, %v1493_v63 }
 0x1a9   : > { %v1710_v38 = vpop.f32.mrf.mxu0 }
 0x1ae   : > { %v1624_v5 = vpop.f32.mrf.mxu3 }
 0x1af   : > { %v11738_v43 = vpop.f32.mrf.mxu2  ;;  %v1644_v25 = vadd.f32 %v1624_v5, %v1547_v54  ;;  %v1498_v48 = vpop.f32.mrf.mxu1  ;;  %v2090_v5 = vpack.c.bf16 %v11770_v41, %v2085_v11 }
 0x1b1   : > { %v11743_v35 = vpop.f32.mrf.mxu0  ;;  %v1730_v40 = vadd.f32 %v1710_v38, %v1644_v25 }
 0x1b2   : > { %9342 = vmatmul.msk.bf16.gmra.mxu1 %vm15357_vm1, %v2088_v31 }
 0x1b6   : > { %v11746_v42 = vpop.f32.mrf.mxu3 }
 0x1b7   : > { %v1551_v4 = vpop.f32.mrf.mxu2  ;;  %v11748_v60 = vpop.f32.mrf.mxu1 }
 0x1b8   : > { %v1552_v55 = vadd.f32 %v1551_v4, %v1498_v48 }
 0x1b9   : > { %v1715_v22 = vpop.f32.mrf.mxu0 }
 0x1be   : > { %v1629_v18 = vpop.f32.mrf.mxu3 }
 0x1bf   : > { %v11753_v10 = vpop.f32.mrf.mxu2  ;;  %v1646_v24 = vadd.f32 %v1629_v18, %v1552_v55  ;;  %v1503_v28 = vpop.f32.mrf.mxu1 }
 0x1c1   : > { %v11758_v1 = vpop.f32.mrf.mxu0  ;;  %v1732_v37 = vadd.f32 %v1715_v22, %v1646_v24 }
 0x1c2   : > { %9343 = vmatmul.msk.bf16.gmra.mxu1 %vm15357_vm1, %v2089_v21  ;;  %vm15377_vm1 = vcmask 1043456  }
 0x1c3   : > { %v2180_v25 = vsel %vm15377_vm1, %v2164_v50, 0 }
 0x1c4   : > { %2189 = vmatpush.bf16.msrb.mxu2 %v2180_v25 }
 0x1c6   : > { %v11761_v27 = vpop.f32.mrf.mxu3 }
 0x1c7   : > { %v1556_v36 = vpop.f32.mrf.mxu2  ;;  %v11763_v33 = vpop.f32.mrf.mxu1 }
 0x1c8   : > { %v1557_v3 = vadd.f32 %v1556_v36, %v1503_v28 }
 0x1c9   : > { %v1720_v63 = vpop.f32.mrf.mxu0 }
 0x1ce   : > { %v1634_v57 = vpop.f32.mrf.mxu3 }
 0x1cf   : > { %v11772_v15 = vpop.f32.mrf.mxu2  ;;  %v1648_v54 = vadd.f32 %v1634_v57, %v1557_v3  ;;  %v1508_v38 = vpop.f32.mrf.mxu1 }
 0x1d1   : > { %v1734_v34 = vadd.f32 %v1720_v63, %v1648_v54  ;;  %v11780_v48 = vpop.f32.mrf.mxu0 }
 0x1d2   : > { %9344 = vmatmul.msk.bf16.gmra.mxu1 %vm15516_vm0, %v2090_v5  ;;  %vm15376_vm0 = vcmask 64512  }
 0x1d6   : > { %v11782_v31 = vpop.f32.mrf.mxu3 }
 0x1d7   : > { %v1561_v13 = vpop.f32.mrf.mxu2  ;;  %v11784_v55 = vpop.f32.mrf.mxu1 }
 0x1d8   : > { %v1562_v4 = vadd.f32 %v1561_v13, %v1508_v38 }
 0x1d9   : > { %v1725_v24 = vpop.f32.mrf.mxu0 }
 0x1de   : > { %v1639_v22 = vpop.f32.mrf.mxu3 }
 0x1df   : > { %v1650_v6 = vadd.f32 %v1639_v22, %v1562_v4  ;;  %v1788_v18 = vpop.f32.mrf.mxu1  ;;  %v11786_v63 = vpop.f32.mrf.mxu2 }
 0x1e0   : > { %v1808_v28 = vadd.f32 %v1788_v18, %v1730_v40 }
 0x1e1   : > { %v1736_v56 = vadd.f32 %v1725_v24, %v1650_v6  ;;  %v11790_v50 = vpop.f32.mrf.mxu0 }
 0x1e6   : > { %v11788_v11 = vpop.f32.mrf.mxu3 }
 0x1e7   : > { %v1790_v21 = vpop.f32.mrf.mxu1  ;;  %v1874_v38 = vpop.f32.mrf.mxu2 }
 0x1e8   : > { %v1894_v62 = vadd.f32 %v1874_v38, %v1808_v28 }
 0x1e9   : > { %v2038_v13 = vpop.f32.mrf.mxu0 }
 0x1ee   : > { %v1960_v25 = vpop.f32.mrf.mxu3 }
 0x1ef   : > { %v1793_v36 = vpop.f32.mrf.mxu1  ;;  %v1876_v40 = vpop.f32.mrf.mxu2 }
 0x1f0   : > { %v1810_v3 = vadd.f32 %v1793_v36, %v1732_v37  ;;  %v1549_v37 = vadd.f32 %v11738_v43, %v11733_v12  ;;  %v1554_v12 = vadd.f32 %v11753_v10, %v11748_v60 }
 0x1f1   : > { %v2040_v36 = vpop.f32.mrf.mxu0 }
 0x1f2   : > { %v1645_v24 = vadd.f32 %v11746_v42, %v1549_v37  ;;  %v1647_v23 = vadd.f32 %v11761_v27, %v1554_v12 }
 0x1f6   : > { %v1962_v6 = vpop.f32.mrf.mxu3 }
 0x1f7   : > { %v1795_v19 = vpop.f32.mrf.mxu1 }
 0x1f9   : > { %v2043_v45 = vpop.f32.mrf.mxu0 }
 0x1fe   : > { %v1965_v41 = vpop.f32.mrf.mxu3 }
 0x1ff   : > { %v1798_v57 = vpop.f32.mrf.mxu1 }
 0x200   : > { %v1812_v54 = vadd.f32 %v1798_v57, %v1734_v34  ;;  %v1879_v34 = vpop.f32.mrf.mxu2  ;;  %v1731_v57 = vadd.f32 %v11743_v35, %v1645_v24 }
 0x202   : > { %v1809_v44 = vadd.f32 %v1790_v21, %v1731_v57  ;;  %v1896_v21 = vadd.f32 %v1879_v34, %v1810_v3 }
 0x204   : > { %v1895_v47 = vadd.f32 %v1876_v40, %v1809_v44  ;;  %v1733_v44 = vadd.f32 %v11758_v1, %v1647_v23 }
 0x206   : > { %v1967_v42 = vpop.f32.mrf.mxu3  ;;  %v1811_v38 = vadd.f32 %v1795_v19, %v1733_v44 }
 0x207   : > { %v1800_v5 = vpop.f32.mrf.mxu1 }
 0x208   : > { %v1881_v26 = vpop.f32.mrf.mxu2 }
 0x20e   : > { %v1970_v10 = vpop.f32.mrf.mxu3 }
 0x20f   : > { %v1803_v4 = vpop.f32.mrf.mxu1 }
 0x210   : > { %v11792_v22 = vadd.f32 %v1803_v4, %v1736_v56  ;;  %v1980_v56 = vadd.f32 %v1960_v25, %v1894_v62  ;;  %v1981_v4 = vadd.f32 %v1962_v6, %v1895_v47  ;;  %v2045_v47 = vpop.f32.mrf.mxu0  ;;  %v1884_v25 = vpop.f32.mrf.mxu2 }
 0x212   : > { %v2058_v29 = vadd.f32 %v2038_v13, %v1980_v56  ;;  %v2059_v61 = vadd.f32 %v2040_v36, %v1981_v4  ;;  %v1898_v4 = vadd.f32 %v1884_v25, %v1812_v54 }
 0x216   : > { %v1972_v56 = vpop.f32.mrf.mxu3 }
 0x217   : > { %v11796_v18 = vpop.f32.mrf.mxu1 }
 0x218   : > { %v2048_v36 = vpop.f32.mrf.mxu0  ;;  %v1886_v19 = vpop.f32.mrf.mxu2 }
 0x21e   : > { %v1975_v54 = vpop.f32.mrf.mxu3 }
 0x21f   : > { %v2124_v49 = vpop.f32.mrf.mxu1 }
 0x220   : > { %v2144_v43 = vadd.f32 %v2124_v49, %v2058_v29  ;;  %v1897_v29 = vadd.f32 %v1881_v26, %v1811_v38  ;;  %v1982_v49 = vadd.f32 %v1965_v41, %v1896_v21 }
 0x222   : > { %v2152_v24 = vmax.f32 %v2144_v43, 0.0  ;;  %v1983_v13 = vadd.f32 %v1967_v42, %v1897_v29  ;;  %v2060_v40 = vadd.f32 %v2043_v45, %v1982_v49  ;;  %v10521_v45 = vld [vmem:[%s15337_s5 + $0x18] sm:$0xff]  ;;  %v1984_v43 = vadd.f32 %v1970_v10, %v1898_v4  ;;  %v2050_v42 = vpop.f32.mrf.mxu0  ;;  %v10522_v4 = vld [vmem:[%s15337_s5 + $0x20] sm:$0xff] }
 0x223   : > { %2321 = vmatpush.bf16.msrb.mxu3 %v10521_v45 }
 0x224   : > { %v2061_v6 = vadd.f32 %v2045_v47, %v1983_v13 }
 0x227   : > { %v2126_v37 = vpop.f32.mrf.mxu1 }
 0x228   : > { %v2145_v35 = vadd.f32 %v2126_v37, %v2059_v61  ;;  %v1559_v61 = vadd.f32 %v11772_v15, %v11763_v33 }
 0x22a   : > { %v2153_v28 = vmax.f32 %v2145_v35, 0.0  ;;  %v1649_v1 = vadd.f32 %v11782_v31, %v1559_v61  ;;  %v10520_v31 = vld [vmem:[%s15337_s5 + $0x10] sm:$0xff]  ;;  %v2062_v35 = vadd.f32 %v2048_v36, %v1984_v43  ;;  %v2053_v25 = vpop.f32.mrf.mxu0 }
 0x22b   : > { %2322 = vmatpush.bf16.msrb.mxu3 %v10520_v31 }
 0x22c   : > { %v2160_v62 = vpack.c.bf16 %v2153_v28, %v2152_v24  ;;  %v1735_v26 = vadd.f32 %v11780_v48, %v1649_v1  ;;  %v1889_v48 = vpop.f32.mrf.mxu2 }
 0x22d   : > { %v1900_v10 = vadd.f32 %v1889_v48, %v11792_v22  ;;  %v10519_v22 = vld [vmem:[%s15337_s5 + $0x8] sm:$0xff] }
 0x22e   : > { %9345 = vmatmul.msk.bf16.vlgmr.msrb.gmra.mxu2 %vm15376_vm0, %v2160_v62  ;;  %v1813_v12 = vadd.f32 %v1800_v5, %v1735_v26  ;;  %v1564_v5 = vadd.f32 %v11786_v63, %v11784_v55  ;;  %v1977_v55 = vpop.f32.mrf.mxu3  ;;  %2374 = vmatpush.bf16.msrb.mxu0 %v10519_v22  ;;  %v10527_v26 = vld [vmem:[%s15337_s5 + $0x48] sm:$0xff] }
 0x22f   : > { %v2129_v60 = vpop.f32.mrf.mxu1  ;;  %v1986_v61 = vadd.f32 %v1975_v54, %v1900_v10  ;;  %2613 = vmatpush.bf16.msra.mxu3 %v10527_v26 }
 0x230   : > { %v2146_v27 = vadd.f32 %v2129_v60, %v2060_v40  ;;  %v1899_v15 = vadd.f32 %v1886_v19, %v1813_v12  ;;  %v1651_v62 = vadd.f32 %v11788_v11, %v1564_v5  ;;  %v10524_v12 = vld [vmem:[%s15337_s5 + $0x30] sm:$0xff] }
 0x231   : > { %v2064_v11 = vadd.f32 %v2053_v25, %v1986_v61 }
 0x232   : > { %v2154_v34 = vmax.f32 %v2146_v27, 0.0  ;;  %v1985_v37 = vadd.f32 %v1972_v56, %v1899_v15  ;;  %v1737_v60 = vadd.f32 %v11790_v50, %v1651_v62  ;;  %v10523_v56 = vld [vmem:[%s15337_s5 + $0x28] sm:$0xff] }
 0x233   : > { %2451 = vmatpush.bf16.msra.mxu1 %v10523_v56 }
 0x234   : > { %v2063_v28 = vadd.f32 %v2050_v42, %v1985_v37  ;;  %v1891_v49 = vpop.f32.mrf.mxu2  ;;  %v1815_v13 = vadd.f32 %v11796_v18, %v1737_v60  ;;  %v10518_v18 = vld [vmem:[%s15337_s5] sm:$0xff] }
 0x235   : > { %2375 = vmatpush.bf16.msrb.mxu0 %v10518_v18  ;;  %v10526_v60 = vld [vmem:[%s15337_s5 + $0x40] sm:$0xff] }
 0x236   : > { %v1901_v40 = vadd.f32 %v1891_v49, %v1815_v13  ;;  %2614 = vmatpush.bf16.msra.mxu3 %v10526_v60 }
 0x237   : > { %v2131_v23 = vpop.f32.mrf.mxu1  ;;  %2452 = vmatpush.bf16.msra.mxu1 %v10522_v4 }
 0x238   : > { %v2147_v3 = vadd.f32 %v2131_v23, %v2061_v6  ;;  %v1987_v27 = vadd.f32 %v1977_v55, %v1901_v40  ;;  %v2055_v6 = vpop.f32.mrf.mxu0 }
 0x23a   : > { %v2155_v57 = vmax.f32 %v2147_v3, 0.0  ;;  %v2065_v23 = vadd.f32 %v2055_v6, %v1987_v27 }
 0x23c   : > { %v2161_v41 = vpack.c.bf16 %v2155_v57, %v2154_v34  ;;  %v10525_v57 = vld [vmem:[%s15337_s5 + $0x38] sm:$0xff] }
 0x23d   : > { %2536 = vmatpush.bf16.msra.mxu2 %v10525_v57 }
 0x23e   : > { %9346 = vmatmul.msk.bf16.gmra.mxu2 %vm15376_vm0, %v2161_v41 }
 0x23f   : > { %v2134_v33 = vpop.f32.mrf.mxu1 }
 0x240   : > { %v2148_v24 = vadd.f32 %v2134_v33, %v2062_v35 }
 0x241   : > { %2537 = vmatpush.bf16.msra.mxu2 %v10524_v12  ;;  %v10529_v12 = vld [vmem:[%s15337_s5 + $0x58] sm:$0xff] }
 0x242   : > { %v2156_v21 = vmax.f32 %v2148_v24, 0.0  ;;  %2698 = vmatpush.bf16.msra.mxu0 %v10529_v12  ;;  %v15543_v12 = vld [vmem:[#allocation20_spill] sm:$0xff] }
 0x247   : > { %v2136_v44 = vpop.f32.mrf.mxu1 }
 0x248   : > { %v2149_v47 = vadd.f32 %v2136_v44, %v2063_v28 }
 0x24a   : > { %v2157_v38 = vmax.f32 %v2149_v47, 0.0 }
 0x24c   : > { %v2162_v29 = vpack.c.bf16 %v2157_v38, %v2156_v21 }
 0x24e   : > { %9347 = vmatmul.msk.bf16.gmra.mxu2 %vm15376_vm0, %v2162_v29 }
 0x24f   : > { %v2139_v63 = vpop.f32.mrf.mxu1 }
 0x250   : > { %v2150_v36 = vadd.f32 %v2139_v63, %v2064_v11 }
 0x252   : > { %v2158_v50 = vmax.f32 %v2150_v36, 0.0 }
 0x257   : > { %v2141_v1 = vpop.f32.mrf.mxu1 }
 0x258   : > { %v2151_v3 = vadd.f32 %v2141_v1, %v2065_v23 }
 0x25a   : > { %v2159_v19 = vmax.f32 %v2151_v3, 0.0 }
 0x25c   : > { %v2163_v34 = vpack.c.bf16 %v2159_v19, %v2158_v50 }
 0x25e   : > { %9348 = vmatmul.msk.bf16.gmra.mxu2 %vm15376_vm0, %v2163_v34  ;;  %vm15517_vm0 = vcmask 261120  }
 0x25f   : > { %vm15518_vm1 = vmmov %vm15517_vm0 }
 0x260   : > { %vm15519_vm11 = vmmov %vm15517_vm0 }
 0x261   : > { %vm15520_vm15 = vmmov %vm15517_vm0 }
 0x2b1   : > { %v2191_v41 = vpop.f32.mrf.mxu2 }
 0x2b2   : > { %v2211_v45 = vadd.f32 %v2191_v41, %v11428_v2 }
 0x2b4   : > { %2219 = vst.msk [vmem:[#allocation3] sm:$0xff] %vm15517_vm0, %v2211_v45  ;;  %v10533_v45 = vld [vmem:[%s15337_s5 + $0x78] sm:$0xff] }
 0x2b5   : > { %2860 = vmatpush.bf16.msrb.mxu2 %v10533_v45 }
 0x2b9   : > { %v2193_v33 = vpop.f32.mrf.mxu2 }
 0x2ba   : > { %v2212_v15 = vadd.f32 %v2193_v33, %v11441_v51 }
 0x2bb   : > { %v11848_v43 = vld [vmem:[#allocation3] sm:$0xff] }
 0x2bc   : > { %v2235_v31 = vmax.f32 %v11848_v43, 0.0  ;;  %2220 = vst.msk [vmem:[#allocation3 + $0x8] sm:$0xff] %vm15518_vm1, %v2212_v15  ;;  %vm15522_vm1 = vmmov %vm15517_vm0 }
 0x2be   : > { %2243 = vst.msk [vmem:[#allocation4 + $0x10] sm:$0xff] %vm15519_vm11, %v2235_v31  ;;  %vm15521_vm11 = vmmov %vm15517_vm0  ;;  %v10528_v31 = vld [vmem:[%s15337_s5 + $0x50] sm:$0xff] }
 0x2bf   : > { %2699 = vmatpush.bf16.msra.mxu0 %v10528_v31 }
 0x2c1   : > { %v2196_v42 = vpop.f32.mrf.mxu2 }
 0x2c2   : > { %v2213_v37 = vadd.f32 %v2196_v42, %v11467_v0 }
 0x2c3   : > { %v11854_v48 = vld [vmem:[#allocation3 + $0x8] sm:$0xff] }
 0x2c4   : > { %v2236_v2 = vmax.f32 %v11854_v48, 0.0  ;;  %2221 = vst.msk [vmem:[#allocation3 + $0x10] sm:$0xff] %vm15520_vm15, %v2213_v37  ;;  %vm15523_vm15 = vmmov %vm15517_vm0 }
 0x2c5   : > { %v11858_v35 = vld [vmem:[#allocation4 + $0x10] sm:$0xff] }
 0x2c6   : > { %v2256_v51 = vld [vmem:[#allocation4 + $0xf] sm:$0xff]  ;;  %2244 = vst.msk [vmem:[#allocation4 + $0x18] sm:$0xff] %vm15517_vm0, %v2236_v2  ;;  %v2287_v54 = vpack.c.bf16 %v11858_v35, %v11443_v30 }
 0x2c7   : > { %v2264_v5 = vsel %vm11023_vm3, %v2256_v51, 0.0  ;;  %v2401_v62 = vld [vmem:[#allocation4 + $0x9] sm:$0xff]  ;;  %v2494_v38 = vsel %vm15512_vm5, %v2256_v51, 0.0 }
 0x2c8   : > { %v2271_v24 = vpack.c.bf16 %v2264_v5, %v11449_v32  ;;  %9361 = vmatmul.msk.bf16.vlgmr.msrb.gmra.mxu3 %vm15521_vm11, %v2287_v54  ;;  %v2409_v32 = vsel %vm11030_vm4, %v2401_v62, 0.0  ;;  %vm15524_vm11 = vmmov %vm15517_vm0  ;;  %v15533_v5 = vld [vmem:[#allocation17_spill] sm:$0xff] }
 0x2c9   : > { %v2198_v0 = vpop.f32.mrf.mxu2 }
 0x2ca   : > { %9373 = vmatmul.msk.bf16.vlgmr.msrb.gmra.mxu0 %vm15522_vm1, %v2271_v24  ;;  %v2214_v28 = vadd.f32 %v2198_v0, %v11494_v39  ;;  %vm15525_vm1 = vmmov %vm15517_vm0 }
 0x2cb   : > { %v11869_v44 = vld [vmem:[#allocation3 + $0x10] sm:$0xff] }
 0x2cc   : > { %v2237_v47 = vmax.f32 %v11869_v44, 0.0  ;;  %2222 = vst.msk [vmem:[#allocation3 + $0x18] sm:$0xff] %vm15523_vm15, %v2214_v28  ;;  %vm15526_vm15 = vmmov %vm15517_vm0  ;;  %v10535_v28 = vld [vmem:[%s15337_s5 + $0x88] sm:$0xff] }
 0x2cd   : > { %v11873_v30 = vld [vmem:[#allocation4 + $0x11] sm:$0xff]  ;;  %2945 = vmatpush.bf16.msrb.mxu3 %v10535_v28  ;;  %v15547_v28 = vld [vmem:[#allocation22_spill] sm:$0xff] }
 0x2ce   : > { %v11875_v21 = vld [vmem:[#allocation4 + $0x17] sm:$0xff]  ;;  %2245 = vst.msk [vmem:[#allocation4 + $0x20] sm:$0xff] %vm15517_vm0, %v2237_v47  ;;  %v2410_v39 = vsel %vm15514_vm8, %v11873_v30, 0.0  ;;  %v10531_v47 = vld [vmem:[%s15337_s5 + $0x68] sm:$0xff] }
 0x2cf   : > { %v2495_v25 = vsel %vm11023_vm3, %v11875_v21, 0.0  ;;  %v2417_v29 = vpack.c.bf16 %v2410_v39, %v2409_v32  ;;  %v11898_v40 = vld [vmem:[#allocation4 + $0x18] sm:$0xff]  ;;  %v10532_v32 = vld [vmem:[%s15337_s5 + $0x70] sm:$0xff]  ;;  %2783 = vmatpush.bf16.msrb.mxu1 %v10531_v47 }
 0x2d0   : > { %v2502_v49 = vpack.c.bf16 %v2495_v25, %v2494_v38  ;;  %v15537_v39 = vld [vmem:[#allocation24_spill] sm:$0xff]  ;;  %2861 = vmatpush.bf16.msrb.mxu2 %v10532_v32  ;;  %v15549_v47 = vld [vmem:[#allocation23_spill] sm:$0xff] }
 0x2d1   : > { %v2201_v10 = vpop.f32.mrf.mxu2  ;;  %9389 = vmatmul.msk.bf16.vlgmr.msra.gmra.mxu1 %vm15524_vm11, %v2417_v29  ;;  %vm15527_vm11 = vmmov %vm15517_vm0  ;;  %v10530_v29 = vld [vmem:[%s15337_s5 + $0x60] sm:$0xff] }
 0x2d2   : > { %9405 = vmatmul.msk.bf16.vlgmr.msra.gmra.mxu2 %vm15525_vm1, %v2502_v49  ;;  %v2215_v13 = vadd.f32 %v2201_v10, %v11533_v17  ;;  %v2265_v17 = vsel %vm11078_vm6, %v11875_v21, 0.0  ;;  %vm15528_vm1 = vmmov %vm15517_vm0 }
 0x2d3   : > { %v11894_v55 = vld [vmem:[#allocation3 + $0x18] sm:$0xff]  ;;  %2784 = vmatpush.bf16.msrb.mxu1 %v10530_v29 }
 0x2d4   : > { %v2238_v63 = vmax.f32 %v11894_v55, 0.0  ;;  %2223 = vst.msk [vmem:[#allocation3 + $0x20] sm:$0xff] %vm15526_vm15, %v2215_v13  ;;  %vm15529_vm15 = vmmov %vm15517_vm0 }
 0x2d5   : > { %v11900_v61 = vld [vmem:[#allocation4 + $0x20] sm:$0xff] }
 0x2d6   : > { %v11902_v27 = vld [vmem:[#allocation4 + $0x1f] sm:$0xff]  ;;  %2246 = vst.msk [vmem:[#allocation4 + $0x28] sm:$0xff] %vm15517_vm0, %v2238_v63  ;;  %v11907_v11 = vpack.c.bf16 %v11900_v61, %v11898_v40 }
 0x2d7   : > { %v2266_v6 = vsel %vm11082_vm7, %v11902_v27, 0.0  ;;  %v11921_v50 = vld [vmem:[#allocation4 + $0x19] sm:$0xff]  ;;  %v2496_v57 = vsel %vm11078_vm6, %v11902_v27, 0.0 }
 0x2d8   : > { %v2272_v36 = vpack.c.bf16 %v2266_v6, %v2265_v17  ;;  %9362 = vmatmul.msk.bf16.gmra.mxu3 %vm15527_vm11, %v11907_v11  ;;  %v2411_v18 = vsel %vm15509_vm2, %v11921_v50, 0.0  ;;  %vm15530_vm11 = vmmov %vm15517_vm0 }
 0x2d9   : > { %v2203_v23 = vpop.f32.mrf.mxu2 }
 0x2da   : > { %9374 = vmatmul.msk.bf16.gmra.mxu0 %vm15528_vm1, %v2272_v36  ;;  %v2216_v1 = vadd.f32 %v2203_v23, %v11564_v58  ;;  %vm15531_vm1 = vmmov %vm15517_vm0 }
 0x2db   : > { %v11919_v3 = vld [vmem:[#allocation3 + $0x20] sm:$0xff] }
 0x2dc   : > { %v2239_v19 = vmax.f32 %v11919_v3, 0.0  ;;  %2224 = vst.msk [vmem:[#allocation3 + $0x28] sm:$0xff] %vm15529_vm15, %v2216_v1  ;;  %vm15532_vm15 = vmmov %vm15517_vm0 }
 0x2dd   : > { %v11925_v34 = vld [vmem:[#allocation4 + $0x21] sm:$0xff] }
 0x2de   : > { %v11927_v22 = vld [vmem:[#allocation4 + $0x27] sm:$0xff]  ;;  %2247 = vst.msk [vmem:[#allocation4 + $0x30] sm:$0xff] %vm15517_vm0, %v2239_v19  ;;  %v2412_v58 = vsel %vm11094_vm9, %v11925_v34, 0.0 }
 0x2df   : > { %v2497_v56 = vsel %vm11082_vm7, %v11927_v22, 0.0  ;;  %v2418_v26 = vpack.c.bf16 %v2412_v58, %v2411_v18  ;;  %v11958_v37 = vld [vmem:[#allocation4 + $0x28] sm:$0xff]  ;;  %v2267_v54 = vsel %vm11130_vm10, %v11927_v22, 0.0 }
 0x2e0   : > { %v2503_v41 = vpack.c.bf16 %v2497_v56, %v2496_v57 }
 0x2e1   : > { %v2206_v4 = vpop.f32.mrf.mxu2  ;;  %9390 = vmatmul.msk.bf16.gmra.mxu1 %vm15530_vm11, %v2418_v26  ;;  %vm15534_vm11 = vnez %v15533_v5 }
 0x2e2   : > { %9406 = vmatmul.msk.bf16.gmra.mxu2 %vm15531_vm1, %v2503_v41  ;;  %v2217_v33 = vadd.f32 %v2206_v4, %v11598_v59  ;;  %vm15535_vm1 = vmmov %vm15517_vm0 }
 0x2e3   : > { %v11951_v15 = vld [vmem:[#allocation3 + $0x28] sm:$0xff] }
 0x2e4   : > { %v2240_v42 = vmax.f32 %v11951_v15, 0.0  ;;  %2225 = vst.msk [vmem:[#allocation3 + $0x30] sm:$0xff] %vm15532_vm15, %v2217_v33  ;;  %vm15536_vm15 = vmmov %vm15517_vm0  ;;  %v15544_v33 = vld [vmem:[#allocation21_spill] sm:$0xff] }
 0x2e5   : > { %v11960_v2 = vld [vmem:[#allocation4 + $0x30] sm:$0xff] }
 0x2e6   : > { %v11962_v51 = vld [vmem:[#allocation4 + $0x2f] sm:$0xff]  ;;  %2248 = vst.msk [vmem:[#allocation4 + $0x38] sm:$0xff] %vm15517_vm0, %v2240_v42  ;;  %v11967_v59 = vpack.c.bf16 %v11960_v2, %v11958_v37 }
 0x2e7   : > { %v2268_v24 = vsel %vm15534_vm11, %v11962_v51, 0.0  ;;  %v11990_v60 = vld [vmem:[#allocation4 + $0x29] sm:$0xff]  ;;  %v2498_v23 = vsel %vm11130_vm10, %v11962_v51, 0.0  ;;  %vm15545_vm10 = vnez %v15544_v33 }
 0x2e8   : > { %v2273_v0 = vpack.c.bf16 %v2268_v24, %v2267_v54  ;;  %9363 = vmatmul.msk.bf16.gmra.mxu3 %vm15535_vm1, %v11967_v59  ;;  %vm15538_vm1 = vmmov %vm15517_vm0  ;;  %v2413_v17 = vsel %vm11142_vm12, %v11990_v60, 0.0 }
 0x2e9   : > { %v2208_v62 = vpop.f32.mrf.mxu2 }
 0x2ea   : > { %9375 = vmatmul.msk.bf16.gmra.mxu0 %vm15536_vm15, %v2273_v0  ;;  %v2218_v38 = vadd.f32 %v2208_v62, %v15537_v39  ;;  %vm15541_vm15 = vmmov %vm15517_vm0 }
 0x2eb   : > { %v11988_v25 = vld [vmem:[#allocation3 + $0x30] sm:$0xff] }
 0x2ec   : > { %v2241_v49 = vmax.f32 %v11988_v25, 0.0  ;;  %2226 = vst.msk [vmem:[#allocation3 + $0x38] sm:$0xff] %vm15517_vm0, %v2218_v38 }
 0x2ed   : > { %v11997_v10 = vld [vmem:[#allocation4 + $0x31] sm:$0xff] }
 0x2ee   : > { %v11999_v13 = vld [vmem:[#allocation4 + $0x37] sm:$0xff]  ;;  %2249 = vst.msk [vmem:[#allocation4 + $0x40] sm:$0xff] %vm15538_vm1, %v2241_v49  ;;  %v2414_v36 = vsel %vm11146_vm13, %v11997_v10, 0.0  ;;  %vm15542_vm1 = vmmov %vm15517_vm0 }
 0x2ef   : > { %v2499_v1 = vsel %vm15534_vm11, %v11999_v13, 0.0  ;;  %v2419_v19 = vpack.c.bf16 %v2414_v36, %v2413_v17  ;;  %v2285_v56 = vld [vmem:[#allocation4 + $0x38] sm:$0xff]  ;;  %v2269_v45 = vsel %vm11180_vm14, %v11999_v13, 0.0  ;;  %vm15550_vm11 = vnez %v15549_v47 }
 0x2f0   : > { %v2504_v18 = vpack.c.bf16 %v2499_v1, %v2498_v23  ;;  %v2657_v17 = vsel %vm15514_vm8, %v11921_v50, 0.0  ;;  %v2579_v36 = vpack.c.bf16 %v11898_v40, %v11858_v35  ;;  %v2656_v23 = vsel %vm11030_vm4, %v11873_v30, 0.0 }
 0x2f1   : > { %9391 = vmatmul.msk.bf16.gmra.mxu1 %vm15541_vm15, %v2419_v19  ;;  %vm15546_vm15 = vmmov %vm15517_vm0  ;;  %v2664_v1 = vpack.c.bf16 %v2657_v17, %v2656_v23  ;;  %v10534_v19 = vld [vmem:[%s15337_s5 + $0x80] sm:$0xff]  ;;  %v2741_v35 = vsel %vm15512_vm5, %v11875_v21, 0.0  ;;  %v2659_v30 = vsel %vm11094_vm9, %v11990_v60, 0.0  ;;  %v2744_v21 = vsel %vm11082_vm7, %v11962_v51, 0.0 }
 0x2f2   : > { %9407 = vmatmul.msk.bf16.gmra.mxu2 %vm15517_vm0, %v2504_v18  ;;  %2946 = vmatpush.bf16.msrb.mxu3 %v10534_v19  ;;  %v2742_v18 = vsel %vm11023_vm3, %v11902_v27, 0.0  ;;  %v2658_v27 = vsel %vm15509_vm2, %v11925_v34, 0.0  ;;  %vm15556_vm3 = vmmov %vm15517_vm0  ;;  %v2660_v51 = vsel %vm11142_vm12, %v11997_v10, 0.0  ;;  %v15566_v17 = vld [vmem:[#allocation25_spill] sm:$0xff]  ;;  %v2903_v23 = vsel %vm11030_vm4, %v11921_v50, 0.0 }
 0x2f3   : > { %v12016_v58 = vld [vmem:[#allocation3 + $0x38] sm:$0xff]  ;;  %v2749_v40 = vpack.c.bf16 %v2742_v18, %v2741_v35  ;;  %v2905_v50 = vsel %vm15509_vm2, %v11990_v60, 0.0 }
 0x2f4   : > { %v2242_v57 = vmax.f32 %v12016_v58, 0.0 }
 0x2f5   : > { %v2286_v26 = vld [vmem:[#allocation4 + $0x40] sm:$0xff] }
 0x2f6   : > { %v2262_v41 = vld [vmem:[#allocation4 + $0x3f] sm:$0xff]  ;;  %2250 = vst.msk [vmem:[#allocation4 + $0x48] sm:$0xff] %vm15542_vm1, %v2242_v57  ;;  %v2290_v4 = vpack.c.bf16 %v2286_v26, %v2285_v56  ;;  %vm15548_vm1 = vnez %v15547_v28  ;;  %v2580_v57 = vpack.c.bf16 %v11958_v37, %v11900_v61  ;;  %v2581_v37 = vpack.c.bf16 %v2285_v56, %v11960_v2 }
 0x2f7   : > { %v2270_v31 = vsel %vm15545_vm10, %v2262_v41, 0.0  ;;  %v12027_v54 = vld [vmem:[#allocation4 + $0x39] sm:$0xff]  ;;  %v2500_v39 = vsel %vm11180_vm14, %v2262_v41, 0.0  ;;  %vm15552_vm14 = vmmov %vm15517_vm0 }
 0x2f8   : > { %v2274_v42 = vpack.c.bf16 %v2270_v31, %v2269_v45  ;;  %9364 = vmatmul.msk.bf16.gmra.mxu3 %vm15546_vm15, %v2290_v4  ;;  %v2415_v62 = vsel %vm15548_vm1, %v12027_v54, 0.0  ;;  %vm15551_vm15 = vmmov %vm15517_vm0  ;;  %v2665_v45 = vpack.c.bf16 %v2659_v30, %v2658_v27  ;;  %v2661_v61 = vsel %vm11146_vm13, %v12027_v54, 0.0 }
 0x2fa   : > { %9376 = vmatmul.msk.bf16.gmra.mxu0 %vm15517_vm0, %v2274_v42  ;;  %v2666_v42 = vpack.c.bf16 %v2661_v61, %v2660_v51 }
 0x2fd   : > { %v12029_v24 = vld [vmem:[#allocation4 + $0x41] sm:$0xff]  ;;  %v2655_v2 = vld [vmem:[#allocation4 + $0x49] sm:$0xff] }
 0x2fe   : > { %v2493_v0 = vld [vmem:[#allocation4 + $0x47] sm:$0xff]  ;;  %v2416_v32 = vsel %vm15550_vm11, %v12029_v24, 0.0 }
 0x2ff   : > { %v2501_v38 = vsel %vm15545_vm10, %v2493_v0, 0.0  ;;  %v2420_v29 = vpack.c.bf16 %v2416_v32, %v2415_v62  ;;  %v2578_v56 = vld [vmem:[#allocation4 + $0x48] sm:$0xff]  ;;  %v2662_v32 = vsel %vm15548_vm1, %v12029_v24, 0.0 }
 0x300   : > { %v2505_v49 = vpack.c.bf16 %v2501_v38, %v2500_v39  ;;  %v2663_v39 = vsel %vm15550_vm11, %v2655_v2, 0.0  ;;  %v2582_v38 = vpack.c.bf16 %v2578_v56, %v2286_v26  ;;  %v2904_v26 = vsel %vm15514_vm8, %v11925_v34, 0.0 }
 0x301   : > { %9392 = vmatmul.msk.bf16.gmra.mxu1 %vm15551_vm15, %v2420_v29  ;;  %vm15553_vm15 = vmmov %vm15517_vm0  ;;  %v2906_v34 = vsel %vm11094_vm9, %v11997_v10, 0.0  ;;  %vm15589_vm11 = vnez %v15474_v46 }
 0x302   : > { %9408 = vmatmul.msk.bf16.gmra.mxu2 %vm15517_vm0, %v2505_v49 }
 0x308   : > { %9421 = vmatmul.msk.bf16.vlgmr.msra.gmra.mxu3 %vm15552_vm14, %v2579_v36  ;;  %vm15554_vm14 = vmmov %vm15517_vm0  ;;  %v2829_v36 = vpack.c.bf16 %v15566_v17, %v2578_v56 }
 0x30a   : > { %9437 = vmatmul.msk.bf16.vlgmr.msra.gmra.mxu0 %vm15553_vm15, %v2664_v1  ;;  %vm15555_vm15 = vmmov %vm15517_vm0 }
 0x311   : > { %9453 = vmatmul.msk.bf16.vlgmr.msrb.gmra.mxu1 %vm15517_vm0, %v2749_v40 }
 0x312   : > { %9469 = vmatmul.msk.bf16.vlgmr.msrb.gmra.mxu2 %vm15554_vm14, %v11907_v11  ;;  %v2743_v11 = vsel %vm11078_vm6, %v11927_v22, 0.0  ;;  %vm15557_vm14 = vmmov %vm15517_vm0 }
 0x313   : > { %v2750_v31 = vpack.c.bf16 %v2744_v21, %v2743_v11 }
 0x318   : > { %9422 = vmatmul.msk.bf16.gmra.mxu3 %vm15555_vm15, %v2580_v57  ;;  %vm15559_vm15 = vmmov %vm15517_vm0 }
 0x31a   : > { %9438 = vmatmul.msk.bf16.gmra.mxu0 %vm15556_vm3, %v2665_v45  ;;  %vm15558_vm3 = vmmov %vm15517_vm0 }
 0x31b   : > { %vm15562_vm7 = vmmov %vm15558_vm3 }
 0x31c   : > { %vm15563_vm6 = vmmov %vm15558_vm3 }
 0x321   : > { %9454 = vmatmul.msk.bf16.gmra.mxu1 %vm15517_vm0, %v2750_v31  ;;  %vm15560_vm0 = vnez %v15533_v5  ;;  %v2912_v31 = vpack.c.bf16 %v2906_v34, %v2905_v50 }
 0x322   : > { %9470 = vmatmul.msk.bf16.gmra.mxu2 %vm15557_vm14, %v11967_v59  ;;  %v2746_v22 = vsel %vm15560_vm0, %v2262_v41, 0.0  ;;  %vm15561_vm14 = vnez %v15485_v20  ;;  %v2667_v41 = vpack.c.bf16 %v2663_v39, %v2662_v32  ;;  %vm15568_vm0 = vmmov %vm15558_vm3  ;;  %v2907_v32 = vsel %vm11142_vm12, %v12027_v54, 0.0 }
 0x323   : > { %v2745_v59 = vsel %vm15561_vm14, %v11999_v13, 0.0  ;;  %v2740_v13 = vld [vmem:[#allocation4 + $0x4f] sm:$0xff] }
 0x324   : > { %v2751_v62 = vpack.c.bf16 %v2746_v22, %v2745_v59 }
 0x328   : > { %9423 = vmatmul.msk.bf16.gmra.mxu3 %vm15558_vm3, %v2581_v37 }
 0x32a   : > { %9439 = vmatmul.msk.bf16.gmra.mxu0 %vm15559_vm15, %v2666_v42  ;;  %vm15564_vm15 = vmmov %vm15558_vm3 }
 0x331   : > { %9455 = vmatmul.msk.bf16.gmra.mxu1 %vm15562_vm7, %v2751_v62  ;;  %vm15565_vm7 = vnez %v15543_v12  ;;  %v2908_v62 = vsel %vm11146_vm13, %v12029_v24, 0.0 }
 0x332   : > { %9471 = vmatmul.msk.bf16.gmra.mxu2 %vm15563_vm6, %v2290_v4  ;;  %v2747_v29 = vsel %vm15565_vm7, %v2493_v0, 0.0  ;;  %v2748_v4 = vsel %vm15545_vm10, %v2740_v13, 0.0  ;;  %vm15567_vm6 = vmmov %vm15558_vm3  ;;  %v2911_v0 = vpack.c.bf16 %v2904_v26, %v2903_v23  ;;  %v2909_v26 = vsel %vm15548_vm1, %v2655_v2, 0.0 }
 0x333   : > { %v2752_v49 = vpack.c.bf16 %v2748_v4, %v2747_v29 }
 0x338   : > { %9424 = vmatmul.msk.bf16.gmra.mxu3 %vm15558_vm3, %v2582_v38  ;;  %vm15569_vm3 = vmmov %vm15568_vm0  ;;  %v2913_v38 = vpack.c.bf16 %v2908_v62, %v2907_v32 }
 0x33a   : > { %9440 = vmatmul.msk.bf16.gmra.mxu0 %vm15564_vm15, %v2667_v41  ;;  %vm15570_vm15 = vmmov %vm15568_vm0 }
 0x341   : > { %9456 = vmatmul.msk.bf16.gmra.mxu1 %vm15567_vm6, %v2752_v49  ;;  %vm15572_vm6 = vmmov %vm15568_vm0 }
 0x342   : > { %9472 = vmatmul.msk.bf16.gmra.mxu2 %vm15568_vm0, %v2829_v36 }
 0x347   : > { %v2377_v1 = vpop.f32.mrf.mxu0 }
 0x348   : > { %9485 = vmatmul.msk.bf16.vlgmr.msrb.gmra.mxu3 %vm15569_vm3, %v2911_v0  ;;  %v15571_v0 = vld [vmem:[#allocation26_spill] sm:$0xff]  ;;  %vm15573_vm3 = vcmask 1043456  }
 0x34b   : > { %v2324_v19 = vpop.f32.mrf.mxu3 }
 0x34c   : > { %v2378_v18 = vadd.f32 %v2377_v1, %v2324_v19  ;;  %v2914_v19 = vpack.c.bf16 %v15571_v0, %v2909_v26 }
 0x34e   : > { %v2454_v40 = vpop.f32.mrf.mxu1 }
 0x34f   : > { %v12121_v35 = vpop.f32.mrf.mxu0  ;;  %v2474_v30 = vadd.f32 %v2454_v40, %v2378_v18  ;;  %v2988_v18 = vld [vmem:[%s15338_s6] sm:$0xf] }
 0x350   : > { %v3002_v40 = vsel %vm15573_vm3, %v2988_v18, 0 }
 0x351   : > { %3011 = vmatpush.bf16.msrb.mxu0 %v3002_v40 }
 0x353   : > { %v12123_v57 = vpop.f32.mrf.mxu3 }
 0x355   : > { %v2539_v27 = vpop.f32.mrf.mxu2 }
 0x356   : > { %v2559_v45 = vadd.f32 %v2539_v27, %v2474_v30  ;;  %v12131_v11 = vpop.f32.mrf.mxu1 }
 0x357   : > { %v2382_v21 = vpop.f32.mrf.mxu0 }
 0x358   : > { %9486 = vmatmul.msk.bf16.gmra.mxu3 %vm15568_vm0, %v2912_v31  ;;  %vm15574_vm0 = vcmask 64512  }
 0x359   : > { %vm15577_vm3 = vmmov %vm15574_vm0 }
 0x35b   : > { %v2329_v61 = vpop.f32.mrf.mxu3 }
 0x35c   : > { %v2383_v37 = vadd.f32 %v2382_v21, %v2329_v61 }
 0x35d   : > { %v2541_v51 = vpop.f32.mrf.mxu2 }
 0x35e   : > { %v2459_v22 = vpop.f32.mrf.mxu1 }
 0x35f   : > { %v12134_v42 = vpop.f32.mrf.mxu0  ;;  %v2476_v59 = vadd.f32 %v2459_v22, %v2383_v37 }
 0x363   : > { %v12136_v10 = vpop.f32.mrf.mxu3 }
 0x365   : > { %v2544_v60 = vpop.f32.mrf.mxu2 }
 0x366   : > { %v2561_v56 = vadd.f32 %v2544_v60, %v2476_v59  ;;  %v12144_v39 = vpop.f32.mrf.mxu1 }
 0x367   : > { %v2387_v41 = vpop.f32.mrf.mxu0 }
 0x368   : > { %9487 = vmatmul.msk.bf16.gmra.mxu3 %vm15570_vm15, %v2913_v38  ;;  %vm15575_vm15 = vmmov %vm15574_vm0 }
 0x36b   : > { %v2334_v13 = vpop.f32.mrf.mxu3 }
 0x36c   : > { %v2388_v29 = vadd.f32 %v2387_v41, %v2334_v13 }
 0x36d   : > { %v12147_v4 = vpop.f32.mrf.mxu2 }
 0x36e   : > { %v2464_v49 = vpop.f32.mrf.mxu1 }
 0x36f   : > { %v2478_v17 = vadd.f32 %v2464_v49, %v2388_v29  ;;  %v12149_v36 = vpop.f32.mrf.mxu0 }
 0x373   : > { %v12151_v24 = vpop.f32.mrf.mxu3 }
 0x375   : > { %v2549_v54 = vpop.f32.mrf.mxu2 }
 0x376   : > { %v2563_v23 = vadd.f32 %v2549_v54, %v2478_v17  ;;  %v12155_v1 = vpop.f32.mrf.mxu1 }
 0x377   : > { %v2392_v30 = vpop.f32.mrf.mxu0 }
 0x378   : > { %9488 = vmatmul.msk.bf16.gmra.mxu3 %vm15572_vm6, %v2914_v19  ;;  %vm15576_vm6 = vmmov %vm15574_vm0 }
 0x37b   : > { %v2339_v34 = vpop.f32.mrf.mxu3 }
 0x37c   : > { %v2393_v27 = vadd.f32 %v2392_v30, %v2339_v34 }
 0x37d   : > { %v12163_v50 = vpop.f32.mrf.mxu2 }
 0x37e   : > { %v2469_v2 = vpop.f32.mrf.mxu1 }
 0x37f   : > { %v2480_v21 = vadd.f32 %v2469_v2, %v2393_v27  ;;  %v12167_v41 = vpop.f32.mrf.mxu0 }
 0x383   : > { %v12165_v31 = vpop.f32.mrf.mxu3 }
 0x385   : > { %v2554_v61 = vpop.f32.mrf.mxu2 }
 0x386   : > { %v2565_v37 = vadd.f32 %v2554_v61, %v2480_v21  ;;  %v12171_v49 = vpop.f32.mrf.mxu1 }
 0x387   : > { %v2701_v54 = vpop.f32.mrf.mxu0 }
 0x38b   : > { %v2616_v22 = vpop.f32.mrf.mxu3 }
 0x38c   : > { %v2636_v59 = vadd.f32 %v2616_v22, %v2559_v45 }
 0x38d   : > { %v12173_v17 = vpop.f32.mrf.mxu2 }
 0x38e   : > { %v2786_v0 = vpop.f32.mrf.mxu1  ;;  %v2721_v22 = vadd.f32 %v2701_v54, %v2636_v59 }
 0x38f   : > { %v2703_v45 = vpop.f32.mrf.mxu0 }
 0x393   : > { %v2618_v62 = vpop.f32.mrf.mxu3 }
 0x395   : > { %v2863_v19 = vpop.f32.mrf.mxu2 }
 0x396   : > { %v2788_v30 = vpop.f32.mrf.mxu1 }
 0x397   : > { %v2706_v61 = vpop.f32.mrf.mxu0 }
 0x39b   : > { %v2621_v60 = vpop.f32.mrf.mxu3 }
 0x39c   : > { %v2638_v32 = vadd.f32 %v2621_v60, %v2561_v56  ;;  %v2380_v56 = vadd.f32 %v12121_v35, %v12123_v57 }
 0x39d   : > { %v2865_v34 = vpop.f32.mrf.mxu2 }
 0x39e   : > { %v2791_v60 = vpop.f32.mrf.mxu1 }
 0x39f   : > { %v2708_v33 = vpop.f32.mrf.mxu0 }
 0x3a3   : > { %v2623_v38 = vpop.f32.mrf.mxu3 }
 0x3a5   : > { %v2868_v47 = vpop.f32.mrf.mxu2 }
 0x3ab   : > { %v2626_v13 = vpop.f32.mrf.mxu3 }
 0x3ac   : > { %v12169_v29 = vadd.f32 %v2626_v13, %v2563_v23  ;;  %v2475_v23 = vadd.f32 %v12131_v11, %v2380_v56 }
 0x3ae   : > { %v2560_v2 = vadd.f32 %v2541_v51, %v2475_v23 }
 0x3b0   : > { %v2637_v21 = vadd.f32 %v2618_v62, %v2560_v2  ;;  %v2793_v62 = vpop.f32.mrf.mxu1  ;;  %v2723_v2 = vadd.f32 %v2706_v61, %v2638_v32 }
 0x3b2   : > { %v2722_v28 = vadd.f32 %v2703_v45, %v2637_v21  ;;  %v2870_v45 = vpop.f32.mrf.mxu2 }
 0x3b3   : > { %v2628_v26 = vpop.f32.mrf.mxu3 }
 0x3b4   : > { %v2807_v35 = vadd.f32 %v2788_v30, %v2722_v28 }
 0x3b6   : > { %v2884_v57 = vadd.f32 %v2865_v34, %v2807_v35 }
 0x3ba   : > { %v2873_v34 = vpop.f32.mrf.mxu2 }
 0x3bb   : > { %v2631_v18 = vpop.f32.mrf.mxu3 }
 0x3bc   : > { %v12175_v40 = vadd.f32 %v2631_v18, %v2565_v37  ;;  %v2806_v37 = vadd.f32 %v2786_v0, %v2721_v22  ;;  %v2385_v18 = vadd.f32 %v12134_v42, %v12136_v10  ;;  %v2711_v10 = vpop.f32.mrf.mxu0 }
 0x3bd   : > { %v2725_v35 = vadd.f32 %v2711_v10, %v12169_v29  ;;  %v10543_v29 = vld [vmem:[%s15339_s7 + $0x38] sm:$0xff] }
 0x3be   : > { %v2883_v6 = vadd.f32 %v2863_v19, %v2806_v37  ;;  %v2477_v11 = vadd.f32 %v12144_v39, %v2385_v18  ;;  %v2796_v19 = vpop.f32.mrf.mxu1  ;;  %v2390_v39 = vadd.f32 %v12149_v36, %v12151_v24  ;;  %v10541_v36 = vld [vmem:[%s15339_s7 + $0x28] sm:$0xff]  ;;  %v10539_v24 = vld [vmem:[%s15339_s7 + $0x18] sm:$0xff]  ;;  %3353 = vmatpush.bf16.msra.mxu0 %v10543_v29 }
 0x3bf   : > { %3267 = vmatpush.bf16.msra.mxu3 %v10541_v36  ;;  %3144 = vmatpush.bf16.msra.mxu1 %v10539_v24  ;;  %v10547_v29 = vld [vmem:[%s15339_s7 + $0x58] sm:$0xff] }
 0x3c0   : > { %v2562_v59 = vadd.f32 %v12147_v4, %v2477_v11  ;;  %v2810_v11 = vadd.f32 %v2796_v19, %v2725_v35 }
 0x3c2   : > { %v2639_v23 = vadd.f32 %v2623_v38, %v2562_v59  ;;  %v2479_v38 = vadd.f32 %v12155_v1, %v2390_v39  ;;  %v2875_v1 = vpop.f32.mrf.mxu2 }
 0x3c3   : > { %v12179_v27 = vpop.f32.mrf.mxu3 }
 0x3c4   : > { %v2724_v28 = vadd.f32 %v2708_v33, %v2639_v23  ;;  %v2564_v32 = vadd.f32 %v12163_v50, %v2479_v38  ;;  %v2713_v33 = vpop.f32.mrf.mxu0 }
 0x3c6   : > { %v2809_v30 = vadd.f32 %v2793_v62, %v2724_v28  ;;  %v2641_v37 = vadd.f32 %v2628_v26, %v2564_v32  ;;  %v2798_v18 = vpop.f32.mrf.mxu1  ;;  %v2887_v62 = vadd.f32 %v2873_v34, %v2810_v11 }
 0x3c8   : > { %v2886_v4 = vadd.f32 %v2870_v45, %v2809_v30  ;;  %v2726_v26 = vadd.f32 %v2713_v33, %v2641_v37  ;;  %v10538_v37 = vld [vmem:[%s15339_s7 + $0x10] sm:$0xff] }
 0x3c9   : > { %3145 = vmatpush.bf16.msra.mxu1 %v10538_v37  ;;  %v10550_v37 = vld [vmem:[%s15339_s7 + $0x70] sm:$0xff] }
 0x3ca   : > { %v2811_v59 = vadd.f32 %v2798_v18, %v2726_v26  ;;  %v2878_v28 = vpop.f32.mrf.mxu2 }
 0x3cb   : > { %v2948_v13 = vpop.f32.mrf.mxu3 }
 0x3cc   : > { %v2968_v63 = vadd.f32 %v2948_v13, %v2883_v6  ;;  %v2808_v6 = vadd.f32 %v2791_v60, %v2723_v2 }
 0x3cd   : > { %3484 = vmatpush.bf16.msrb.mxu1 %v10547_v29 }
 0x3ce   : > { %v2976_v54 = vmax.f32 %v2968_v63, 0.0  ;;  %v2801_v23 = vpop.f32.mrf.mxu1 }
 0x3d3   : > { %v2950_v12 = vpop.f32.mrf.mxu3 }
 0x3d4   : > { %v2969_v51 = vadd.f32 %v2950_v12, %v2884_v57  ;;  %v2885_v12 = vadd.f32 %v2868_v47, %v2808_v6  ;;  %v10537_v47 = vld [vmem:[%s15339_s7 + $0x8] sm:$0xff]  ;;  %v10536_v57 = vld [vmem:[%s15339_s7] sm:$0xff] }
 0x3d5   : > { %3197 = vmatpush.bf16.msra.mxu2 %v10537_v47  ;;  %v10545_v47 = vld [vmem:[%s15339_s7 + $0x48] sm:$0xff] }
 0x3d6   : > { %v2977_v56 = vmax.f32 %v2969_v51, 0.0  ;;  %v2395_v51 = vadd.f32 %v12167_v41, %v12165_v31 }
 0x3d8   : > { %v2984_v0 = vpack.c.bf16 %v2977_v56, %v2976_v54  ;;  %v2716_v54 = vpop.f32.mrf.mxu0  ;;  %v2888_v56 = vadd.f32 %v2875_v1, %v2811_v59  ;;  %v2481_v2 = vadd.f32 %v12171_v49, %v2395_v51  ;;  %v3225_v51 = vld [vmem:[#allocation4 + $0x8] sm:$0xff] }
 0x3d9   : > { %3198 = vmatpush.bf16.msra.mxu2 %v10536_v57  ;;  %v2727_v31 = vadd.f32 %v2716_v54, %v12175_v40  ;;  %v10540_v40 = vld [vmem:[%s15339_s7 + $0x20] sm:$0xff] }
 0x3da   : > { %9489 = vmatmul.msk.bf16.vlgmr.msrb.gmra.mxu0 %vm15574_vm0, %v2984_v0  ;;  %v2566_v10 = vadd.f32 %v12173_v17, %v2481_v2  ;;  %3268 = vmatpush.bf16.msra.mxu3 %v10540_v40  ;;  %vm15578_vm0 = vcmask 261120   ;;  %v3303_v57 = vld [vmem:[#allocation4 + $0x7] sm:$0xff] }
 0x3db   : > { %v2953_v42 = vpop.f32.mrf.mxu3  ;;  %v3311_v59 = vsel %vm15512_vm5, %v3303_v57, 0.0  ;;  %vm15585_vm1 = vmmov %vm15578_vm0 }
 0x3dc   : > { %v2970_v63 = vadd.f32 %v2953_v42, %v2885_v12  ;;  %v2643_v19 = vadd.f32 %v12179_v27, %v2566_v10 }
 0x3dd   : > { %3537 = vmatpush.bf16.msrb.mxu2 %v10545_v47 }
 0x3de   : > { %v2978_v61 = vmax.f32 %v2970_v63, 0.0  ;;  %v2812_v63 = vadd.f32 %v2801_v23, %v2727_v31 }
 0x3e0   : > { %v2718_v41 = vpop.f32.mrf.mxu0  ;;  %v2889_v49 = vadd.f32 %v2878_v28, %v2812_v63 }
 0x3e1   : > { %v2728_v34 = vadd.f32 %v2718_v41, %v2643_v19 }
 0x3e3   : > { %v2955_v21 = vpop.f32.mrf.mxu3 }
 0x3e4   : > { %v2971_v22 = vadd.f32 %v2955_v21, %v2886_v4  ;;  %v2803_v4 = vpop.f32.mrf.mxu1  ;;  %v2880_v21 = vpop.f32.mrf.mxu2 }
 0x3e5   : > { %v2813_v38 = vadd.f32 %v2803_v4, %v2728_v34 }
 0x3e6   : > { %v2979_v13 = vmax.f32 %v2971_v22, 0.0 }
 0x3e7   : > { %v2890_v22 = vadd.f32 %v2880_v21, %v2813_v38 }
 0x3e8   : > { %v2985_v60 = vpack.c.bf16 %v2979_v13, %v2978_v61 }
 0x3ea   : > { %9490 = vmatmul.msk.bf16.gmra.mxu0 %vm15575_vm15, %v2985_v60  ;;  %v10542_v60 = vld [vmem:[%s15339_s7 + $0x30] sm:$0xff]  ;;  %vm15579_vm15 = vmmov %vm15578_vm0 }
 0x3eb   : > { %v2958_v50 = vpop.f32.mrf.mxu3  ;;  %3354 = vmatpush.bf16.msra.mxu0 %v10542_v60 }
 0x3ec   : > { %v2972_v45 = vadd.f32 %v2958_v50, %v2887_v62 }
 0x3ee   : > { %v2980_v6 = vmax.f32 %v2972_v45, 0.0 }
 0x3f3   : > { %v2960_v0 = vpop.f32.mrf.mxu3 }
 0x3f4   : > { %v2973_v42 = vadd.f32 %v2960_v0, %v2888_v56 }
 0x3f6   : > { %v2981_v39 = vmax.f32 %v2973_v42, 0.0 }
 0x3f8   : > { %v2986_v12 = vpack.c.bf16 %v2981_v39, %v2980_v6 }
 0x3fa   : > { %9491 = vmatmul.msk.bf16.gmra.mxu0 %vm15576_vm6, %v2986_v12  ;;  %vm15580_vm6 = vmmov %vm15578_vm0 }
 0x3fb   : > { %v2963_v30 = vpop.f32.mrf.mxu3 }
 0x3fc   : > { %v2974_v32 = vadd.f32 %v2963_v30, %v2889_v49 }
 0x3fe   : > { %v2982_v13 = vmax.f32 %v2974_v32, 0.0  ;;  %v10548_v32 = vld [vmem:[%s15339_s7 + $0x60] sm:$0xff] }
 0x403   : > { %v2965_v17 = vpop.f32.mrf.mxu3 }
 0x404   : > { %v2975_v61 = vadd.f32 %v2965_v17, %v2890_v22  ;;  %v10546_v17 = vld [vmem:[%s15339_s7 + $0x50] sm:$0xff] }
 0x405   : > { %3485 = vmatpush.bf16.msrb.mxu1 %v10546_v17  ;;  %v10555_v17 = vld [vmem:[%s15339_s7 + $0x98] sm:$0xff] }
 0x406   : > { %v2983_v33 = vmax.f32 %v2975_v61, 0.0 }
 0x408   : > { %v2987_v27 = vpack.c.bf16 %v2983_v33, %v2982_v13 }
 0x40a   : > { %9492 = vmatmul.msk.bf16.gmra.mxu0 %vm15577_vm3, %v2987_v27  ;;  %vm15581_vm3 = vmmov %vm15578_vm0 }
 0x457   : > { %v3013_v18 = vpop.f32.mrf.mxu0 }
 0x458   : > { %v3033_v35 = vadd.f32 %v3013_v18, %v11848_v43  ;;  %v10549_v43 = vld [vmem:[%s15339_s7 + $0x68] sm:$0xff] }
 0x459   : > { %3615 = vmatpush.bf16.msrb.mxu3 %v10549_v43 }
 0x45a   : > { %3041 = vst.msk [vmem:[#allocation3] sm:$0xff] %vm15578_vm0, %v3033_v35 }
 0x45d   : > { %3616 = vmatpush.bf16.msrb.mxu3 %v10548_v32  ;;  %v10557_v32 = vld [vmem:[%s15339_s7 + $0xa8] sm:$0xff] }
 0x45f   : > { %v3015_v36 = vpop.f32.mrf.mxu0 }
 0x460   : > { %v3034_v24 = vadd.f32 %v3015_v36, %v11854_v48 }
 0x461   : > { %v3049_v1 = vld [vmem:[#allocation3] sm:$0xff] }
 0x462   : > { %v3057_v50 = vmax.f32 %v3049_v1, 0.0  ;;  %3042 = vst.msk [vmem:[#allocation3 + $0x8] sm:$0xff] %vm15579_vm15, %v3034_v24  ;;  %vm15582_vm15 = vnez %v15465_v8 }
 0x464   : > { %3065 = vst.msk [vmem:[#allocation4 + $0x10] sm:$0xff] %vm15580_vm6, %v3057_v50  ;;  %vm15583_vm6 = vmmov %vm15578_vm0 }
 0x467   : > { %v3018_v26 = vpop.f32.mrf.mxu0 }
 0x468   : > { %v3035_v48 = vadd.f32 %v3018_v26, %v11869_v44  ;;  %v10551_v44 = vld [vmem:[%s15339_s7 + $0x78] sm:$0xff] }
 0x469   : > { %v3050_v11 = vld [vmem:[#allocation3 + $0x8] sm:$0xff]  ;;  %3693 = vmatpush.bf16.msrb.mxu0 %v10551_v44 }
 0x46a   : > { %v3058_v62 = vmax.f32 %v3050_v11, 0.0  ;;  %3043 = vst.msk [vmem:[#allocation3 + $0x10] sm:$0xff] %vm15581_vm3, %v3035_v48  ;;  %vm15584_vm3 = vmmov %vm15578_vm0 }
 0x46b   : > { %v3226_v54 = vld [vmem:[#allocation4 + $0x10] sm:$0xff] }
 0x46c   : > { %v3304_v56 = vld [vmem:[#allocation4 + $0xf] sm:$0xff]  ;;  %3066 = vst.msk [vmem:[#allocation4 + $0x18] sm:$0xff] %vm15578_vm0, %v3058_v62  ;;  %v12244_v45 = vpack.c.bf16 %v3226_v54, %v3225_v51 }
 0x46d   : > { %v3312_v23 = vsel %vm15582_vm15, %v3304_v56, 0.0  ;;  %v3102_v12 = vsel %vm15512_vm5, %v3304_v56, 0.0  ;;  %3694 = vmatpush.bf16.msrb.mxu0 %v10550_v37 }
 0x46e   : > { %v3319_v0 = vpack.c.bf16 %v3312_v23, %v3311_v59  ;;  %9533 = vmatmul.msk.bf16.vlgmr.msra.gmra.mxu3 %vm15583_vm6, %v12244_v45  ;;  %vm15586_vm6 = vmmov %vm15578_vm0 }
 0x46f   : > { %v3020_v2 = vpop.f32.mrf.mxu0  ;;  %3948 = vmatpush.bf16.msra.mxu3 %v10557_v32  ;;  %v10552_v32 = vld [vmem:[%s15339_s7 + $0x80] sm:$0xff] }
 0x470   : > { %9549 = vmatmul.msk.bf16.vlgmr.msra.gmra.mxu0 %vm15584_vm3, %v3319_v0  ;;  %v3036_v42 = vadd.f32 %v3020_v2, %v11894_v55  ;;  %vm15587_vm3 = vmmov %vm15578_vm0 }
 0x471   : > { %v3051_v28 = vld [vmem:[#allocation3 + $0x10] sm:$0xff] }
 0x472   : > { %v3059_v10 = vmax.f32 %v3051_v28, 0.0  ;;  %3044 = vst.msk [vmem:[#allocation3 + $0x18] sm:$0xff] %vm15578_vm0, %v3036_v42 }
 0x473   : > { %v3078_v6 = vld [vmem:[#allocation4 + $0x18] sm:$0xff] }
 0x474   : > { %v3095_v39 = vld [vmem:[#allocation4 + $0x17] sm:$0xff]  ;;  %3067 = vst.msk [vmem:[#allocation4 + $0x20] sm:$0xff] %vm15585_vm1, %v3059_v10  ;;  %v12257_v19 = vpack.c.bf16 %v3078_v6, %v3226_v54  ;;  %vm15588_vm1 = vmmov %vm15578_vm0 }
 0x475   : > { %v3103_v31 = vsel %vm15582_vm15, %v3095_v39, 0.0  ;;  %v3313_v38 = vsel %vm15589_vm11, %v3095_v39, 0.0  ;;  %v3783_v13 = vsel %vm15512_vm5, %v3095_v39, 0.0 }
 0x476   : > { %v12263_v41 = vpack.c.bf16 %v3103_v31, %v3102_v12  ;;  %9517 = vmatmul.msk.bf16.vlgmr.msra.gmra.mxu2 %vm15586_vm6, %v12257_v19  ;;  %vm15590_vm6 = vnez %v15477_v9 }
 0x477   : > { %v3023_v55 = vpop.f32.mrf.mxu0 }
 0x478   : > { %9505 = vmatmul.msk.bf16.vlgmr.msra.gmra.mxu1 %vm15587_vm3, %v12263_v41  ;;  %v3037_v30 = vadd.f32 %v3023_v55, %v11919_v3  ;;  %v10544_v3 = vld [vmem:[%s15339_s7 + $0x40] sm:$0xff]  ;;  %vm15591_vm3 = vmmov %vm15578_vm0 }
 0x479   : > { %v3052_v34 = vld [vmem:[#allocation3 + $0x18] sm:$0xff]  ;;  %3538 = vmatpush.bf16.msrb.mxu2 %v10544_v3  ;;  %3825 = vmatpush.bf16.msra.mxu1 %v10555_v17  ;;  %v10554_v17 = vld [vmem:[%s15339_s7 + $0x90] sm:$0xff] }
 0x47a   : > { %v3060_v4 = vmax.f32 %v3052_v34, 0.0  ;;  %3045 = vst.msk [vmem:[#allocation3 + $0x20] sm:$0xff] %vm15588_vm1, %v3037_v30  ;;  %vm15592_vm1 = vmmov %vm15578_vm0 }
 0x47b   : > { %v3228_v63 = vld [vmem:[#allocation4 + $0x20] sm:$0xff] }
 0x47c   : > { %v3306_v21 = vld [vmem:[#allocation4 + $0x1f] sm:$0xff]  ;;  %3068 = vst.msk [vmem:[#allocation4 + $0x28] sm:$0xff] %vm15578_vm0, %v3060_v4  ;;  %v12272_v49 = vpack.c.bf16 %v3228_v63, %v3078_v6 }
 0x47d   : > { %v3314_v22 = vsel %vm15590_vm6, %v3306_v21, 0.0  ;;  %v3784_v33 = vsel %vm15582_vm15, %v3306_v21, 0.0  ;;  %v12301_v47 = vld [vmem:[#allocation4 + $0x19] sm:$0xff]  ;;  %v3104_v43 = vsel %vm15589_vm11, %v3306_v21, 0.0  ;;  %vm15597_vm15 = vnez %v15533_v5  ;;  %3826 = vmatpush.bf16.msra.mxu1 %v10554_v17 }
 0x47e   : > { %v3320_v61 = vpack.c.bf16 %v3314_v22, %v3313_v38  ;;  %9534 = vmatmul.msk.bf16.gmra.mxu3 %vm15591_vm3, %v12272_v49  ;;  %v12293_v27 = vpack.c.bf16 %v3784_v33, %v3783_v13  ;;  %vm15593_vm3 = vmmov %vm15578_vm0  ;;  %v4107_v26 = vsel %vm11030_vm4, %v12301_v47, 0.0  ;;  %v10553_v38 = vld [vmem:[%s15339_s7 + $0x88] sm:$0xff] }
 0x47f   : > { %v3025_v40 = vpop.f32.mrf.mxu0  ;;  %3878 = vmatpush.bf16.msra.mxu2 %v10553_v38  ;;  %v3426_v38 = vsel %vm15514_vm8, %v12301_v47, 0.0 }
 0x480   : > { %9550 = vmatmul.msk.bf16.gmra.mxu0 %vm15592_vm1, %v3320_v61  ;;  %v3038_v60 = vadd.f32 %v3025_v40, %v11951_v15  ;;  %vm15594_vm1 = vmmov %vm15578_vm0 }
 0x481   : > { %v3053_v18 = vld [vmem:[#allocation3 + $0x20] sm:$0xff] }
 0x482   : > { %v3061_v35 = vmax.f32 %v3053_v18, 0.0  ;;  %3046 = vst.msk [vmem:[#allocation3 + $0x28] sm:$0xff] %vm15578_vm0, %v3038_v60  ;;  %v15603_v18 = vld [vmem:[#allocation20_spill] sm:$0xff] }
 0x483   : > { %v3080_v36 = vld [vmem:[#allocation4 + $0x28] sm:$0xff]  ;;  %3879 = vmatpush.bf16.msra.mxu2 %v10552_v32 }
 0x484   : > { %v3097_v24 = vld [vmem:[#allocation4 + $0x27] sm:$0xff]  ;;  %3069 = vst.msk [vmem:[#allocation4 + $0x30] sm:$0xff] %vm15593_vm3, %v3061_v35  ;;  %v12306_v50 = vpack.c.bf16 %v3080_v36, %v3228_v63  ;;  %vm15595_vm3 = vmmov %vm15578_vm0 }
 0x485   : > { %v12303_v1 = vld [vmem:[#allocation4 + $0x21] sm:$0xff]  ;;  %v3105_v15 = vsel %vm15590_vm6, %v3097_v24, 0.0  ;;  %v3315_v44 = vsel %vm15561_vm14, %v3097_v24, 0.0 }
 0x486   : > { %v12312_v29 = vpack.c.bf16 %v3105_v15, %v3104_v43  ;;  %9518 = vmatmul.msk.bf16.gmra.mxu2 %vm15594_vm1, %v12306_v50  ;;  %v4108_v57 = vsel %vm15514_vm8, %v12303_v1, 0.0  ;;  %vm15596_vm1 = vmmov %vm15578_vm0 }
 0x487   : > { %v3028_v48 = vpop.f32.mrf.mxu0  ;;  %v12324_v11 = vpack.c.bf16 %v4108_v57, %v4107_v26 }
 0x488   : > { %9506 = vmatmul.msk.bf16.gmra.mxu1 %vm15578_vm0, %v12312_v29  ;;  %v3039_v51 = vadd.f32 %v3028_v48, %v11988_v25  ;;  %v3785_v25 = vsel %vm15589_vm11, %v3097_v24, 0.0  ;;  %v10559_v48 = vld [vmem:[%s15339_s7 + $0xb8] sm:$0xff] }
 0x489   : > { %v3054_v62 = vld [vmem:[#allocation3 + $0x28] sm:$0xff]  ;;  %4034 = vmatpush.bf16.msra.mxu0 %v10559_v48 }
 0x48a   : > { %v3062_v59 = vmax.f32 %v3054_v62, 0.0  ;;  %3047 = vst.msk [vmem:[#allocation3 + $0x30] sm:$0xff] %vm15595_vm3, %v3039_v51  ;;  %vm15598_vm3 = vmmov %vm15578_vm0 }
 0x48b   : > { %v3230_v54 = vld [vmem:[#allocation4 + $0x30] sm:$0xff] }
 0x48c   : > { %v3308_v56 = vld [vmem:[#allocation4 + $0x2f] sm:$0xff]  ;;  %3070 = vst.msk [vmem:[#allocation4 + $0x38] sm:$0xff] %vm15596_vm1, %v3062_v59  ;;  %v12329_v23 = vpack.c.bf16 %v3230_v54, %v3080_v36  ;;  %vm15599_vm1 = vmmov %vm15578_vm0  ;;  %v15604_v36 = vld [vmem:[#allocation21_spill] sm:$0xff] }
 0x48d   : > { %v3316_v0 = vsel %vm15597_vm15, %v3308_v56, 0.0  ;;  %v3786_v42 = vsel %vm15590_vm6, %v3308_v56, 0.0  ;;  %v12346_v31 = vld [vmem:[#allocation4 + $0x29] sm:$0xff]  ;;  %vm15600_vm6 = vmmov %vm15578_vm0  ;;  %v3106_v63 = vsel %vm15561_vm14, %v3308_v56, 0.0 }
 0x48e   : > { %v3321_v2 = vpack.c.bf16 %v3316_v0, %v3315_v44  ;;  %9535 = vmatmul.msk.bf16.gmra.mxu3 %vm15578_vm0, %v12329_v23  ;;  %v12341_v28 = vpack.c.bf16 %v3786_v42, %v3785_v25  ;;  %v4109_v22 = vsel %vm15509_vm2, %v12346_v31, 0.0  ;;  %v3566_v25 = vld [vmem:[#allocation4 + $0x11] sm:$0xff]  ;;  %v15607_v42 = vld [vmem:[#allocation18_spill] sm:$0xff] }
 0x48f   : > { %v3030_v10 = vpop.f32.mrf.mxu0 }
 0x490   : > { %9551 = vmatmul.msk.bf16.gmra.mxu0 %vm15598_vm3, %v3321_v2  ;;  %v3040_v6 = vadd.f32 %v3030_v10, %v12016_v58  ;;  %vm15602_vm3 = vmmov %vm15578_vm0 }
 0x491   : > { %v3055_v39 = vld [vmem:[#allocation3 + $0x30] sm:$0xff] }
 0x492   : > { %v3063_v12 = vmax.f32 %v3055_v39, 0.0  ;;  %3048 = vst.msk [vmem:[#allocation3 + $0x38] sm:$0xff] %vm15599_vm1, %v3040_v6  ;;  %vm15605_vm1 = vmmov %vm15578_vm0  ;;  %v15608_v6 = vld [vmem:[#allocation19_spill] sm:$0xff] }
 0x493   : > { %v3082_v55 = vld [vmem:[#allocation4 + $0x38] sm:$0xff] }
 0x494   : > { %v3099_v30 = vld [vmem:[#allocation4 + $0x37] sm:$0xff]  ;;  %3071 = vst.msk [vmem:[#allocation4 + $0x40] sm:$0xff] %vm15600_vm6, %v3063_v12  ;;  %v12351_v4 = vpack.c.bf16 %v3082_v55, %v3230_v54  ;;  %vm15601_vm6 = vmmov %vm15578_vm0 }
 0x495   : > { %v12348_v34 = vld [vmem:[#allocation4 + $0x31] sm:$0xff]  ;;  %v3107_v58 = vsel %vm15597_vm15, %v3099_v30, 0.0  ;;  %v3317_v35 = vsel %vm15565_vm7, %v3099_v30, 0.0  ;;  %v3787_v15 = vsel %vm15561_vm14, %v3099_v30, 0.0  ;;  %v3574_v30 = vsel %vm15514_vm8, %v3566_v25, 0.0 }
 0x496   : > { %v12357_v21 = vpack.c.bf16 %v3107_v58, %v3106_v63  ;;  %9519 = vmatmul.msk.bf16.gmra.mxu2 %vm15578_vm0, %v12351_v4  ;;  %v4110_v3 = vsel %vm11094_vm9, %v12348_v34, 0.0  ;;  %v3429_v48 = vsel %vm11142_vm12, %v12348_v34, 0.0 }
 0x497   : > { %v12378_v61 = vpack.c.bf16 %v4110_v3, %v4109_v22  ;;  %v3425_v22 = vsel %vm11030_vm4, %v3566_v25, 0.0  ;;  %v15619_v25 = vmov 0.0  }
 0x498   : > { %9507 = vmatmul.msk.bf16.gmra.mxu1 %vm15601_vm6, %v12357_v21  ;;  %vm15606_vm6 = vmmov %vm15578_vm0  ;;  %v12441_v3 = vpack.c.bf16 %v3426_v38, %v3425_v22  ;;  %v10567_v22 = vld [vmem:[%s15339_s7 + $0xf8] sm:$0xff] }
 0x499   : > { %v3056_v13 = vld [vmem:[#allocation3 + $0x38] sm:$0xff] }
 0x49a   : > { %v3064_v33 = vmax.f32 %v3056_v13, 0.0  ;;  %v3576_v13 = vsel %vm11094_vm9, %v12303_v1, 0.0 }
 0x49b   : > { %v3232_v40 = vld [vmem:[#allocation4 + $0x40] sm:$0xff] }
 0x49c   : > { %v3310_v37 = vld [vmem:[#allocation4 + $0x3f] sm:$0xff]  ;;  %3072 = vst.msk [vmem:[#allocation4 + $0x48] sm:$0xff] %vm15602_vm3, %v3064_v33  ;;  %v12381_v60 = vpack.c.bf16 %v3232_v40, %v3082_v55  ;;  %vm15609_vm3 = vmmov %vm15578_vm0  ;;  %v3565_v55 = vld [vmem:[#allocation4 + $0x9] sm:$0xff]  ;;  %v3575_v33 = vsel %vm15509_vm2, %v12301_v47, 0.0 }
 0x49d   : > { %v3318_v24 = vsel %vm15545_vm10, %v3310_v37, 0.0  ;;  %v3788_v26 = vsel %vm15597_vm15, %v3310_v37, 0.0  ;;  %v12399_v51 = vld [vmem:[#allocation4 + $0x39] sm:$0xff]  ;;  %v3108_v44 = vsel %vm15565_vm7, %v3310_v37, 0.0  ;;  %v3573_v63 = vsel %vm11030_vm4, %v3565_v55, 0.0  ;;  %v10558_v37 = vld [vmem:[%s15339_s7 + $0xb0] sm:$0xff] }
 0x49e   : > { %v3322_v43 = vpack.c.bf16 %v3318_v24, %v3317_v35  ;;  %9536 = vmatmul.msk.bf16.gmra.mxu3 %vm15605_vm1, %v12381_v60  ;;  %v12393_v57 = vpack.c.bf16 %v3788_v26, %v3787_v15  ;;  %v4111_v10 = vsel %vm11142_vm12, %v12399_v51, 0.0  ;;  %v3581_v58 = vpack.c.bf16 %v3574_v30, %v3573_v63  ;;  %vm15610_vm1 = vmmov %vm15578_vm0  ;;  %4035 = vmatpush.bf16.msra.mxu0 %v10558_v37 }
 0x49f   : > { %v3428_v35 = vsel %vm11094_vm9, %v12346_v31, 0.0  ;;  %v3427_v24 = vsel %vm15509_vm2, %v12303_v1, 0.0  ;;  %v3577_v15 = vsel %vm11142_vm12, %v12346_v31, 0.0  ;;  %v3430_v1 = vsel %vm11146_vm13, %v12399_v51, 0.0  ;;  %v10561_v31 = vld [vmem:[%s15339_s7 + $0xc8] sm:$0xff] }
 0x4a0   : > { %9552 = vmatmul.msk.bf16.gmra.mxu0 %vm15578_vm0, %v3322_v43  ;;  %v12474_v47 = vpack.c.bf16 %v3428_v35, %v3427_v24  ;;  %v3578_v43 = vsel %vm11146_vm13, %v12348_v34, 0.0  ;;  %v15620_v34 = vld [vmem:[#allocation23_spill] sm:$0xff] }
 0x4a1   : > { %v3583_v26 = vpack.c.bf16 %v3578_v43, %v3577_v15  ;;  %v10560_v43 = vld [vmem:[%s15339_s7 + $0xc0] sm:$0xff] }
 0x4a2   : > { %v10564_v15 = vld [vmem:[%s15339_s7 + $0xe0] sm:$0xff] }
 0x4a3   : > { %v12401_v62 = vld [vmem:[#allocation4 + $0x48] sm:$0xff] }
 0x4a4   : > { %v12403_v59 = vld [vmem:[#allocation4 + $0x47] sm:$0xff]  ;;  %v12408_v56 = vpack.c.bf16 %v12401_v62, %v3232_v40  ;;  %v3582_v40 = vpack.c.bf16 %v3576_v13, %v3575_v33 }
 0x4a5   : > { %v12405_v54 = vld [vmem:[#allocation4 + $0x41] sm:$0xff]  ;;  %v3109_v0 = vsel %vm15545_vm10, %v12403_v59, 0.0  ;;  %v12522_v63 = vld [vmem:[#allocation4 + $0x49] sm:$0xff] }
 0x4a6   : > { %v12415_v2 = vpack.c.bf16 %v3109_v0, %v3108_v44  ;;  %9520 = vmatmul.msk.bf16.gmra.mxu2 %vm15606_vm6, %v12408_v56  ;;  %v4112_v39 = vsel %vm11146_vm13, %v12405_v54, 0.0  ;;  %vm15611_vm6 = vmmov %vm15578_vm0  ;;  %v12495_v44 = vpack.c.bf16 %v3430_v1, %v3429_v48  ;;  %v10565_v0 = vld [vmem:[%s15339_s7 + $0xe8] sm:$0xff] }
 0x4a7   : > { %v12427_v12 = vpack.c.bf16 %v4112_v39, %v4111_v10  ;;  %v15622_v39 = vld [vmem:[#allocation22_spill] sm:$0xff] }
 0x4a8   : > { %9508 = vmatmul.msk.bf16.gmra.mxu1 %vm15609_vm3, %v12415_v2  ;;  %vm15612_vm3 = vmmov %vm15578_vm0 }
 0x4ae   : > { %9597 = vmatmul.msk.bf16.vlgmr.msrb.gmra.mxu3 %vm15610_vm1, %v3581_v58  ;;  %vm15613_vm1 = vmmov %vm15578_vm0 }
 0x4b0   : > { %9613 = vmatmul.msk.bf16.vlgmr.msrb.gmra.mxu0 %vm15578_vm0, %v12244_v45  ;;  %v10556_v45 = vld [vmem:[%s15339_s7 + $0xa0] sm:$0xff] }
 0x4b1   : > { %3949 = vmatpush.bf16.msra.mxu3 %v10556_v45  ;;  %4375 = vmatpush.bf16.msrb.mxu0 %v10567_v22 }
 0x4b5   : > { %4297 = vmatpush.bf16.msrb.mxu3 %v10565_v0 }
 0x4b6   : > { %9581 = vmatmul.msk.bf16.vlgmr.msrb.gmra.mxu2 %vm15611_vm6, %v12441_v3  ;;  %vm15614_vm6 = vmmov %vm15578_vm0 }
 0x4b7   : > { %4219 = vmatpush.bf16.msrb.mxu2 %v10561_v31 }
 0x4b8   : > { %9569 = vmatmul.msk.bf16.vlgmr.msrb.gmra.mxu1 %vm15612_vm3, %v12257_v19  ;;  %vm15615_vm3 = vmmov %vm15578_vm0 }
 0x4b9   : > { %4298 = vmatpush.bf16.msrb.mxu3 %v10564_v15 }
 0x4bb   : > { %4220 = vmatpush.bf16.msrb.mxu2 %v10560_v43 }
 0x4be   : > { %9598 = vmatmul.msk.bf16.gmra.mxu3 %vm15613_vm1, %v3582_v40  ;;  %vm15616_vm1 = vmmov %vm15578_vm0 }
 0x4c0   : > { %9614 = vmatmul.msk.bf16.gmra.mxu0 %vm15578_vm0, %v12272_v49 }
 0x4c6   : > { %9582 = vmatmul.msk.bf16.gmra.mxu2 %vm15614_vm6, %v12474_v47  ;;  %vm15617_vm6 = vmmov %vm15578_vm0 }
 0x4c8   : > { %9570 = vmatmul.msk.bf16.gmra.mxu1 %vm15615_vm3, %v12306_v50  ;;  %vm15618_vm3 = vmmov %vm15578_vm0 }
 0x4c9   : > { %vm15624_vm12 = vmmov %vm15618_vm3 }
 0x4ca   : > { %vm15630_vm13 = vmmov %vm15618_vm3 }
 0x4cb   : > { %vm15636_vm2 = vmmov %vm15618_vm3 }
 0x4ce   : > { %9599 = vmatmul.msk.bf16.gmra.mxu3 %vm15616_vm1, %v3583_v26  ;;  %vm15425_vm1 = vcmask 130048  }
 0x4cf   : > { %411 = vst.msk [vmem:[#allocation5 + $0x10] sm:$0xff] %vm15425_vm1, %v15619_v25 }
 0x4d0   : > { %9615 = vmatmul.msk.bf16.gmra.mxu0 %vm15578_vm0, %v12329_v23  ;;  %vm15621_vm0 = vnez %v15620_v34  ;;  %412 = vst.msk [vmem:[#allocation5 + $0x18] sm:$0xff] %vm15425_vm1, %v15619_v25 }
 0x4d1   : > { %v3580_v10 = vsel %vm15621_vm0, %v12405_v54, 0.0  ;;  %413 = vst.msk [vmem:[#allocation5 + $0x20] sm:$0xff] %vm15425_vm1, %v15619_v25  ;;  %v3432_v58 = vsel %vm15621_vm0, %v12522_v63, 0.0 }
 0x4d2   : > { %414 = vst.msk [vmem:[#allocation5 + $0x28] sm:$0xff] %vm15425_vm1, %v15619_v25 }
 0x4d3   : > { %415 = vst.msk [vmem:[#allocation5 + $0x30] sm:$0xff] %vm15425_vm1, %v15619_v25 }
 0x4d4   : > { %416 = vst.msk [vmem:[#allocation5 + $0x38] sm:$0xff] %vm15425_vm1, %v15619_v25 }
 0x4d5   : > { %417 = vst.msk [vmem:[#allocation5 + $0x40] sm:$0xff] %vm15425_vm1, %v15619_v25 }
 0x4d6   : > { %9583 = vmatmul.msk.bf16.gmra.mxu2 %vm15617_vm6, %v12495_v44  ;;  %vm15623_vm6 = vnez %v15622_v39  ;;  %418 = vst.msk [vmem:[#allocation5 + $0x48] sm:$0xff] %vm15425_vm1, %v15619_v25 }
 0x4d7   : > { %v3579_v55 = vsel %vm15623_vm6, %v12399_v51, 0.0  ;;  %v3431_v51 = vsel %vm15623_vm6, %v12405_v54, 0.0  ;;  %419 = vst.msk [vmem:[#allocation5 + $0x50] sm:$0xff] %vm15425_vm1, %v15619_v25  ;;  %v10563_v54 = vld [vmem:[%s15339_s7 + $0xd8] sm:$0xff] }
 0x4d8   : > { %9571 = vmatmul.msk.bf16.gmra.mxu1 %vm15618_vm3, %v12351_v4  ;;  %v3584_v30 = vpack.c.bf16 %v3580_v10, %v3579_v55  ;;  %420 = vst.msk [vmem:[#allocation5 + $0x58] sm:$0xff] %vm15425_vm1, %v15619_v25  ;;  %v12544_v38 = vpack.c.bf16 %v3432_v58, %v3431_v51  ;;  %v10562_v51 = vld [vmem:[%s15339_s7 + $0xd0] sm:$0xff] }
 0x4d9   : > { %422 = vst.msk [vmem:[#allocation5 + $0x68] sm:$0xff] %vm15425_vm1, %v15619_v25  ;;  %4166 = vmatpush.bf16.msrb.mxu1 %v10563_v54  ;;  %v10566_v58 = vld [vmem:[%s15339_s7 + $0xf0] sm:$0xff] }
 0x4da   : > { %423 = vst.msk [vmem:[#allocation5 + $0x70] sm:$0xff] %vm15425_vm1, %v15619_v25  ;;  %4376 = vmatpush.bf16.msrb.mxu0 %v10566_v58 }
 0x4db   : > { %424 = vst.msk [vmem:[#allocation5 + $0x78] sm:$0xff] %vm15425_vm1, %v15619_v25 }
 0x4dc   : > { %425 = vst.msk [vmem:[#allocation5 + $0x80] sm:$0xff] %vm15425_vm1, %v15619_v25 }
 0x4dd   : > { %426 = vst.msk [vmem:[#allocation5 + $0x88] sm:$0xff] %vm15425_vm1, %v15619_v25  ;;  %4167 = vmatpush.bf16.msrb.mxu1 %v10562_v51 }
 0x4de   : > { %9600 = vmatmul.msk.bf16.gmra.mxu3 %vm15618_vm3, %v3584_v30  ;;  %427 = vst.msk [vmem:[#allocation5 + $0x90] sm:$0xff] %vm15425_vm1, %v15619_v25 }
 0x4df   : > { %428 = vst.msk [vmem:[#allocation5 + $0x98] sm:$0xff] %vm15425_vm1, %v15619_v25 }
 0x4e0   : > { %9616 = vmatmul.msk.bf16.gmra.mxu0 %vm15624_vm12, %v12381_v60  ;;  %vm15625_vm12 = vmmov %vm15618_vm3  ;;  %429 = vst.msk [vmem:[#allocation5 + $0xa0] sm:$0xff] %vm15425_vm1, %v15619_v25 }
 0x4e1   : > { %430 = vst.msk [vmem:[#allocation5 + $0xa8] sm:$0xff] %vm15425_vm1, %v15619_v25 }
 0x4e2   : > { %431 = vst.msk [vmem:[#allocation5 + $0xb0] sm:$0xff] %vm15425_vm1, %v15619_v25 }
 0x4e3   : > { %434 = vst.msk [vmem:[#allocation5 + $0xc8] sm:$0xff] %vm15425_vm1, %v15619_v25 }
 0x4e4   : > { %435 = vst.msk [vmem:[#allocation5 + $0xd0] sm:$0xff] %vm15425_vm1, %v15619_v25 }
 0x4e5   : > { %436 = vst.msk [vmem:[#allocation5 + $0xd8] sm:$0xff] %vm15425_vm1, %v15619_v25 }
 0x4e6   : > { %9584 = vmatmul.msk.bf16.gmra.mxu2 %vm15625_vm12, %v12544_v38  ;;  %vm15626_vm12 = vmmov %vm15618_vm3  ;;  %437 = vst.msk [vmem:[#allocation5 + $0xe0] sm:$0xff] %vm15425_vm1, %v15619_v25 }
 0x4e7   : > { %438 = vst.msk [vmem:[#allocation5 + $0xe8] sm:$0xff] %vm15425_vm1, %v15619_v25 }
 0x4e8   : > { %9572 = vmatmul.msk.bf16.gmra.mxu1 %vm15618_vm3, %v12408_v56  ;;  %439 = vst.msk [vmem:[#allocation5 + $0xf0] sm:$0xff] %vm15425_vm1, %v15619_v25 }
 0x4e9   : > { %440 = vst.msk [vmem:[#allocation5 + $0xf8] sm:$0xff] %vm15425_vm1, %v15619_v25 }
 0x4ea   : > { %441 = vst.msk [vmem:[#allocation5 + $0x100] sm:$0xff] %vm15425_vm1, %v15619_v25 }
 0x4eb   : > { %442 = vst.msk [vmem:[#allocation5 + $0x108] sm:$0xff] %vm15425_vm1, %v15619_v25 }
 0x4ec   : > { %443 = vst.msk [vmem:[#allocation5 + $0x110] sm:$0xff] %vm15425_vm1, %v15619_v25 }
 0x4ed   : > { %v3356_v32 = vpop.f32.mrf.mxu0  ;;  %445 = vst.msk [vmem:[#allocation5 + $0x120] sm:$0xff] %vm15425_vm1, %v15619_v25 }
 0x4ee   : > { %9661 = vmatmul.msk.bf16.vlgmr.msra.gmra.mxu3 %vm15626_vm12, %v12257_v19  ;;  %vm15627_vm12 = vmmov %vm15618_vm3  ;;  %446 = vst.msk [vmem:[#allocation5 + $0x128] sm:$0xff] %vm15425_vm1, %v15619_v25 }
 0x4ef   : > { %447 = vst.msk [vmem:[#allocation5 + $0x130] sm:$0xff] %vm15425_vm1, %v15619_v25 }
 0x4f0   : > { %9677 = vmatmul.msk.bf16.vlgmr.msra.gmra.mxu0 %vm15618_vm3, %v12263_v41  ;;  %448 = vst.msk [vmem:[#allocation5 + $0x138] sm:$0xff] %vm15425_vm1, %v15619_v25 }
 0x4f1   : > { %v3270_v45 = vpop.f32.mrf.mxu3  ;;  %449 = vst.msk [vmem:[#allocation5 + $0x140] sm:$0xff] %vm15425_vm1, %v15619_v25 }
 0x4f2   : > { %450 = vst.msk [vmem:[#allocation5 + $0x148] sm:$0xff] %vm15425_vm1, %v15619_v25 }
 0x4f3   : > { %451 = vst.msk [vmem:[#allocation5 + $0x150] sm:$0xff] %vm15425_vm1, %v15619_v25 }
 0x4f4   : > { %452 = vst.msk [vmem:[#allocation5 + $0x158] sm:$0xff] %vm15425_vm1, %v15619_v25 }
 0x4f5   : > { %v3147_v17 = vpop.f32.mrf.mxu1  ;;  %v3358_v13 = vpop.f32.mrf.mxu0  ;;  %453 = vst.msk [vmem:[#allocation5 + $0x160] sm:$0xff] %vm15425_vm1, %v15619_v25 }
 0x4f6   : > { %9645 = vmatmul.msk.bf16.vlgmr.msra.gmra.mxu2 %vm15627_vm12, %v12272_v49  ;;  %vm15628_vm12 = vmmov %vm15618_vm3  ;;  %454 = vst.msk [vmem:[#allocation5 + $0x168] sm:$0xff] %vm15425_vm1, %v15619_v25 }
 0x4f8   : > { %9633 = vmatmul.msk.bf16.vlgmr.msra.gmra.mxu1 %vm15618_vm3, %v12293_v27  ;;  %v12607_v27 = vld [vmem:[%s15340_s8] ss:$0 sm:$0xff] }
 0x4f9   : > { %v3200_v41 = vpop.f32.mrf.mxu2  ;;  %v3272_v33 = vpop.f32.mrf.mxu3 }
 0x4fa   : > { %v3201_v40 = vadd.f32 %v3200_v41, %v3147_v17 }
 0x4fc   : > { %v3290_v37 = vadd.f32 %v3270_v45, %v3201_v40 }
 0x4fd   : > { %v3149_v35 = vpop.f32.mrf.mxu1  ;;  %v3361_v24 = vpop.f32.mrf.mxu0 }
 0x4fe   : > { %v3376_v26 = vadd.f32 %v3356_v32, %v3290_v37  ;;  %9662 = vmatmul.msk.bf16.gmra.mxu3 %vm15628_vm12, %v12306_v50  ;;  %vm15629_vm12 = vmmov %vm15618_vm3 }
 0x500   : > { %9678 = vmatmul.msk.bf16.gmra.mxu0 %vm15618_vm3, %v12312_v29  ;;  %v3388_v1 = vadd.f32 %v12607_v27, %v3376_v26 }
 0x501   : > { %v3202_v48 = vpop.f32.mrf.mxu2  ;;  %v3275_v31 = vpop.f32.mrf.mxu3 }
 0x502   : > { %v3396_v0 = vmax.f32 %v3388_v1, 0.0  ;;  %v3203_v10 = vadd.f32 %v3202_v48, %v3149_v35 }
 0x504   : > { %3404 = vst.msk [vmem:[#allocation5 + $0x10] sm:$0xff] %vm15425_vm1, %v3396_v0  ;;  %v3291_v29 = vadd.f32 %v3272_v33, %v3203_v10 }
 0x505   : > { %v3152_v55 = vpop.f32.mrf.mxu1  ;;  %v3363_v30 = vpop.f32.mrf.mxu0 }
 0x506   : > { %v3377_v54 = vadd.f32 %v3358_v13, %v3291_v29  ;;  %9646 = vmatmul.msk.bf16.gmra.mxu2 %vm15629_vm12, %v12329_v23  ;;  %vm15631_vm12 = vmmov %vm15618_vm3 }
 0x508   : > { %9634 = vmatmul.msk.bf16.gmra.mxu1 %vm15618_vm3, %v12341_v28  ;;  %v3389_v22 = vadd.f32 %v12607_v27, %v3377_v54 }
 0x509   : > { %v3205_v32 = vpop.f32.mrf.mxu2  ;;  %v3277_v45 = vpop.f32.mrf.mxu3 }
 0x50a   : > { %v3397_v17 = vmax.f32 %v3389_v22, 0.0  ;;  %v3206_v41 = vadd.f32 %v3205_v32, %v3152_v55 }
 0x50c   : > { %3405 = vst.msk [vmem:[#allocation5 + $0x18] sm:$0xff] %vm15425_vm1, %v3397_v17  ;;  %v3292_v33 = vadd.f32 %v3275_v31, %v3206_v41 }
 0x50d   : > { %v3154_v40 = vpop.f32.mrf.mxu1  ;;  %v3366_v25 = vpop.f32.mrf.mxu0 }
 0x50e   : > { %v3378_v13 = vadd.f32 %v3361_v24, %v3292_v33  ;;  %9663 = vmatmul.msk.bf16.gmra.mxu3 %vm15630_vm13, %v12351_v4  ;;  %vm15632_vm13 = vmmov %vm15618_vm3  ;;  %v3789_v33 = vsel %vm15565_vm7, %v12403_v59, 0.0 }
 0x510   : > { %9679 = vmatmul.msk.bf16.gmra.mxu0 %vm15631_vm12, %v12357_v21  ;;  %v3390_v28 = vadd.f32 %v12607_v27, %v3378_v13  ;;  %vm15633_vm12 = vmmov %vm15618_vm3 }
 0x511   : > { %v3207_v37 = vpop.f32.mrf.mxu2  ;;  %v3280_v35 = vpop.f32.mrf.mxu3 }
 0x512   : > { %v3398_v43 = vmax.f32 %v3390_v28, 0.0  ;;  %v3208_v15 = vadd.f32 %v3207_v37, %v3154_v40 }
 0x514   : > { %3406 = vst.msk [vmem:[#allocation5 + $0x20] sm:$0xff] %vm15425_vm1, %v3398_v43  ;;  %v3293_v26 = vadd.f32 %v3277_v45, %v3208_v15  ;;  %v3765_v45 = vld [vmem:[#allocation4 + $0x50] sm:$0xff] }
 0x515   : > { %v3157_v1 = vpop.f32.mrf.mxu1  ;;  %v3368_v48 = vpop.f32.mrf.mxu0  ;;  %v12677_v28 = vpack.c.bf16 %v3765_v45, %v12401_v62 }
 0x516   : > { %v3379_v31 = vadd.f32 %v3363_v30, %v3293_v26  ;;  %9647 = vmatmul.msk.bf16.gmra.mxu2 %vm15618_vm3, %v12381_v60  ;;  %v3782_v30 = vld [vmem:[#allocation4 + $0x4f] sm:$0xff] }
 0x517   : > { %v3790_v40 = vsel %vm15545_vm10, %v3782_v30, 0.0 }
 0x518   : > { %9635 = vmatmul.msk.bf16.gmra.mxu1 %vm15632_vm13, %v12393_v57  ;;  %v3391_v21 = vadd.f32 %v12607_v27, %v3379_v31  ;;  %v3794_v37 = vpack.c.bf16 %v3790_v40, %v3789_v33  ;;  %vm15634_vm13 = vmmov %vm15618_vm3 }
 0x519   : > { %v3210_v24 = vpop.f32.mrf.mxu2  ;;  %v3282_v0 = vpop.f32.mrf.mxu3 }
 0x51a   : > { %v3399_v10 = vmax.f32 %v3391_v21, 0.0  ;;  %v3211_v29 = vadd.f32 %v3210_v24, %v3157_v1 }
 0x51c   : > { %3407 = vst.msk [vmem:[#allocation5 + $0x28] sm:$0xff] %vm15425_vm1, %v3399_v10  ;;  %v3294_v55 = vadd.f32 %v3280_v35, %v3211_v29 }
 0x51d   : > { %v3159_v51 = vpop.f32.mrf.mxu1  ;;  %v3371_v58 = vpop.f32.mrf.mxu0 }
 0x51e   : > { %v3380_v54 = vadd.f32 %v3366_v25, %v3294_v55  ;;  %9664 = vmatmul.msk.bf16.gmra.mxu3 %vm15633_vm12, %v12408_v56  ;;  %vm15635_vm12 = vmmov %vm15618_vm3 }
 0x520   : > { %9680 = vmatmul.msk.bf16.gmra.mxu0 %vm15618_vm3, %v12415_v2  ;;  %v3392_v57 = vadd.f32 %v12607_v27, %v3380_v54 }
 0x521   : > { %v3212_v22 = vpop.f32.mrf.mxu2  ;;  %v3285_v32 = vpop.f32.mrf.mxu3 }
 0x522   : > { %v3400_v17 = vmax.f32 %v3392_v57, 0.0  ;;  %v3213_v41 = vadd.f32 %v3212_v22, %v3159_v51 }
 0x524   : > { %3408 = vst.msk [vmem:[#allocation5 + $0x30] sm:$0xff] %vm15425_vm1, %v3400_v17  ;;  %v3295_v25 = vadd.f32 %v3282_v0, %v3213_v41  ;;  %v12699_v17 = vld [vmem:[%s15340_s8] ss:$0 sm:$0xff] }
 0x525   : > { %v3162_v13 = vpop.f32.mrf.mxu1  ;;  %v3373_v2 = vpop.f32.mrf.mxu0 }
 0x526   : > { %v3381_v35 = vadd.f32 %v3368_v48, %v3295_v25  ;;  %9648 = vmatmul.msk.bf16.gmra.mxu2 %vm15634_vm13, %v12677_v28  ;;  %vm15637_vm13 = vmmov %vm15636_vm2 }
 0x528   : > { %9636 = vmatmul.msk.bf16.gmra.mxu1 %vm15635_vm12, %v3794_v37  ;;  %v3393_v59 = vadd.f32 %v12607_v27, %v3381_v35  ;;  %vm15638_vm12 = vmmov %vm15636_vm2 }
 0x529   : > { %v3215_v43 = vpop.f32.mrf.mxu2  ;;  %v3287_v15 = vpop.f32.mrf.mxu3 }
 0x52a   : > { %v3401_v26 = vmax.f32 %v3393_v59, 0.0  ;;  %v3216_v1 = vadd.f32 %v3215_v43, %v3162_v13 }
 0x52c   : > { %3409 = vst.msk [vmem:[#allocation5 + $0x38] sm:$0xff] %vm15425_vm1, %v3401_v26  ;;  %v3296_v31 = vadd.f32 %v3285_v32, %v3216_v1 }
 0x52d   : > { %v3164_v21 = vpop.f32.mrf.mxu1  ;;  %v3696_v24 = vpop.f32.mrf.mxu0 }
 0x52e   : > { %v3382_v62 = vadd.f32 %v3371_v58, %v3296_v31  ;;  %9725 = vmatmul.msk.bf16.vlgmr.msrb.gmra.mxu3 %vm15618_vm3, %v12441_v3  ;;  %vm15639_vm3 = vmmov %vm15636_vm2 }
 0x530   : > { %9741 = vmatmul.msk.bf16.vlgmr.msrb.gmra.mxu0 %vm15636_vm2, %v12257_v19  ;;  %v3394_v48 = vadd.f32 %v12607_v27, %v3382_v62 }
 0x531   : > { %v3217_v0 = vpop.f32.mrf.mxu2  ;;  %v3618_v10 = vpop.f32.mrf.mxu3 }
 0x532   : > { %v3402_v29 = vmax.f32 %v3394_v48, 0.0  ;;  %v3218_v55 = vadd.f32 %v3217_v0, %v3164_v21 }
 0x534   : > { %3410 = vst.msk [vmem:[#allocation5 + $0x40] sm:$0xff] %vm15425_vm1, %v3402_v29  ;;  %v3297_v51 = vadd.f32 %v3287_v15, %v3218_v55 }
 0x535   : > { %v3487_v54 = vpop.f32.mrf.mxu1  ;;  %v3698_v30 = vpop.f32.mrf.mxu0 }
 0x536   : > { %v3383_v57 = vadd.f32 %v3373_v2, %v3297_v51  ;;  %9709 = vmatmul.msk.bf16.vlgmr.msrb.gmra.mxu2 %vm15637_vm13, %v12324_v11  ;;  %vm15640_vm13 = vmmov %vm15636_vm2 }
 0x538   : > { %9697 = vmatmul.msk.bf16.vlgmr.msrb.gmra.mxu1 %vm15638_vm12, %v12272_v49  ;;  %v3395_v19 = vadd.f32 %v12607_v27, %v3383_v57  ;;  %vm15641_vm12 = vmmov %vm15636_vm2 }
 0x539   : > { %v3540_v3 = vpop.f32.mrf.mxu2  ;;  %v3620_v58 = vpop.f32.mrf.mxu3 }
 0x53a   : > { %v3403_v22 = vmax.f32 %v3395_v19, 0.0  ;;  %v3541_v32 = vadd.f32 %v3540_v3, %v3487_v54 }
 0x53c   : > { %3411 = vst.msk [vmem:[#allocation5 + $0x48] sm:$0xff] %vm15425_vm1, %v3403_v22  ;;  %v3638_v45 = vadd.f32 %v3618_v10, %v3541_v32 }
 0x53d   : > { %v3489_v41 = vpop.f32.mrf.mxu1  ;;  %v3701_v33 = vpop.f32.mrf.mxu0 }
 0x53e   : > { %v3716_v11 = vadd.f32 %v3696_v24, %v3638_v45  ;;  %9726 = vmatmul.msk.bf16.gmra.mxu3 %vm15636_vm2, %v12474_v47 }
 0x540   : > { %9742 = vmatmul.msk.bf16.gmra.mxu0 %vm15639_vm3, %v12306_v50  ;;  %v3728_v49 = vadd.f32 %v12699_v17, %v3716_v11  ;;  %vm15642_vm3 = vmmov %vm15636_vm2  ;;  %v4106_v11 = vld [vmem:[#allocation4 + $0x51] sm:$0xff] }
 0x541   : > { %v3542_v27 = vpop.f32.mrf.mxu2  ;;  %v3623_v40 = vpop.f32.mrf.mxu3 }
 0x542   : > { %v3736_v25 = vmax.f32 %v3728_v49, 0.0  ;;  %v3543_v13 = vadd.f32 %v3542_v27, %v3489_v41 }
 0x544   : > { %3745 = vst.msk [vmem:[#allocation5 + $0x70] sm:$0xff] %vm15425_vm1, %v3736_v25  ;;  %v3639_v2 = vadd.f32 %v3620_v58, %v3543_v13  ;;  %v4113_v13 = vsel %vm15623_vm6, %v12522_v63, 0.0 }
 0x545   : > { %v3492_v37 = vpop.f32.mrf.mxu1  ;;  %v3703_v35 = vpop.f32.mrf.mxu0 }
 0x546   : > { %v3717_v59 = vadd.f32 %v3698_v30, %v3639_v2  ;;  %9710 = vmatmul.msk.bf16.gmra.mxu2 %vm15640_vm13, %v12378_v61  ;;  %vm15643_vm13 = vmmov %vm15636_vm2  ;;  %v4114_v2 = vsel %vm15621_vm0, %v4106_v11, 0.0 }
 0x548   : > { %9698 = vmatmul.msk.bf16.gmra.mxu1 %vm15641_vm12, %v12329_v23  ;;  %v3729_v50 = vadd.f32 %v12699_v17, %v3717_v59  ;;  %vm15644_vm12 = vmmov %vm15636_vm2 }
 0x549   : > { %v3545_v47 = vpop.f32.mrf.mxu2  ;;  %v3625_v43 = vpop.f32.mrf.mxu3 }
 0x54a   : > { %v3737_v15 = vmax.f32 %v3729_v50, 0.0  ;;  %v3546_v26 = vadd.f32 %v3545_v47, %v3492_v37  ;;  %v4118_v47 = vpack.c.bf16 %v4114_v2, %v4113_v13 }
 0x54c   : > { %3746 = vst.msk [vmem:[#allocation5 + $0x78] sm:$0xff] %vm15425_vm1, %v3737_v15  ;;  %v3640_v1 = vadd.f32 %v3623_v40, %v3546_v26 }
 0x54d   : > { %v3494_v31 = vpop.f32.mrf.mxu1  ;;  %v3706_v21 = vpop.f32.mrf.mxu0 }
 0x54e   : > { %v3718_v24 = vadd.f32 %v3701_v33, %v3640_v1  ;;  %9727 = vmatmul.msk.bf16.gmra.mxu3 %vm15636_vm2, %v12495_v44  ;;  %v10568_v44 = vld [vmem:[%s15341_s9] sm:$0xff]  ;;  %vm15645_vm2 = vnez %v15465_v8 }
 0x54f   : > { %4544 = vmatpush.bf16.msra.mxu2 %v10568_v44 }
 0x550   : > { %9743 = vmatmul.msk.bf16.gmra.mxu0 %vm15642_vm3, %v12351_v4  ;;  %v3730_v23 = vadd.f32 %v12699_v17, %v3718_v24  ;;  %v10569_v4 = vld [vmem:[%s15341_s9 + $0x8] sm:$0xff] }
 0x551   : > { %v3547_v61 = vpop.f32.mrf.mxu2  ;;  %v3628_v62 = vpop.f32.mrf.mxu3  ;;  %4497 = vmatpush.bf16.msra.mxu1 %v10569_v4  ;;  %v4438_v4 = vld [vmem:[#allocation5 + $0x18] sm:$0xff] }
 0x552   : > { %v3738_v48 = vmax.f32 %v3730_v23, 0.0  ;;  %v3548_v0 = vadd.f32 %v3547_v61, %v3494_v31  ;;  %v10570_v61 = vld [vmem:[%s15341_s9 + $0x10] sm:$0xff] }
 0x553   : > { %4606 = vmatpush.bf16.msra.mxu3 %v10570_v61 }
 0x554   : > { %3747 = vst.msk [vmem:[#allocation5 + $0x80] sm:$0xff] %vm15425_vm1, %v3738_v48  ;;  %v3641_v10 = vadd.f32 %v3625_v43, %v3548_v0 }
 0x555   : > { %v3497_v29 = vpop.f32.mrf.mxu1  ;;  %v3708_v55 = vpop.f32.mrf.mxu0 }
 0x556   : > { %v3719_v51 = vadd.f32 %v3703_v35, %v3641_v10  ;;  %9711 = vmatmul.msk.bf16.gmra.mxu2 %vm15643_vm13, %v12427_v12  ;;  %v6959_v12 = vld [vmem:[#allocation5 + $0x77] sm:$0xff]  ;;  %vm15647_vm13 = vmmov %vm15642_vm3 }
 0x557   : > { %v4453_v10 = vld [vmem:[#allocation5 + $0x77] sm:$0xff] }
 0x558   : > { %9699 = vmatmul.msk.bf16.gmra.mxu1 %vm15644_vm12, %v12381_v60  ;;  %v3731_v54 = vadd.f32 %v12699_v17, %v3719_v51  ;;  %v7941_v60 = vsel %vm15512_vm5, %v6959_v12, 0.0  ;;  %vm15648_vm12 = vmmov %vm15642_vm3 }
 0x559   : > { %v3550_v30 = vpop.f32.mrf.mxu2  ;;  %v3630_v57 = vpop.f32.mrf.mxu3 }
 0x55a   : > { %v3739_v19 = vmax.f32 %v3731_v54, 0.0  ;;  %v3551_v3 = vadd.f32 %v3550_v30, %v3497_v29  ;;  %v4452_v54 = vld [vmem:[#allocation5 + $0x6f] sm:$0xff] }
 0x55b   : > { %v6960_v45 = vld [vmem:[#allocation5 + $0x7f] sm:$0xff] }
 0x55c   : > { %3748 = vst.msk [vmem:[#allocation5 + $0x88] sm:$0xff] %vm15425_vm1, %v3739_v19  ;;  %v3642_v58 = vadd.f32 %v3628_v62, %v3551_v3  ;;  %v7942_v41 = vsel %vm15645_vm2, %v6960_v45, 0.0  ;;  %v4461_v19 = vsel %vm15645_vm2, %v4453_v10, 0.0  ;;  %v4437_v3 = vld [vmem:[#allocation5 + $0x10] sm:$0xff]  ;;  %v4460_v45 = vsel %vm15512_vm5, %v4452_v54, 0.0 }
 0x55d   : > { %v3499_v22 = vpop.f32.mrf.mxu1  ;;  %v3711_v32 = vpop.f32.mrf.mxu0  ;;  %v12737_v49 = vpack.c.bf16 %v7942_v41, %v7941_v60  ;;  %v10571_v60 = vld [vmem:[%s15341_s9 + $0x18] sm:$0xff]  ;;  %v4468_v41 = vpack.c.bf16 %v4461_v19, %v4460_v45 }
 0x55e   : > { %v3720_v33 = vadd.f32 %v3706_v21, %v3642_v58  ;;  %9728 = vmatmul.msk.bf16.gmra.mxu3 %vm15642_vm3, %v12544_v38  ;;  %4684 = vmatpush.bf16.msra.mxu0 %v10571_v60 }
 0x55f   : > { %15646 = vst [vmem:[#allocation24_spill] sm:$0xff] %v12737_v49 }
 0x560   : > { %9744 = vmatmul.msk.bf16.gmra.mxu0 %vm15647_vm13, %v12408_v56  ;;  %v3732_v27 = vadd.f32 %v12699_v17, %v3720_v33  ;;  %vm15649_vm13 = vnez %v15477_v9 }
 0x561   : > { %v3552_v40 = vpop.f32.mrf.mxu2  ;;  %v3633_v25 = vpop.f32.mrf.mxu3 }
 0x562   : > { %v3740_v37 = vmax.f32 %v3732_v27, 0.0  ;;  %v3553_v35 = vadd.f32 %v3552_v40, %v3499_v22 }
 0x563   : > { %v6961_v31 = vld [vmem:[#allocation5 + $0x87] sm:$0xff] }
 0x564   : > { %3749 = vst.msk [vmem:[#allocation5 + $0x90] sm:$0xff] %vm15425_vm1, %v3740_v37  ;;  %v3643_v38 = vadd.f32 %v3630_v57, %v3553_v35  ;;  %v12781_v35 = vld [vmem:[%s15340_s8] ss:$0 sm:$0xff] }
 0x565   : > { %v3502_v59 = vpop.f32.mrf.mxu1  ;;  %v3713_v50 = vpop.f32.mrf.mxu0 }
 0x566   : > { %v3721_v56 = vadd.f32 %v3708_v55, %v3643_v38  ;;  %9712 = vmatmul.msk.bf16.gmra.mxu2 %vm15648_vm12, %v4118_v47  ;;  %vm15656_vm12 = vnez %v15480_v52 }
 0x568   : > { %9700 = vmatmul.msk.bf16.gmra.mxu1 %vm15642_vm3, %v12677_v28  ;;  %v3733_v43 = vadd.f32 %v12699_v17, %v3721_v56  ;;  %v7943_v28 = vsel %vm15589_vm11, %v6961_v31, 0.0  ;;  %v4440_v31 = vld [vmem:[#allocation5 + $0x28] sm:$0xff]  ;;  %vm15657_vm3 = vcmask 64512  }
 0x569   : > { %v3555_v63 = vpop.f32.mrf.mxu2  ;;  %v3635_v15 = vpop.f32.mrf.mxu3 }
 0x56a   : > { %v3741_v26 = vmax.f32 %v3733_v43, 0.0  ;;  %v3556_v1 = vadd.f32 %v3555_v63, %v3502_v59  ;;  %v4455_v63 = vld [vmem:[#allocation5 + $0x87] sm:$0xff] }
 0x56b   : > { %v6962_v62 = vld [vmem:[#allocation5 + $0x8f] sm:$0xff] }
 0x56c   : > { %3750 = vst.msk [vmem:[#allocation5 + $0x98] sm:$0xff] %vm15425_vm1, %v3741_v26  ;;  %v3644_v21 = vadd.f32 %v3633_v25, %v3556_v1  ;;  %v7944_v0 = vsel %vm15649_vm13, %v6962_v62, 0.0  ;;  %v4463_v62 = vsel %vm15649_vm13, %v4455_v63, 0.0 }
 0x56d   : > { %v3504_v24 = vpop.f32.mrf.mxu1  ;;  %v4037_v23 = vpop.f32.mrf.mxu0  ;;  %v12760_v29 = vpack.c.bf16 %v7944_v0, %v7943_v28 }
 0x56e   : > { %v3722_v48 = vadd.f32 %v3711_v32, %v3644_v21  ;;  %v12766_v32 = vpack.c.bf16 %v4438_v4, %v4437_v3  ;;  %v4454_v21 = vld [vmem:[#allocation5 + $0x7f] sm:$0xff] }
 0x56f   : > { %15650 = vst [vmem:[#allocation25_spill] sm:$0xff] %v12760_v29 }
 0x570   : > { %v3734_v55 = vadd.f32 %v12699_v17, %v3722_v48  ;;  %v4439_v48 = vld [vmem:[#allocation5 + $0x20] sm:$0xff] }
 0x571   : > { %v3557_v51 = vpop.f32.mrf.mxu2  ;;  %v3951_v44 = vpop.f32.mrf.mxu3  ;;  %v12793_v10 = vpack.c.bf16 %v4440_v31, %v4439_v48  ;;  %v10573_v31 = vld [vmem:[%s15341_s9 + $0x8] sm:$0xff] }
 0x572   : > { %v3742_v30 = vmax.f32 %v3734_v55, 0.0  ;;  %v3558_v57 = vadd.f32 %v3557_v51, %v3504_v24  ;;  %v4462_v55 = vsel %vm15589_vm11, %v4454_v21, 0.0  ;;  %4787 = vmatpush.bf16.msrb.mxu1 %v10573_v31  ;;  %v10574_v31 = vld [vmem:[%s15341_s9 + $0x10] sm:$0xff] }
 0x573   : > { %v6963_v2 = vld [vmem:[#allocation5 + $0x97] sm:$0xff]  ;;  %v4469_v51 = vpack.c.bf16 %v4463_v62, %v4462_v55  ;;  %4895 = vmatpush.bf16.msrb.mxu3 %v10574_v31 }
 0x574   : > { %3751 = vst.msk [vmem:[#allocation5 + $0xa0] sm:$0xff] %vm15425_vm1, %v3742_v30  ;;  %v3645_v12 = vadd.f32 %v3635_v15, %v3558_v57  ;;  %v7945_v47 = vsel %vm15561_vm14, %v6963_v2, 0.0  ;;  %v4569_v57 = vld [vmem:[#allocation5 + $0xc8] sm:$0xff] }
 0x575   : > { %v3828_v58 = vpop.f32.mrf.mxu1  ;;  %v4039_v22 = vpop.f32.mrf.mxu0 }
 0x576   : > { %v3723_v33 = vadd.f32 %v3713_v50, %v3645_v12  ;;  %9759 = vmatmul.msk.bf16.vlgmr.msra.gmra.mxu2 %vm15425_vm1, %v12766_v32 }
 0x578   : > { %9751 = vmatmul.msk.bf16.vlgmr.msra.gmra.mxu1 %vm15425_vm1, %v4468_v41  ;;  %v3735_v11 = vadd.f32 %v12699_v17, %v3723_v33  ;;  %v4457_v33 = vld [vmem:[#allocation5 + $0x97] sm:$0xff] }
 0x579   : > { %v3881_v27 = vpop.f32.mrf.mxu2  ;;  %v3953_v40 = vpop.f32.mrf.mxu3 }
 0x57a   : > { %v3743_v25 = vmax.f32 %v3735_v11, 0.0  ;;  %v3882_v13 = vadd.f32 %v3881_v27, %v3828_v58 }
 0x57b   : > { %v6964_v50 = vld [vmem:[#allocation5 + $0x9f] sm:$0xff] }
 0x57c   : > { %3752 = vst.msk [vmem:[#allocation5 + $0xa8] sm:$0xff] %vm15425_vm1, %v3743_v25  ;;  %v3971_v37 = vadd.f32 %v3951_v44, %v3882_v13  ;;  %v7946_v17 = vsel %vm15597_vm15, %v6964_v50, 0.0  ;;  %v4442_v25 = vld [vmem:[#allocation5 + $0x38] sm:$0xff]  ;;  %v4456_v13 = vld [vmem:[#allocation5 + $0x8f] sm:$0xff] }
 0x57d   : > { %v3830_v38 = vpop.f32.mrf.mxu1  ;;  %v4042_v59 = vpop.f32.mrf.mxu0  ;;  %v12787_v43 = vpack.c.bf16 %v7946_v17, %v7945_v47  ;;  %v4441_v50 = vld [vmem:[#allocation5 + $0x30] sm:$0xff]  ;;  %v4464_v63 = vsel %vm15561_vm14, %v4456_v13, 0.0 }
 0x57e   : > { %v4057_v56 = vadd.f32 %v4037_v23, %v3971_v37 }
 0x57f   : > { %15651 = vst [vmem:[#allocation26_spill] sm:$0xff] %v12787_v43 }
 0x580   : > { %v4069_v15 = vadd.f32 %v12781_v35, %v4057_v56  ;;  %v12810_v56 = vpack.c.bf16 %v4442_v25, %v4441_v50 }
 0x581   : > { %v3883_v26 = vpop.f32.mrf.mxu2  ;;  %v3956_v1 = vpop.f32.mrf.mxu3 }
 0x582   : > { %v4077_v24 = vmax.f32 %v4069_v15, 0.0  ;;  %v3884_v61 = vadd.f32 %v3883_v26, %v3830_v38  ;;  %v4465_v38 = vsel %vm15597_vm15, %v4457_v33, 0.0  ;;  %v4443_v33 = vld [vmem:[#allocation5 + $0x40] sm:$0xff] }
 0x583   : > { %v4470_v15 = vpack.c.bf16 %v4465_v38, %v4464_v63 }
 0x584   : > { %4086 = vst.msk [vmem:[#allocation5 + $0xd0] sm:$0xff] %vm15425_vm1, %v4077_v24  ;;  %v3972_v28 = vadd.f32 %v3953_v40, %v3884_v61 }
 0x585   : > { %v3833_v0 = vpop.f32.mrf.mxu1  ;;  %v4044_v23 = vpop.f32.mrf.mxu0 }
 0x586   : > { %v4058_v44 = vadd.f32 %v4039_v22, %v3972_v28  ;;  %9760 = vmatmul.msk.bf16.gmra.mxu2 %vm15425_vm1, %v12793_v10 }
 0x588   : > { %9752 = vmatmul.msk.bf16.gmra.mxu1 %vm15425_vm1, %v4469_v51  ;;  %v4070_v4 = vadd.f32 %v12781_v35, %v4058_v44 }
 0x589   : > { %v3886_v54 = vpop.f32.mrf.mxu2  ;;  %v3958_v30 = vpop.f32.mrf.mxu3 }
 0x58a   : > { %v4078_v19 = vmax.f32 %v4070_v4, 0.0  ;;  %v3887_v3 = vadd.f32 %v3886_v54, %v3833_v0  ;;  %v4459_v54 = vld [vmem:[#allocation5 + $0xa7] sm:$0xff] }
 0x58b   : > { %v4570_v12 = vld [vmem:[#allocation5 + $0xd0] sm:$0xff] }
 0x58c   : > { %4087 = vst.msk [vmem:[#allocation5 + $0xd8] sm:$0xff] %vm15425_vm1, %v4078_v19  ;;  %v3973_v58 = vadd.f32 %v3956_v1, %v3887_v3  ;;  %v12802_v41 = vpack.c.bf16 %v4570_v12, %v4569_v57  ;;  %v10572_v1 = vld [vmem:[%s15341_s9] sm:$0xff]  ;;  %v4444_v3 = vld [vmem:[#allocation5 + $0x48] sm:$0xff] }
 0x58d   : > { %v3835_v45 = vpop.f32.mrf.mxu1  ;;  %v4047_v60 = vpop.f32.mrf.mxu0  ;;  %4834 = vmatpush.bf16.msrb.mxu2 %v10572_v1  ;;  %v4458_v12 = vld [vmem:[#allocation5 + $0x9f] sm:$0xff] }
 0x58e   : > { %v4059_v22 = vadd.f32 %v4042_v59, %v3973_v58  ;;  %9769 = vmatmul.msk.bf16.vlgmr.msra.gmra.mxu3 %vm15425_vm1, %v12802_v41  ;;  %v4466_v25 = vsel %vm15565_vm7, %v4458_v12, 0.0 }
 0x590   : > { %v4071_v11 = vadd.f32 %v12781_v35, %v4059_v22  ;;  %v4467_v22 = vsel %vm15545_vm10, %v4459_v54, 0.0 }
 0x591   : > { %v3888_v27 = vpop.f32.mrf.mxu2  ;;  %v3961_v40 = vpop.f32.mrf.mxu3  ;;  %v4471_v13 = vpack.c.bf16 %v4467_v22, %v4466_v25  ;;  %v12873_v25 = vld [vmem:[%s15340_s8] ss:$0 sm:$0xff] }
 0x592   : > { %v4079_v2 = vmax.f32 %v4071_v11, 0.0  ;;  %v3889_v37 = vadd.f32 %v3888_v27, %v3835_v45 }
 0x593   : > { %v12824_v28 = vld [vmem:[#allocation5 + $0xd8] sm:$0xff] }
 0x594   : > { %4088 = vst.msk [vmem:[#allocation5 + $0xe0] sm:$0xff] %vm15425_vm1, %v4079_v2  ;;  %v3974_v47 = vadd.f32 %v3958_v30, %v3889_v37  ;;  %v5433_v8 = vld [vmem:[#allocation5 + $0xd1] sm:$0xff] }
 0x595   : > { %v3838_v59 = vpop.f32.mrf.mxu1  ;;  %v4049_v17 = vpop.f32.mrf.mxu0 }
 0x596   : > { %v4060_v26 = vadd.f32 %v4044_v23, %v3974_v47  ;;  %9761 = vmatmul.msk.bf16.gmra.mxu2 %vm15425_vm1, %v12810_v56 }
 0x598   : > { %9753 = vmatmul.msk.bf16.gmra.mxu1 %vm15425_vm1, %v4470_v15  ;;  %v4072_v21 = vadd.f32 %v12781_v35, %v4060_v26 }
 0x599   : > { %v3891_v24 = vpop.f32.mrf.mxu2  ;;  %v3963_v61 = vpop.f32.mrf.mxu3 }
 0x59a   : > { %v4080_v62 = vmax.f32 %v4072_v21, 0.0  ;;  %v3892_v48 = vadd.f32 %v3891_v24, %v3838_v59 }
 0x59b   : > { %v4572_v0 = vld [vmem:[#allocation5 + $0xe0] sm:$0xff] }
 0x59c   : > { %4089 = vst.msk [vmem:[#allocation5 + $0xe8] sm:$0xff] %vm15425_vm1, %v4080_v62  ;;  %v3975_v23 = vadd.f32 %v3961_v40, %v3892_v48  ;;  %v12828_v44 = vpack.c.bf16 %v4572_v0, %v12824_v28  ;;  %v12836_v40 = vpack.c.bf16 %v4444_v3, %v4443_v33  ;;  %v4737_v0 = vld [vmem:[#allocation5 + $0x78] sm:$0xff] }
 0x59d   : > { %v3840_v55 = vpop.f32.mrf.mxu1  ;;  %v4052_v51 = vpop.f32.mrf.mxu0 }
 0x59e   : > { %v4061_v4 = vadd.f32 %v4047_v60, %v3975_v23  ;;  %9770 = vmatmul.msk.bf16.gmra.mxu3 %vm15425_vm1, %v12828_v44 }
 0x5a0   : > { %v4073_v30 = vadd.f32 %v12781_v35, %v4061_v4  ;;  %v4736_v4 = vld [vmem:[#allocation5 + $0x70] sm:$0xff] }
 0x5a1   : > { %v3893_v57 = vpop.f32.mrf.mxu2  ;;  %v3966_v19 = vpop.f32.mrf.mxu3 }
 0x5a2   : > { %v4081_v58 = vmax.f32 %v4073_v30, 0.0  ;;  %v3894_v45 = vadd.f32 %v3893_v57, %v3840_v55  ;;  %v12857_v57 = vpack.c.bf16 %v4737_v0, %v4736_v4 }
 0x5a3   : > { %v12844_v63 = vld [vmem:[#allocation5 + $0xe8] sm:$0xff] }
 0x5a4   : > { %4090 = vst.msk [vmem:[#allocation5 + $0xf0] sm:$0xff] %vm15425_vm1, %v4081_v58  ;;  %v3976_v11 = vadd.f32 %v3963_v61, %v3894_v45  ;;  %v5435_v14 = vld [vmem:[#allocation5 + $0xe1] sm:$0xff] }
 0x5a5   : > { %v3843_v60 = vpop.f32.mrf.mxu1  ;;  %v4054_v27 = vpop.f32.mrf.mxu0 }
 0x5a6   : > { %v4062_v2 = vadd.f32 %v4049_v17, %v3976_v11  ;;  %9762 = vmatmul.msk.bf16.gmra.mxu2 %vm15425_vm1, %v12836_v40 }
 0x5a8   : > { %9754 = vmatmul.msk.bf16.gmra.mxu1 %vm15425_vm1, %v4471_v13  ;;  %v4074_v37 = vadd.f32 %v12781_v35, %v4062_v2 }
 0x5a9   : > { %v3896_v38 = vpop.f32.mrf.mxu2  ;;  %v3968_v50 = vpop.f32.mrf.mxu3 }
 0x5aa   : > { %v4082_v47 = vmax.f32 %v4074_v37, 0.0  ;;  %v3897_v59 = vadd.f32 %v3896_v38, %v3843_v60 }
 0x5ab   : > { %v4574_v15 = vld [vmem:[#allocation5 + $0xf0] sm:$0xff] }
 0x5ac   : > { %4091 = vst.msk [vmem:[#allocation5 + $0xf8] sm:$0xff] %vm15425_vm1, %v4082_v47  ;;  %v3977_v26 = vadd.f32 %v3966_v19, %v3897_v59  ;;  %v12848_v17 = vpack.c.bf16 %v4574_v15, %v12844_v63  ;;  %v4739_v47 = vld [vmem:[#allocation5 + $0x88] sm:$0xff] }
 0x5ad   : > { %v3845_v1 = vpop.f32.mrf.mxu1  ;;  %v4378_v24 = vpop.f32.mrf.mxu0 }
 0x5ae   : > { %v4063_v21 = vadd.f32 %v4052_v51, %v3977_v26  ;;  %9771 = vmatmul.msk.bf16.gmra.mxu3 %vm15425_vm1, %v12848_v17  ;;  %v10575_v51 = vld [vmem:[%s15341_s9 + $0x18] sm:$0xff] }
 0x5af   : > { %4964 = vmatpush.bf16.msrb.mxu0 %v10575_v51 }
 0x5b0   : > { %v4075_v61 = vadd.f32 %v12781_v35, %v4063_v21 }
 0x5b1   : > { %v3898_v62 = vpop.f32.mrf.mxu2  ;;  %v4300_v48 = vpop.f32.mrf.mxu3 }
 0x5b2   : > { %v4083_v23 = vmax.f32 %v4075_v61, 0.0  ;;  %v3899_v55 = vadd.f32 %v3898_v62, %v3845_v1  ;;  %v4738_v1 = vld [vmem:[#allocation5 + $0x80] sm:$0xff] }
 0x5b3   : > { %v12867_v11 = vld [vmem:[#allocation5 + $0xf8] sm:$0xff]  ;;  %v12882_v61 = vpack.c.bf16 %v4739_v47, %v4738_v1 }
 0x5b4   : > { %4092 = vst.msk [vmem:[#allocation5 + $0x100] sm:$0xff] %vm15425_vm1, %v4083_v23  ;;  %v3978_v54 = vadd.f32 %v3968_v50, %v3899_v55  ;;  %v4858_v23 = vld [vmem:[#allocation5 + $0x128] sm:$0xff] }
 0x5b5   : > { %v4169_v30 = vpop.f32.mrf.mxu1  ;;  %v4380_v12 = vpop.f32.mrf.mxu0 }
 0x5b6   : > { %v4064_v19 = vadd.f32 %v4054_v27, %v3978_v54  ;;  %9797 = vmatmul.msk.bf16.vlgmr.msrb.gmra.mxu2 %vm15425_vm1, %v12857_v57 }
 0x5b8   : > { %9789 = vmatmul.msk.bf16.vlgmr.msrb.gmra.mxu1 %vm15425_vm1, %v12766_v32  ;;  %v4076_v3 = vadd.f32 %v12781_v35, %v4064_v19 }
 0x5b9   : > { %v4222_v58 = vpop.f32.mrf.mxu2  ;;  %v4302_v45 = vpop.f32.mrf.mxu3 }
 0x5ba   : > { %v4084_v22 = vmax.f32 %v4076_v3, 0.0  ;;  %v4223_v33 = vadd.f32 %v4222_v58, %v4169_v30 }
 0x5bb   : > { %v4576_v60 = vld [vmem:[#allocation5 + $0x100] sm:$0xff] }
 0x5bc   : > { %4093 = vst.msk [vmem:[#allocation5 + $0x108] sm:$0xff] %vm15425_vm1, %v4084_v22  ;;  %v4320_v27 = vadd.f32 %v4300_v48, %v4223_v33  ;;  %v12876_v2 = vpack.c.bf16 %v4576_v60, %v12867_v11 }
 0x5bd   : > { %v4171_v13 = vpop.f32.mrf.mxu1  ;;  %v4383_v26 = vpop.f32.mrf.mxu0 }
 0x5be   : > { %v4398_v35 = vadd.f32 %v4378_v24, %v4320_v27  ;;  %9772 = vmatmul.msk.bf16.gmra.mxu3 %vm15425_vm1, %v12876_v2  ;;  %v4639_v24 = vld [vmem:[#allocation5 + $0x127] sm:$0xff] }
 0x5bf   : > { %v4647_v54 = vsel %vm15512_vm5, %v4639_v24, 0.0 }
 0x5c0   : > { %v4410_v37 = vadd.f32 %v12873_v25, %v4398_v35  ;;  %v4741_v35 = vld [vmem:[#allocation5 + $0x98] sm:$0xff] }
 0x5c1   : > { %v4224_v38 = vpop.f32.mrf.mxu2  ;;  %v4305_v50 = vpop.f32.mrf.mxu3 }
 0x5c2   : > { %v4418_v59 = vmax.f32 %v4410_v37, 0.0  ;;  %v4225_v15 = vadd.f32 %v4224_v38, %v4171_v13 }
 0x5c4   : > { %4427 = vst.msk [vmem:[#allocation5 + $0x130] sm:$0xff] %vm15425_vm1, %v4418_v59  ;;  %v4321_v31 = vadd.f32 %v4302_v45, %v4225_v15 }
 0x5c5   : > { %v4174_v21 = vpop.f32.mrf.mxu1  ;;  %v4385_v22 = vpop.f32.mrf.mxu0 }
 0x5c6   : > { %v4399_v62 = vadd.f32 %v4380_v12, %v4321_v31  ;;  %9798 = vmatmul.msk.bf16.gmra.mxu2 %vm15425_vm1, %v12882_v61 }
 0x5c8   : > { %9790 = vmatmul.msk.bf16.gmra.mxu1 %vm15425_vm1, %v12793_v10  ;;  %v4411_v48 = vadd.f32 %v12873_v25, %v4399_v62 }
 0x5c9   : > { %v4227_v0 = vpop.f32.mrf.mxu2  ;;  %v4307_v30 = vpop.f32.mrf.mxu3 }
 0x5ca   : > { %v4419_v55 = vmax.f32 %v4411_v48, 0.0  ;;  %v4228_v4 = vadd.f32 %v4227_v0, %v4174_v21  ;;  %v10576_v48 = vld [vmem:[%s15341_s9 + $0x20] sm:$0xff] }
 0x5cb   : > { %v4859_v51 = vld [vmem:[#allocation5 + $0x130] sm:$0xff]  ;;  %5117 = vmatpush.bf16.msra.mxu2 %v10576_v48 }
 0x5cc   : > { %v4640_v19 = vld [vmem:[#allocation5 + $0x12f] sm:$0xff]  ;;  %4428 = vst.msk [vmem:[#allocation5 + $0x138] sm:$0xff] %vm15425_vm1, %v4419_v55  ;;  %v4322_v3 = vadd.f32 %v4305_v50, %v4228_v4  ;;  %v12892_v58 = vpack.c.bf16 %v4859_v51, %v4858_v23 }
 0x5cd   : > { %v4176_v12 = vpop.f32.mrf.mxu1  ;;  %v4648_v45 = vsel %vm15645_vm2, %v4640_v19, 0.0  ;;  %v4740_v50 = vld [vmem:[#allocation5 + $0x90] sm:$0xff]  ;;  %v4388_v0 = vpop.f32.mrf.mxu0  ;;  %v10577_v23 = vld [vmem:[%s15341_s9 + $0x28] sm:$0xff] }
 0x5ce   : > { %v4655_v33 = vpack.c.bf16 %v4648_v45, %v4647_v54  ;;  %v4400_v60 = vadd.f32 %v4383_v26, %v4322_v3  ;;  %9807 = vmatmul.msk.bf16.vlgmr.msrb.gmra.mxu3 %vm15425_vm1, %v12892_v58  ;;  %v12901_v1 = vpack.c.bf16 %v4741_v35, %v4740_v50  ;;  %v5621_v26 = vsel %vm15512_vm5, %v4640_v19, 0.0  ;;  %5070 = vmatpush.bf16.msra.mxu1 %v10577_v23 }
 0x5d0   : > { %9779 = vmatmul.msk.bf16.vlgmr.msra.gmra.mxu0 %vm15425_vm1, %v4655_v33  ;;  %v4412_v27 = vadd.f32 %v12873_v25, %v4400_v60 }
 0x5d1   : > { %v4229_v13 = vpop.f32.mrf.mxu2  ;;  %v4310_v21 = vpop.f32.mrf.mxu3 }
 0x5d2   : > { %v4420_v37 = vmax.f32 %v4412_v27, 0.0  ;;  %v4230_v38 = vadd.f32 %v4229_v13, %v4176_v12 }
 0x5d3   : > { %v4641_v47 = vld [vmem:[#allocation5 + $0x137] sm:$0xff] }
 0x5d4   : > { %4429 = vst.msk [vmem:[#allocation5 + $0x140] sm:$0xff] %vm15425_vm1, %v4420_v37  ;;  %v4323_v59 = vadd.f32 %v4307_v30, %v4230_v38  ;;  %v5622_v31 = vsel %vm15645_vm2, %v4641_v47, 0.0  ;;  %v12920_v51 = vld [vmem:[#allocation5 + $0x138] sm:$0xff]  ;;  %v4649_v33 = vsel %vm15589_vm11, %v4641_v47, 0.0 }
 0x5d5   : > { %v4179_v15 = vpop.f32.mrf.mxu1  ;;  %v12907_v62 = vpack.c.bf16 %v5622_v31, %v5621_v26  ;;  %15652 = vst [vmem:[#allocation20_spill] sm:$0xff] %v12920_v51  ;;  %v4390_v38 = vpop.f32.mrf.mxu0  ;;  %v4742_v31 = vld [vmem:[#allocation5 + $0xa0] sm:$0xff] }
 0x5d6   : > { %v4401_v24 = vadd.f32 %v4385_v22, %v4323_v59  ;;  %9799 = vmatmul.msk.bf16.gmra.mxu2 %vm15425_vm1, %v12901_v1  ;;  %v4743_v59 = vld [vmem:[#allocation5 + $0xa8] sm:$0xff] }
 0x5d7   : > { %v12935_v48 = vpack.c.bf16 %v4743_v59, %v4742_v31  ;;  %v10579_v31 = vld [vmem:[%s15341_s9 + $0x38] sm:$0xff] }
 0x5d8   : > { %9791 = vmatmul.msk.bf16.gmra.mxu1 %vm15425_vm1, %v12810_v56  ;;  %v4413_v55 = vadd.f32 %v12873_v25, %v4401_v24  ;;  %5249 = vmatpush.bf16.msra.mxu0 %v10579_v31 }
 0x5d9   : > { %v4232_v4 = vpop.f32.mrf.mxu2  ;;  %v4312_v35 = vpop.f32.mrf.mxu3 }
 0x5da   : > { %v4421_v54 = vmax.f32 %v4413_v55, 0.0  ;;  %v4233_v30 = vadd.f32 %v4232_v4, %v4179_v15 }
 0x5db   : > { %v4861_v19 = vld [vmem:[#allocation5 + $0x140] sm:$0xff] }
 0x5dc   : > { %v4642_v3 = vld [vmem:[#allocation5 + $0x13f] sm:$0xff]  ;;  %4430 = vst.msk [vmem:[#allocation5 + $0x148] sm:$0xff] %vm15425_vm1, %v4421_v54  ;;  %v4324_v12 = vadd.f32 %v4310_v21, %v4233_v30  ;;  %v12924_v22 = vpack.c.bf16 %v4861_v19, %v12920_v51  ;;  %v10578_v54 = vld [vmem:[%s15341_s9 + $0x30] sm:$0xff] }
 0x5dd   : > { %v4181_v45 = vpop.f32.mrf.mxu1  ;;  %v4650_v60 = vsel %vm15649_vm13, %v4642_v3, 0.0  ;;  %5179 = vmatpush.bf16.msra.mxu3 %v10578_v54 }
 0x5de   : > { %v4656_v27 = vpack.c.bf16 %v4650_v60, %v4649_v33  ;;  %v4402_v13 = vadd.f32 %v4388_v0, %v4324_v12  ;;  %9808 = vmatmul.msk.bf16.gmra.mxu3 %vm15425_vm1, %v12924_v22  ;;  %v5623_v0 = vsel %vm15589_vm11, %v4642_v3, 0.0  ;;  %v4393_v33 = vpop.f32.mrf.mxu0 }
 0x5e0   : > { %9780 = vmatmul.msk.bf16.gmra.mxu0 %vm15425_vm1, %v4656_v27  ;;  %v4414_v37 = vadd.f32 %v12873_v25, %v4402_v13 }
 0x5e1   : > { %v4234_v50 = vpop.f32.mrf.mxu2  ;;  %v4315_v19 = vpop.f32.mrf.mxu3 }
 0x5e2   : > { %v4422_v15 = vmax.f32 %v4414_v37, 0.0  ;;  %v4235_v26 = vadd.f32 %v4234_v50, %v4181_v45 }
 0x5e3   : > { %v4643_v47 = vld [vmem:[#allocation5 + $0x147] sm:$0xff] }
 0x5e4   : > { %4431 = vst.msk [vmem:[#allocation5 + $0x150] sm:$0xff] %vm15425_vm1, %v4422_v15  ;;  %v4325_v21 = vadd.f32 %v4312_v35, %v4235_v26  ;;  %v5624_v23 = vsel %vm15649_vm13, %v4643_v47, 0.0  ;;  %v12951_v60 = vld [vmem:[#allocation5 + $0x148] sm:$0xff]  ;;  %v4651_v50 = vsel %vm15561_vm14, %v4643_v47, 0.0 }
 0x5e5   : > { %v4184_v24 = vpop.f32.mrf.mxu1  ;;  %v12941_v55 = vpack.c.bf16 %v5624_v23, %v5623_v0  ;;  %15653 = vst [vmem:[#allocation21_spill] sm:$0xff] %v12951_v60 }
 0x5e6   : > { %v4403_v4 = vadd.f32 %v4390_v38, %v4325_v21  ;;  %9800 = vmatmul.msk.bf16.gmra.mxu2 %vm15425_vm1, %v12935_v48 }
 0x5e8   : > { %9792 = vmatmul.msk.bf16.gmra.mxu1 %vm15425_vm1, %v12836_v40  ;;  %v4415_v30 = vadd.f32 %v12873_v25, %v4403_v4 }
 0x5e9   : > { %v4237_v3 = vpop.f32.mrf.mxu2  ;;  %v4317_v23 = vpop.f32.mrf.mxu3 }
 0x5ea   : > { %v4423_v12 = vmax.f32 %v4415_v30, 0.0  ;;  %v4238_v45 = vadd.f32 %v4237_v3, %v4184_v24 }
 0x5eb   : > { %v4863_v27 = vld [vmem:[#allocation5 + $0x150] sm:$0xff] }
 0x5ec   : > { %v4644_v13 = vld [vmem:[#allocation5 + $0x14f] sm:$0xff]  ;;  %4432 = vst.msk [vmem:[#allocation5 + $0x158] sm:$0xff] %vm15425_vm1, %v4423_v12  ;;  %v4326_v35 = vadd.f32 %v4315_v19, %v4238_v45  ;;  %v12955_v38 = vpack.c.bf16 %v4863_v27, %v12951_v60  ;;  %v4395_v12 = vpop.f32.mrf.mxu0 }
 0x5ed   : > { %v4186_v37 = vpop.f32.mrf.mxu1  ;;  %v4652_v59 = vsel %vm15597_vm15, %v4644_v13, 0.0  ;;  %v5625_v19 = vsel %vm15561_vm14, %v4644_v13, 0.0  ;;  %v5432_v60 = vld [vmem:[#allocation5 + $0xc9] sm:$0xff]  ;;  %vm15662_vm14 = vcmask 64512  }
 0x5ee   : > { %15654 = vst [vmem:[#allocation27_spill] sm:$0xff] %v12955_v38  ;;  %v4657_v15 = vpack.c.bf16 %v4652_v59, %v4651_v50  ;;  %v4404_v26 = vadd.f32 %v4393_v33, %v4326_v35  ;;  %9809 = vmatmul.msk.bf16.gmra.mxu3 %vm15425_vm1, %v12955_v38 }
 0x5f0   : > { %9781 = vmatmul.msk.bf16.gmra.mxu0 %vm15425_vm1, %v4657_v15  ;;  %v4416_v21 = vadd.f32 %v12873_v25, %v4404_v26 }
 0x5f1   : > { %v4239_v24 = vpop.f32.mrf.mxu2 }
 0x5f2   : > { %v4424_v0 = vmax.f32 %v4416_v21, 0.0  ;;  %v4240_v47 = vadd.f32 %v4239_v24, %v4186_v37 }
 0x5f3   : > { %v4645_v4 = vld [vmem:[#allocation5 + $0x157] sm:$0xff] }
 0x5f4   : > { %4433 = vst.msk [vmem:[#allocation5 + $0x160] sm:$0xff] %vm15425_vm1, %v4424_v0  ;;  %v4327_v54 = vadd.f32 %v4317_v23, %v4240_v47  ;;  %v5626_v3 = vsel %vm15597_vm15, %v4645_v4, 0.0  ;;  %v4864_v50 = vld [vmem:[#allocation5 + $0x158] sm:$0xff]  ;;  %v4653_v31 = vsel %vm15565_vm7, %v4645_v4, 0.0 }
 0x5f5   : > { %v12969_v30 = vpop.f32.mrf.mxu1  ;;  %v12975_v45 = vpack.c.bf16 %v5626_v3, %v5625_v19 }
 0x5f6   : > { %v4405_v33 = vadd.f32 %v4395_v12, %v4327_v54  ;;  %9845 = vmatmul.msk.bf16.vlgmr.msra.gmra.mxu2 %vm15425_vm1, %v12857_v57  ;;  %v10580_v54 = vld [vmem:[%s15341_s9 + $0x20] sm:$0xff] }
 0x5f7   : > { %5408 = vmatpush.bf16.msrb.mxu2 %v10580_v54  ;;  %v5302_v54 = vld [vmem:[#allocation5 + $0x11] sm:$0xff] }
 0x5f8   : > { %9837 = vmatmul.msk.bf16.vlgmr.msra.gmra.mxu1 %vm15425_vm1, %v12766_v32  ;;  %v4417_v27 = vadd.f32 %v12873_v25, %v4405_v33  ;;  %v5310_v29 = vsel %vm11030_vm4, %v5302_v54, 0.0  ;;  %v5305_v54 = vld [vmem:[#allocation5 + $0x29] sm:$0xff] }
 0x5f9   : > { %v12982_v35 = vpop.f32.mrf.mxu2 }
 0x5fa   : > { %v4425_v37 = vmax.f32 %v4417_v27, 0.0 }
 0x5fb   : > { %v4865_v13 = vld [vmem:[#allocation5 + $0x160] sm:$0xff] }
 0x5fc   : > { %v12984_v59 = vld [vmem:[#allocation5 + $0x15f] sm:$0xff]  ;;  %4434 = vst.msk [vmem:[#allocation5 + $0x168] sm:$0xff] %vm15425_vm1, %v4425_v37  ;;  %v12989_v26 = vpack.c.bf16 %v4865_v13, %v4864_v50 }
 0x5fd   : > { %v12987_v15 = vpop.f32.mrf.mxu1  ;;  %v4654_v32 = vsel %vm15545_vm10, %v12984_v59, 0.0 }
 0x5fe   : > { %15655 = vst [vmem:[#allocation28_spill] sm:$0xff] %v12989_v26  ;;  %v4658_v25 = vpack.c.bf16 %v4654_v32, %v4653_v31  ;;  %9810 = vmatmul.msk.bf16.gmra.mxu3 %vm15425_vm1, %v12989_v26 }
 0x600   : > { %9782 = vmatmul.msk.bf16.gmra.mxu0 %vm15425_vm1, %v4658_v25  ;;  %v5303_v25 = vld [vmem:[#allocation5 + $0x19] sm:$0xff] }
 0x601   : > { %v12999_v21 = vpop.f32.mrf.mxu2  ;;  %v5311_v43 = vsel %vm15514_vm8, %v5303_v25, 0.0 }
 0x602   : > { %v5318_v20 = vpack.c.bf16 %v5311_v43, %v5310_v29  ;;  %v5304_v29 = vld [vmem:[#allocation5 + $0x21] sm:$0xff] }
 0x605   : > { %v13001_v24 = vpop.f32.mrf.mxu1 }
 0x606   : > { %9846 = vmatmul.msk.bf16.gmra.mxu2 %vm15425_vm1, %v12882_v61 }
 0x608   : > { %9838 = vmatmul.msk.bf16.gmra.mxu1 %vm15425_vm1, %v12793_v10  ;;  %v10581_v10 = vld [vmem:[%s15341_s9 + $0x28] sm:$0xff] }
 0x609   : > { %v13007_v0 = vpop.f32.mrf.mxu2  ;;  %5361 = vmatpush.bf16.msrb.mxu1 %v10581_v10 }
 0x60d   : > { %v13009_v47 = vpop.f32.mrf.mxu1 }
 0x60e   : > { %9855 = vmatmul.msk.bf16.vlgmr.msra.gmra.mxu3 %vm15425_vm1, %v12892_v58 }
 0x610   : > { %9817 = vmatmul.msk.bf16.vlgmr.msrb.gmra.mxu0 %vm15425_vm1, %v12802_v41 }
 0x611   : > { %v13015_v23 = vpop.f32.mrf.mxu2  ;;  %v4608_v4 = vpop.f32.mrf.mxu3 }
 0x615   : > { %v13020_v19 = vpop.f32.mrf.mxu1 }
 0x616   : > { %9847 = vmatmul.msk.bf16.gmra.mxu2 %vm15425_vm1, %v12901_v1 }
 0x618   : > { %9839 = vmatmul.msk.bf16.gmra.mxu1 %vm15425_vm1, %v12810_v56  ;;  %v10582_v56 = vld [vmem:[%s15341_s9 + $0x30] sm:$0xff] }
 0x619   : > { %v13029_v3 = vpop.f32.mrf.mxu2  ;;  %v13031_v12 = vpop.f32.mrf.mxu3  ;;  %5477 = vmatpush.bf16.msrb.mxu3 %v10582_v56  ;;  %v10583_v56 = vld [vmem:[%s15341_s9 + $0x38] sm:$0xff] }
 0x61a   : > { %5546 = vmatpush.bf16.msrb.mxu0 %v10583_v56  ;;  %v5312_v56 = vsel %vm15656_vm12, %v5304_v29, 0.0  ;;  %v5441_v29 = vsel %vm15514_vm8, %v5433_v8, 0.0  ;;  %v5307_v8 = vld [vmem:[#allocation5 + $0x39] sm:$0xff] }
 0x61d   : > { %v13033_v33 = vpop.f32.mrf.mxu1 }
 0x61e   : > { %9856 = vmatmul.msk.bf16.gmra.mxu3 %vm15425_vm1, %v12924_v22 }
 0x620   : > { %9818 = vmatmul.msk.bf16.gmra.mxu0 %vm15425_vm1, %v12828_v44 }
 0x621   : > { %v13039_v27 = vpop.f32.mrf.mxu2  ;;  %v13041_v37 = vpop.f32.mrf.mxu3 }
 0x625   : > { %v13043_v50 = vpop.f32.mrf.mxu1 }
 0x626   : > { %9848 = vmatmul.msk.bf16.gmra.mxu2 %vm15425_vm1, %v12935_v48 }
 0x628   : > { %9840 = vmatmul.msk.bf16.gmra.mxu1 %vm15425_vm1, %v12836_v40 }
 0x629   : > { %v13052_v13 = vpop.f32.mrf.mxu2  ;;  %v13054_v31 = vpop.f32.mrf.mxu3 }
 0x62d   : > { %v13056_v32 = vpop.f32.mrf.mxu1 }
 0x62e   : > { %9857 = vmatmul.msk.bf16.gmra.mxu3 %vm15425_vm1, %v12955_v38 }
 0x630   : > { %9819 = vmatmul.msk.bf16.gmra.mxu0 %vm15425_vm1, %v12848_v17 }
 0x631   : > { %v13062_v40 = vpop.f32.mrf.mxu2  ;;  %v13064_v10 = vpop.f32.mrf.mxu3 }
 0x635   : > { %v13073_v49 = vpop.f32.mrf.mxu1 }
 0x636   : > { %9893 = vmatmul.msk.bf16.vlgmr.msrb.gmra.mxu2 %vm15425_vm1, %v5318_v20 }
 0x638   : > { %9885 = vmatmul.msk.bf16.vlgmr.msrb.gmra.mxu1 %vm15425_vm1, %v12857_v57  ;;  %v5313_v57 = vsel %vm11094_vm9, %v5305_v54, 0.0 }
 0x639   : > { %v13078_v5 = vpop.f32.mrf.mxu3  ;;  %v13080_v25 = vpop.f32.mrf.mxu2  ;;  %v5319_v7 = vpack.c.bf16 %v5313_v57, %v5312_v56 }
 0x63d   : > { %v13082_v46 = vpop.f32.mrf.mxu1 }
 0x63e   : > { %9858 = vmatmul.msk.bf16.gmra.mxu3 %vm15425_vm1, %v12989_v26  ;;  %v4547_v26 = vadd.f32 %v12982_v35, %v12969_v30 }
 0x640   : > { %9820 = vmatmul.msk.bf16.gmra.mxu0 %vm15425_vm1, %v12876_v2  ;;  %v4628_v38 = vadd.f32 %v4608_v4, %v4547_v26  ;;  %v4549_v4 = vadd.f32 %v12999_v21, %v12987_v15 }
 0x641   : > { %v13088_v43 = vpop.f32.mrf.mxu3  ;;  %v13090_v20 = vpop.f32.mrf.mxu2 }
 0x645   : > { %v13097_v9 = vpop.f32.mrf.mxu1 }
 0x646   : > { %9894 = vmatmul.msk.bf16.gmra.mxu2 %vm15425_vm1, %v5319_v7  ;;  %v13114_v7 = vld [vmem:[%s15342_s10] ss:$0 sm:$0xff] }
 0x648   : > { %9886 = vmatmul.msk.bf16.gmra.mxu1 %vm15425_vm1, %v12882_v61  ;;  %v5440_v61 = vsel %vm11030_vm4, %v5432_v60, 0.0  ;;  %v5306_v60 = vld [vmem:[#allocation5 + $0x31] sm:$0xff]  ;;  %vm15658_vm4 = vnez %v15608_v6 }
 0x649   : > { %v13105_v51 = vpop.f32.mrf.mxu3  ;;  %v13107_v54 = vpop.f32.mrf.mxu2  ;;  %v5448_v30 = vpack.c.bf16 %v5441_v29, %v5440_v61  ;;  %v5315_v61 = vsel %vm15658_vm4, %v5307_v8, 0.0 }
 0x64d   : > { %v4686_v57 = vpop.f32.mrf.mxu0  ;;  %v13118_v56 = vpop.f32.mrf.mxu1 }
 0x64e   : > { %v4706_v35 = vadd.f32 %v4686_v57, %v4628_v38  ;;  %9903 = vmatmul.msk.bf16.vlgmr.msrb.gmra.mxu3 %vm15425_vm1, %v5448_v30  ;;  %v10584_v57 = vld [vmem:[%s15341_s9] sm:$0xff] }
 0x64f   : > { %5705 = vmatpush.bf16.msra.mxu2 %v10584_v57 }
 0x650   : > { %v4718_v26 = vadd.f32 %v13114_v7, %v4706_v35  ;;  %9865 = vmatmul.msk.bf16.vlgmr.msra.gmra.mxu0 %vm15425_vm1, %v12802_v41  ;;  %v4629_v41 = vadd.f32 %v13031_v12, %v4549_v4  ;;  %vm15659_vm1 = vnez %v15607_v42  ;;  %v10585_v12 = vld [vmem:[%s15341_s9 + $0x8] sm:$0xff]  ;;  %v5434_v4 = vld [vmem:[#allocation5 + $0xd9] sm:$0xff] }
 0x651   : > { %v13133_v38 = vpop.f32.mrf.mxu2  ;;  %v13135_v29 = vpop.f32.mrf.mxu3  ;;  %v5314_v30 = vsel %vm15659_vm1, %v5306_v60, 0.0  ;;  %v4552_v60 = vadd.f32 %v13007_v0, %v13001_v24  ;;  %5658 = vmatpush.bf16.msra.mxu1 %v10585_v12 }
 0x652   : > { %4726 = vst.msk [vmem:[%s13123_s16] sm:$0xff] %vm15657_vm3, %v4718_v26  ;;  %v5320_v35 = vpack.c.bf16 %v5315_v61, %v5314_v30  ;;  %vm15660_vm3 = vcmask 130048   ;;  %v5442_v30 = vsel %vm15656_vm12, %v5434_v4, 0.0 }
 0x653   : > { %vm15661_vm8 = vmmov %vm15660_vm3 }
 0x655   : > { %v4688_v15 = vpop.f32.mrf.mxu0  ;;  %v13145_v21 = vpop.f32.mrf.mxu1 }
 0x656   : > { %v4707_v26 = vadd.f32 %v4688_v15, %v4629_v41  ;;  %9895 = vmatmul.msk.bf16.gmra.mxu2 %vm15660_vm3, %v5320_v35  ;;  %v5443_v41 = vsel %vm11094_vm9, %v5435_v14, 0.0  ;;  %v4554_v14 = vadd.f32 %v13015_v23, %v13009_v47 }
 0x657   : > { %v5449_v24 = vpack.c.bf16 %v5443_v41, %v5442_v30 }
 0x658   : > { %v4719_v8 = vadd.f32 %v13114_v7, %v4707_v26  ;;  %9887 = vmatmul.msk.bf16.gmra.mxu1 %vm15661_vm8, %v12901_v1  ;;  %v4630_v1 = vadd.f32 %v13041_v37, %v4552_v60  ;;  %vm15663_vm8 = vmmov %vm15660_vm3  ;;  %v5308_v26 = vld [vmem:[#allocation5 + $0x41] sm:$0xff]  ;;  %v4631_v41 = vadd.f32 %v13054_v31, %v4554_v14 }
 0x659   : > { %v13158_v61 = vpop.f32.mrf.mxu2  ;;  %v13160_v57 = vpop.f32.mrf.mxu3  ;;  %v5316_v4 = vsel %vm15623_vm6, %v5308_v26, 0.0 }
 0x65a   : > { %4727 = vst.msk [vmem:[%s13123_s16 + $0x8] sm:$0xff] %vm15662_vm14, %v4719_v8  ;;  %v5309_v8 = vld [vmem:[#allocation5 + $0x49] sm:$0xff]  ;;  %vm15664_vm14 = vmmov %vm15660_vm3  ;;  %vm15665_vm3 = vcmask 64512  }
 0x65b   : > { %v5317_v60 = vsel %vm15621_vm0, %v5309_v8, 0.0  ;;  %v10586_v8 = vld [vmem:[%s15341_s9 + $0x10] sm:$0xff] }
 0x65c   : > { %v5321_v30 = vpack.c.bf16 %v5317_v60, %v5316_v4  ;;  %5766 = vmatpush.bf16.msra.mxu3 %v10586_v8  ;;  %v5438_v8 = vld [vmem:[#allocation5 + $0xf9] sm:$0xff] }
 0x65d   : > { %v4691_v15 = vpop.f32.mrf.mxu0  ;;  %v13167_v35 = vpop.f32.mrf.mxu1 }
 0x65e   : > { %v4708_v0 = vadd.f32 %v4691_v15, %v4630_v1  ;;  %9904 = vmatmul.msk.bf16.gmra.mxu3 %vm15663_vm8, %v5449_v24  ;;  %v5436_v15 = vld [vmem:[#allocation5 + $0xe9] sm:$0xff]  ;;  %v4557_v24 = vadd.f32 %v13029_v3, %v13020_v19 }
 0x65f   : > { %v5444_v14 = vsel %vm15659_vm1, %v5436_v15, 0.0 }
 0x660   : > { %v4720_v16 = vadd.f32 %v13114_v7, %v4708_v0  ;;  %9866 = vmatmul.msk.bf16.gmra.mxu0 %vm15664_vm14, %v12828_v44  ;;  %vm15666_vm14 = vmmov %vm15663_vm8 }
 0x661   : > { %v13177_v37 = vpop.f32.mrf.mxu2  ;;  %v13179_v12 = vpop.f32.mrf.mxu3 }
 0x662   : > { %4728 = vst.msk [vmem:[%s13123_s16 + $0x10] sm:$0xff] %vm15665_vm3, %v4720_v16  ;;  %v5437_v16 = vld [vmem:[#allocation5 + $0xf1] sm:$0xff] }
 0x663   : > { %v5445_v26 = vsel %vm15658_vm4, %v5437_v16, 0.0 }
 0x664   : > { %v5450_v4 = vpack.c.bf16 %v5445_v26, %v5444_v14 }
 0x665   : > { %v4693_v1 = vpop.f32.mrf.mxu0  ;;  %v13186_v44 = vpop.f32.mrf.mxu1 }
 0x666   : > { %v4709_v47 = vadd.f32 %v4693_v1, %v4631_v41  ;;  %9896 = vmatmul.msk.bf16.gmra.mxu2 %vm15663_vm8, %v5321_v30  ;;  %v4559_v1 = vadd.f32 %v13039_v27, %v13033_v33 }
 0x668   : > { %v4721_v23 = vadd.f32 %v13114_v7, %v4709_v47  ;;  %9888 = vmatmul.msk.bf16.gmra.mxu1 %vm15666_vm14, %v12935_v48  ;;  %v4632_v48 = vadd.f32 %v13064_v10, %v4557_v24  ;;  %vm15667_vm14 = vmmov %vm15663_vm8  ;;  %v10587_v47 = vld [vmem:[%s15341_s9 + $0x18] sm:$0xff]  ;;  %v4633_v16 = vadd.f32 %v13078_v5, %v4559_v1  ;;  %v5439_v24 = vld [vmem:[#allocation5 + $0x101] sm:$0xff]  ;;  %v4562_v5 = vadd.f32 %v13052_v13, %v13043_v50 }
 0x669   : > { %v13196_v31 = vpop.f32.mrf.mxu2  ;;  %v13198_v0 = vpop.f32.mrf.mxu3  ;;  %5843 = vmatpush.bf16.msra.mxu0 %v10587_v47  ;;  %v4564_v13 = vadd.f32 %v13062_v40, %v13056_v32  ;;  %v4837_v40 = vadd.f32 %v13080_v25, %v13073_v49 }
 0x66a   : > { %4729 = vst.msk [vmem:[%s13123_s16 + $0x18] sm:$0xff] %vm15665_vm3, %v4721_v23  ;;  %v13226_v23 = vld [vmem:[#allocation5 + $0xd0] sm:$0xff] }
 0x66b   : > { %v5607_v33 = vpack.c.bf16 %v12824_v28, %v13226_v23  ;;  %v5447_v28 = vsel %vm15621_vm0, %v5439_v24, 0.0 }
 0x66d   : > { %v4696_v19 = vpop.f32.mrf.mxu0  ;;  %v13208_v3 = vpop.f32.mrf.mxu1 }
 0x66e   : > { %v4710_v60 = vadd.f32 %v4696_v19, %v4632_v48  ;;  %9905 = vmatmul.msk.bf16.gmra.mxu3 %vm15663_vm8, %v5450_v4  ;;  %v4634_v19 = vadd.f32 %v13088_v43, %v4562_v5  ;;  %v5446_v4 = vsel %vm15623_vm6, %v5438_v8, 0.0  ;;  %v5730_v8 = vld [vmem:[#allocation5 + $0x18] sm:$0xff]  ;;  %v5729_v5 = vld [vmem:[#allocation5 + $0x10] sm:$0xff] }
 0x66f   : > { %v13290_v49 = vpack.c.bf16 %v5730_v8, %v5729_v5 }
 0x670   : > { %v4722_v41 = vadd.f32 %v13114_v7, %v4710_v60  ;;  %9867 = vmatmul.msk.bf16.gmra.mxu0 %vm15667_vm14, %v12848_v17  ;;  %vm15668_vm14 = vmmov %vm15663_vm8 }
 0x671   : > { %v13218_v10 = vpop.f32.mrf.mxu2  ;;  %v13220_v30 = vpop.f32.mrf.mxu3 }
 0x672   : > { %4730 = vst.msk [vmem:[%s13123_s16 + $0x20] sm:$0xff] %vm15665_vm3, %v4722_v41  ;;  %v5451_v41 = vpack.c.bf16 %v5447_v28, %v5446_v4 }
 0x675   : > { %v4698_v17 = vpop.f32.mrf.mxu0  ;;  %v13228_v15 = vpop.f32.mrf.mxu1 }
 0x676   : > { %v4711_v27 = vadd.f32 %v4698_v17, %v4633_v16  ;;  %9939 = vmatmul.msk.bf16.vlgmr.msra.gmra.mxu2 %vm15663_vm8, %v5607_v33  ;;  %v4635_v16 = vadd.f32 %v13105_v51, %v4564_v13  ;;  %v13264_v17 = vld [vmem:[#allocation5 + $0xe0] sm:$0xff] }
 0x677   : > { %v5608_v24 = vpack.c.bf16 %v12844_v63, %v13264_v17  ;;  %v4917_v63 = vadd.f32 %v13135_v29, %v4837_v40  ;;  %v4839_v29 = vadd.f32 %v13090_v20, %v13082_v46  ;;  %v5731_v40 = vld [vmem:[#allocation5 + $0x20] sm:$0xff] }
 0x678   : > { %v4723_v26 = vadd.f32 %v13114_v7, %v4711_v27  ;;  %9931 = vmatmul.msk.bf16.vlgmr.msra.gmra.mxu1 %vm15668_vm14, %v12907_v62  ;;  %vm15669_vm14 = vmmov %vm15663_vm8 }
 0x679   : > { %v13240_v48 = vpop.f32.mrf.mxu3  ;;  %v13242_v14 = vpop.f32.mrf.mxu2 }
 0x67a   : > { %4731 = vst.msk [vmem:[%s13123_s16 + $0x28] sm:$0xff] %vm15665_vm3, %v4723_v26 }
 0x67d   : > { %v4701_v62 = vpop.f32.mrf.mxu0  ;;  %v13249_v60 = vpop.f32.mrf.mxu1 }
 0x67e   : > { %v4712_v1 = vadd.f32 %v4701_v62, %v4634_v19  ;;  %9906 = vmatmul.msk.bf16.gmra.mxu3 %vm15663_vm8, %v5451_v41  ;;  %v10588_v41 = vld [vmem:[%s15341_s9] sm:$0xff] }
 0x67f   : > { %5994 = vmatpush.bf16.msrb.mxu2 %v10588_v41 }
 0x680   : > { %v4724_v50 = vadd.f32 %v13114_v7, %v4712_v1  ;;  %9868 = vmatmul.msk.bf16.gmra.mxu0 %vm15669_vm14, %v12876_v2  ;;  %vm15670_vm14 = vmmov %vm15663_vm8  ;;  %v4918_v1 = vadd.f32 %v13160_v57, %v4839_v29  ;;  %v10589_v57 = vld [vmem:[%s15341_s9 + $0x8] sm:$0xff] }
 0x681   : > { %v13259_v43 = vpop.f32.mrf.mxu3  ;;  %v13261_v47 = vpop.f32.mrf.mxu2  ;;  %5947 = vmatpush.bf16.msrb.mxu1 %v10589_v57 }
 0x682   : > { %4732 = vst.msk [vmem:[%s13123_s16 + $0x30] sm:$0xff] %vm15665_vm3, %v4724_v50  ;;  %v13309_v50 = vld [vmem:[#allocation5 + $0xf0] sm:$0xff] }
 0x683   : > { %v5609_v46 = vpack.c.bf16 %v12867_v11, %v13309_v50 }
 0x685   : > { %v4703_v33 = vpop.f32.mrf.mxu0  ;;  %v13266_v27 = vpop.f32.mrf.mxu1 }
 0x686   : > { %v4713_v2 = vadd.f32 %v4703_v33, %v4635_v16  ;;  %9940 = vmatmul.msk.bf16.gmra.mxu2 %vm15663_vm8, %v5608_v24  ;;  %v4842_v33 = vadd.f32 %v13107_v54, %v13097_v9  ;;  %v5620_v54 = vld [vmem:[#allocation5 + $0x167] sm:$0xff] }
 0x687   : > { %v5628_v29 = vsel %vm15545_vm10, %v5620_v54, 0.0  ;;  %v15675_v54 = vld [vmem:[#allocation27_spill] sm:$0xff] }
 0x688   : > { %v4725_v32 = vadd.f32 %v13114_v7, %v4713_v2  ;;  %9932 = vmatmul.msk.bf16.gmra.mxu1 %vm15670_vm14, %v12941_v55  ;;  %v13286_v7 = vld [vmem:[%s15342_s10] ss:$0 sm:$0xff]  ;;  %vm15671_vm14 = vmmov %vm15663_vm8  ;;  %v5732_v2 = vld [vmem:[#allocation5 + $0x28] sm:$0xff] }
 0x689   : > { %v13278_v51 = vpop.f32.mrf.mxu3  ;;  %v13280_v26 = vpop.f32.mrf.mxu2 }
 0x68a   : > { %4733 = vst.msk [vmem:[%s13123_s16 + $0x38] sm:$0xff] %vm15665_vm3, %v4725_v32  ;;  %v4919_v32 = vadd.f32 %v13179_v12, %v4842_v33 }
 0x68d   : > { %v4966_v55 = vpop.f32.mrf.mxu0  ;;  %v13288_v28 = vpop.f32.mrf.mxu1 }
 0x68e   : > { %v4986_v25 = vadd.f32 %v4966_v55, %v4917_v63  ;;  %9949 = vmatmul.msk.bf16.vlgmr.msra.gmra.mxu3 %vm15663_vm8, %v13290_v49  ;;  %v13333_v63 = vpack.c.bf16 %v5732_v2, %v5731_v40  ;;  %v4844_v55 = vadd.f32 %v13133_v38, %v13118_v56  ;;  %v5627_v56 = vsel %vm15565_vm7, %v12984_v59, 0.0  ;;  %v5734_v59 = vld [vmem:[#allocation5 + $0x38] sm:$0xff]  ;;  %v10590_v2 = vld [vmem:[%s15341_s9 + $0x10] sm:$0xff] }
 0x68f   : > { %v5733_v40 = vld [vmem:[#allocation5 + $0x30] sm:$0xff]  ;;  %6055 = vmatpush.bf16.msrb.mxu3 %v10590_v2 }
 0x690   : > { %v4998_v19 = vadd.f32 %v13286_v7, %v4986_v25  ;;  %9913 = vmatmul.msk.bf16.vlgmr.msrb.gmra.mxu0 %vm15671_vm14, %v12892_v58  ;;  %vm15672_vm14 = vmmov %vm15663_vm8  ;;  %v4920_v41 = vadd.f32 %v13198_v0, %v4844_v55  ;;  %v4847_v0 = vadd.f32 %v13158_v61, %v13145_v21  ;;  %v13376_v21 = vpack.c.bf16 %v5734_v59, %v5733_v40  ;;  %v5735_v40 = vld [vmem:[#allocation5 + $0x40] sm:$0xff] }
 0x691   : > { %v13301_v4 = vpop.f32.mrf.mxu2  ;;  %v13303_v62 = vpop.f32.mrf.mxu3  ;;  %v4849_v55 = vadd.f32 %v13177_v37, %v13167_v35  ;;  %v15678_v37 = vld [vmem:[#allocation20_spill] sm:$0xff] }
 0x692   : > { %9821 = vst.msk [vmem:[%s13123_s16 + $0x80] sm:$0xff] %vm15665_vm3, %v4998_v19  ;;  %v5606_v19 = vld [vmem:[#allocation5 + $0x108] sm:$0xff] }
 0x695   : > { %v4968_v13 = vpop.f32.mrf.mxu0  ;;  %v13311_v58 = vpop.f32.mrf.mxu1 }
 0x696   : > { %v4987_v20 = vadd.f32 %v4968_v13, %v4918_v1  ;;  %9941 = vmatmul.msk.bf16.gmra.mxu2 %vm15663_vm8, %v5609_v46  ;;  %v5605_v1 = vld [vmem:[#allocation5 + $0x100] sm:$0xff] }
 0x697   : > { %v13353_v46 = vpack.c.bf16 %v5606_v19, %v5605_v1  ;;  %v4922_v1 = vadd.f32 %v13240_v48, %v4849_v55  ;;  %v4852_v48 = vadd.f32 %v13196_v31, %v13186_v44  ;;  %v15680_v31 = vld [vmem:[#allocation28_spill] sm:$0xff]  ;;  %v4854_v55 = vadd.f32 %v13218_v10, %v13208_v3 }
 0x698   : > { %v4999_v16 = vadd.f32 %v13286_v7, %v4987_v20  ;;  %9933 = vmatmul.msk.bf16.gmra.mxu1 %vm15672_vm14, %v12975_v45  ;;  %vm15673_vm14 = vmmov %vm15663_vm8  ;;  %v5632_v20 = vpack.c.bf16 %v5628_v29, %v5627_v56  ;;  %v10591_v29 = vld [vmem:[%s15341_s9 + $0x18] sm:$0xff] }
 0x699   : > { %v13326_v11 = vpop.f32.mrf.mxu2  ;;  %v13328_v24 = vpop.f32.mrf.mxu3  ;;  %6124 = vmatpush.bf16.msrb.mxu0 %v10591_v29 }
 0x69a   : > { %9822 = vst.msk [vmem:[%s13123_s16 + $0x88] sm:$0xff] %vm15665_vm3, %v4999_v16 }
 0x69d   : > { %v4971_v45 = vpop.f32.mrf.mxu0  ;;  %v13331_v8 = vpop.f32.mrf.mxu1 }
 0x69e   : > { %v4988_v5 = vadd.f32 %v4971_v45, %v4919_v32  ;;  %9950 = vmatmul.msk.bf16.gmra.mxu3 %vm15663_vm8, %v13333_v63  ;;  %v4921_v32 = vadd.f32 %v13220_v30, %v4847_v0 }
 0x6a0   : > { %v5000_v9 = vadd.f32 %v13286_v7, %v4988_v5  ;;  %9914 = vmatmul.msk.bf16.gmra.mxu0 %vm15673_vm14, %v12924_v22  ;;  %vm15674_vm14 = vmmov %vm15663_vm8 }
 0x6a1   : > { %v13344_v12 = vpop.f32.mrf.mxu2  ;;  %v13346_v25 = vpop.f32.mrf.mxu3 }
 0x6a2   : > { %9823 = vst.msk [vmem:[%s13123_s16 + $0x90] sm:$0xff] %vm15665_vm3, %v5000_v9 }
 0x6a5   : > { %v4973_v13 = vpop.f32.mrf.mxu0  ;;  %v13351_v22 = vpop.f32.mrf.mxu1 }
 0x6a6   : > { %v4989_v38 = vadd.f32 %v4973_v13, %v4920_v41  ;;  %9942 = vmatmul.msk.bf16.gmra.mxu2 %vm15663_vm8, %v13353_v46  ;;  %v13394_v41 = vld [vmem:[#allocation5 + $0xd8] sm:$0xff]  ;;  %v13397_v13 = vld [vmem:[#allocation5 + $0x130] sm:$0xff] }
 0x6a7   : > { %15677 = vst [vmem:[#allocation27_spill] sm:$0xff] %v13394_v41 }
 0x6a8   : > { %v5001_v16 = vadd.f32 %v13286_v7, %v4989_v38  ;;  %9934 = vmatmul.msk.bf16.gmra.mxu1 %vm15674_vm14, %v5632_v20  ;;  %vm15676_vm14 = vmmov %vm15663_vm8  ;;  %v5904_v38 = vpack.c.bf16 %v15678_v37, %v13397_v13  ;;  %v13440_v37 = vld [vmem:[#allocation5 + $0x140] sm:$0xff] }
 0x6a9   : > { %v13366_v57 = vpop.f32.mrf.mxu2  ;;  %v13368_v33 = vpop.f32.mrf.mxu3 }
 0x6aa   : > { %9824 = vst.msk [vmem:[%s13123_s16 + $0x98] sm:$0xff] %vm15665_vm3, %v5001_v16  ;;  %v13405_v16 = vpack.c.bf16 %v13394_v41, %v13226_v23  ;;  %v4923_v23 = vadd.f32 %v13259_v43, %v4852_v48 }
 0x6ad   : > { %v4976_v45 = vpop.f32.mrf.mxu0  ;;  %v13374_v5 = vpop.f32.mrf.mxu1 }
 0x6ae   : > { %v4990_v61 = vadd.f32 %v4976_v45, %v4921_v32  ;;  %9951 = vmatmul.msk.bf16.gmra.mxu3 %vm15663_vm8, %v13376_v21  ;;  %v5736_v32 = vld [vmem:[#allocation5 + $0x48] sm:$0xff] }
 0x6b0   : > { %v5002_v9 = vadd.f32 %v13286_v7, %v4990_v61  ;;  %9915 = vmatmul.msk.bf16.gmra.mxu0 %vm15676_vm14, %v15675_v54  ;;  %vm15679_vm14 = vmmov %vm15663_vm8 }
 0x6b1   : > { %v13387_v30 = vpop.f32.mrf.mxu2  ;;  %v13389_v19 = vpop.f32.mrf.mxu3 }
 0x6b2   : > { %9825 = vst.msk [vmem:[%s13123_s16 + $0xa0] sm:$0xff] %vm15665_vm3, %v5002_v9  ;;  %v13422_v9 = vpack.c.bf16 %v5736_v32, %v5735_v40 }
 0x6b5   : > { %v4978_v56 = vpop.f32.mrf.mxu0  ;;  %v13399_v35 = vpop.f32.mrf.mxu1 }
 0x6b6   : > { %v4991_v20 = vadd.f32 %v4978_v56, %v4922_v1  ;;  %9985 = vmatmul.msk.bf16.vlgmr.msrb.gmra.mxu2 %vm15663_vm8, %v5904_v38  ;;  %v13437_v1 = vld [vmem:[#allocation5 + $0xe8] sm:$0xff]  ;;  %v4924_v56 = vadd.f32 %v13278_v51, %v4854_v55  ;;  %v5799_v51 = vld [vmem:[#allocation5 + $0x77] sm:$0xff]  ;;  %v13468_v55 = vld [vmem:[%s15342_s10] ss:$0 sm:$0xff] }
 0x6b7   : > { %15682 = vst [vmem:[#allocation20_spill] sm:$0xff] %v13437_v1  ;;  %v13448_v10 = vpack.c.bf16 %v13437_v1, %v13264_v17  ;;  %v5798_v17 = vld [vmem:[#allocation5 + $0x6f] sm:$0xff]  ;;  %v6020_v1 = vld [vmem:[#allocation5 + $0x80] sm:$0xff] }
 0x6b8   : > { %v5003_v0 = vadd.f32 %v13286_v7, %v4991_v20  ;;  %9977 = vmatmul.msk.bf16.vlgmr.msrb.gmra.mxu1 %vm15679_vm14, %v13405_v16  ;;  %vm15681_vm14 = vmmov %vm15663_vm8 }
 0x6b9   : > { %v13415_v59 = vpop.f32.mrf.mxu3  ;;  %v13417_v2 = vpop.f32.mrf.mxu2 }
 0x6ba   : > { %9826 = vst.msk [vmem:[%s13123_s16 + $0xa8] sm:$0xff] %vm15665_vm3, %v5003_v0  ;;  %v15683_v0 = vld [vmem:[#allocation21_spill] sm:$0xff] }
 0x6bb   : > { %v5905_v48 = vpack.c.bf16 %v15683_v0, %v13440_v37 }
 0x6bd   : > { %v4981_v45 = vpop.f32.mrf.mxu0  ;;  %v13420_v61 = vpop.f32.mrf.mxu1 }
 0x6be   : > { %v4992_v54 = vadd.f32 %v4981_v45, %v4923_v23  ;;  %9952 = vmatmul.msk.bf16.gmra.mxu3 %vm15663_vm8, %v13422_v9  ;;  %v5120_v23 = vadd.f32 %v13242_v14, %v13228_v15  ;;  %v6018_v15 = vld [vmem:[#allocation5 + $0x70] sm:$0xff] }
 0x6c0   : > { %v5004_v44 = vadd.f32 %v13286_v7, %v4992_v54  ;;  %9916 = vmatmul.msk.bf16.gmra.mxu0 %vm15681_vm14, %v15680_v31  ;;  %vm15684_vm14 = vmmov %vm15663_vm8  ;;  %v6019_v54 = vld [vmem:[#allocation5 + $0x78] sm:$0xff]  ;;  %v5807_v31 = vsel %vm15645_vm2, %v5799_v51, 0.0  ;;  %v5122_v51 = vadd.f32 %v13261_v47, %v13249_v60 }
 0x6c1   : > { %v13433_v43 = vpop.f32.mrf.mxu3  ;;  %v13435_v29 = vpop.f32.mrf.mxu2 }
 0x6c2   : > { %9827 = vst.msk [vmem:[%s13123_s16 + $0xb0] sm:$0xff] %vm15665_vm3, %v5004_v44 }
 0x6c5   : > { %v4983_v38 = vpop.f32.mrf.mxu0  ;;  %v13442_v20 = vpop.f32.mrf.mxu1 }
 0x6c6   : > { %v4993_v3 = vadd.f32 %v4983_v38, %v4924_v56  ;;  %9986 = vmatmul.msk.bf16.gmra.mxu2 %vm15663_vm8, %v5905_v48  ;;  %v13472_v38 = vpack.c.bf16 %v6019_v54, %v6018_v15  ;;  %v5806_v48 = vsel %vm15512_vm5, %v5798_v17, 0.0  ;;  %v5901_v15 = vld [vmem:[#allocation5 + $0x158] sm:$0xff] }
 0x6c7   : > { %v13488_v17 = vld [vmem:[#allocation5 + $0xf8] sm:$0xff] }
 0x6c8   : > { %v5005_v32 = vadd.f32 %v13286_v7, %v4993_v3  ;;  %9978 = vmatmul.msk.bf16.gmra.mxu1 %vm15684_vm14, %v13448_v10  ;;  %v5201_v7 = vadd.f32 %v13303_v62, %v5120_v23  ;;  %vm15687_vm14 = vmmov %vm15663_vm8  ;;  %15688 = vst [vmem:[#allocation28_spill] sm:$0xff] %v13488_v17 }
 0x6c9   : > { %v13458_v40 = vpop.f32.mrf.mxu3  ;;  %v13460_v45 = vpop.f32.mrf.mxu2 }
 0x6ca   : > { %9828 = vst.msk [vmem:[%s13123_s16 + $0xb8] sm:$0xff] %vm15665_vm3, %v5005_v32  ;;  %v5814_v32 = vpack.c.bf16 %v5807_v31, %v5806_v48  ;;  %v10592_v31 = vld [vmem:[%s15341_s9 + $0x20] sm:$0xff] }
 0x6cb   : > { %6275 = vmatpush.bf16.msra.mxu2 %v10592_v31 }
 0x6cd   : > { %v5251_v14 = vpop.f32.mrf.mxu0  ;;  %v13470_v56 = vpop.f32.mrf.mxu1 }
 0x6ce   : > { %v5271_v3 = vadd.f32 %v5251_v14, %v5201_v7  ;;  %9995 = vmatmul.msk.bf16.vlgmr.msrb.gmra.mxu3 %vm15663_vm8, %v13472_v38  ;;  %v5202_v7 = vadd.f32 %v13328_v24, %v5122_v51  ;;  %v5900_v14 = vld [vmem:[#allocation5 + $0x150] sm:$0xff]  ;;  %v5801_v24 = vld [vmem:[#allocation5 + $0x87] sm:$0xff] }
 0x6cf   : > { %v13496_v60 = vpack.c.bf16 %v5901_v15, %v5900_v14  ;;  %v10593_v51 = vld [vmem:[%s15341_s9 + $0x28] sm:$0xff]  ;;  %v5125_v15 = vadd.f32 %v13280_v26, %v13266_v27  ;;  %v5800_v14 = vld [vmem:[#allocation5 + $0x7f] sm:$0xff] }
 0x6d0   : > { %v5283_v62 = vadd.f32 %v13468_v55, %v5271_v3  ;;  %9959 = vmatmul.msk.bf16.vlgmr.msra.gmra.mxu0 %vm15687_vm14, %v5814_v32  ;;  %v13500_v32 = vpack.c.bf16 %v13488_v17, %v13309_v50  ;;  %vm15689_vm14 = vmmov %vm15663_vm8  ;;  %6228 = vmatpush.bf16.msra.mxu1 %v10593_v51  ;;  %v15695_v26 = vld [vmem:[#allocation16_spill] sm:$0xff] }
 0x6d1   : > { %v13484_v23 = vpop.f32.mrf.mxu2  ;;  %v13486_v54 = vpop.f32.mrf.mxu3  ;;  %v5203_v17 = vadd.f32 %v13346_v25, %v5125_v15  ;;  %v5127_v25 = vadd.f32 %v13301_v4, %v13288_v28  ;;  %v5903_v15 = vld [vmem:[#allocation5 + $0x168] sm:$0xff]  ;;  %v5803_v4 = vld [vmem:[#allocation5 + $0x97] sm:$0xff] }
 0x6d2   : > { %9869 = vst.msk [vmem:[%s13123_s16 + $0x40] sm:$0xff] %vm15665_vm3, %v5283_v62 }
 0x6d5   : > { %v5253_v48 = vpop.f32.mrf.mxu0  ;;  %v13494_v3 = vpop.f32.mrf.mxu1 }
 0x6d6   : > { %v5272_v47 = vadd.f32 %v5253_v48, %v5202_v7  ;;  %9987 = vmatmul.msk.bf16.gmra.mxu2 %vm15663_vm8, %v13496_v60  ;;  %v6021_v7 = vld [vmem:[#allocation5 + $0x88] sm:$0xff] }
 0x6d7   : > { %v13523_v27 = vpack.c.bf16 %v6021_v7, %v6020_v1 }
 0x6d8   : > { %v5284_v62 = vadd.f32 %v13468_v55, %v5272_v47  ;;  %9979 = vmatmul.msk.bf16.gmra.mxu1 %vm15689_vm14, %v13500_v32  ;;  %v5809_v47 = vsel %vm15649_vm13, %v5801_v24, 0.0  ;;  %vm15692_vm14 = vmmov %vm15663_vm8 }
 0x6d9   : > { %v13514_v50 = vpop.f32.mrf.mxu2  ;;  %v13516_v31 = vpop.f32.mrf.mxu3 }
 0x6da   : > { %9870 = vst.msk [vmem:[%s13123_s16 + $0x48] sm:$0xff] %vm15665_vm3, %v5284_v62  ;;  %v5808_v62 = vsel %vm15589_vm11, %v5800_v14, 0.0 }
 0x6db   : > { %v5815_v34 = vpack.c.bf16 %v5809_v47, %v5808_v62  ;;  %v5130_v47 = vadd.f32 %v13326_v11, %v13311_v58 }
 0x6dd   : > { %v5256_v0 = vpop.f32.mrf.mxu0  ;;  %v13521_v41 = vpop.f32.mrf.mxu1 }
 0x6de   : > { %v5273_v44 = vadd.f32 %v5256_v0, %v5203_v17  ;;  %9996 = vmatmul.msk.bf16.gmra.mxu3 %vm15663_vm8, %v13523_v27  ;;  %v5204_v0 = vadd.f32 %v13368_v33, %v5127_v25  ;;  %v5902_v17 = vld [vmem:[#allocation5 + $0x160] sm:$0xff]  ;;  %v5802_v25 = vld [vmem:[#allocation5 + $0x8f] sm:$0xff] }
 0x6e0   : > { %v5285_v51 = vadd.f32 %v13468_v55, %v5273_v44  ;;  %9960 = vmatmul.msk.bf16.gmra.mxu0 %vm15692_vm14, %v5815_v34  ;;  %v13542_v44 = vpack.c.bf16 %v5903_v15, %v5902_v17  ;;  %vm15693_vm14 = vmmov %vm15663_vm8  ;;  %v10594_v15 = vld [vmem:[%s15341_s9 + $0x30] sm:$0xff]  ;;  %v5811_v17 = vsel %vm15597_vm15, %v5803_v4, 0.0  ;;  %vm15698_vm15 = vcmask 64512  }
 0x6e1   : > { %v13535_v1 = vpop.f32.mrf.mxu2  ;;  %v13537_v24 = vpop.f32.mrf.mxu3  ;;  %6336 = vmatpush.bf16.msra.mxu3 %v10594_v15 }
 0x6e2   : > { %9871 = vst.msk [vmem:[%s13123_s16 + $0x50] sm:$0xff] %vm15665_vm3, %v5285_v51  ;;  %v6023_v51 = vld [vmem:[#allocation5 + $0x98] sm:$0xff] }
 0x6e5   : > { %v5258_v7 = vpop.f32.mrf.mxu0  ;;  %v13540_v14 = vpop.f32.mrf.mxu1 }
 0x6e6   : > { %v5274_v34 = vadd.f32 %v5258_v7, %v5204_v0  ;;  %9988 = vmatmul.msk.bf16.gmra.mxu2 %vm15663_vm8, %v13542_v44  ;;  %v5205_v7 = vadd.f32 %v13389_v19, %v5130_v47  ;;  %vm15696_vm8 = vnez %v15695_v26  ;;  %v5132_v19 = vadd.f32 %v13344_v12, %v13331_v8  ;;  %v10627_v26 = vld [vmem:[%s15341_s9 + $0x78] sm:$0xff] }
 0x6e7   : > { %v5810_v48 = vsel %vm15696_vm8, %v5802_v25, 0.0 }
 0x6e8   : > { %v5286_v28 = vadd.f32 %v13468_v55, %v5274_v34  ;;  %9980 = vmatmul.msk.bf16.gmra.mxu1 %vm15693_vm14, %v13353_v46  ;;  %v6022_v34 = vld [vmem:[#allocation5 + $0x90] sm:$0xff]  ;;  %v5816_v42 = vpack.c.bf16 %v5811_v17, %v5810_v48  ;;  %v10595_v48 = vld [vmem:[%s15341_s9 + $0x38] sm:$0xff] }
 0x6e9   : > { %v13553_v33 = vpop.f32.mrf.mxu2  ;;  %v13555_v62 = vpop.f32.mrf.mxu3  ;;  %6405 = vmatpush.bf16.msra.mxu0 %v10595_v48  ;;  %v6024_v48 = vld [vmem:[#allocation5 + $0xa0] sm:$0xff] }
 0x6ea   : > { %9872 = vst.msk [vmem:[%s13123_s16 + $0x58] sm:$0xff] %vm15665_vm3, %v5286_v28  ;;  %v13565_v28 = vpack.c.bf16 %v6023_v51, %v6022_v34  ;;  %vm15697_vm3 = vmmov %vm15693_vm14  ;;  %v13581_v51 = vld [vmem:[#allocation5 + $0x138] sm:$0xff] }
 0x6eb   : > { %v13591_v8 = vpack.c.bf16 %v13581_v51, %v13397_v13  ;;  %v6025_v13 = vld [vmem:[#allocation5 + $0xa8] sm:$0xff]  ;;  %v5804_v34 = vld [vmem:[#allocation5 + $0x9f] sm:$0xff] }
 0x6ed   : > { %v5261_v58 = vpop.f32.mrf.mxu0  ;;  %v13563_v11 = vpop.f32.mrf.mxu1 }
 0x6ee   : > { %v5275_v39 = vadd.f32 %v5261_v58, %v5205_v7  ;;  %9997 = vmatmul.msk.bf16.gmra.mxu3 %vm15693_vm14, %v13565_v28  ;;  %vm15700_vm14 = vmmov %vm15697_vm3 }
 0x6f0   : > { %v5287_v0 = vadd.f32 %v13468_v55, %v5275_v39  ;;  %9961 = vmatmul.msk.bf16.gmra.mxu0 %vm15697_vm3, %v5816_v42  ;;  %v5206_v39 = vadd.f32 %v13415_v59, %v5132_v19  ;;  %v5135_v59 = vadd.f32 %v13366_v57, %v13351_v22  ;;  %v5812_v22 = vsel %vm15565_vm7, %v5804_v34, 0.0 }
 0x6f1   : > { %v13577_v4 = vpop.f32.mrf.mxu2  ;;  %v13579_v47 = vpop.f32.mrf.mxu3 }
 0x6f2   : > { %9873 = vst.msk [vmem:[%s13123_s16 + $0x60] sm:$0xff] %vm15698_vm15, %v5287_v0  ;;  %vm15699_vm15 = vmmov %vm15697_vm3  ;;  %v5805_v0 = vld [vmem:[#allocation5 + $0xa7] sm:$0xff]  ;;  %vm15701_vm3 = vcmask 64512   ;;  %v5207_v19 = vadd.f32 %v13433_v43, %v5135_v59  ;;  %v5137_v43 = vadd.f32 %v13387_v30, %v13374_v5  ;;  %v5411_v30 = vadd.f32 %v13417_v2, %v13399_v35 }
 0x6f3   : > { %v5813_v58 = vsel %vm15545_vm10, %v5805_v0, 0.0  ;;  %v5413_v2 = vadd.f32 %v13435_v29, %v13420_v61  ;;  %v10597_v29 = vld [vmem:[%s15341_s9 + $0x28] sm:$0xff]  ;;  %vm15714_vm10 = vcmask 64512  }
 0x6f4   : > { %v5208_v34 = vadd.f32 %v13458_v40, %v5137_v43  ;;  %v10596_v43 = vld [vmem:[%s15341_s9 + $0x20] sm:$0xff]  ;;  %6517 = vmatpush.bf16.msrb.mxu1 %v10597_v29  ;;  %v10598_v29 = vld [vmem:[%s15341_s9 + $0x30] sm:$0xff] }
 0x6f5   : > { %v5263_v42 = vpop.f32.mrf.mxu0  ;;  %v13587_v25 = vpop.f32.mrf.mxu1  ;;  %6564 = vmatpush.bf16.msrb.mxu2 %v10596_v43  ;;  %6633 = vmatpush.bf16.msrb.mxu3 %v10598_v29 }
 0x6f6   : > { %v5276_v12 = vadd.f32 %v5263_v42, %v5206_v39  ;;  %10033 = vmatmul.msk.bf16.vlgmr.msra.gmra.mxu2 %vm15699_vm15, %v13591_v8  ;;  %v13611_v42 = vpack.c.bf16 %v6025_v13, %v6024_v48  ;;  %vm15702_vm15 = vmmov %vm15700_vm14  ;;  %v13627_v13 = vld [vmem:[#allocation5 + $0x148] sm:$0xff] }
 0x6f7   : > { %v13634_v48 = vpack.c.bf16 %v13627_v13, %v13440_v37  ;;  %v5499_v37 = vadd.f32 %v13486_v54, %v5411_v30 }
 0x6f8   : > { %v5288_v15 = vadd.f32 %v13468_v55, %v5276_v12  ;;  %10025 = vmatmul.msk.bf16.vlgmr.msra.gmra.mxu1 %vm15700_vm14, %v13405_v16  ;;  %v5817_v12 = vpack.c.bf16 %v5813_v58, %v5812_v22 }
 0x6f9   : > { %v13602_v17 = vpop.f32.mrf.mxu3  ;;  %v13604_v7 = vpop.f32.mrf.mxu2 }
 0x6fa   : > { %9874 = vst.msk [vmem:[%s13123_s16 + $0x68] sm:$0xff] %vm15701_vm3, %v5288_v15 }
 0x6fd   : > { %v5266_v16 = vpop.f32.mrf.mxu0  ;;  %v13609_v39 = vpop.f32.mrf.mxu1 }
 0x6fe   : > { %v5277_v57 = vadd.f32 %v5266_v16, %v5207_v19  ;;  %9998 = vmatmul.msk.bf16.gmra.mxu3 %vm15702_vm15, %v13611_v42  ;;  %vm15703_vm15 = vmmov %vm15700_vm14 }
 0x700   : > { %v5289_v15 = vadd.f32 %v13468_v55, %v5277_v57  ;;  %9962 = vmatmul.msk.bf16.gmra.mxu0 %vm15700_vm14, %v5817_v12  ;;  %v13653_v57 = vld [vmem:[%s15342_s10] ss:$0 sm:$0xff] }
 0x701   : > { %v13623_v0 = vpop.f32.mrf.mxu3  ;;  %v13625_v59 = vpop.f32.mrf.mxu2 }
 0x702   : > { %9875 = vst.msk [vmem:[%s13123_s16 + $0x70] sm:$0xff] %vm15701_vm3, %v5289_v15 }
 0x705   : > { %v5268_v58 = vpop.f32.mrf.mxu0  ;;  %v13630_v19 = vpop.f32.mrf.mxu1 }
 0x706   : > { %v5278_v16 = vadd.f32 %v5268_v58, %v5208_v34  ;;  %10034 = vmatmul.msk.bf16.gmra.mxu2 %vm15703_vm15, %v13634_v48  ;;  %vm15704_vm15 = vmmov %vm15700_vm14  ;;  %v5500_v34 = vadd.f32 %v13516_v31, %v5413_v2  ;;  %v5416_v31 = vadd.f32 %v13460_v45, %v13442_v20  ;;  %v5418_v20 = vadd.f32 %v13484_v23, %v13470_v56 }
 0x707   : > { %v5421_v56 = vadd.f32 %v13514_v50, %v13494_v3  ;;  %v6459_v3 = vld [vmem:[#allocation5 + $0xd9] sm:$0xff] }
 0x708   : > { %v5290_v5 = vadd.f32 %v13468_v55, %v5278_v16  ;;  %10026 = vmatmul.msk.bf16.gmra.mxu1 %vm15700_vm14, %v13448_v10  ;;  %v5502_v43 = vadd.f32 %v13555_v62, %v5418_v20 }
 0x709   : > { %v13645_v40 = vpop.f32.mrf.mxu3  ;;  %v13647_v22 = vpop.f32.mrf.mxu2 }
 0x70a   : > { %9876 = vst.msk [vmem:[%s13123_s16 + $0x78] sm:$0xff] %vm15701_vm3, %v5290_v5 }
 0x70d   : > { %v5548_v55 = vpop.f32.mrf.mxu0  ;;  %v13655_v12 = vpop.f32.mrf.mxu1 }
 0x70e   : > { %v5568_v10 = vadd.f32 %v5548_v55, %v5499_v37  ;;  %10043 = vmatmul.msk.bf16.vlgmr.msra.gmra.mxu3 %vm15704_vm15, %v13472_v38  ;;  %vm15705_vm15 = vmmov %vm15700_vm14  ;;  %v5501_v55 = vadd.f32 %v13537_v24, %v5416_v31  ;;  %v5503_v31 = vadd.f32 %v13579_v47, %v5421_v56  ;;  %v15711_v56 = vld [vmem:[#allocation11_spill] sm:$0xff] }
 0x710   : > { %v5580_v35 = vadd.f32 %v13653_v57, %v5568_v10  ;;  %10005 = vmatmul.msk.bf16.vlgmr.msrb.gmra.mxu0 %vm15700_vm14, %v13290_v49 }
 0x711   : > { %v13666_v54 = vpop.f32.mrf.mxu2  ;;  %v13668_v15 = vpop.f32.mrf.mxu3 }
 0x712   : > { %9917 = vst.msk [vmem:[%s13123_s16 + $0xc0] sm:$0xff] %vm15701_vm3, %v5580_v35 }
 0x715   : > { %v5550_v58 = vpop.f32.mrf.mxu0  ;;  %v13674_v16 = vpop.f32.mrf.mxu1 }
 0x716   : > { %v5569_v5 = vadd.f32 %v5550_v58, %v5500_v34  ;;  %10035 = vmatmul.msk.bf16.gmra.mxu2 %vm15705_vm15, %v13496_v60  ;;  %vm15706_vm15 = vmmov %vm15700_vm14 }
 0x718   : > { %v5581_v61 = vadd.f32 %v13653_v57, %v5569_v5  ;;  %10027 = vmatmul.msk.bf16.gmra.mxu1 %vm15700_vm14, %v13500_v32 }
 0x719   : > { %v13688_v30 = vpop.f32.mrf.mxu2  ;;  %v13690_v37 = vpop.f32.mrf.mxu3 }
 0x71a   : > { %9918 = vst.msk [vmem:[%s13123_s16 + $0xc8] sm:$0xff] %vm15701_vm3, %v5581_v61 }
 0x71d   : > { %v5553_v10 = vpop.f32.mrf.mxu0  ;;  %v13693_v35 = vpop.f32.mrf.mxu1 }
 0x71e   : > { %v5570_v32 = vadd.f32 %v5553_v10, %v5501_v55  ;;  %10044 = vmatmul.msk.bf16.gmra.mxu3 %vm15706_vm15, %v13523_v27  ;;  %vm15707_vm15 = vmmov %vm15700_vm14 }
 0x720   : > { %v5582_v2 = vadd.f32 %v13653_v57, %v5570_v32  ;;  %10006 = vmatmul.msk.bf16.gmra.mxu0 %vm15700_vm14, %v13333_v63  ;;  %v6458_v32 = vld [vmem:[#allocation5 + $0xd1] sm:$0xff] }
 0x721   : > { %v13704_v45 = vpop.f32.mrf.mxu2  ;;  %v13706_v24 = vpop.f32.mrf.mxu3 }
 0x722   : > { %9919 = vst.msk [vmem:[%s13123_s16 + $0xd0] sm:$0xff] %vm15701_vm3, %v5582_v2  ;;  %v5423_v2 = vadd.f32 %v13535_v1, %v13521_v41 }
 0x725   : > { %v5555_v34 = vpop.f32.mrf.mxu0  ;;  %v13709_v58 = vpop.f32.mrf.mxu1 }
 0x726   : > { %v5571_v5 = vadd.f32 %v5555_v34, %v5502_v43  ;;  %10036 = vmatmul.msk.bf16.gmra.mxu2 %vm15707_vm15, %v13542_v44  ;;  %vm15708_vm15 = vmmov %vm15700_vm14  ;;  %v15709_v43 = vld [vmem:[#allocation12_spill] sm:$0xff] }
 0x727   : > { %vm15710_vm7 = vnez %v15709_v43  ;;  %v8783_v43 = vld [vmem:[#allocation5 + $0x41] sm:$0xff] }
 0x728   : > { %v5583_v61 = vadd.f32 %v13653_v57, %v5571_v5  ;;  %10028 = vmatmul.msk.bf16.gmra.mxu1 %vm15700_vm14, %v13353_v46  ;;  %v6467_v34 = vsel %vm15710_vm7, %v6459_v3, 0.0  ;;  %v10599_v5 = vld [vmem:[%s15341_s9 + $0x38] sm:$0xff] }
 0x729   : > { %v13720_v23 = vpop.f32.mrf.mxu2  ;;  %v13722_v62 = vpop.f32.mrf.mxu3  ;;  %6702 = vmatpush.bf16.msrb.mxu0 %v10599_v5 }
 0x72a   : > { %9920 = vst.msk [vmem:[%s13123_s16 + $0xd8] sm:$0xff] %vm15701_vm3, %v5583_v61  ;;  %v5504_v61 = vadd.f32 %v13602_v17, %v5423_v2  ;;  %v5426_v17 = vadd.f32 %v13553_v33, %v13540_v14  ;;  %v6460_v14 = vld [vmem:[#allocation5 + $0xe1] sm:$0xff]  ;;  %v5428_v33 = vadd.f32 %v13577_v4, %v13563_v11  ;;  %v6589_v4 = vld [vmem:[#allocation5 + $0x19] sm:$0xff] }
 0x72d   : > { %v5558_v55 = vpop.f32.mrf.mxu0  ;;  %v13728_v10 = vpop.f32.mrf.mxu1 }
 0x72e   : > { %v5572_v46 = vadd.f32 %v5558_v55, %v5503_v31  ;;  %10045 = vmatmul.msk.bf16.gmra.mxu3 %vm15708_vm15, %v13565_v28  ;;  %vm15712_vm15 = vnez %v15711_v56 }
 0x72f   : > { %v6466_v29 = vsel %vm15712_vm15, %v6458_v32, 0.0  ;;  %v5505_v32 = vadd.f32 %v13623_v0, %v5426_v17 }
 0x730   : > { %v5584_v50 = vadd.f32 %v13653_v57, %v5572_v46  ;;  %10007 = vmatmul.msk.bf16.gmra.mxu0 %vm15700_vm14, %v13376_v21  ;;  %v6474_v31 = vpack.c.bf16 %v6467_v34, %v6466_v29 }
 0x731   : > { %v13739_v47 = vpop.f32.mrf.mxu2  ;;  %v13741_v20 = vpop.f32.mrf.mxu3 }
 0x732   : > { %9921 = vst.msk [vmem:[%s13123_s16 + $0xe0] sm:$0xff] %vm15701_vm3, %v5584_v50  ;;  %vm15713_vm3 = vmmov %vm15700_vm14 }
 0x735   : > { %v5560_v41 = vpop.f32.mrf.mxu0  ;;  %v13751_v1 = vpop.f32.mrf.mxu1 }
 0x736   : > { %v5573_v55 = vadd.f32 %v5560_v41, %v5504_v61  ;;  %10081 = vmatmul.msk.bf16.vlgmr.msrb.gmra.mxu2 %vm15700_vm14, %v6474_v31  ;;  %vm15715_vm14 = vmmov %vm15713_vm3  ;;  %v6461_v61 = vld [vmem:[#allocation5 + $0xe9] sm:$0xff]  ;;  %v5506_v31 = vadd.f32 %v13645_v40, %v5428_v33  ;;  %v5708_v40 = vadd.f32 %v13604_v7, %v13587_v25 }
 0x737   : > { %v6469_v41 = vsel %vm11094_vm9, %v6461_v61, 0.0 }
 0x738   : > { %v5585_v46 = vadd.f32 %v13653_v57, %v5573_v55  ;;  %10073 = vmatmul.msk.bf16.vlgmr.msrb.gmra.mxu1 %vm15713_vm3, %v13591_v8  ;;  %v6468_v55 = vsel %vm15656_vm12, %v6460_v14, 0.0  ;;  %v6597_v14 = vsel %vm15710_vm7, %v6589_v4, 0.0  ;;  %v5788_v33 = vadd.f32 %v13668_v15, %v5708_v40  ;;  %v6462_v15 = vld [vmem:[#allocation5 + $0xf1] sm:$0xff] }
 0x739   : > { %v13761_v3 = vpop.f32.mrf.mxu3  ;;  %v13763_v50 = vpop.f32.mrf.mxu2 }
 0x73a   : > { %9922 = vst.msk [vmem:[%s13123_s16 + $0xe8] sm:$0xff] %vm15714_vm10, %v5585_v46 }
 0x73d   : > { %v5563_v2 = vpop.f32.mrf.mxu0  ;;  %v13766_v34 = vpop.f32.mrf.mxu1 }
 0x73e   : > { %v5574_v5 = vadd.f32 %v5563_v2, %v5505_v32  ;;  %10046 = vmatmul.msk.bf16.gmra.mxu3 %vm15715_vm14, %v13611_v42  ;;  %v6475_v32 = vpack.c.bf16 %v6469_v41, %v6468_v55  ;;  %vm15716_vm14 = vmmov %vm15713_vm3  ;;  %v6463_v55 = vld [vmem:[#allocation5 + $0xf9] sm:$0xff] }
 0x740   : > { %v5586_v8 = vadd.f32 %v13653_v57, %v5574_v5  ;;  %10008 = vmatmul.msk.bf16.gmra.mxu0 %vm15713_vm3, %v13422_v9  ;;  %v6588_v5 = vld [vmem:[#allocation5 + $0x11] sm:$0xff] }
 0x741   : > { %v13777_v0 = vpop.f32.mrf.mxu3  ;;  %v13779_v29 = vpop.f32.mrf.mxu2  ;;  %v6596_v25 = vsel %vm15712_vm15, %v6588_v5, 0.0  ;;  %v10600_v5 = vld [vmem:[%s15341_s9 + $0x40] sm:$0xff] }
 0x742   : > { %9923 = vst.msk [vmem:[%s13123_s16 + $0xf0] sm:$0xff] %vm15714_vm10, %v5586_v8  ;;  %v6604_v41 = vpack.c.bf16 %v6597_v14, %v6596_v25  ;;  %v6470_v14 = vsel %vm15659_vm1, %v6462_v15, 0.0  ;;  %6863 = vmatpush.bf16.msra.mxu2 %v10600_v5 }
 0x745   : > { %v5565_v46 = vpop.f32.mrf.mxu0  ;;  %v13786_v17 = vpop.f32.mrf.mxu1 }
 0x746   : > { %v5575_v11 = vadd.f32 %v5565_v46, %v5506_v31  ;;  %10082 = vmatmul.msk.bf16.gmra.mxu2 %vm15716_vm14, %v6475_v32  ;;  %vm15717_vm14 = vmmov %vm15713_vm3  ;;  %v5710_v32 = vadd.f32 %v13625_v59, %v13609_v39 }
 0x748   : > { %v5587_v2 = vadd.f32 %v13653_v57, %v5575_v11  ;;  %10074 = vmatmul.msk.bf16.gmra.mxu1 %vm15713_vm3, %v13634_v48  ;;  %v13806_v48 = vld [vmem:[%s15342_s10] ss:$0 sm:$0xff] }
 0x749   : > { %v13796_v61 = vpop.f32.mrf.mxu3  ;;  %v13798_v8 = vpop.f32.mrf.mxu2 }
 0x74a   : > { %9924 = vst.msk [vmem:[%s13123_s16 + $0xf8] sm:$0xff] %vm15714_vm10, %v5587_v2  ;;  %v6471_v2 = vsel %vm15658_vm4, %v6463_v55, 0.0  ;;  %v5713_v55 = vadd.f32 %v13647_v22, %v13630_v19 }
 0x74d   : > { %v5845_v7 = vpop.f32.mrf.mxu0  ;;  %v13810_v57 = vpop.f32.mrf.mxu1 }
 0x74e   : > { %v5865_v31 = vadd.f32 %v5845_v7, %v5788_v33  ;;  %10091 = vmatmul.msk.bf16.vlgmr.msrb.gmra.mxu3 %vm15717_vm14, %v6604_v41  ;;  %v6476_v33 = vpack.c.bf16 %v6471_v2, %v6470_v14  ;;  %vm15719_vm14 = vmmov %vm15713_vm3  ;;  %v6591_v7 = vld [vmem:[#allocation5 + $0x29] sm:$0xff]  ;;  %v6464_v14 = vld [vmem:[#allocation5 + $0x101] sm:$0xff] }
 0x750   : > { %v5877_v46 = vadd.f32 %v13806_v48, %v5865_v31  ;;  %10053 = vmatmul.msk.bf16.vlgmr.msra.gmra.mxu0 %vm15713_vm3, %v13290_v49  ;;  %v5789_v49 = vadd.f32 %v13690_v37, %v5710_v32  ;;  %v10601_v37 = vld [vmem:[%s15341_s9 + $0x48] sm:$0xff]  ;;  %v6599_v32 = vsel %vm11094_vm9, %v6591_v7, 0.0 }
 0x751   : > { %v13820_v11 = vpop.f32.mrf.mxu2  ;;  %v13822_v4 = vpop.f32.mrf.mxu3  ;;  %v6590_v31 = vld [vmem:[#allocation5 + $0x21] sm:$0xff]  ;;  %6816 = vmatpush.bf16.msra.mxu1 %v10601_v37  ;;  %v6472_v37 = vsel %vm15623_vm6, %v6464_v14, 0.0 }
 0x752   : > { %9963 = vst.msk [vmem:[%s13123_s16 + $0x200] sm:$0xff] %vm15714_vm10, %v5877_v46  ;;  %v6598_v2 = vsel %vm15656_vm12, %v6590_v31, 0.0 }
 0x753   : > { %v6605_v19 = vpack.c.bf16 %v6599_v32, %v6598_v2 }
 0x755   : > { %v5847_v39 = vpop.f32.mrf.mxu0  ;;  %v13832_v59 = vpop.f32.mrf.mxu1 }
 0x756   : > { %v5866_v25 = vadd.f32 %v5847_v39, %v5789_v49  ;;  %10083 = vmatmul.msk.bf16.gmra.mxu2 %vm15719_vm14, %v6476_v33  ;;  %vm15720_vm14 = vmmov %vm15713_vm3  ;;  %v6465_v39 = vld [vmem:[#allocation5 + $0x109] sm:$0xff] }
 0x758   : > { %v5878_v41 = vadd.f32 %v13806_v48, %v5866_v25  ;;  %10075 = vmatmul.msk.bf16.gmra.mxu1 %vm15713_vm3, %v13496_v60  ;;  %v5790_v60 = vadd.f32 %v13706_v24, %v5713_v55  ;;  %v5715_v24 = vadd.f32 %v13666_v54, %v13655_v12  ;;  %v6473_v55 = vsel %vm15621_vm0, %v6465_v39, 0.0  ;;  %v6593_v54 = vld [vmem:[#allocation5 + $0x39] sm:$0xff] }
 0x759   : > { %v13845_v46 = vpop.f32.mrf.mxu2  ;;  %v13847_v15 = vpop.f32.mrf.mxu3  ;;  %v6477_v2 = vpack.c.bf16 %v6473_v55, %v6472_v37  ;;  %v6601_v39 = vsel %vm15658_vm4, %v6593_v54, 0.0  ;;  %v6771_v54 = vld [vmem:[#allocation5 + $0x12f] sm:$0xff] }
 0x75a   : > { %9964 = vst.msk [vmem:[%s13123_s16 + $0x208] sm:$0xff] %vm15714_vm10, %v5878_v41  ;;  %v5791_v32 = vadd.f32 %v13722_v62, %v5715_v24 }
 0x75d   : > { %v5850_v5 = vpop.f32.mrf.mxu0  ;;  %v13854_v49 = vpop.f32.mrf.mxu1 }
 0x75e   : > { %v5867_v22 = vadd.f32 %v5850_v5, %v5790_v60  ;;  %10092 = vmatmul.msk.bf16.gmra.mxu3 %vm15720_vm14, %v6605_v19  ;;  %vm15723_vm14 = vmmov %vm15713_vm3  ;;  %v6592_v19 = vld [vmem:[#allocation5 + $0x31] sm:$0xff] }
 0x75f   : > { %v6600_v24 = vsel %vm15659_vm1, %v6592_v19, 0.0  ;;  %vm15744_vm1 = vcmask 64512  }
 0x760   : > { %v5879_v33 = vadd.f32 %v13806_v48, %v5867_v22  ;;  %10054 = vmatmul.msk.bf16.gmra.mxu0 %vm15713_vm3, %v13333_v63  ;;  %v5718_v22 = vadd.f32 %v13688_v30, %v13674_v16  ;;  %v6606_v37 = vpack.c.bf16 %v6601_v39, %v6600_v24  ;;  %v13915_v39 = vld [vmem:[#allocation5 + $0xd0] sm:$0xff] }
 0x761   : > { %v13864_v25 = vpop.f32.mrf.mxu2  ;;  %v13866_v7 = vpop.f32.mrf.mxu3 }
 0x762   : > { %9965 = vst.msk [vmem:[%s13123_s16 + $0x210] sm:$0xff] %vm15714_vm10, %v5879_v33  ;;  %v10602_v33 = vld [vmem:[%s15341_s9 + $0x50] sm:$0xff] }
 0x763   : > { %6925 = vmatpush.bf16.msra.mxu3 %v10602_v33  ;;  %v15726_v33 = vld [vmem:[#allocation27_spill] sm:$0xff] }
 0x765   : > { %v5852_v60 = vpop.f32.mrf.mxu0  ;;  %v13873_v63 = vpop.f32.mrf.mxu1 }
 0x766   : > { %v5868_v12 = vadd.f32 %v5852_v60, %v5791_v32  ;;  %10084 = vmatmul.msk.bf16.gmra.mxu2 %vm15723_vm14, %v6477_v2  ;;  %vm15724_vm14 = vmmov %vm15713_vm3  ;;  %v6772_v60 = vld [vmem:[#allocation5 + $0x137] sm:$0xff] }
 0x768   : > { %v5880_v5 = vadd.f32 %v13806_v48, %v5868_v12  ;;  %10076 = vmatmul.msk.bf16.gmra.mxu1 %vm15713_vm3, %v13542_v44  ;;  %v5792_v44 = vadd.f32 %v13741_v20, %v5718_v22  ;;  %v5720_v20 = vadd.f32 %v13704_v45, %v13693_v35  ;;  %v6780_v22 = vsel %vm15645_vm2, %v6772_v60, 0.0  ;;  %v6595_v60 = vld [vmem:[#allocation5 + $0x49] sm:$0xff] }
 0x769   : > { %v13883_v62 = vpop.f32.mrf.mxu2  ;;  %v13885_v14 = vpop.f32.mrf.mxu3 }
 0x76a   : > { %9966 = vst.msk [vmem:[%s13123_s16 + $0x218] sm:$0xff] %vm15714_vm10, %v5880_v5  ;;  %v10603_v5 = vld [vmem:[%s15341_s9 + $0x58] sm:$0xff] }
 0x76b   : > { %7003 = vmatpush.bf16.msra.mxu0 %v10603_v5 }
 0x76d   : > { %v5855_v16 = vpop.f32.mrf.mxu0  ;;  %v13895_v30 = vpop.f32.mrf.mxu1 }
 0x76e   : > { %v5869_v55 = vadd.f32 %v5855_v16, %v5792_v44  ;;  %10093 = vmatmul.msk.bf16.gmra.mxu3 %vm15724_vm14, %v6606_v37  ;;  %v6764_v44 = vpack.c.bf16 %v15726_v33, %v13915_v39  ;;  %v6779_v16 = vsel %vm15512_vm5, %v6771_v54, 0.0  ;;  %vm15728_vm14 = vmmov %vm15713_vm3 }
 0x770   : > { %v5881_v32 = vadd.f32 %v13806_v48, %v5869_v55  ;;  %10055 = vmatmul.msk.bf16.gmra.mxu0 %vm15713_vm3, %v13376_v21  ;;  %v5793_v21 = vadd.f32 %v13761_v3, %v5720_v20  ;;  %v6787_v55 = vpack.c.bf16 %v6780_v22, %v6779_v16  ;;  %v5723_v20 = vadd.f32 %v13720_v23, %v13709_v58 }
 0x771   : > { %v13905_v2 = vpop.f32.mrf.mxu2  ;;  %v13907_v12 = vpop.f32.mrf.mxu3  ;;  %v6603_v22 = vsel %vm15621_vm0, %v6595_v60, 0.0  ;;  %v6773_v60 = vld [vmem:[#allocation5 + $0x13f] sm:$0xff] }
 0x772   : > { %9967 = vst.msk [vmem:[%s13123_s16 + $0x220] sm:$0xff] %vm15714_vm10, %v5881_v32  ;;  %v6594_v32 = vld [vmem:[#allocation5 + $0x41] sm:$0xff] }
 0x773   : > { %v6602_v54 = vsel %vm15623_vm6, %v6594_v32, 0.0 }
 0x774   : > { %v6607_v16 = vpack.c.bf16 %v6603_v22, %v6602_v54  ;;  %v13956_v22 = vld [vmem:[#allocation5 + $0xe0] sm:$0xff] }
 0x775   : > { %v5857_v35 = vpop.f32.mrf.mxu0  ;;  %v13917_v45 = vpop.f32.mrf.mxu1 }
 0x776   : > { %v5870_v37 = vadd.f32 %v5857_v35, %v5793_v21  ;;  %10129 = vmatmul.msk.bf16.vlgmr.msra.gmra.mxu2 %vm15728_vm14, %v6764_v44  ;;  %v5794_v21 = vadd.f32 %v13777_v0, %v5723_v20  ;;  %vm15729_vm14 = vmmov %vm15713_vm3 }
 0x778   : > { %v5882_v3 = vadd.f32 %v13806_v48, %v5870_v37  ;;  %10121 = vmatmul.msk.bf16.vlgmr.msra.gmra.mxu1 %vm15713_vm3, %v6787_v55  ;;  %v6774_v37 = vld [vmem:[#allocation5 + $0x147] sm:$0xff]  ;;  %v5725_v55 = vadd.f32 %v13739_v47, %v13728_v10  ;;  %v15731_v10 = vld [vmem:[#allocation20_spill] sm:$0xff] }
 0x779   : > { %v13930_v5 = vpop.f32.mrf.mxu3  ;;  %v13932_v33 = vpop.f32.mrf.mxu2  ;;  %v6782_v20 = vsel %vm15649_vm13, %v6774_v37, 0.0  ;;  %v6765_v47 = vpack.c.bf16 %v15731_v10, %v13956_v22  ;;  %v6889_v10 = vld [vmem:[#allocation5 + $0x18] sm:$0xff] }
 0x77a   : > { %9968 = vst.msk [vmem:[%s13123_s16 + $0x228] sm:$0xff] %vm15714_vm10, %v5882_v3  ;;  %v5795_v54 = vadd.f32 %v13796_v61, %v5725_v55  ;;  %v5997_v61 = vadd.f32 %v13763_v50, %v13751_v1 }
 0x77d   : > { %v5860_v35 = vpop.f32.mrf.mxu0  ;;  %v13939_v44 = vpop.f32.mrf.mxu1 }
 0x77e   : > { %v5871_v58 = vadd.f32 %v5860_v35, %v5794_v21  ;;  %10094 = vmatmul.msk.bf16.gmra.mxu3 %vm15729_vm14, %v6607_v16  ;;  %v6781_v16 = vsel %vm15589_vm11, %v6773_v60, 0.0  ;;  %vm15733_vm14 = vmmov %vm15713_vm3  ;;  %v6077_v60 = vadd.f32 %v13822_v4, %v5997_v61  ;;  %v6776_v4 = vld [vmem:[#allocation5 + $0x157] sm:$0xff]  ;;  %v15735_v61 = vld [vmem:[#allocation17_spill] sm:$0xff] }
 0x77f   : > { %vm15736_vm0 = vnez %v15735_v61 }
 0x780   : > { %v5883_v23 = vadd.f32 %v13806_v48, %v5871_v58  ;;  %10056 = vmatmul.msk.bf16.gmra.mxu0 %vm15713_vm3, %v13422_v9 }
 0x781   : > { %v13949_v32 = vpop.f32.mrf.mxu3  ;;  %v13951_v0 = vpop.f32.mrf.mxu2 }
 0x782   : > { %9969 = vst.msk [vmem:[%s13123_s16 + $0x230] sm:$0xff] %vm15714_vm10, %v5883_v23  ;;  %v6788_v23 = vpack.c.bf16 %v6782_v20, %v6781_v16  ;;  %v13979_v20 = vld [vmem:[%s15342_s10] ss:$0 sm:$0xff] }
 0x785   : > { %v5862_v9 = vpop.f32.mrf.mxu0  ;;  %v13958_v21 = vpop.f32.mrf.mxu1 }
 0x786   : > { %v5872_v58 = vadd.f32 %v5862_v9, %v5795_v54  ;;  %10130 = vmatmul.msk.bf16.gmra.mxu2 %vm15733_vm14, %v6765_v47  ;;  %vm15734_vm14 = vmmov %vm15713_vm3  ;;  %v5999_v47 = vadd.f32 %v13779_v29, %v13766_v34 }
 0x788   : > { %v5884_v31 = vadd.f32 %v13806_v48, %v5872_v58  ;;  %10122 = vmatmul.msk.bf16.gmra.mxu1 %vm15713_vm3, %v6788_v23  ;;  %v6888_v48 = vld [vmem:[#allocation5 + $0x10] sm:$0xff] }
 0x789   : > { %v13971_v37 = vpop.f32.mrf.mxu3  ;;  %v13973_v55 = vpop.f32.mrf.mxu2  ;;  %v13983_v1 = vpack.c.bf16 %v6889_v10, %v6888_v48  ;;  %v6775_v23 = vld [vmem:[#allocation5 + $0x14f] sm:$0xff]  ;;  %v6784_v10 = vsel %vm15736_vm0, %v6776_v4, 0.0 }
 0x78a   : > { %9970 = vst.msk [vmem:[%s13123_s16 + $0x238] sm:$0xff] %vm15714_vm10, %v5884_v31  ;;  %v14004_v48 = vld [vmem:[#allocation5 + $0xf0] sm:$0xff] }
 0x78d   : > { %v6126_v54 = vpop.f32.mrf.mxu0  ;;  %v13981_v9 = vpop.f32.mrf.mxu1 }
 0x78e   : > { %v6146_v50 = vadd.f32 %v6126_v54, %v6077_v60  ;;  %10139 = vmatmul.msk.bf16.vlgmr.msra.gmra.mxu3 %vm15734_vm14, %v13983_v1  ;;  %v10604_v60 = vld [vmem:[%s15341_s9 + $0x40] sm:$0xff]  ;;  %v15737_v54 = vld [vmem:[#allocation28_spill] sm:$0xff]  ;;  %vm15738_vm14 = vmmov %vm15713_vm3 }
 0x78f   : > { %7154 = vmatpush.bf16.msrb.mxu2 %v10604_v60 }
 0x790   : > { %v6158_v31 = vadd.f32 %v13979_v20, %v6146_v50  ;;  %10101 = vmatmul.msk.bf16.vlgmr.msrb.gmra.mxu0 %vm15713_vm3, %v13472_v38  ;;  %v6078_v38 = vadd.f32 %v13847_v15, %v5999_v47  ;;  %v6766_v50 = vpack.c.bf16 %v15737_v54, %v14004_v48  ;;  %v10605_v15 = vld [vmem:[%s15341_s9 + $0x48] sm:$0xff]  ;;  %v6002_v47 = vadd.f32 %v13798_v8, %v13786_v17 }
 0x791   : > { %v13994_v16 = vpop.f32.mrf.mxu2  ;;  %v13996_v58 = vpop.f32.mrf.mxu3  ;;  %7107 = vmatpush.bf16.msrb.mxu1 %v10605_v15  ;;  %v6778_v8 = vld [vmem:[#allocation5 + $0x167] sm:$0xff] }
 0x792   : > { %10009 = vst.msk [vmem:[%s13123_s16 + $0x280] sm:$0xff] %vm15714_vm10, %v6158_v31  ;;  %v6783_v31 = vsel %vm15696_vm8, %v6775_v23, 0.0  ;;  %v6763_v15 = vld [vmem:[#allocation5 + $0x108] sm:$0xff] }
 0x793   : > { %v6789_v41 = vpack.c.bf16 %v6784_v10, %v6783_v31  ;;  %v6891_v10 = vld [vmem:[#allocation5 + $0x28] sm:$0xff] }
 0x795   : > { %v6128_v34 = vpop.f32.mrf.mxu0  ;;  %v14006_v29 = vpop.f32.mrf.mxu1 }
 0x796   : > { %v6147_v4 = vadd.f32 %v6128_v34, %v6078_v38  ;;  %10131 = vmatmul.msk.bf16.gmra.mxu2 %vm15738_vm14, %v6766_v50  ;;  %v6079_v38 = vadd.f32 %v13866_v7, %v6002_v47  ;;  %v6890_v34 = vld [vmem:[#allocation5 + $0x20] sm:$0xff]  ;;  %vm15739_vm14 = vmmov %vm15713_vm3 }
 0x797   : > { %v14029_v50 = vpack.c.bf16 %v6891_v10, %v6890_v34  ;;  %v6777_v47 = vld [vmem:[#allocation5 + $0x15f] sm:$0xff] }
 0x798   : > { %v6159_v40 = vadd.f32 %v13979_v20, %v6147_v4  ;;  %10123 = vmatmul.msk.bf16.gmra.mxu1 %vm15713_vm3, %v6789_v41  ;;  %v6762_v34 = vld [vmem:[#allocation5 + $0x100] sm:$0xff] }
 0x799   : > { %v14022_v23 = vpop.f32.mrf.mxu2  ;;  %v14024_v60 = vpop.f32.mrf.mxu3 }
 0x79a   : > { %10010 = vst.msk [vmem:[%s13123_s16 + $0x288] sm:$0xff] %vm15714_vm10, %v6159_v40  ;;  %v6004_v40 = vadd.f32 %v13820_v11, %v13810_v57 }
 0x79d   : > { %v6131_v41 = vpop.f32.mrf.mxu0  ;;  %v14027_v54 = vpop.f32.mrf.mxu1 }
 0x79e   : > { %v6148_v31 = vadd.f32 %v6131_v41, %v6079_v38  ;;  %10140 = vmatmul.msk.bf16.gmra.mxu3 %vm15739_vm14, %v14029_v50  ;;  %vm15740_vm14 = vnez %v15604_v36  ;;  %v6080_v38 = vadd.f32 %v13885_v14, %v6004_v40  ;;  %v6007_v14 = vadd.f32 %v13845_v46, %v13832_v59 }
 0x79f   : > { %v6786_v10 = vsel %vm15740_vm14, %v6778_v8, 0.0 }
 0x7a0   : > { %v6160_v17 = vadd.f32 %v13979_v20, %v6148_v31  ;;  %10102 = vmatmul.msk.bf16.gmra.mxu0 %vm15713_vm3, %v13523_v27  ;;  %v14049_v31 = vpack.c.bf16 %v6763_v15, %v6762_v34  ;;  %vm15741_vm3 = vnez %v15603_v18  ;;  %v6893_v15 = vld [vmem:[#allocation5 + $0x38] sm:$0xff] }
 0x7a1   : > { %v14040_v7 = vpop.f32.mrf.mxu2  ;;  %v14042_v4 = vpop.f32.mrf.mxu3  ;;  %v6785_v57 = vsel %vm15741_vm3, %v6777_v47, 0.0  ;;  %v10606_v47 = vld [vmem:[%s15341_s9 + $0x50] sm:$0xff] }
 0x7a2   : > { %10011 = vst.msk [vmem:[%s13123_s16 + $0x290] sm:$0xff] %vm15714_vm10, %v6160_v17  ;;  %v6790_v17 = vpack.c.bf16 %v6786_v10, %v6785_v57  ;;  %vm15742_vm10 = vcmask 130048   ;;  %v6081_v10 = vadd.f32 %v13907_v12, %v6007_v14  ;;  %7215 = vmatpush.bf16.msrb.mxu3 %v10606_v47  ;;  %v6009_v57 = vadd.f32 %v13864_v25, %v13854_v49  ;;  %v7071_v14 = vld [vmem:[#allocation5 + $0xd8] sm:$0xff]  ;;  %v14090_v47 = vld [vmem:[#allocation5 + $0x130] sm:$0xff] }
 0x7a3   : > { %vm15743_vm6 = vmmov %vm15742_vm10  ;;  %v7064_v49 = vpack.c.bf16 %v13581_v51, %v14090_v47 }
 0x7a5   : > { %v6133_v27 = vpop.f32.mrf.mxu0  ;;  %v14047_v41 = vpop.f32.mrf.mxu1 }
 0x7a6   : > { %v6149_v11 = vadd.f32 %v6133_v27, %v6080_v38  ;;  %10132 = vmatmul.msk.bf16.gmra.mxu2 %vm15742_vm10, %v14049_v31  ;;  %v6892_v38 = vld [vmem:[#allocation5 + $0x30] sm:$0xff]  ;;  %vm15747_vm10 = vcmask 64512  }
 0x7a7   : > { %v14071_v59 = vpack.c.bf16 %v6893_v15, %v6892_v38  ;;  %v6082_v15 = vadd.f32 %v13930_v5, %v6009_v57  ;;  %v14097_v38 = vpack.c.bf16 %v7071_v14, %v13915_v39  ;;  %v6012_v5 = vadd.f32 %v13883_v62, %v13873_v63  ;;  %v6894_v57 = vld [vmem:[#allocation5 + $0x40] sm:$0xff] }
 0x7a8   : > { %v6161_v6 = vadd.f32 %v13979_v20, %v6149_v11  ;;  %10124 = vmatmul.msk.bf16.gmra.mxu1 %vm15743_vm6, %v6790_v17  ;;  %v10607_v17 = vld [vmem:[%s15341_s9 + $0x58] sm:$0xff]  ;;  %v6014_v62 = vadd.f32 %v13905_v2, %v13895_v30 }
 0x7a9   : > { %v14061_v8 = vpop.f32.mrf.mxu2  ;;  %v14063_v40 = vpop.f32.mrf.mxu3  ;;  %7284 = vmatpush.bf16.msrb.mxu0 %v10607_v17  ;;  %v6083_v39 = vadd.f32 %v13949_v32, %v6012_v5  ;;  %v14130_v5 = vld [vmem:[#allocation5 + $0x140] sm:$0xff] }
 0x7aa   : > { %10012 = vst.msk [vmem:[%s13123_s16 + $0x298] sm:$0xff] %vm15744_vm1, %v6161_v6  ;;  %vm15745_vm1 = vmmov %vm15743_vm6 }
 0x7ab   : > { %vm15746_vm6 = vmmov %vm15745_vm1 }
 0x7ad   : > { %v6136_v34 = vpop.f32.mrf.mxu0  ;;  %v14069_v27 = vpop.f32.mrf.mxu1 }
 0x7ae   : > { %v6150_v6 = vadd.f32 %v6136_v34, %v6081_v10  ;;  %10141 = vmatmul.msk.bf16.gmra.mxu3 %vm15745_vm1, %v14071_v59 }
 0x7b0   : > { %v6162_v46 = vadd.f32 %v13979_v20, %v6150_v6  ;;  %10103 = vmatmul.msk.bf16.gmra.mxu0 %vm15746_vm6, %v13565_v28  ;;  %vm15748_vm6 = vmmov %vm15745_vm1 }
 0x7b1   : > { %v14082_v12 = vpop.f32.mrf.mxu2  ;;  %v14084_v11 = vpop.f32.mrf.mxu3 }
 0x7b2   : > { %10013 = vst.msk [vmem:[%s13123_s16 + $0x2a0] sm:$0xff] %vm15747_vm10, %v6162_v46  ;;  %v6895_v46 = vld [vmem:[#allocation5 + $0x48] sm:$0xff] }
 0x7b5   : > { %v6138_v28 = vpop.f32.mrf.mxu0  ;;  %v14092_v10 = vpop.f32.mrf.mxu1 }
 0x7b6   : > { %v6151_v25 = vadd.f32 %v6138_v28, %v6082_v15  ;;  %10177 = vmatmul.msk.bf16.vlgmr.msrb.gmra.mxu2 %vm15745_vm1, %v7064_v49  ;;  %v14114_v15 = vpack.c.bf16 %v6895_v46, %v6894_v57 }
 0x7b8   : > { %v6163_v34 = vadd.f32 %v13979_v20, %v6151_v25  ;;  %10169 = vmatmul.msk.bf16.vlgmr.msrb.gmra.mxu1 %vm15748_vm6, %v14097_v38  ;;  %vm15749_vm6 = vmmov %vm15745_vm1  ;;  %v7073_v25 = vld [vmem:[#allocation5 + $0xe8] sm:$0xff] }
 0x7b9   : > { %v14107_v6 = vpop.f32.mrf.mxu3  ;;  %v14109_v51 = vpop.f32.mrf.mxu2  ;;  %v14137_v30 = vpack.c.bf16 %v7073_v25, %v13956_v22  ;;  %v10677_v22 = vld [vmem:[#allocation5 + $0x77] sm:$0xff]  ;;  %v14157_v25 = vld [vmem:[%s15342_s10] ss:$0 sm:$0xff] }
 0x7ba   : > { %10014 = vst.msk [vmem:[%s13123_s16 + $0x2a8] sm:$0xff] %vm15747_vm10, %v6163_v34  ;;  %v6084_v34 = vadd.f32 %v13971_v37, %v6014_v62  ;;  %v6278_v37 = vadd.f32 %v13932_v33, %v13917_v45  ;;  %v6967_v62 = vsel %vm15645_vm2, %v10677_v22, 0.0  ;;  %v7178_v45 = vld [vmem:[#allocation5 + $0x70] sm:$0xff] }
 0x7bd   : > { %v6141_v17 = vpop.f32.mrf.mxu0  ;;  %v14112_v14 = vpop.f32.mrf.mxu1 }
 0x7be   : > { %v6152_v28 = vadd.f32 %v6141_v17, %v6083_v39  ;;  %10142 = vmatmul.msk.bf16.gmra.mxu3 %vm15745_vm1, %v14114_v15 }
 0x7c0   : > { %v6164_v63 = vadd.f32 %v13979_v20, %v6152_v28  ;;  %10104 = vmatmul.msk.bf16.gmra.mxu0 %vm15749_vm6, %v13611_v42  ;;  %v7065_v42 = vpack.c.bf16 %v13627_v13, %v14130_v5  ;;  %vm15750_vm6 = vmmov %vm15745_vm1  ;;  %v7179_v13 = vld [vmem:[#allocation5 + $0x78] sm:$0xff] }
 0x7c1   : > { %v14125_v32 = vpop.f32.mrf.mxu3  ;;  %v14127_v49 = vpop.f32.mrf.mxu2 }
 0x7c2   : > { %10015 = vst.msk [vmem:[%s13123_s16 + $0x2b0] sm:$0xff] %vm15747_vm10, %v6164_v63  ;;  %v6958_v63 = vld [vmem:[#allocation5 + $0x6f] sm:$0xff] }
 0x7c5   : > { %v6143_v46 = vpop.f32.mrf.mxu0  ;;  %v14132_v39 = vpop.f32.mrf.mxu1 }
 0x7c6   : > { %v6153_v57 = vadd.f32 %v6143_v46, %v6084_v34  ;;  %10178 = vmatmul.msk.bf16.gmra.mxu2 %vm15745_vm1, %v7065_v42  ;;  %v14161_v46 = vpack.c.bf16 %v7179_v13, %v7178_v45  ;;  %v6966_v42 = vsel %vm15512_vm5, %v6958_v63, 0.0  ;;  %v7061_v45 = vld [vmem:[#allocation5 + $0x158] sm:$0xff] }
 0x7c7   : > { %v7075_v63 = vld [vmem:[#allocation5 + $0xf8] sm:$0xff] }
 0x7c8   : > { %v6165_v2 = vadd.f32 %v13979_v20, %v6153_v57  ;;  %10170 = vmatmul.msk.bf16.gmra.mxu1 %vm15750_vm6, %v14137_v30  ;;  %v6358_v20 = vadd.f32 %v13996_v58, %v6278_v37  ;;  %vm15751_vm6 = vmmov %vm15745_vm1  ;;  %v6280_v37 = vadd.f32 %v13951_v0, %v13939_v44 }
 0x7c9   : > { %v14147_v17 = vpop.f32.mrf.mxu3  ;;  %v14149_v28 = vpop.f32.mrf.mxu2 }
 0x7ca   : > { %10016 = vst.msk [vmem:[%s13123_s16 + $0x2b8] sm:$0xff] %vm15747_vm10, %v6165_v2  ;;  %v6974_v2 = vpack.c.bf16 %v6967_v62, %v6966_v42  ;;  %v10608_v62 = vld [vmem:[%s15341_s9 + $0x60] sm:$0xff] }
 0x7cb   : > { %7437 = vmatpush.bf16.msra.mxu2 %v10608_v62  ;;  %v10678_v62 = vld [vmem:[#allocation5 + $0x87] sm:$0xff] }
 0x7cd   : > { %v6407_v33 = vpop.f32.mrf.mxu0  ;;  %v14159_v34 = vpop.f32.mrf.mxu1 }
 0x7ce   : > { %v6427_v57 = vadd.f32 %v6407_v33, %v6358_v20  ;;  %10187 = vmatmul.msk.bf16.vlgmr.msrb.gmra.mxu3 %vm15745_vm1, %v14161_v46  ;;  %v6359_v20 = vadd.f32 %v14024_v60, %v6280_v37  ;;  %v7060_v33 = vld [vmem:[#allocation5 + $0x150] sm:$0xff]  ;;  %v10609_v60 = vld [vmem:[%s15341_s9 + $0x68] sm:$0xff]  ;;  %v6283_v37 = vadd.f32 %v13973_v55, %v13958_v21  ;;  %v10679_v55 = vld [vmem:[#allocation5 + $0x7f] sm:$0xff] }
 0x7cf   : > { %v14183_v44 = vpack.c.bf16 %v7061_v45, %v7060_v33  ;;  %7390 = vmatpush.bf16.msra.mxu1 %v10609_v60 }
 0x7d0   : > { %v6439_v58 = vadd.f32 %v14157_v25, %v6427_v57  ;;  %10149 = vmatmul.msk.bf16.vlgmr.msra.gmra.mxu0 %vm15751_vm6, %v6974_v2  ;;  %v14186_v2 = vpack.c.bf16 %v7075_v63, %v14004_v48  ;;  %vm15752_vm6 = vmmov %vm15745_vm1  ;;  %v7181_v63 = vld [vmem:[#allocation5 + $0x88] sm:$0xff]  ;;  %v6360_v33 = vadd.f32 %v14042_v4, %v6283_v37  ;;  %v6285_v4 = vadd.f32 %v13994_v16, %v13981_v9 }
 0x7d1   : > { %v14173_v22 = vpop.f32.mrf.mxu2  ;;  %v14175_v13 = vpop.f32.mrf.mxu3  ;;  %v6288_v16 = vadd.f32 %v14022_v23, %v14006_v29 }
 0x7d2   : > { %10057 = vst.msk [vmem:[%s13123_s16 + $0x240] sm:$0xff] %vm15747_vm10, %v6439_v58 }
 0x7d5   : > { %v6409_v42 = vpop.f32.mrf.mxu0  ;;  %v14181_v57 = vpop.f32.mrf.mxu1 }
 0x7d6   : > { %v6428_v0 = vadd.f32 %v6409_v42, %v6359_v20  ;;  %10179 = vmatmul.msk.bf16.gmra.mxu2 %vm15745_vm1, %v14183_v44  ;;  %v6969_v20 = vsel %vm15649_vm13, %v10678_v62, 0.0  ;;  %v7180_v42 = vld [vmem:[#allocation5 + $0x80] sm:$0xff]  ;;  %v7063_v62 = vld [vmem:[#allocation5 + $0x168] sm:$0xff] }
 0x7d7   : > { %v14209_v21 = vpack.c.bf16 %v7181_v63, %v7180_v42 }
 0x7d8   : > { %v6440_v58 = vadd.f32 %v14157_v25, %v6428_v0  ;;  %10171 = vmatmul.msk.bf16.gmra.mxu1 %vm15752_vm6, %v14186_v2  ;;  %vm15753_vm6 = vmmov %vm15745_vm1 }
 0x7d9   : > { %v14200_v45 = vpop.f32.mrf.mxu2  ;;  %v14202_v48 = vpop.f32.mrf.mxu3 }
 0x7da   : > { %10058 = vst.msk [vmem:[%s13123_s16 + $0x248] sm:$0xff] %vm15747_vm10, %v6440_v58  ;;  %v6968_v58 = vsel %vm15589_vm11, %v10679_v55, 0.0 }
 0x7db   : > { %v6975_v52 = vpack.c.bf16 %v6969_v20, %v6968_v58  ;;  %v6361_v20 = vadd.f32 %v14063_v40, %v6285_v4  ;;  %v7183_v58 = vld [vmem:[#allocation5 + $0x98] sm:$0xff] }
 0x7dc   : > { %v10680_v4 = vld [vmem:[#allocation5 + $0x97] sm:$0xff] }
 0x7dd   : > { %v6412_v0 = vpop.f32.mrf.mxu0  ;;  %v14207_v24 = vpop.f32.mrf.mxu1 }
 0x7de   : > { %v6429_v19 = vadd.f32 %v6412_v0, %v6360_v33  ;;  %10188 = vmatmul.msk.bf16.gmra.mxu3 %vm15745_vm1, %v14209_v21  ;;  %v7062_v33 = vld [vmem:[#allocation5 + $0x160] sm:$0xff] }
 0x7e0   : > { %v6441_v60 = vadd.f32 %v14157_v25, %v6429_v19  ;;  %10150 = vmatmul.msk.bf16.gmra.mxu0 %vm15753_vm6, %v6975_v52  ;;  %v14228_v19 = vpack.c.bf16 %v7063_v62, %v7062_v33  ;;  %vm15754_vm6 = vmmov %vm15745_vm1  ;;  %v6971_v62 = vsel %vm15736_vm0, %v10680_v4, 0.0  ;;  %v7182_v33 = vld [vmem:[#allocation5 + $0x90] sm:$0xff] }
 0x7e1   : > { %v14221_v37 = vpop.f32.mrf.mxu2  ;;  %v14223_v63 = vpop.f32.mrf.mxu3 }
 0x7e2   : > { %10059 = vst.msk [vmem:[%s13123_s16 + $0x250] sm:$0xff] %vm15747_vm10, %v6441_v60  ;;  %v10610_v60 = vld [vmem:[%s15341_s9 + $0x70] sm:$0xff] }
 0x7e3   : > { %7499 = vmatpush.bf16.msra.mxu3 %v10610_v60  ;;  %v7339_v60 = vld [vmem:[#allocation5 + $0x138] sm:$0xff] }
 0x7e5   : > { %v6414_v42 = vpop.f32.mrf.mxu0  ;;  %v14226_v0 = vpop.f32.mrf.mxu1 }
 0x7e6   : > { %v6430_v52 = vadd.f32 %v6414_v42, %v6361_v20  ;;  %10180 = vmatmul.msk.bf16.gmra.mxu2 %vm15745_vm1, %v14228_v19  ;;  %v6362_v20 = vadd.f32 %v14084_v11, %v6288_v16  ;;  %v14251_v42 = vpack.c.bf16 %v7183_v58, %v7182_v33  ;;  %v6290_v11 = vadd.f32 %v14040_v7, %v14027_v54 }
 0x7e7   : > { %v14274_v54 = vpack.c.bf16 %v7339_v60, %v14090_v47 }
 0x7e8   : > { %v6442_v9 = vadd.f32 %v14157_v25, %v6430_v52  ;;  %10172 = vmatmul.msk.bf16.gmra.mxu1 %vm15754_vm6, %v14049_v31  ;;  %v10681_v52 = vld [vmem:[#allocation5 + $0x8f] sm:$0xff]  ;;  %vm15755_vm6 = vmmov %vm15745_vm1 }
 0x7e9   : > { %v14239_v40 = vpop.f32.mrf.mxu2  ;;  %v14241_v55 = vpop.f32.mrf.mxu3 }
 0x7ea   : > { %10060 = vst.msk [vmem:[%s13123_s16 + $0x258] sm:$0xff] %vm15747_vm10, %v6442_v9  ;;  %v6970_v9 = vsel %vm15696_vm8, %v10681_v52, 0.0 }
 0x7eb   : > { %v6976_v3 = vpack.c.bf16 %v6971_v62, %v6970_v9  ;;  %v10611_v62 = vld [vmem:[%s15341_s9 + $0x78] sm:$0xff]  ;;  %v7185_v9 = vld [vmem:[#allocation5 + $0xa8] sm:$0xff] }
 0x7ec   : > { %7569 = vmatpush.bf16.msra.mxu0 %v10611_v62 }
 0x7ed   : > { %v6417_v29 = vpop.f32.mrf.mxu0  ;;  %v14249_v23 = vpop.f32.mrf.mxu1 }
 0x7ee   : > { %v6431_v35 = vadd.f32 %v6417_v29, %v6362_v20  ;;  %10189 = vmatmul.msk.bf16.gmra.mxu3 %vm15745_vm1, %v14251_v42  ;;  %v6363_v20 = vadd.f32 %v14107_v6, %v6290_v11  ;;  %v14281_v29 = vld [vmem:[#allocation5 + $0xa7] sm:$0xff]  ;;  %v6293_v6 = vadd.f32 %v14061_v8, %v14047_v41  ;;  %v10682_v41 = vld [vmem:[#allocation5 + $0x9f] sm:$0xff] }
 0x7ef   : > { %v6972_v8 = vsel %vm15741_vm3, %v10682_v41, 0.0 }
 0x7f0   : > { %v6443_v4 = vadd.f32 %v14157_v25, %v6431_v35  ;;  %10151 = vmatmul.msk.bf16.gmra.mxu0 %vm15755_vm6, %v6976_v3  ;;  %vm15756_vm6 = vmmov %vm15745_vm1  ;;  %v6364_v11 = vadd.f32 %v14125_v32, %v6293_v6  ;;  %v6295_v32 = vadd.f32 %v14082_v12, %v14069_v27  ;;  %v6567_v12 = vadd.f32 %v14109_v51, %v14092_v10 }
 0x7f1   : > { %v14263_v16 = vpop.f32.mrf.mxu2  ;;  %v14265_v58 = vpop.f32.mrf.mxu3  ;;  %v6569_v51 = vadd.f32 %v14127_v49, %v14112_v14  ;;  %v10613_v49 = vld [vmem:[%s15341_s9 + $0x68] sm:$0xff] }
 0x7f2   : > { %10061 = vst.msk [vmem:[%s13123_s16 + $0x260] sm:$0xff] %vm15747_vm10, %v6443_v4  ;;  %v6973_v4 = vsel %vm15740_vm14, %v14281_v29, 0.0  ;;  %7681 = vmatpush.bf16.msrb.mxu1 %v10613_v49  ;;  %v10614_v49 = vld [vmem:[%s15341_s9 + $0x70] sm:$0xff] }
 0x7f3   : > { %7797 = vmatpush.bf16.msrb.mxu3 %v10614_v49 }
 0x7f5   : > { %v6419_v35 = vpop.f32.mrf.mxu0  ;;  %v14271_v3 = vpop.f32.mrf.mxu1 }
 0x7f6   : > { %v6432_v7 = vadd.f32 %v6419_v35, %v6363_v20  ;;  %10225 = vmatmul.msk.bf16.vlgmr.msra.gmra.mxu2 %vm15745_vm1, %v14274_v54 }
 0x7f8   : > { %v6444_v33 = vadd.f32 %v14157_v25, %v6432_v7  ;;  %10217 = vmatmul.msk.bf16.vlgmr.msra.gmra.mxu1 %vm15756_vm6, %v14097_v38  ;;  %v7184_v38 = vld [vmem:[#allocation5 + $0xa0] sm:$0xff]  ;;  %v6977_v7 = vpack.c.bf16 %v6973_v4, %v6972_v8  ;;  %vm15757_vm6 = vmmov %vm15745_vm1  ;;  %v6365_v4 = vadd.f32 %v14147_v17, %v6295_v32 }
 0x7f9   : > { %v14287_v52 = vpop.f32.mrf.mxu3  ;;  %v14289_v47 = vpop.f32.mrf.mxu2  ;;  %v14297_v20 = vpack.c.bf16 %v7185_v9, %v7184_v38  ;;  %v7341_v38 = vld [vmem:[#allocation5 + $0x148] sm:$0xff] }
 0x7fa   : > { %10062 = vst.msk [vmem:[%s13123_s16 + $0x268] sm:$0xff] %vm15747_vm10, %v6444_v33  ;;  %v14317_v41 = vpack.c.bf16 %v7341_v38, %v14130_v5  ;;  %v6655_v5 = vadd.f32 %v14175_v13, %v6567_v12  ;;  %v10612_v38 = vld [vmem:[%s15341_s9 + $0x60] sm:$0xff] }
 0x7fb   : > { %7728 = vmatpush.bf16.msrb.mxu2 %v10612_v38 }
 0x7fd   : > { %v6422_v60 = vpop.f32.mrf.mxu0  ;;  %v14295_v62 = vpop.f32.mrf.mxu1 }
 0x7fe   : > { %v6433_v35 = vadd.f32 %v6422_v60, %v6364_v11  ;;  %10190 = vmatmul.msk.bf16.gmra.mxu3 %vm15745_vm1, %v14297_v20 }
 0x800   : > { %v6445_v33 = vadd.f32 %v14157_v25, %v6433_v35  ;;  %10152 = vmatmul.msk.bf16.gmra.mxu0 %vm15757_vm6, %v6977_v7  ;;  %vm15758_vm6 = vmmov %vm15745_vm1  ;;  %v14336_v7 = vld [vmem:[%s15342_s10] ss:$0 sm:$0xff] }
 0x801   : > { %v14309_v6 = vpop.f32.mrf.mxu3  ;;  %v14311_v9 = vpop.f32.mrf.mxu2 }
 0x802   : > { %10063 = vst.msk [vmem:[%s13123_s16 + $0x270] sm:$0xff] %vm15747_vm10, %v6445_v33 }
 0x805   : > { %v6424_v11 = vpop.f32.mrf.mxu0  ;;  %v14314_v60 = vpop.f32.mrf.mxu1 }
 0x806   : > { %v6434_v8 = vadd.f32 %v6424_v11, %v6365_v4  ;;  %10226 = vmatmul.msk.bf16.gmra.mxu2 %vm15745_vm1, %v14317_v41  ;;  %v6656_v4 = vadd.f32 %v14202_v48, %v6569_v51  ;;  %v6572_v48 = vadd.f32 %v14149_v28, %v14132_v39  ;;  %v6574_v39 = vadd.f32 %v14173_v22, %v14159_v34 }
 0x807   : > { %v6577_v34 = vadd.f32 %v14200_v45, %v14181_v57  ;;  %v7623_v57 = vld [vmem:[#allocation5 + $0xd9] sm:$0xff] }
 0x808   : > { %v6446_v27 = vadd.f32 %v14157_v25, %v6434_v8  ;;  %10218 = vmatmul.msk.bf16.gmra.mxu1 %vm15758_vm6, %v14137_v30  ;;  %vm15759_vm6 = vmmov %vm15745_vm1  ;;  %v6658_v38 = vadd.f32 %v14241_v55, %v6574_v39 }
 0x809   : > { %v14328_v17 = vpop.f32.mrf.mxu3  ;;  %v14330_v35 = vpop.f32.mrf.mxu2 }
 0x80a   : > { %10064 = vst.msk [vmem:[%s13123_s16 + $0x278] sm:$0xff] %vm15747_vm10, %v6446_v27 }
 0x80d   : > { %v6704_v25 = vpop.f32.mrf.mxu0  ;;  %v14338_v33 = vpop.f32.mrf.mxu1 }
 0x80e   : > { %v6724_v30 = vadd.f32 %v6704_v25, %v6655_v5  ;;  %10235 = vmatmul.msk.bf16.vlgmr.msra.gmra.mxu3 %vm15745_vm1, %v14161_v46  ;;  %v6657_v25 = vadd.f32 %v14223_v63, %v6572_v48  ;;  %v6659_v48 = vadd.f32 %v14265_v58, %v6577_v34 }
 0x810   : > { %v6736_v10 = vadd.f32 %v14336_v7, %v6724_v30  ;;  %10197 = vmatmul.msk.bf16.vlgmr.msrb.gmra.mxu0 %vm15759_vm6, %v13983_v1  ;;  %vm15760_vm6 = vmmov %vm15745_vm1 }
 0x811   : > { %v14349_v13 = vpop.f32.mrf.mxu2  ;;  %v14351_v32 = vpop.f32.mrf.mxu3 }
 0x812   : > { %10105 = vst.msk [vmem:[%s13123_s16 + $0x2c0] sm:$0xff] %vm15747_vm10, %v6736_v10 }
 0x815   : > { %v6706_v11 = vpop.f32.mrf.mxu0  ;;  %v14357_v8 = vpop.f32.mrf.mxu1 }
 0x816   : > { %v6725_v27 = vadd.f32 %v6706_v11, %v6656_v4  ;;  %10227 = vmatmul.msk.bf16.gmra.mxu2 %vm15745_vm1, %v14183_v44 }
 0x818   : > { %v6737_v14 = vadd.f32 %v14336_v7, %v6725_v27  ;;  %10219 = vmatmul.msk.bf16.gmra.mxu1 %vm15760_vm6, %v14186_v2  ;;  %vm15761_vm6 = vmmov %vm15745_vm1 }
 0x819   : > { %v14371_v12 = vpop.f32.mrf.mxu2  ;;  %v14373_v5 = vpop.f32.mrf.mxu3 }
 0x81a   : > { %10106 = vst.msk [vmem:[%s13123_s16 + $0x2c8] sm:$0xff] %vm15747_vm10, %v6737_v14 }
 0x81d   : > { %v6709_v30 = vpop.f32.mrf.mxu0  ;;  %v14376_v10 = vpop.f32.mrf.mxu1 }
 0x81e   : > { %v6726_v2 = vadd.f32 %v6709_v30, %v6657_v25  ;;  %10236 = vmatmul.msk.bf16.gmra.mxu3 %vm15745_vm1, %v14209_v21 }
 0x820   : > { %v6738_v51 = vadd.f32 %v14336_v7, %v6726_v2  ;;  %10198 = vmatmul.msk.bf16.gmra.mxu0 %vm15761_vm6, %v14029_v50  ;;  %vm15762_vm6 = vmmov %vm15745_vm1  ;;  %v7622_v2 = vld [vmem:[#allocation5 + $0xd1] sm:$0xff] }
 0x821   : > { %v14387_v28 = vpop.f32.mrf.mxu2  ;;  %v14389_v63 = vpop.f32.mrf.mxu3 }
 0x822   : > { %10107 = vst.msk [vmem:[%s13123_s16 + $0x2d0] sm:$0xff] %vm15747_vm10, %v6738_v51  ;;  %v6579_v51 = vadd.f32 %v14221_v37, %v14207_v24 }
 0x825   : > { %v6711_v4 = vpop.f32.mrf.mxu0  ;;  %v14392_v11 = vpop.f32.mrf.mxu1 }
 0x826   : > { %v6727_v27 = vadd.f32 %v6711_v4, %v6658_v38  ;;  %10228 = vmatmul.msk.bf16.gmra.mxu2 %vm15745_vm1, %v14228_v19  ;;  %v7631_v38 = vsel %vm15710_vm7, %v7623_v57, 0.0  ;;  %v10615_v4 = vld [vmem:[%s15341_s9 + $0x78] sm:$0xff] }
 0x827   : > { %7866 = vmatpush.bf16.msrb.mxu0 %v10615_v4 }
 0x828   : > { %v6739_v14 = vadd.f32 %v14336_v7, %v6727_v27  ;;  %10220 = vmatmul.msk.bf16.gmra.mxu1 %vm15762_vm6, %v14049_v31  ;;  %vm15763_vm6 = vmmov %vm15745_vm1  ;;  %v6660_v27 = vadd.f32 %v14287_v52, %v6579_v51  ;;  %v6582_v52 = vadd.f32 %v14239_v40, %v14226_v0  ;;  %v7624_v0 = vld [vmem:[#allocation5 + $0xe1] sm:$0xff]  ;;  %v6584_v40 = vadd.f32 %v14263_v16, %v14249_v23  ;;  %v7753_v16 = vld [vmem:[#allocation5 + $0x19] sm:$0xff] }
 0x829   : > { %v14403_v22 = vpop.f32.mrf.mxu2  ;;  %v14405_v55 = vpop.f32.mrf.mxu3 }
 0x82a   : > { %10108 = vst.msk [vmem:[%s13123_s16 + $0x2d8] sm:$0xff] %vm15747_vm10, %v6739_v14  ;;  %v7630_v14 = vsel %vm15712_vm15, %v7622_v2, 0.0  ;;  %v6661_v57 = vadd.f32 %v14309_v6, %v6582_v52 }
 0x82b   : > { %v7638_v34 = vpack.c.bf16 %v7631_v38, %v7630_v14  ;;  %v7625_v38 = vld [vmem:[#allocation5 + $0xe9] sm:$0xff]  ;;  %v6662_v14 = vadd.f32 %v14328_v17, %v6584_v40  ;;  %v6866_v17 = vadd.f32 %v14289_v47, %v14271_v3 }
 0x82d   : > { %v6714_v25 = vpop.f32.mrf.mxu0  ;;  %v14411_v30 = vpop.f32.mrf.mxu1 }
 0x82e   : > { %v6728_v31 = vadd.f32 %v6714_v25, %v6659_v48  ;;  %10237 = vmatmul.msk.bf16.gmra.mxu3 %vm15745_vm1, %v14251_v42 }
 0x830   : > { %v6740_v45 = vadd.f32 %v14336_v7, %v6728_v31  ;;  %10199 = vmatmul.msk.bf16.gmra.mxu0 %vm15763_vm6, %v14071_v59  ;;  %vm15764_vm6 = vmmov %vm15745_vm1 }
 0x831   : > { %v14422_v58 = vpop.f32.mrf.mxu2  ;;  %v14424_v39 = vpop.f32.mrf.mxu3 }
 0x832   : > { %10109 = vst.msk [vmem:[%s13123_s16 + $0x2e0] sm:$0xff] %vm15747_vm10, %v6740_v45 }
 0x835   : > { %v6716_v24 = vpop.f32.mrf.mxu0  ;;  %v14434_v37 = vpop.f32.mrf.mxu1 }
 0x836   : > { %v6729_v49 = vadd.f32 %v6716_v24, %v6660_v27  ;;  %10273 = vmatmul.msk.bf16.vlgmr.msrb.gmra.mxu2 %vm15745_vm1, %v7638_v34  ;;  %v7633_v27 = vsel %vm11094_vm9, %v7625_v38, 0.0  ;;  %v15766_v24 = vld [vmem:[#allocation15_spill] sm:$0xff]  ;;  %v7632_v34 = vsel %vm15656_vm12, %v7624_v0, 0.0  ;;  %v6947_v0 = vadd.f32 %v14351_v32, %v6866_v17  ;;  %v15770_v17 = vld [vmem:[#allocation18_spill] sm:$0xff] }
 0x837   : > { %v7639_v52 = vpack.c.bf16 %v7633_v27, %v7632_v34  ;;  %v7626_v32 = vld [vmem:[#allocation5 + $0xf1] sm:$0xff] }
 0x838   : > { %v6741_v48 = vadd.f32 %v14336_v7, %v6729_v49  ;;  %10265 = vmatmul.msk.bf16.vlgmr.msrb.gmra.mxu1 %vm15764_vm6, %v14274_v54  ;;  %vm15765_vm6 = vmmov %vm15745_vm1 }
 0x839   : > { %v14444_v25 = vpop.f32.mrf.mxu3  ;;  %v14446_v31 = vpop.f32.mrf.mxu2 }
 0x83a   : > { %10110 = vst.msk [vmem:[%s13123_s16 + $0x2e8] sm:$0xff] %vm15747_vm10, %v6741_v48 }
 0x83d   : > { %v6719_v45 = vpop.f32.mrf.mxu0  ;;  %v14449_v2 = vpop.f32.mrf.mxu1 }
 0x83e   : > { %v6730_v51 = vadd.f32 %v6719_v45, %v6661_v57  ;;  %10238 = vmatmul.msk.bf16.gmra.mxu3 %vm15745_vm1, %v14297_v20  ;;  %v7752_v45 = vld [vmem:[#allocation5 + $0x11] sm:$0xff] }
 0x83f   : > { %v7760_v3 = vsel %vm15712_vm15, %v7752_v45, 0.0  ;;  %v10616_v45 = vld [vmem:[%s15341_s9 + $0x40] sm:$0xff]  ;;  %vm15773_vm15 = vcmask 64512  }
 0x840   : > { %v6742_v54 = vadd.f32 %v14336_v7, %v6730_v51  ;;  %10200 = vmatmul.msk.bf16.gmra.mxu0 %vm15765_vm6, %v14114_v15  ;;  %vm15767_vm6 = vmmov %vm15745_vm1  ;;  %8025 = vmatpush.bf16.msra.mxu2 %v10616_v45 }
 0x841   : > { %v14460_v6 = vpop.f32.mrf.mxu3  ;;  %v14462_v4 = vpop.f32.mrf.mxu2 }
 0x842   : > { %10111 = vst.msk [vmem:[%s13123_s16 + $0x2f0] sm:$0xff] %vm15747_vm10, %v6742_v54  ;;  %v7761_v54 = vsel %vm15710_vm7, %v7753_v16, 0.0 }
 0x843   : > { %v7768_v40 = vpack.c.bf16 %v7761_v54, %v7760_v3 }
 0x845   : > { %v6721_v49 = vpop.f32.mrf.mxu0  ;;  %v14469_v48 = vpop.f32.mrf.mxu1 }
 0x846   : > { %v6731_v23 = vadd.f32 %v6721_v49, %v6662_v14  ;;  %10274 = vmatmul.msk.bf16.gmra.mxu2 %vm15745_vm1, %v7639_v52  ;;  %v7627_v14 = vld [vmem:[#allocation5 + $0xf9] sm:$0xff]  ;;  %v6868_v49 = vadd.f32 %v14311_v9, %v14295_v62 }
 0x848   : > { %v6743_v57 = vadd.f32 %v14336_v7, %v6731_v23  ;;  %10266 = vmatmul.msk.bf16.gmra.mxu1 %vm15767_vm6, %v14317_v41  ;;  %v14489_v41 = vld [vmem:[%s15342_s10] ss:$0 sm:$0xff]  ;;  %vm15768_vm6 = vmmov %vm15745_vm1 }
 0x849   : > { %v14479_v51 = vpop.f32.mrf.mxu3  ;;  %v14481_v38 = vpop.f32.mrf.mxu2 }
 0x84a   : > { %10112 = vst.msk [vmem:[%s13123_s16 + $0x2f8] sm:$0xff] %vm15747_vm10, %v6743_v57  ;;  %v7635_v57 = vsel %vm15658_vm4, %v7627_v14, 0.0  ;;  %v6871_v14 = vadd.f32 %v14330_v35, %v14314_v60 }
 0x84d   : > { %v7005_v47 = vpop.f32.mrf.mxu0  ;;  %v14493_v7 = vpop.f32.mrf.mxu1 }
 0x84e   : > { %v7025_v27 = vadd.f32 %v7005_v47, %v6947_v0  ;;  %10283 = vmatmul.msk.bf16.vlgmr.msrb.gmra.mxu3 %vm15745_vm1, %v7768_v40  ;;  %vm15771_vm1 = vnez %v15770_v17  ;;  %v7755_v47 = vld [vmem:[#allocation5 + $0x29] sm:$0xff] }
 0x84f   : > { %v7634_v54 = vsel %vm15771_vm1, %v7626_v32, 0.0 }
 0x850   : > { %v7037_v34 = vadd.f32 %v14489_v41, %v7025_v27  ;;  %10245 = vmatmul.msk.bf16.vlgmr.msra.gmra.mxu0 %vm15768_vm6, %v13983_v1  ;;  %v6948_v1 = vadd.f32 %v14373_v5, %v6868_v49  ;;  %v7640_v0 = vpack.c.bf16 %v7635_v57, %v7634_v54  ;;  %v10617_v5 = vld [vmem:[%s15341_s9 + $0x48] sm:$0xff]  ;;  %v7763_v49 = vsel %vm11094_vm9, %v7755_v47, 0.0 }
 0x851   : > { %v14503_v52 = vpop.f32.mrf.mxu2  ;;  %v14505_v23 = vpop.f32.mrf.mxu3  ;;  %v7754_v27 = vld [vmem:[#allocation5 + $0x21] sm:$0xff]  ;;  %7978 = vmatpush.bf16.msra.mxu1 %v10617_v5  ;;  %vm15781_vm9 = vcmask 64512  }
 0x852   : > { %10153 = vst.msk [vmem:[%s13123_s16 + $0x100] sm:$0xff] %vm15747_vm10, %v7037_v34  ;;  %vm15772_vm10 = vmmov %vm15768_vm6  ;;  %v7762_v57 = vsel %vm15656_vm12, %v7754_v27, 0.0  ;;  %v7628_v54 = vld [vmem:[#allocation5 + $0x101] sm:$0xff]  ;;  %v15778_v27 = vld [vmem:[#allocation23_spill] sm:$0xff] }
 0x853   : > { %v7769_v60 = vpack.c.bf16 %v7763_v49, %v7762_v57 }
 0x855   : > { %v7007_v62 = vpop.f32.mrf.mxu0  ;;  %v14515_v9 = vpop.f32.mrf.mxu1 }
 0x856   : > { %v7026_v3 = vadd.f32 %v7007_v62, %v6948_v1  ;;  %10275 = vmatmul.msk.bf16.gmra.mxu2 %vm15768_vm6, %v7640_v0  ;;  %v7629_v62 = vld [vmem:[#allocation5 + $0x109] sm:$0xff] }
 0x858   : > { %v7038_v40 = vadd.f32 %v14489_v41, %v7026_v3  ;;  %10267 = vmatmul.msk.bf16.gmra.mxu1 %vm15772_vm10, %v14183_v44  ;;  %v6949_v44 = vadd.f32 %v14389_v63, %v6871_v14  ;;  %v6873_v63 = vadd.f32 %v14349_v13, %v14338_v33  ;;  %vm15775_vm10 = vcmask 64512   ;;  %v7757_v13 = vld [vmem:[#allocation5 + $0x39] sm:$0xff] }
 0x859   : > { %v14528_v34 = vpop.f32.mrf.mxu2  ;;  %v14530_v32 = vpop.f32.mrf.mxu3 }
 0x85a   : > { %10154 = vst.msk [vmem:[%s13123_s16 + $0x108] sm:$0xff] %vm15773_vm15, %v7038_v40  ;;  %vm15774_vm15 = vmmov %vm15768_vm6  ;;  %v15776_v40 = vld [vmem:[#allocation22_spill] sm:$0xff]  ;;  %v6950_v49 = vadd.f32 %v14405_v55, %v6873_v63 }
 0x85b   : > { %vm15777_vm12 = vnez %v15776_v40 }
 0x85c   : > { %v7636_v5 = vsel %vm15777_vm12, %v7628_v54, 0.0 }
 0x85d   : > { %v7010_v45 = vpop.f32.mrf.mxu0  ;;  %v14537_v1 = vpop.f32.mrf.mxu1 }
 0x85e   : > { %v7027_v35 = vadd.f32 %v7010_v45, %v6949_v44  ;;  %10284 = vmatmul.msk.bf16.gmra.mxu3 %vm15774_vm15, %v7769_v60  ;;  %vm15779_vm15 = vnez %v15778_v27  ;;  %v7756_v60 = vld [vmem:[#allocation5 + $0x31] sm:$0xff] }
 0x85f   : > { %v7637_v14 = vsel %vm15779_vm15, %v7629_v62, 0.0  ;;  %v7765_v62 = vsel %vm15658_vm4, %v7757_v13, 0.0  ;;  %v7764_v63 = vsel %vm15771_vm1, %v7756_v60, 0.0  ;;  %v10619_v13 = vld [vmem:[%s15341_s9 + $0x58] sm:$0xff] }
 0x860   : > { %v7039_v0 = vadd.f32 %v14489_v41, %v7027_v35  ;;  %10246 = vmatmul.msk.bf16.gmra.mxu0 %vm15768_vm6, %v14029_v50  ;;  %v7641_v57 = vpack.c.bf16 %v7637_v14, %v7636_v5  ;;  %v6876_v35 = vadd.f32 %v14371_v12, %v14357_v8  ;;  %v7770_v5 = vpack.c.bf16 %v7765_v62, %v7764_v63  ;;  %v7919_v60 = vld [vmem:[#allocation5 + $0x18] sm:$0xff]  ;;  %v7758_v62 = vld [vmem:[#allocation5 + $0x41] sm:$0xff] }
 0x861   : > { %v14547_v3 = vpop.f32.mrf.mxu2  ;;  %v14549_v47 = vpop.f32.mrf.mxu3  ;;  %8163 = vmatpush.bf16.msra.mxu0 %v10619_v13  ;;  %v15785_v63 = vld [vmem:[#allocation24_spill] sm:$0xff] }
 0x862   : > { %10155 = vst.msk [vmem:[%s13123_s16 + $0x110] sm:$0xff] %vm15775_vm10, %v7039_v0  ;;  %vm15780_vm10 = vmmov %vm15768_vm6  ;;  %v10618_v0 = vld [vmem:[%s15341_s9 + $0x50] sm:$0xff] }
 0x863   : > { %8086 = vmatpush.bf16.msra.mxu3 %v10618_v0  ;;  %v7759_v0 = vld [vmem:[#allocation5 + $0x49] sm:$0xff] }
 0x865   : > { %v7012_v44 = vpop.f32.mrf.mxu0  ;;  %v14556_v50 = vpop.f32.mrf.mxu1 }
 0x866   : > { %v7028_v33 = vadd.f32 %v7012_v44, %v6950_v49  ;;  %10276 = vmatmul.msk.bf16.gmra.mxu2 %vm15768_vm6, %v7641_v57  ;;  %v6878_v44 = vadd.f32 %v14387_v28, %v14376_v10 }
 0x868   : > { %v7040_v45 = vadd.f32 %v14489_v41, %v7028_v33  ;;  %10268 = vmatmul.msk.bf16.gmra.mxu1 %vm15780_vm10, %v14228_v19  ;;  %v6951_v19 = vadd.f32 %v14424_v39, %v6876_v35  ;;  %vm15783_vm10 = vcmask 64512   ;;  %v7920_v33 = vld [vmem:[#allocation5 + $0x20] sm:$0xff] }
 0x869   : > { %v14566_v55 = vpop.f32.mrf.mxu2  ;;  %v14568_v54 = vpop.f32.mrf.mxu3  ;;  %v14598_v10 = vpack.c.bf16 %v7920_v33, %v7919_v60 }
 0x86a   : > { %10156 = vst.msk [vmem:[%s13123_s16 + $0x118] sm:$0xff] %vm15781_vm9, %v7040_v45  ;;  %vm15782_vm9 = vmmov %vm15768_vm6  ;;  %v6952_v45 = vadd.f32 %v14444_v25, %v6878_v44  ;;  %v6881_v25 = vadd.f32 %v14403_v22, %v14392_v11  ;;  %v6883_v22 = vadd.f32 %v14422_v58, %v14411_v30  ;;  %v15788_v58 = vld [vmem:[#allocation25_spill] sm:$0xff] }
 0x86c   : > { %v6953_v44 = vadd.f32 %v14460_v6, %v6881_v25 }
 0x86d   : > { %v7015_v8 = vpop.f32.mrf.mxu0  ;;  %v14578_v12 = vpop.f32.mrf.mxu1 }
 0x86e   : > { %v7029_v14 = vadd.f32 %v7015_v8, %v6951_v19  ;;  %10285 = vmatmul.msk.bf16.gmra.mxu3 %vm15782_vm9, %v7770_v5  ;;  %vm15784_vm9 = vmmov %vm15768_vm6 }
 0x870   : > { %v7041_v49 = vadd.f32 %v14489_v41, %v7029_v14  ;;  %10247 = vmatmul.msk.bf16.gmra.mxu0 %vm15768_vm6, %v14071_v59  ;;  %v7766_v14 = vsel %vm15777_vm12, %v7758_v62, 0.0  ;;  %v6954_v62 = vadd.f32 %v14479_v51, %v6883_v22 }
 0x871   : > { %v14588_v39 = vpop.f32.mrf.mxu2  ;;  %v14590_v57 = vpop.f32.mrf.mxu3 }
 0x872   : > { %10157 = vst.msk [vmem:[%s13123_s16 + $0x120] sm:$0xff] %vm15783_vm10, %v7041_v49  ;;  %v7767_v49 = vsel %vm15779_vm15, %v7759_v0, 0.0  ;;  %v7921_v0 = vld [vmem:[#allocation5 + $0x28] sm:$0xff] }
 0x875   : > { %v7017_v59 = vpop.f32.mrf.mxu0  ;;  %v14596_v35 = vpop.f32.mrf.mxu1 }
 0x876   : > { %v7030_v28 = vadd.f32 %v7017_v59, %v6952_v45  ;;  %10321 = vmatmul.msk.bf16.vlgmr.msra.gmra.mxu2 %vm15784_vm9, %v14598_v10  ;;  %v7771_v45 = vpack.c.bf16 %v7767_v49, %v7766_v14  ;;  %vm15786_vm9 = vmmov %vm15768_vm6  ;;  %v7157_v14 = vadd.f32 %v14446_v31, %v14434_v37 }
 0x878   : > { %v7042_v19 = vadd.f32 %v14489_v41, %v7030_v28  ;;  %10313 = vmatmul.msk.bf16.vlgmr.msra.gmra.mxu1 %vm15768_vm6, %v15785_v63  ;;  %v7922_v28 = vld [vmem:[#allocation5 + $0x30] sm:$0xff] }
 0x879   : > { %v14609_v8 = vpop.f32.mrf.mxu3  ;;  %v14611_v5 = vpop.f32.mrf.mxu2  ;;  %v14635_v25 = vpack.c.bf16 %v7922_v28, %v7921_v0  ;;  %v7924_v0 = vld [vmem:[#allocation5 + $0x40] sm:$0xff] }
 0x87a   : > { %10158 = vst.msk [vmem:[%s13123_s16 + $0x128] sm:$0xff] %vm15783_vm10, %v7042_v19 }
 0x87d   : > { %v7020_v33 = vpop.f32.mrf.mxu0  ;;  %v14618_v13 = vpop.f32.mrf.mxu1 }
 0x87e   : > { %v7031_v60 = vadd.f32 %v7020_v33, %v6953_v44  ;;  %10286 = vmatmul.msk.bf16.gmra.mxu3 %vm15786_vm9, %v7771_v45  ;;  %vm15787_vm9 = vmmov %vm15768_vm6  ;;  %v8050_v44 = vld [vmem:[#allocation5 + $0xd8] sm:$0xff]  ;;  %v7237_v33 = vadd.f32 %v14505_v23, %v7157_v14  ;;  %v8049_v45 = vld [vmem:[#allocation5 + $0xd0] sm:$0xff]  ;;  %v7159_v23 = vadd.f32 %v14462_v4, %v14449_v2 }
 0x87f   : > { %v14658_v37 = vpack.c.bf16 %v8050_v44, %v8049_v45  ;;  %v15791_v44 = vld [vmem:[#allocation26_spill] sm:$0xff] }
 0x880   : > { %v7043_v11 = vadd.f32 %v14489_v41, %v7031_v60  ;;  %10248 = vmatmul.msk.bf16.gmra.mxu0 %vm15768_vm6, %v14114_v15 }
 0x881   : > { %v14628_v59 = vpop.f32.mrf.mxu3  ;;  %v14630_v6 = vpop.f32.mrf.mxu2 }
 0x882   : > { %10159 = vst.msk [vmem:[%s13123_s16 + $0x130] sm:$0xff] %vm15783_vm10, %v7043_v11 }
 0x885   : > { %v7022_v19 = vpop.f32.mrf.mxu0  ;;  %v14633_v63 = vpop.f32.mrf.mxu1 }
 0x886   : > { %v7032_v15 = vadd.f32 %v7022_v19, %v6954_v62  ;;  %10322 = vmatmul.msk.bf16.gmra.mxu2 %vm15787_vm9, %v14635_v25  ;;  %vm15789_vm9 = vmmov %vm15768_vm6  ;;  %v10620_v19 = vld [vmem:[%s15341_s9 + $0x40] sm:$0xff] }
 0x887   : > { %8314 = vmatpush.bf16.msrb.mxu2 %v10620_v19 }
 0x888   : > { %v7044_v30 = vadd.f32 %v14489_v41, %v7032_v15  ;;  %10314 = vmatmul.msk.bf16.gmra.mxu1 %vm15768_vm6, %v15788_v58  ;;  %v14654_v41 = vld [vmem:[%s15342_s10] ss:$0 sm:$0xff]  ;;  %v7238_v15 = vadd.f32 %v14530_v32, %v7159_v23  ;;  %v10621_v32 = vld [vmem:[%s15341_s9 + $0x48] sm:$0xff] }
 0x889   : > { %v14646_v51 = vpop.f32.mrf.mxu3  ;;  %v14648_v49 = vpop.f32.mrf.mxu2  ;;  %8267 = vmatpush.bf16.msrb.mxu1 %v10621_v32  ;;  %v8051_v23 = vld [vmem:[#allocation5 + $0xe0] sm:$0xff]  ;;  %v7947_v32 = vsel %vm15741_vm3, %v14281_v29, 0.0  ;;  %v7167_v29 = vadd.f32 %v14528_v34, %v14515_v9 }
 0x88a   : > { %10160 = vst.msk [vmem:[%s13123_s16 + $0x138] sm:$0xff] %vm15783_vm10, %v7044_v30  ;;  %v7923_v30 = vld [vmem:[#allocation5 + $0x38] sm:$0xff] }
 0x88b   : > { %v14679_v14 = vpack.c.bf16 %v7924_v0, %v7923_v30 }
 0x88d   : > { %v7286_v60 = vpop.f32.mrf.mxu0  ;;  %v14656_v11 = vpop.f32.mrf.mxu1 }
 0x88e   : > { %v7306_v31 = vadd.f32 %v7286_v60, %v7237_v33  ;;  %10331 = vmatmul.msk.bf16.vlgmr.msra.gmra.mxu3 %vm15789_vm9, %v14658_v37  ;;  %vm15790_vm9 = vmmov %vm15768_vm6  ;;  %v7162_v33 = vadd.f32 %v14481_v38, %v14469_v48  ;;  %v7940_v38 = vld [vmem:[#allocation5 + $0xaf] sm:$0xff] }
 0x890   : > { %v7318_v22 = vadd.f32 %v14654_v41, %v7306_v31  ;;  %10293 = vmatmul.msk.bf16.vlgmr.msrb.gmra.mxu0 %vm15768_vm6, %v14161_v46  ;;  %v8052_v31 = vld [vmem:[#allocation5 + $0xe8] sm:$0xff] }
 0x891   : > { %v14669_v28 = vpop.f32.mrf.mxu2  ;;  %v14671_v62 = vpop.f32.mrf.mxu3 }
 0x892   : > { %10201 = vst.msk [vmem:[%s13123_s16 + $0x180] sm:$0xff] %vm15783_vm10, %v7318_v22  ;;  %v7239_v22 = vadd.f32 %v14549_v47, %v7162_v33 }
 0x895   : > { %v7288_v58 = vpop.f32.mrf.mxu0  ;;  %v14677_v46 = vpop.f32.mrf.mxu1 }
 0x896   : > { %v7307_v2 = vadd.f32 %v7288_v58, %v7238_v15  ;;  %10323 = vmatmul.msk.bf16.gmra.mxu2 %vm15790_vm9, %v14679_v14  ;;  %v14700_v15 = vpack.c.bf16 %v8052_v31, %v8051_v23  ;;  %vm15792_vm9 = vmmov %vm15768_vm6  ;;  %v7164_v58 = vadd.f32 %v14503_v52, %v14493_v7 }
 0x898   : > { %v7319_v4 = vadd.f32 %v14654_v41, %v7307_v2  ;;  %10315 = vmatmul.msk.bf16.gmra.mxu1 %vm15768_vm6, %v15791_v44  ;;  %v7926_v44 = vld [vmem:[#allocation5 + $0x50] sm:$0xff]  ;;  %v7240_v33 = vadd.f32 %v14568_v54, %v7164_v58  ;;  %v7241_v58 = vadd.f32 %v14590_v57, %v7167_v29  ;;  %v8216_v29 = vld [vmem:[#allocation5 + $0x78] sm:$0xff] }
 0x899   : > { %v14693_v45 = vpop.f32.mrf.mxu2  ;;  %v14695_v60 = vpop.f32.mrf.mxu3 }
 0x89a   : > { %10202 = vst.msk [vmem:[%s13123_s16 + $0x188] sm:$0xff] %vm15783_vm10, %v7319_v4  ;;  %v7925_v4 = vld [vmem:[#allocation5 + $0x48] sm:$0xff] }
 0x89b   : > { %v14723_v52 = vpack.c.bf16 %v7926_v44, %v7925_v4  ;;  %v8053_v4 = vld [vmem:[#allocation5 + $0xf0] sm:$0xff] }
 0x89d   : > { %v7291_v0 = vpop.f32.mrf.mxu0  ;;  %v14698_v19 = vpop.f32.mrf.mxu1 }
 0x89e   : > { %v7308_v30 = vadd.f32 %v7291_v0, %v7239_v22  ;;  %10332 = vmatmul.msk.bf16.gmra.mxu3 %vm15792_vm9, %v14700_v15  ;;  %vm15793_vm9 = vmmov %vm15768_vm6 }
 0x8a0   : > { %v7320_v48 = vadd.f32 %v14654_v41, %v7308_v30  ;;  %10294 = vmatmul.msk.bf16.gmra.mxu0 %vm15768_vm6, %v14209_v21  ;;  %v7948_v21 = vsel %vm15740_vm14, %v7940_v38, 0.0  ;;  %v10622_v38 = vld [vmem:[%s15341_s9 + $0x50] sm:$0xff] }
 0x8a1   : > { %v14711_v47 = vpop.f32.mrf.mxu2  ;;  %v14713_v2 = vpop.f32.mrf.mxu3  ;;  %v7952_v23 = vpack.c.bf16 %v7948_v21, %v7947_v32  ;;  %8375 = vmatpush.bf16.msrb.mxu3 %v10622_v38 }
 0x8a2   : > { %10203 = vst.msk [vmem:[%s13123_s16 + $0x190] sm:$0xff] %vm15783_vm10, %v7320_v48  ;;  %v8054_v48 = vld [vmem:[#allocation5 + $0xf8] sm:$0xff] }
 0x8a3   : > { %v14741_v32 = vpack.c.bf16 %v8054_v48, %v8053_v4 }
 0x8a5   : > { %v7293_v31 = vpop.f32.mrf.mxu0  ;;  %v14721_v7 = vpop.f32.mrf.mxu1 }
 0x8a6   : > { %v7309_v22 = vadd.f32 %v7293_v31, %v7240_v33  ;;  %10324 = vmatmul.msk.bf16.gmra.mxu2 %vm15793_vm9, %v14723_v52  ;;  %vm15794_vm9 = vmmov %vm15768_vm6  ;;  %v7169_v33 = vadd.f32 %v14547_v3, %v14537_v1 }
 0x8a8   : > { %v7321_v0 = vadd.f32 %v14654_v41, %v7309_v22  ;;  %10316 = vmatmul.msk.bf16.gmra.mxu1 %vm15768_vm6, %v7952_v23  ;;  %v8217_v22 = vld [vmem:[#allocation5 + $0x80] sm:$0xff]  ;;  %v10623_v23 = vld [vmem:[%s15341_s9 + $0x58] sm:$0xff] }
 0x8a9   : > { %v14733_v54 = vpop.f32.mrf.mxu2  ;;  %v14735_v30 = vpop.f32.mrf.mxu3  ;;  %8444 = vmatpush.bf16.msrb.mxu0 %v10623_v23  ;;  %v14762_v48 = vpack.c.bf16 %v8217_v22, %v8216_v29 }
 0x8aa   : > { %10204 = vst.msk [vmem:[%s13123_s16 + $0x198] sm:$0xff] %vm15783_vm10, %v7321_v0  ;;  %v7242_v0 = vadd.f32 %v14609_v8, %v7169_v33  ;;  %v7172_v8 = vadd.f32 %v14566_v55, %v14556_v50  ;;  %v7174_v50 = vadd.f32 %v14588_v39, %v14578_v12  ;;  %v8119_v39 = vld [vmem:[#allocation5 + $0x137] sm:$0xff] }
 0x8ad   : > { %v7296_v44 = vpop.f32.mrf.mxu0  ;;  %v14743_v34 = vpop.f32.mrf.mxu1 }
 0x8ae   : > { %v7310_v9 = vadd.f32 %v7296_v44, %v7241_v58  ;;  %10333 = vmatmul.msk.bf16.gmra.mxu3 %vm15794_vm9, %v14741_v32  ;;  %vm15795_vm9 = vmmov %vm15768_vm6  ;;  %v8056_v44 = vld [vmem:[#allocation5 + $0x108] sm:$0xff] }
 0x8b0   : > { %v7322_v21 = vadd.f32 %v14654_v41, %v7310_v9  ;;  %10295 = vmatmul.msk.bf16.gmra.mxu0 %vm15768_vm6, %v14251_v42  ;;  %v7243_v9 = vadd.f32 %v14628_v59, %v7172_v8  ;;  %v8219_v59 = vld [vmem:[#allocation5 + $0x90] sm:$0xff] }
 0x8b1   : > { %v14754_v57 = vpop.f32.mrf.mxu2  ;;  %v14756_v31 = vpop.f32.mrf.mxu3 }
 0x8b2   : > { %10205 = vst.msk [vmem:[%s13123_s16 + $0x1a0] sm:$0xff] %vm15783_vm10, %v7322_v21  ;;  %v8055_v21 = vld [vmem:[#allocation5 + $0x100] sm:$0xff] }
 0x8b3   : > { %v14780_v22 = vpack.c.bf16 %v8056_v44, %v8055_v21  ;;  %v8339_v21 = vld [vmem:[#allocation5 + $0x138] sm:$0xff] }
 0x8b5   : > { %v7298_v42 = vpop.f32.mrf.mxu0  ;;  %v14769_v38 = vpop.f32.mrf.mxu1 }
 0x8b6   : > { %v7311_v1 = vadd.f32 %v7298_v42, %v7242_v0  ;;  %10369 = vmatmul.msk.bf16.vlgmr.msrb.gmra.mxu2 %vm15795_vm9, %v14762_v48  ;;  %vm15796_vm9 = vmmov %vm15768_vm6  ;;  %v7244_v42 = vadd.f32 %v14646_v51, %v7174_v50 }
 0x8b8   : > { %v7323_v3 = vadd.f32 %v14654_v41, %v7311_v1  ;;  %10361 = vmatmul.msk.bf16.vlgmr.msrb.gmra.mxu1 %vm15768_vm6, %v14598_v10 }
 0x8b9   : > { %v14775_v58 = vpop.f32.mrf.mxu3  ;;  %v14777_v4 = vpop.f32.mrf.mxu2 }
 0x8ba   : > { %10206 = vst.msk [vmem:[%s13123_s16 + $0x1a8] sm:$0xff] %vm15783_vm10, %v7323_v3  ;;  %v8218_v3 = vld [vmem:[#allocation5 + $0x88] sm:$0xff] }
 0x8bb   : > { %v14798_v44 = vpack.c.bf16 %v8219_v59, %v8218_v3  ;;  %v8338_v59 = vld [vmem:[#allocation5 + $0x130] sm:$0xff] }
 0x8bd   : > { %v7301_v33 = vpop.f32.mrf.mxu0  ;;  %v14796_v1 = vpop.f32.mrf.mxu1 }
 0x8be   : > { %v7312_v23 = vadd.f32 %v7301_v33, %v7243_v9  ;;  %10334 = vmatmul.msk.bf16.gmra.mxu3 %vm15796_vm9, %v14780_v22  ;;  %vm15797_vm9 = vmmov %vm15768_vm6  ;;  %v7440_v9 = vadd.f32 %v14611_v5, %v14596_v35  ;;  %v8118_v33 = vld [vmem:[#allocation5 + $0x12f] sm:$0xff]  ;;  %v14821_v5 = vpack.c.bf16 %v8339_v21, %v8338_v59 }
 0x8c0   : > { %v7324_v0 = vadd.f32 %v14654_v41, %v7312_v23  ;;  %10296 = vmatmul.msk.bf16.gmra.mxu0 %vm15768_vm6, %v14297_v20  ;;  %v7521_v50 = vadd.f32 %v14671_v62, %v7440_v9  ;;  %v7442_v9 = vadd.f32 %v14630_v6, %v14618_v13  ;;  %v8221_v23 = vld [vmem:[#allocation5 + $0xa0] sm:$0xff] }
 0x8c1   : > { %v14791_v55 = vpop.f32.mrf.mxu3  ;;  %v14793_v29 = vpop.f32.mrf.mxu2 }
 0x8c2   : > { %10207 = vst.msk [vmem:[%s13123_s16 + $0x1b0] sm:$0xff] %vm15783_vm10, %v7324_v0  ;;  %v8127_v0 = vsel %vm15645_vm2, %v8119_v39, 0.0  ;;  %vm15800_vm2 = vmmov %vm15768_vm6 }
 0x8c5   : > { %v7303_v8 = vpop.f32.mrf.mxu0 }
 0x8c6   : > { %v7313_v20 = vadd.f32 %v7303_v8, %v7244_v42  ;;  %10370 = vmatmul.msk.bf16.gmra.mxu2 %vm15797_vm9, %v14798_v44  ;;  %v8126_v8 = vsel %vm15512_vm5, %v8118_v33, 0.0  ;;  %vm15801_vm9 = vmmov %vm15800_vm2  ;;  %v10624_v33 = vld [vmem:[%s15341_s9 + $0x60] sm:$0xff] }
 0x8c7   : > { %v8134_v39 = vpack.c.bf16 %v8127_v0, %v8126_v8  ;;  %v7522_v0 = vadd.f32 %v14695_v60, %v7442_v9  ;;  %8595 = vmatpush.bf16.msra.mxu2 %v10624_v33  ;;  %vm15803_vm5 = vmmov %vm15800_vm2  ;;  %v10625_v60 = vld [vmem:[%s15341_s9 + $0x68] sm:$0xff] }
 0x8c8   : > { %v7325_v12 = vadd.f32 %v14654_v41, %v7313_v20  ;;  %10362 = vmatmul.msk.bf16.gmra.mxu1 %vm15768_vm6, %v14635_v25  ;;  %v14817_v41 = vld [vmem:[%s15342_s10] ss:$0 sm:$0xff]  ;;  %v14825_v20 = vpop.f32.mrf.mxu1  ;;  %vm15802_vm6 = vmmov %vm15783_vm10  ;;  %v8341_v9 = vld [vmem:[#allocation5 + $0x148] sm:$0xff] }
 0x8c9   : > { %v14809_v51 = vpop.f32.mrf.mxu3  ;;  %v14819_v42 = vpop.f32.mrf.mxu2  ;;  %8548 = vmatpush.bf16.msra.mxu1 %v10625_v60 }
 0x8ca   : > { %10208 = vst.msk [vmem:[%s13123_s16 + $0x1b8] sm:$0xff] %vm15783_vm10, %v7325_v12  ;;  %vm15804_vm10 = vmmov %vm15800_vm2 }
 0x8cd   : > { %v7571_v35 = vpop.f32.mrf.mxu0 }
 0x8ce   : > { %v7591_v12 = vadd.f32 %v7571_v35, %v7521_v50  ;;  %10379 = vmatmul.msk.bf16.vlgmr.msrb.gmra.mxu3 %vm15800_vm2, %v14821_v5  ;;  %v8220_v50 = vld [vmem:[#allocation5 + $0x98] sm:$0xff]  ;;  %vm15805_vm2 = vmmov %vm15802_vm6 }
 0x8cf   : > { %v14841_v35 = vpack.c.bf16 %v8221_v23, %v8220_v50  ;;  %v8120_v23 = vld [vmem:[#allocation5 + $0x13f] sm:$0xff] }
 0x8d0   : > { %v7603_v62 = vadd.f32 %v14817_v41, %v7591_v12  ;;  %10341 = vmatmul.msk.bf16.vlgmr.msra.gmra.mxu0 %vm15801_vm9, %v8134_v39  ;;  %v14847_v13 = vpop.f32.mrf.mxu1  ;;  %v8121_v12 = vld [vmem:[#allocation5 + $0x147] sm:$0xff]  ;;  %v7445_v39 = vadd.f32 %v14648_v49, %v14633_v63  ;;  %v8128_v63 = vsel %vm15589_vm11, %v8120_v23, 0.0  ;;  %vm15808_vm9 = vmmov %vm15803_vm5 }
 0x8d1   : > { %v14835_v21 = vpop.f32.mrf.mxu3  ;;  %v14843_v8 = vpop.f32.mrf.mxu2  ;;  %vm15811_vm11 = vmmov %vm15803_vm5  ;;  %8725 = vmatpush.bf16.msra.mxu0 %v10627_v26 }
 0x8d2   : > { %10249 = vst.msk [vmem:[%s13123_s16 + $0x140] sm:$0xff] %vm15802_vm6, %v7603_v62  ;;  %v7523_v50 = vadd.f32 %v14713_v2, %v7445_v39  ;;  %vm15809_vm6 = vmmov %vm15803_vm5  ;;  %v7447_v2 = vadd.f32 %v14669_v28, %v14656_v11  ;;  %v8222_v39 = vld [vmem:[#allocation5 + $0xa8] sm:$0xff]  ;;  %v8123_v11 = vld [vmem:[#allocation5 + $0x157] sm:$0xff] }
 0x8d4   : > { %v7524_v23 = vadd.f32 %v14735_v30, %v7447_v2  ;;  %v8343_v30 = vld [vmem:[#allocation5 + $0x158] sm:$0xff] }
 0x8d5   : > { %v7573_v59 = vpop.f32.mrf.mxu0 }
 0x8d6   : > { %v7592_v3 = vadd.f32 %v7573_v59, %v7522_v0  ;;  %10371 = vmatmul.msk.bf16.gmra.mxu2 %vm15803_vm5, %v14841_v35  ;;  %v8129_v0 = vsel %vm15649_vm13, %v8121_v12, 0.0  ;;  %v8340_v59 = vld [vmem:[#allocation5 + $0x140] sm:$0xff]  ;;  %vm15810_vm13 = vmmov %vm15805_vm2 }
 0x8d7   : > { %v14864_v27 = vpack.c.bf16 %v8341_v9, %v8340_v59  ;;  %v8223_v9 = vld [vmem:[#allocation5 + $0xb0] sm:$0xff] }
 0x8d8   : > { %v7604_v6 = vadd.f32 %v14817_v41, %v7592_v3  ;;  %10363 = vmatmul.msk.bf16.gmra.mxu1 %vm15804_vm10, %v14679_v14  ;;  %v14876_v12 = vpop.f32.mrf.mxu1  ;;  %vm15812_vm10 = vmmov %vm15805_vm2 }
 0x8d9   : > { %v14859_v62 = vpop.f32.mrf.mxu3  ;;  %v14872_v60 = vpop.f32.mrf.mxu2 }
 0x8da   : > { %10250 = vst.msk [vmem:[%s13123_s16 + $0x148] sm:$0xff] %vm15805_vm2, %v7604_v6  ;;  %v8135_v6 = vpack.c.bf16 %v8129_v0, %v8128_v63  ;;  %v14883_v0 = vpack.c.bf16 %v8223_v9, %v8222_v39  ;;  %v10626_v63 = vld [vmem:[%s15341_s9 + $0x70] sm:$0xff]  ;;  %vm15813_vm2 = vmmov %vm15803_vm5 }
 0x8db   : > { %8656 = vmatpush.bf16.msra.mxu3 %v10626_v63 }
 0x8dd   : > { %v7576_v3 = vpop.f32.mrf.mxu0 }
 0x8de   : > { %v7593_v49 = vadd.f32 %v7576_v3, %v7523_v50  ;;  %10380 = vmatmul.msk.bf16.gmra.mxu3 %vm15808_vm9, %v14864_v27  ;;  %v8122_v3 = vld [vmem:[#allocation5 + $0x14f] sm:$0xff]  ;;  %vm15815_vm9 = vmmov %vm15812_vm10 }
 0x8e0   : > { %v7605_v17 = vadd.f32 %v14817_v41, %v7593_v49  ;;  %10342 = vmatmul.msk.bf16.gmra.mxu0 %vm15809_vm6, %v8135_v6  ;;  %v8131_v6 = vsel %vm15736_vm0, %v8123_v11, 0.0  ;;  %v14904_v39 = vpop.f32.mrf.mxu1  ;;  %vm15814_vm0 = vmmov %vm15813_vm2 }
 0x8e1   : > { %v14880_v40 = vpop.f32.mrf.mxu3  ;;  %v14899_v49 = vpop.f32.mrf.mxu2  ;;  %vm15817_vm6 = vmmov %vm15814_vm0 }
 0x8e2   : > { %10251 = vst.msk [vmem:[%s13123_s16 + $0x150] sm:$0xff] %vm15810_vm13, %v7605_v17  ;;  %v7450_v17 = vadd.f32 %v14693_v45, %v14677_v46  ;;  %v8342_v46 = vld [vmem:[#allocation5 + $0x150] sm:$0xff]  ;;  %vm15818_vm13 = vmmov %vm15815_vm9 }
 0x8e3   : > { %v14906_v9 = vpack.c.bf16 %v8343_v30, %v8342_v46  ;;  %v8124_v46 = vld [vmem:[#allocation5 + $0x15f] sm:$0xff] }
 0x8e4   : > { %v7525_v2 = vadd.f32 %v14756_v31, %v7450_v17  ;;  %v7452_v31 = vadd.f32 %v14711_v47, %v14698_v19  ;;  %v8125_v47 = vld [vmem:[#allocation5 + $0x167] sm:$0xff] }
 0x8e5   : > { %v7578_v33 = vpop.f32.mrf.mxu0 }
 0x8e6   : > { %v7594_v50 = vadd.f32 %v7578_v33, %v7524_v23  ;;  %10372 = vmatmul.msk.bf16.gmra.mxu2 %vm15811_vm11, %v14883_v0  ;;  %v8130_v23 = vsel %vm15696_vm8, %v8122_v3, 0.0  ;;  %v7526_v11 = vadd.f32 %v14775_v58, %v7452_v31  ;;  %vm15816_vm8 = vmmov %vm15814_vm0 }
 0x8e7   : > { %vm15819_vm11 = vmmov %vm15814_vm0 }
 0x8e8   : > { %v7606_v59 = vadd.f32 %v14817_v41, %v7594_v50  ;;  %10364 = vmatmul.msk.bf16.gmra.mxu1 %vm15803_vm5, %v14723_v52  ;;  %v8136_v50 = vpack.c.bf16 %v8131_v6, %v8130_v23  ;;  %v14926_v3 = vpop.f32.mrf.mxu1  ;;  %v7455_v6 = vadd.f32 %v14733_v54, %v14721_v7  ;;  %vm15821_vm5 = vmmov %vm15815_vm9 }
 0x8e9   : > { %v14894_v28 = vpop.f32.mrf.mxu3  ;;  %v14924_v17 = vpop.f32.mrf.mxu2 }
 0x8ea   : > { %10252 = vst.msk [vmem:[%s13123_s16 + $0x158] sm:$0xff] %vm15812_vm10, %v7606_v59  ;;  %v7527_v23 = vadd.f32 %v14791_v55, %v7455_v6  ;;  %v7457_v55 = vadd.f32 %v14754_v57, %v14743_v34  ;;  %vm15823_vm10 = vmmov %vm15814_vm0  ;;  %v7731_v34 = vadd.f32 %v14777_v4, %v14769_v38  ;;  %v7733_v4 = vadd.f32 %v14793_v29, %v14796_v1  ;;  %v10629_v1 = vld [vmem:[%s15341_s9 + $0x68] sm:$0xff] }
 0x8eb   : > { %8837 = vmatpush.bf16.msrb.mxu1 %v10629_v1 }
 0x8ec   : > { %v7819_v6 = vadd.f32 %v14835_v21, %v7731_v34 }
 0x8ed   : > { %v7581_v45 = vpop.f32.mrf.mxu0 }
 0x8ee   : > { %v7595_v33 = vadd.f32 %v7581_v45, %v7525_v2  ;;  %10381 = vmatmul.msk.bf16.gmra.mxu3 %vm15813_vm2, %v14906_v9  ;;  %v8345_v2 = vld [vmem:[#allocation5 + $0x168] sm:$0xff]  ;;  %v8133_v45 = vsel %vm15740_vm14, %v8125_v47, 0.0  ;;  %vm15820_vm14 = vmmov %vm15814_vm0 }
 0x8ef   : > { %vm15824_vm2 = vmmov %vm15821_vm5 }
 0x8f0   : > { %v7607_v61 = vadd.f32 %v14817_v41, %v7595_v33  ;;  %10343 = vmatmul.msk.bf16.gmra.mxu0 %vm15814_vm0, %v8136_v50  ;;  %v8344_v33 = vld [vmem:[#allocation5 + $0x160] sm:$0xff]  ;;  %v14950_v26 = vpop.f32.mrf.mxu1 }
 0x8f1   : > { %v14918_v59 = vpop.f32.mrf.mxu3  ;;  %v14946_v31 = vpop.f32.mrf.mxu2 }
 0x8f2   : > { %10253 = vst.msk [vmem:[%s13123_s16 + $0x160] sm:$0xff] %vm15815_vm9, %v7607_v61  ;;  %v14942_v61 = vpack.c.bf16 %v8345_v2, %v8344_v33  ;;  %vm15825_vm9 = vmmov %vm15814_vm0 }
 0x8f5   : > { %v7583_v30 = vpop.f32.mrf.mxu0 }
 0x8f6   : > { %v7596_v63 = vadd.f32 %v7583_v30, %v7526_v11  ;;  %10417 = vmatmul.msk.bf16.vlgmr.msra.gmra.mxu2 %vm15816_vm8, %v14762_v48  ;;  %v7528_v11 = vadd.f32 %v14809_v51, %v7457_v55  ;;  %vm15826_vm8 = vmmov %vm15824_vm2 }
 0x8f8   : > { %v7608_v19 = vadd.f32 %v14817_v41, %v7596_v63  ;;  %10409 = vmatmul.msk.bf16.vlgmr.msra.gmra.mxu1 %vm15817_vm6, %v14598_v10  ;;  %v8132_v10 = vsel %vm15741_vm3, %v8124_v46, 0.0  ;;  %vm15822_vm3 = vmmov %vm15814_vm0  ;;  %v14970_v57 = vpop.f32.mrf.mxu1 }
 0x8f9   : > { %v14937_v58 = vpop.f32.mrf.mxu3  ;;  %v8137_v54 = vpack.c.bf16 %v8133_v45, %v8132_v10  ;;  %v14966_v47 = vpop.f32.mrf.mxu2  ;;  %v10628_v45 = vld [vmem:[%s15341_s9 + $0x60] sm:$0xff]  ;;  %vm15827_vm6 = vmmov %vm15814_vm0 }
 0x8fa   : > { %10254 = vst.msk [vmem:[%s13123_s16 + $0x168] sm:$0xff] %vm15818_vm13, %v7608_v19  ;;  %8884 = vmatpush.bf16.msrb.mxu2 %v10628_v45  ;;  %vm15828_vm13 = vmmov %vm15814_vm0  ;;  %v8778_v45 = vld [vmem:[#allocation5 + $0x19] sm:$0xff] }
 0x8fd   : > { %v7586_v50 = vpop.f32.mrf.mxu0 }
 0x8fe   : > { %v7597_v7 = vadd.f32 %v7586_v50, %v7527_v23  ;;  %10382 = vmatmul.msk.bf16.gmra.mxu3 %vm15819_vm11, %v14942_v61  ;;  %v7820_v23 = vadd.f32 %v14859_v62, %v7733_v4  ;;  %v7736_v62 = vadd.f32 %v14819_v42, %v14825_v20  ;;  %vm15829_vm11 = vmmov %vm15824_vm2  ;;  %v7738_v42 = vadd.f32 %v14843_v8, %v14847_v13 }
 0x8ff   : > { %v7741_v8 = vadd.f32 %v14872_v60, %v14876_v12 }
 0x900   : > { %v7609_v36 = vadd.f32 %v14817_v41, %v7597_v7  ;;  %10344 = vmatmul.msk.bf16.gmra.mxu0 %vm15820_vm14, %v8137_v54  ;;  %v14999_v33 = vpop.f32.mrf.mxu1  ;;  %v7821_v54 = vadd.f32 %v14880_v40, %v7736_v62  ;;  %vm15830_vm14 = vmmov %vm15814_vm0  ;;  %v7822_v40 = vadd.f32 %v14894_v28, %v7738_v42  ;;  %v10630_v28 = vld [vmem:[%s15341_s9 + $0x70] sm:$0xff] }
 0x901   : > { %v14958_v18 = vpop.f32.mrf.mxu3  ;;  %v14993_v46 = vpop.f32.mrf.mxu2  ;;  %8953 = vmatpush.bf16.msrb.mxu3 %v10630_v28 }
 0x902   : > { %10255 = vst.msk [vmem:[%s13123_s16 + $0x170] sm:$0xff] %vm15821_vm5, %v7609_v36  ;;  %vm15831_vm5 = vmmov %vm15814_vm0 }
 0x905   : > { %v7588_v30 = vpop.f32.mrf.mxu0 }
 0x906   : > { %v7598_v63 = vadd.f32 %v7588_v30, %v7528_v11  ;;  %10418 = vmatmul.msk.bf16.gmra.mxu2 %vm15822_vm3, %v14798_v44  ;;  %vm15832_vm3 = vmmov %vm15824_vm2 }
 0x908   : > { %v7610_v19 = vadd.f32 %v14817_v41, %v7598_v63  ;;  %10410 = vmatmul.msk.bf16.gmra.mxu1 %vm15823_vm10, %v14635_v25  ;;  %v14980_v41 = vld [vmem:[%s15342_s10] ss:$0 sm:$0xff]  ;;  %v15018_v11 = vpop.f32.mrf.mxu1  ;;  %vm15833_vm10 = vmmov %vm15814_vm0 }
 0x909   : > { %v14974_v51 = vpop.f32.mrf.mxu3  ;;  %v15016_v36 = vpop.f32.mrf.mxu2 }
 0x90a   : > { %10256 = vst.msk [vmem:[%s13123_s16 + $0x178] sm:$0xff] %vm15824_vm2, %v7610_v19  ;;  %vm15834_vm2 = vmmov %vm15814_vm0 }
 0x90d   : > { %v7868_v2 = vpop.f32.mrf.mxu0 }
 0x90e   : > { %v7888_v25 = vadd.f32 %v7868_v2, %v7819_v6  ;;  %10427 = vmatmul.msk.bf16.vlgmr.msra.gmra.mxu3 %vm15814_vm0, %v14821_v5  ;;  %vm15835_vm0 = vmmov %vm15832_vm3 }
 0x910   : > { %v7900_v38 = vadd.f32 %v14980_v41, %v7888_v25  ;;  %10389 = vmatmul.msk.bf16.vlgmr.msrb.gmra.mxu0 %vm15825_vm9, %v14658_v37  ;;  %v15036_v6 = vpop.f32.mrf.mxu1  ;;  %v7823_v25 = vadd.f32 %v14918_v59, %v7741_v8  ;;  %vm15836_vm9 = vmmov %vm15834_vm2 }
 0x911   : > { %v14991_v21 = vpop.f32.mrf.mxu3  ;;  %v15032_v34 = vpop.f32.mrf.mxu2 }
 0x912   : > { %10297 = vst.msk [vmem:[%s13123_s16 + $0x1c0] sm:$0xff] %vm15826_vm8, %v7900_v38  ;;  %vm15837_vm8 = vmmov %vm15834_vm2 }
 0x915   : > { %v7870_v50 = vpop.f32.mrf.mxu0 }
 0x916   : > { %v7889_v10 = vadd.f32 %v7870_v50, %v7820_v23  ;;  %10419 = vmatmul.msk.bf16.gmra.mxu2 %vm15827_vm6, %v14841_v35  ;;  %v7743_v23 = vadd.f32 %v14899_v49, %v14904_v39  ;;  %vm15838_vm6 = vmmov %vm15835_vm0 }
 0x918   : > { %v7901_v29 = vadd.f32 %v14980_v41, %v7889_v10  ;;  %10411 = vmatmul.msk.bf16.gmra.mxu1 %vm15828_vm13, %v14679_v14  ;;  %v15060_v59 = vpop.f32.mrf.mxu1  ;;  %v10631_v10 = vld [vmem:[%s15341_s9 + $0x78] sm:$0xff]  ;;  %v7824_v1 = vadd.f32 %v14937_v58, %v7743_v23  ;;  %vm15839_vm13 = vnez %v15711_v56  ;;  %v8028_v23 = vadd.f32 %v14966_v47, %v14970_v57 }
 0x919   : > { %v15013_v7 = vpop.f32.mrf.mxu3  ;;  %v15056_v12 = vpop.f32.mrf.mxu2  ;;  %v8786_v62 = vsel %vm15839_vm13, %v8778_v45, 0.0  ;;  %9022 = vmatpush.bf16.msrb.mxu0 %v10631_v10  ;;  %v8030_v56 = vadd.f32 %v14993_v46, %v14999_v33  ;;  %v8910_v33 = vld [vmem:[#allocation5 + $0xe1] sm:$0xff] }
 0x91a   : > { %10298 = vst.msk [vmem:[%s13123_s16 + $0x1c8] sm:$0xff] %vm15829_vm11, %v7901_v29  ;;  %vm15840_vm11 = vmmov %vm15834_vm2  ;;  %v8108_v10 = vadd.f32 %v14991_v21, %v8028_v23 }
 0x91d   : > { %v7873_v55 = vpop.f32.mrf.mxu0 }
 0x91e   : > { %v7890_v14 = vadd.f32 %v7873_v55, %v7821_v54  ;;  %10428 = vmatmul.msk.bf16.gmra.mxu3 %vm15830_vm14, %v14864_v27  ;;  %vm15841_vm14 = vmmov %vm15834_vm2 }
 0x920   : > { %v7902_v30 = vadd.f32 %v14980_v41, %v7890_v14  ;;  %10390 = vmatmul.msk.bf16.gmra.mxu0 %vm15831_vm5, %v14700_v15  ;;  %v7746_v14 = vadd.f32 %v14924_v17, %v14926_v3  ;;  %vm15842_vm5 = vmmov %vm15835_vm0  ;;  %v15085_v42 = vpop.f32.mrf.mxu1  ;;  %v8780_v17 = vld [vmem:[#allocation5 + $0x29] sm:$0xff]  ;;  %v7748_v3 = vadd.f32 %v14946_v31, %v14950_v26  ;;  %v8909_v31 = vld [vmem:[#allocation5 + $0xd9] sm:$0xff] }
 0x921   : > { %v15029_v20 = vpop.f32.mrf.mxu3  ;;  %v15082_v58 = vpop.f32.mrf.mxu2 }
 0x922   : > { %10299 = vst.msk [vmem:[%s13123_s16 + $0x1d0] sm:$0xff] %vm15832_vm3, %v7902_v30  ;;  %v7825_v30 = vadd.f32 %v14958_v18, %v7746_v14  ;;  %vm15843_vm3 = vmmov %vm15834_vm2  ;;  %v7826_v8 = vadd.f32 %v14974_v51, %v7748_v3  ;;  %v8908_v51 = vld [vmem:[#allocation5 + $0xd1] sm:$0xff]  ;;  %v8109_v14 = vadd.f32 %v15013_v7, %v8030_v56  ;;  %v8033_v7 = vadd.f32 %v15016_v36, %v15018_v11  ;;  %v8784_v36 = vld [vmem:[#allocation5 + $0x49] sm:$0xff] }
 0x923   : > { %v8785_v11 = vld [vmem:[#allocation5 + $0x51] sm:$0xff]  ;;  %v8040_v16 = vadd.f32 %v15082_v58, %v15085_v42 }
 0x925   : > { %v7875_v63 = vpop.f32.mrf.mxu0 }
 0x926   : > { %v7891_v19 = vadd.f32 %v7875_v63, %v7822_v40  ;;  %10420 = vmatmul.msk.bf16.gmra.mxu2 %vm15833_vm10, %v14883_v0  ;;  %vm15844_vm10 = vmmov %vm15834_vm2 }
 0x928   : > { %v7903_v2 = vadd.f32 %v14980_v41, %v7891_v19  ;;  %10412 = vmatmul.msk.bf16.gmra.mxu1 %vm15834_vm2, %v14723_v52  ;;  %v8779_v52 = vld [vmem:[#allocation5 + $0x21] sm:$0xff]  ;;  %vm15845_vm2 = vmmov %vm15835_vm0 }
 0x929   : > { %v15045_v13 = vpop.f32.mrf.mxu3  ;;  %v8787_v50 = vsel %vm15710_vm7, %v8779_v52, 0.0  ;;  %v15105_v52 = vpop.f32.mrf.mxu1 }
 0x92a   : > { %10300 = vst.msk [vmem:[%s13123_s16 + $0x1d8] sm:$0xff] %vm15835_vm0, %v7903_v2  ;;  %v8794_v39 = vpack.c.bf16 %v8787_v50, %v8786_v62  ;;  %v8781_v2 = vld [vmem:[#allocation5 + $0x31] sm:$0xff]  ;;  %vm15846_vm0 = vnez %v15483_v53  ;;  %v8917_v50 = vsel %vm15710_vm7, %v8909_v31, 0.0  ;;  %vm15852_vm7 = vmmov %vm15843_vm3  ;;  %v8035_v53 = vadd.f32 %v15032_v34, %v15036_v6  ;;  %v8913_v6 = vld [vmem:[#allocation5 + $0xf9] sm:$0xff] }
 0x92b   : > { %v8789_v18 = vsel %vm15846_vm0, %v8781_v2, 0.0 }
 0x92d   : > { %v7878_v38 = vpop.f32.mrf.mxu0 }
 0x92e   : > { %v7892_v4 = vadd.f32 %v7878_v38, %v7823_v25  ;;  %10429 = vmatmul.msk.bf16.gmra.mxu3 %vm15836_vm9, %v14906_v9  ;;  %vm15847_vm9 = vnez %v15766_v24  ;;  %v15103_v25 = vpop.f32.mrf.mxu2  ;;  %v8792_v24 = vsel %vm15777_vm12, %v8784_v36, 0.0 }
 0x92f   : > { %v8788_v28 = vsel %vm15847_vm9, %v8780_v17, 0.0 }
 0x930   : > { %v7904_v60 = vadd.f32 %v14980_v41, %v7892_v4  ;;  %10391 = vmatmul.msk.bf16.gmra.mxu0 %vm15837_vm8, %v14741_v32  ;;  %v8795_v4 = vpack.c.bf16 %v8789_v18, %v8788_v28  ;;  %vm15848_vm8 = vmmov %vm15843_vm3  ;;  %v8110_v28 = vadd.f32 %v15029_v20, %v8033_v7 }
 0x931   : > { %v15069_v29 = vpop.f32.mrf.mxu3  ;;  %v15130_v57 = vpop.f32.mrf.mxu1 }
 0x932   : > { %10301 = vst.msk [vmem:[%s13123_s16 + $0x1e0] sm:$0xff] %vm15838_vm6, %v7904_v60  ;;  %vm15849_vm6 = vmmov %vm15843_vm3 }
 0x935   : > { %v7880_v49 = vpop.f32.mrf.mxu0 }
 0x936   : > { %v7893_v54 = vadd.f32 %v7880_v49, %v7824_v1  ;;  %10465 = vmatmul.msk.bf16.vlgmr.msrb.gmra.mxu2 %vm15840_vm11, %v8794_v39  ;;  %vm15850_vm11 = vmmov %vm15845_vm2  ;;  %v15123_v1 = vld [vmem:[%s15342_s10] ss:$0 sm:$0xff]  ;;  %v15127_v47 = vpop.f32.mrf.mxu2 }
 0x938   : > { %v7905_v55 = vadd.f32 %v14980_v41, %v7893_v54  ;;  %10457 = vmatmul.msk.bf16.vlgmr.msrb.gmra.mxu1 %vm15841_vm14, %v14762_v48  ;;  %vm15851_vm14 = vmmov %vm15843_vm3  ;;  %v8782_v54 = vld [vmem:[#allocation5 + $0x39] sm:$0xff] }
 0x939   : > { %v15087_v40 = vpop.f32.mrf.mxu3  ;;  %v15154_v3 = vpop.f32.mrf.mxu1 }
 0x93a   : > { %10302 = vst.msk [vmem:[%s13123_s16 + $0x1e8] sm:$0xff] %vm15842_vm5, %v7905_v55  ;;  %v8791_v55 = vsel %vm15658_vm4, %v8783_v43, 0.0  ;;  %vm15855_vm5 = vmmov %vm15843_vm3  ;;  %v8921_v43 = vsel %vm15658_vm4, %v8913_v6, 0.0 }
 0x93d   : > { %v7883_v63 = vpop.f32.mrf.mxu0 }
 0x93e   : > { %v7894_v19 = vadd.f32 %v7883_v63, %v7825_v30  ;;  %10430 = vmatmul.msk.bf16.gmra.mxu3 %vm15843_vm3, %v14942_v61  ;;  %v8790_v63 = vsel %vm15771_vm1, %v8782_v54, 0.0  ;;  %v15150_v46 = vpop.f32.mrf.mxu2 }
 0x93f   : > { %v8796_v2 = vpack.c.bf16 %v8791_v55, %v8790_v63 }
 0x940   : > { %v7906_v48 = vadd.f32 %v14980_v41, %v7894_v19  ;;  %10392 = vmatmul.msk.bf16.gmra.mxu0 %vm15844_vm10, %v14780_v22  ;;  %vm15856_vm10 = vmmov %vm15845_vm2 }
 0x941   : > { %v15107_v45 = vpop.f32.mrf.mxu3 }
 0x942   : > { %10303 = vst.msk [vmem:[%s13123_s16 + $0x1f0] sm:$0xff] %vm15845_vm2, %v7906_v48  ;;  %v8911_v48 = vld [vmem:[#allocation5 + $0xe9] sm:$0xff] }
 0x943   : > { %v8919_v18 = vsel %vm15846_vm0, %v8911_v48, 0.0  ;;  %vm15859_vm0 = vmmov %vm15856_vm10  ;;  %v8915_v48 = vld [vmem:[#allocation5 + $0x109] sm:$0xff] }
 0x944   : > { %vm15867_vm4 = vmmov %vm15859_vm0  ;;  %v8923_v42 = vsel %vm15779_vm15, %v8915_v48, 0.0 }
 0x945   : > { %v7885_v38 = vpop.f32.mrf.mxu0 }
 0x946   : > { %v7895_v60 = vadd.f32 %v7885_v38, %v7826_v8  ;;  %10466 = vmatmul.msk.bf16.gmra.mxu2 %vm15848_vm8, %v8795_v4  ;;  %v15177_v23 = vpop.f32.mrf.mxu2 }
 0x948   : > { %v7907_v26 = vadd.f32 %v14980_v41, %v7895_v60  ;;  %10458 = vmatmul.msk.bf16.gmra.mxu1 %vm15849_vm6, %v14798_v44  ;;  %v8916_v44 = vsel %vm15839_vm13, %v8908_v51, 0.0  ;;  %vm15853_vm13 = vmmov %vm15845_vm2  ;;  %v8793_v51 = vsel %vm15779_vm15, %v8785_v11, 0.0 }
 0x949   : > { %v8924_v62 = vpack.c.bf16 %v8917_v50, %v8916_v44  ;;  %v15135_v39 = vpop.f32.mrf.mxu3  ;;  %vm15857_vm2 = vmmov %vm15843_vm3  ;;  %v8111_v50 = vadd.f32 %v15045_v13, %v8035_v53  ;;  %v8038_v13 = vadd.f32 %v15056_v12, %v15060_v59  ;;  %v8113_v59 = vadd.f32 %v15087_v40, %v8040_v16 }
 0x94a   : > { %10304 = vst.msk [vmem:[%s13123_s16 + $0x1f8] sm:$0xff] %vm15850_vm11, %v7907_v26  ;;  %vm15858_vm8 = vmmov %vm15857_vm2  ;;  %v8317_v53 = vadd.f32 %v15150_v46, %v15154_v3 }
 0x94b   : > { %vm15863_vm6 = vmmov %vm15857_vm2 }
 0x94c   : > { %vm15864_vm11 = vmmov %vm15859_vm0 }
 0x94d   : > { %v8165_v41 = vpop.f32.mrf.mxu0  ;;  %vm15872_vm15 = vmmov %vm15859_vm0 }
 0x94e   : > { %v8185_v49 = vadd.f32 %v8165_v41, %v8108_v10  ;;  %10475 = vmatmul.msk.bf16.vlgmr.msrb.gmra.mxu3 %vm15851_vm14, %v8924_v62  ;;  %v15180_v10 = vpop.f32.mrf.mxu1  ;;  %v8797_v41 = vpack.c.bf16 %v8793_v51, %v8792_v24  ;;  %v8321_v56 = vpop.f32.mrf.mxu2  ;;  %vm15865_vm14 = vmmov %vm15857_vm2 }
 0x94f   : > { %v8319_v46 = vadd.f32 %v15177_v23, %v15180_v10 }
 0x950   : > { %v8197_v21 = vadd.f32 %v15123_v1, %v8185_v49  ;;  %10437 = vmatmul.msk.bf16.vlgmr.msra.gmra.mxu0 %vm15852_vm7, %v14658_v37  ;;  %v8912_v49 = vld [vmem:[#allocation5 + $0xf1] sm:$0xff]  ;;  %vm15866_vm7 = vmmov %vm15857_vm2 }
 0x951   : > { %v15160_v8 = vpop.f32.mrf.mxu3  ;;  %v8920_v54 = vsel %vm15771_vm1, %v8912_v49, 0.0  ;;  %vm15868_vm1 = vmmov %vm15859_vm0 }
 0x952   : > { %10345 = vst.msk [vmem:[%s13123_s16 + $0x300] sm:$0xff] %vm15853_vm13, %v8197_v21  ;;  %v8112_v21 = vadd.f32 %v15069_v29, %v8038_v13  ;;  %vm15869_vm13 = vmmov %vm15857_vm2  ;;  %v8397_v20 = vadd.f32 %v15160_v8, %v8317_v53 }
 0x955   : > { %v8167_v19 = vpop.f32.mrf.mxu0 }
 0x956   : > { %v8186_v37 = vadd.f32 %v8167_v19, %v8109_v14  ;;  %10467 = vmatmul.msk.bf16.gmra.mxu2 %vm15855_vm5, %v8796_v2  ;;  %v8926_v14 = vpack.c.bf16 %v8921_v43, %v8920_v54  ;;  %v8274_v63 = vpop.f32.mrf.mxu1  ;;  %v8323_v2 = vpop.f32.mrf.mxu2  ;;  %vm15870_vm5 = vmmov %vm15857_vm2 }
 0x957   : > { %v8322_v6 = vadd.f32 %v8321_v56, %v8274_v63 }
 0x958   : > { %v8198_v17 = vadd.f32 %v15123_v1, %v8186_v37  ;;  %10459 = vmatmul.msk.bf16.gmra.mxu1 %vm15843_vm3, %v14841_v35  ;;  %v8918_v35 = vsel %vm15847_vm9, %v8910_v33, 0.0  ;;  %vm15862_vm9 = vmmov %vm15857_vm2  ;;  %v8914_v37 = vld [vmem:[#allocation5 + $0x101] sm:$0xff] }
 0x959   : > { %v8925_v4 = vpack.c.bf16 %v8919_v18, %v8918_v35  ;;  %v15182_v44 = vpop.f32.mrf.mxu3  ;;  %v8922_v58 = vsel %vm15777_vm12, %v8914_v37, 0.0  ;;  %vm15871_vm12 = vmmov %vm15859_vm0 }
 0x95a   : > { %10346 = vst.msk [vmem:[%s13123_s16 + $0x308] sm:$0xff] %vm15856_vm10, %v8198_v17  ;;  %vm15873_vm3 = vmmov %vm15857_vm2  ;;  %v8398_v3 = vadd.f32 %v15182_v44, %v8319_v46 }
 0x95b   : > { %vm15874_vm10 = vmmov %vm15859_vm0 }
 0x95d   : > { %v8170_v38 = vpop.f32.mrf.mxu0 }
 0x95e   : > { %v8187_v60 = vadd.f32 %v8170_v38, %v8110_v28  ;;  %10476 = vmatmul.msk.bf16.gmra.mxu3 %vm15857_vm2, %v8925_v4  ;;  %v8276_v17 = vpop.f32.mrf.mxu1  ;;  %v8927_v28 = vpack.c.bf16 %v8923_v42, %v8922_v58  ;;  %vm15875_vm2 = vmmov %vm15859_vm0 }
 0x95f   : > { %v8324_v43 = vadd.f32 %v8323_v2, %v8276_v17 }
 0x960   : > { %v8199_v31 = vadd.f32 %v15123_v1, %v8187_v60  ;;  %10438 = vmatmul.msk.bf16.gmra.mxu0 %vm15858_vm8, %v14700_v15  ;;  %vm15876_vm8 = vmmov %vm15873_vm3 }
 0x961   : > { %v8382_v19 = vpop.f32.mrf.mxu3 }
 0x962   : > { %10347 = vst.msk [vmem:[%s13123_s16 + $0x310] sm:$0xff] %vm15859_vm0, %v8199_v31 }
 0x965   : > { %v8172_v15 = vpop.f32.mrf.mxu0 }
 0x966   : > { %v8188_v34 = vadd.f32 %v8172_v15, %v8111_v50  ;;  %10468 = vmatmul.msk.bf16.gmra.mxu2 %vm15862_vm9, %v8797_v41  ;;  %v8279_v4 = vpop.f32.mrf.mxu1  ;;  %vm15877_vm9 = vmmov %vm15859_vm0 }
 0x968   : > { %v8200_v62 = vadd.f32 %v15123_v1, %v8188_v34  ;;  %10460 = vmatmul.msk.bf16.gmra.mxu1 %vm15863_vm6, %v14883_v0  ;;  %vm15878_vm6 = vmmov %vm15873_vm3 }
 0x969   : > { %v8384_v7 = vpop.f32.mrf.mxu3 }
 0x96a   : > { %10348 = vst.msk [vmem:[%s13123_s16 + $0x318] sm:$0xff] %vm15864_vm11, %v8200_v62  ;;  %v8399_v62 = vadd.f32 %v8382_v19, %v8322_v6  ;;  %vm15879_vm11 = vmmov %vm15859_vm0 }
 0x96d   : > { %v8175_v55 = vpop.f32.mrf.mxu0 }
 0x96e   : > { %v8189_v0 = vadd.f32 %v8175_v55, %v8112_v21  ;;  %10477 = vmatmul.msk.bf16.gmra.mxu3 %vm15865_vm14, %v8926_v14  ;;  %v8400_v21 = vadd.f32 %v8384_v7, %v8324_v43  ;;  %vm15880_vm14 = vmmov %vm15859_vm0 }
 0x970   : > { %v8201_v12 = vadd.f32 %v15123_v1, %v8189_v0  ;;  %10439 = vmatmul.msk.bf16.gmra.mxu0 %vm15866_vm7, %v14741_v32  ;;  %v8043_v32 = vadd.f32 %v15103_v25, %v15105_v52  ;;  %v8326_v25 = vpop.f32.mrf.mxu2  ;;  %v8045_v52 = vadd.f32 %v15127_v47, %v15130_v57  ;;  %v8281_v47 = vpop.f32.mrf.mxu1  ;;  %v15234_v57 = vld [vmem:[%s15342_s10] ss:$0 sm:$0xff]  ;;  %vm15881_vm7 = vmmov %vm15873_vm3 }
 0x971   : > { %v8387_v60 = vpop.f32.mrf.mxu3  ;;  %v8327_v63 = vadd.f32 %v8326_v25, %v8279_v4 }
 0x972   : > { %10349 = vst.msk [vmem:[%s13123_s16 + $0x320] sm:$0xff] %vm15867_vm4, %v8201_v12  ;;  %v8114_v40 = vadd.f32 %v15107_v45, %v8043_v32  ;;  %v8115_v45 = vadd.f32 %v15135_v39, %v8045_v52  ;;  %vm15882_vm4 = vmmov %vm15859_vm0 }
 0x973   : > { %v8401_v12 = vadd.f32 %v8387_v60, %v8327_v63 }
 0x975   : > { %v8177_v29 = vpop.f32.mrf.mxu0 }
 0x976   : > { %v8190_v30 = vadd.f32 %v8177_v29, %v8113_v59 }
 0x978   : > { %v8202_v33 = vadd.f32 %v15123_v1, %v8190_v30  ;;  %v8284_v50 = vpop.f32.mrf.mxu1 }
 0x979   : > { %v8389_v39 = vpop.f32.mrf.mxu3 }
 0x97a   : > { %10350 = vst.msk [vmem:[%s13123_s16 + $0x328] sm:$0xff] %vm15868_vm1, %v8202_v33  ;;  %vm15883_vm1 = vmmov %vm15859_vm0 }
 0x97d   : > { %v8180_v18 = vpop.f32.mrf.mxu0 }
 0x97e   : > { %v8191_v35 = vadd.f32 %v8180_v18, %v8114_v40  ;;  %10478 = vmatmul.msk.bf16.gmra.mxu3 %vm15869_vm13, %v8927_v28  ;;  %vm15884_vm13 = vmmov %vm15859_vm0 }
 0x980   : > { %v8203_v38 = vadd.f32 %v15123_v1, %v8191_v35  ;;  %10440 = vmatmul.msk.bf16.gmra.mxu0 %vm15870_vm5, %v14780_v22  ;;  %v8328_v22 = vpop.f32.mrf.mxu2  ;;  %v8286_v10 = vpop.f32.mrf.mxu1  ;;  %vm15885_vm5 = vmmov %vm15859_vm0 }
 0x981   : > { %v8392_v41 = vpop.f32.mrf.mxu3  ;;  %v8329_v29 = vadd.f32 %v8328_v22, %v8281_v47 }
 0x982   : > { %10351 = vst.msk [vmem:[%s13123_s16 + $0x330] sm:$0xff] %vm15871_vm12, %v8203_v38  ;;  %vm15886_vm12 = vmmov %vm15859_vm0 }
 0x983   : > { %v8402_v2 = vadd.f32 %v8389_v39, %v8329_v29 }
 0x985   : > { %v8182_v36 = vpop.f32.mrf.mxu0 }
 0x986   : > { %v8192_v11 = vadd.f32 %v8182_v36, %v8115_v45 }
 0x988   : > { %v8204_v31 = vadd.f32 %v15123_v1, %v8192_v11  ;;  %v8331_v8 = vpop.f32.mrf.mxu2  ;;  %v8550_v0 = vpop.f32.mrf.mxu1 }
 0x989   : > { %v8394_v44 = vpop.f32.mrf.mxu3  ;;  %v8332_v32 = vadd.f32 %v8331_v8, %v8284_v50 }
 0x98a   : > { %10352 = vst.msk [vmem:[%s13123_s16 + $0x338] sm:$0xff] %vm15872_vm15, %v8204_v31  ;;  %vm15887_vm15 = vmmov %vm15859_vm0 }
 0x98b   : > { %v8403_v58 = vadd.f32 %v8392_v41, %v8332_v32 }
 0x98d   : > { %v8446_v24 = vpop.f32.mrf.mxu0 }
 0x98e   : > { %v8466_v26 = vadd.f32 %v8446_v24, %v8397_v20 }
 0x990   : > { %v8478_v1 = vadd.f32 %v15234_v57, %v8466_v26  ;;  %10485 = vmatmul.msk.bf16.vlgmr.msrb.gmra.mxu0 %vm15873_vm3, %v14821_v5  ;;  %v8333_v23 = vpop.f32.mrf.mxu2  ;;  %v8552_v37 = vpop.f32.mrf.mxu1  ;;  %vm15888_vm3 = vmmov %vm15859_vm0 }
 0x991   : > { %v8658_v19 = vpop.f32.mrf.mxu3  ;;  %v8334_v38 = vadd.f32 %v8333_v23, %v8286_v10 }
 0x992   : > { %10393 = vst.msk [vmem:[%s13123_s16 + $0x380] sm:$0xff] %vm15874_vm10, %v8478_v1  ;;  %vm15889_vm10 = vmmov %vm15859_vm0 }
 0x993   : > { %v8404_v25 = vadd.f32 %v8394_v44, %v8334_v38 }
 0x995   : > { %v8448_v51 = vpop.f32.mrf.mxu0 }
 0x996   : > { %v8467_v15 = vadd.f32 %v8448_v51, %v8398_v3 }
 0x998   : > { %v8479_v34 = vadd.f32 %v15234_v57, %v8467_v15  ;;  %v8597_v14 = vpop.f32.mrf.mxu2 }
 0x999   : > { %v8660_v48 = vpop.f32.mrf.mxu3  ;;  %v8598_v31 = vadd.f32 %v8597_v14, %v8550_v0 }
 0x99a   : > { %10394 = vst.msk [vmem:[%s13123_s16 + $0x388] sm:$0xff] %vm15875_vm2, %v8479_v34  ;;  %vm15890_vm2 = vmmov %vm15859_vm0 }
 0x99b   : > { %v8678_v53 = vadd.f32 %v8658_v19, %v8598_v31 }
 0x99d   : > { %v8451_v5 = vpop.f32.mrf.mxu0 }
 0x99e   : > { %v8468_v49 = vadd.f32 %v8451_v5, %v8399_v62 }
 0x9a0   : > { %v8480_v13 = vadd.f32 %v15234_v57, %v8468_v49  ;;  %10486 = vmatmul.msk.bf16.gmra.mxu0 %vm15876_vm8, %v14864_v27  ;;  %v8599_v30 = vpop.f32.mrf.mxu2  ;;  %vm15891_vm8 = vmmov %vm15859_vm0 }
 0x9a1   : > { %v8663_v28 = vpop.f32.mrf.mxu3  ;;  %v8600_v24 = vadd.f32 %v8599_v30, %v8552_v37 }
 0x9a2   : > { %10395 = vst.msk [vmem:[%s13123_s16 + $0x390] sm:$0xff] %vm15859_vm0, %v8480_v13 }
 0x9a3   : > { %v8679_v1 = vadd.f32 %v8660_v48, %v8600_v24 }
 0x9a5   : > { %v8453_v54 = vpop.f32.mrf.mxu0 }
 0x9a6   : > { %v8469_v56 = vadd.f32 %v8453_v54, %v8400_v21 }
 0x9a8   : > { %v8481_v55 = vadd.f32 %v15234_v57, %v8469_v56  ;;  %v8602_v42 = vpop.f32.mrf.mxu2 }
 0x9a9   : > { %v8665_v11 = vpop.f32.mrf.mxu3 }
 0x9aa   : > { %10396 = vst.msk [vmem:[%s13123_s16 + $0x398] sm:$0xff] %vm15877_vm9, %v8481_v55  ;;  %vm15892_vm9 = vmmov %vm15859_vm0 }
 0x9ad   : > { %v8456_v16 = vpop.f32.mrf.mxu0 }
 0x9ae   : > { %v8470_v27 = vadd.f32 %v8456_v16, %v8401_v12 }
 0x9b0   : > { %v8482_v59 = vadd.f32 %v15234_v57, %v8470_v27  ;;  %10487 = vmatmul.msk.bf16.gmra.mxu0 %vm15878_vm6, %v14906_v9  ;;  %v8555_v9 = vpop.f32.mrf.mxu1  ;;  %v8604_v60 = vpop.f32.mrf.mxu2  ;;  %vm15893_vm6 = vmmov %vm15859_vm0 }
 0x9b1   : > { %v8603_v51 = vadd.f32 %v8602_v42, %v8555_v9 }
 0x9b2   : > { %10397 = vst.msk [vmem:[%s13123_s16 + $0x3a0] sm:$0xff] %vm15879_vm11, %v8482_v59  ;;  %vm15894_vm11 = vmmov %vm15859_vm0 }
 0x9b3   : > { %v8680_v41 = vadd.f32 %v8663_v28, %v8603_v51 }
 0x9b5   : > { %v8458_v17 = vpop.f32.mrf.mxu0 }
 0x9b6   : > { %v8471_v33 = vadd.f32 %v8458_v17, %v8402_v2 }
 0x9b8   : > { %v8483_v7 = vadd.f32 %v15234_v57, %v8471_v33  ;;  %v8557_v45 = vpop.f32.mrf.mxu1  ;;  %v8607_v39 = vpop.f32.mrf.mxu2 }
 0x9b9   : > { %v8605_v49 = vadd.f32 %v8604_v60, %v8557_v45  ;;  %v15303_v45 = vld [vmem:[%s15342_s10] ss:$0 sm:$0xff] }
 0x9ba   : > { %10398 = vst.msk [vmem:[%s13123_s16 + $0x3a8] sm:$0xff] %vm15880_vm14, %v8483_v7  ;;  %vm15895_vm14 = vmmov %vm15859_vm0 }
 0x9bb   : > { %v8681_v23 = vadd.f32 %v8665_v11, %v8605_v49 }
 0x9bd   : > { %v8461_v40 = vpop.f32.mrf.mxu0 }
 0x9be   : > { %v8472_v18 = vadd.f32 %v8461_v40, %v8403_v58 }
 0x9c0   : > { %v8484_v35 = vadd.f32 %v15234_v57, %v8472_v18  ;;  %10488 = vmatmul.msk.bf16.gmra.mxu0 %vm15881_vm7, %v14942_v61  ;;  %v15274_v61 = vld [vmem:[%s15342_s10] ss:$0 sm:$0xff]  ;;  %v8560_v26 = vpop.f32.mrf.mxu1  ;;  %v8609_v50 = vpop.f32.mrf.mxu2  ;;  %vm15896_vm7 = vmmov %vm15859_vm0 }
 0x9c1   : > { %v8608_v56 = vadd.f32 %v8607_v39, %v8560_v26 }
 0x9c2   : > { %10399 = vst.msk [vmem:[%s13123_s16 + $0x3b0] sm:$0xff] %vm15882_vm4, %v8484_v35  ;;  %vm15897_vm4 = vmmov %vm15859_vm0 }
 0x9c5   : > { %v8463_v52 = vpop.f32.mrf.mxu0 }
 0x9c6   : > { %v8473_v4 = vadd.f32 %v8463_v52, %v8404_v25 }
 0x9c8   : > { %v8485_v36 = vadd.f32 %v15234_v57, %v8473_v4  ;;  %v8668_v57 = vpop.f32.mrf.mxu3  ;;  %v8562_v15 = vpop.f32.mrf.mxu1 }
 0x9c9   : > { %v8612_v10 = vpop.f32.mrf.mxu2  ;;  %v8682_v55 = vadd.f32 %v8668_v57, %v8608_v56  ;;  %v8610_v27 = vadd.f32 %v8609_v50, %v8562_v15 }
 0x9ca   : > { %10400 = vst.msk [vmem:[%s13123_s16 + $0x3b8] sm:$0xff] %vm15883_vm1, %v8485_v36  ;;  %vm15898_vm1 = vmmov %vm15859_vm0 }
 0x9cd   : > { %v8727_v22 = vpop.f32.mrf.mxu0 }
 0x9ce   : > { %v8747_v20 = vadd.f32 %v8727_v22, %v8678_v53 }
 0x9d0   : > { %v8759_v47 = vadd.f32 %v15274_v61, %v8747_v20  ;;  %v8670_v34 = vpop.f32.mrf.mxu3  ;;  %v8565_v44 = vpop.f32.mrf.mxu1 }
 0x9d1   : > { %v8614_v0 = vpop.f32.mrf.mxu2  ;;  %v8683_v59 = vadd.f32 %v8670_v34, %v8610_v27  ;;  %v8613_v48 = vadd.f32 %v8612_v10, %v8565_v44 }
 0x9d2   : > { %10441 = vst.msk [vmem:[%s13123_s16 + $0x340] sm:$0xff] %vm15884_vm13, %v8759_v47 }
 0x9d5   : > { %v8729_v46 = vpop.f32.mrf.mxu0 }
 0x9d6   : > { %v8748_v3 = vadd.f32 %v8729_v46, %v8679_v1 }
 0x9d8   : > { %v8760_v8 = vadd.f32 %v15274_v61, %v8748_v3  ;;  %v8673_v21 = vpop.f32.mrf.mxu3  ;;  %v8567_v19 = vpop.f32.mrf.mxu1 }
 0x9d9   : > { %v8886_v37 = vpop.f32.mrf.mxu2  ;;  %v8684_v7 = vadd.f32 %v8673_v21, %v8613_v48  ;;  %v8615_v40 = vadd.f32 %v8614_v0, %v8567_v19 }
 0x9da   : > { %10442 = vst.msk [vmem:[%s13123_s16 + $0x348] sm:$0xff] %vm15885_vm5, %v8760_v8 }
 0x9dd   : > { %v8732_v6 = vpop.f32.mrf.mxu0 }
 0x9de   : > { %v8749_v62 = vadd.f32 %v8732_v6, %v8680_v41 }
 0x9e0   : > { %v8761_v5 = vadd.f32 %v15274_v61, %v8749_v62  ;;  %v8675_v16 = vpop.f32.mrf.mxu3  ;;  %v8839_v17 = vpop.f32.mrf.mxu1 }
 0x9e1   : > { %v8888_v9 = vpop.f32.mrf.mxu2  ;;  %v8685_v28 = vadd.f32 %v8675_v16, %v8615_v40  ;;  %v8887_v4 = vadd.f32 %v8886_v37, %v8839_v17 }
 0x9e2   : > { %10443 = vst.msk [vmem:[%s13123_s16 + $0x350] sm:$0xff] %vm15886_vm12, %v8761_v5 }
 0x9e5   : > { %v8734_v13 = vpop.f32.mrf.mxu0 }
 0x9e6   : > { %v8750_v43 = vadd.f32 %v8734_v13, %v8681_v23 }
 0x9e8   : > { %v8762_v54 = vadd.f32 %v15274_v61, %v8750_v43  ;;  %v8955_v33 = vpop.f32.mrf.mxu3  ;;  %v8841_v18 = vpop.f32.mrf.mxu1 }
 0x9e9   : > { %v8975_v60 = vadd.f32 %v8955_v33, %v8887_v4  ;;  %v8891_v36 = vpop.f32.mrf.mxu2  ;;  %v8889_v47 = vadd.f32 %v8888_v9, %v8841_v18 }
 0x9ea   : > { %10444 = vst.msk [vmem:[%s13123_s16 + $0x358] sm:$0xff] %vm15887_vm15, %v8762_v54 }
 0x9ed   : > { %v8737_v14 = vpop.f32.mrf.mxu0 }
 0x9ee   : > { %v8751_v63 = vadd.f32 %v8737_v14, %v8682_v55 }
 0x9f0   : > { %v8763_v12 = vadd.f32 %v15274_v61, %v8751_v63  ;;  %v8957_v35 = vpop.f32.mrf.mxu3  ;;  %v8844_v31 = vpop.f32.mrf.mxu1 }
 0x9f1   : > { %v8893_v26 = vpop.f32.mrf.mxu2  ;;  %v8892_v3 = vadd.f32 %v8891_v36, %v8844_v31 }
 0x9f2   : > { %10445 = vst.msk [vmem:[%s13123_s16 + $0x360] sm:$0xff] %vm15888_vm3, %v8763_v12 }
 0x9f5   : > { %v8739_v29 = vpop.f32.mrf.mxu0 }
 0x9f6   : > { %v8752_v30 = vadd.f32 %v8739_v29, %v8683_v59 }
 0x9f8   : > { %v8764_v2 = vadd.f32 %v15274_v61, %v8752_v30  ;;  %v8960_v22 = vpop.f32.mrf.mxu3  ;;  %v8846_v57 = vpop.f32.mrf.mxu1 }
 0x9f9   : > { %v8977_v8 = vadd.f32 %v8960_v22, %v8892_v3  ;;  %v8896_v41 = vpop.f32.mrf.mxu2  ;;  %v8894_v34 = vadd.f32 %v8893_v26, %v8846_v57 }
 0x9fa   : > { %10446 = vst.msk [vmem:[%s13123_s16 + $0x368] sm:$0xff] %vm15889_vm10, %v8764_v2 }
 0x9fd   : > { %v8742_v32 = vpop.f32.mrf.mxu0 }
 0x9fe   : > { %v8753_v58 = vadd.f32 %v8742_v32, %v8684_v7 }
 0xa00   : > { %v8765_v42 = vadd.f32 %v15274_v61, %v8753_v58  ;;  %v8962_v46 = vpop.f32.mrf.mxu3  ;;  %v8849_v6 = vpop.f32.mrf.mxu1 }
 0xa01   : > { %v8978_v5 = vadd.f32 %v8962_v46, %v8894_v34  ;;  %v8897_v13 = vadd.f32 %v8896_v41, %v8849_v6  ;;  %v8898_v44 = vpop.f32.mrf.mxu2 }
 0xa02   : > { %10447 = vst.msk [vmem:[%s13123_s16 + $0x370] sm:$0xff] %vm15890_vm2, %v8765_v42 }
 0xa05   : > { %v8744_v38 = vpop.f32.mrf.mxu0 }
 0xa06   : > { %v8754_v25 = vadd.f32 %v8744_v38, %v8685_v28 }
 0xa08   : > { %v8766_v52 = vadd.f32 %v15274_v61, %v8754_v25  ;;  %v8976_v61 = vadd.f32 %v8957_v35, %v8889_v47  ;;  %v8965_v62 = vpop.f32.mrf.mxu3  ;;  %v8851_v43 = vpop.f32.mrf.mxu1 }
 0xa09   : > { %v8979_v21 = vadd.f32 %v8965_v62, %v8897_v13  ;;  %v8899_v63 = vadd.f32 %v8898_v44, %v8851_v43  ;;  %v8901_v19 = vpop.f32.mrf.mxu2 }
 0xa0a   : > { %10448 = vst.msk [vmem:[%s13123_s16 + $0x378] sm:$0xff] %vm15891_vm8, %v8766_v52 }
 0xa0d   : > { %v9024_v11 = vpop.f32.mrf.mxu0 }
 0xa0e   : > { %v9044_v53 = vadd.f32 %v9024_v11, %v8975_v60 }
 0xa10   : > { %v9056_v20 = vadd.f32 %v15303_v45, %v9044_v53  ;;  %v8967_v54 = vpop.f32.mrf.mxu3  ;;  %v8854_v27 = vpop.f32.mrf.mxu1 }
 0xa11   : > { %v8980_v0 = vadd.f32 %v8967_v54, %v8899_v63  ;;  %v8902_v30 = vadd.f32 %v8901_v19, %v8854_v27  ;;  %v8903_v17 = vpop.f32.mrf.mxu2 }
 0xa12   : > { %10489 = vst.msk [vmem:[%s13123_s16 + $0x3c0] sm:$0xff] %vm15859_vm0, %v9056_v20 }
 0xa15   : > { %v9026_v39 = vpop.f32.mrf.mxu0 }
 0xa16   : > { %v9045_v24 = vadd.f32 %v9026_v39, %v8976_v61 }
 0xa18   : > { %v9057_v1 = vadd.f32 %v15303_v45, %v9045_v24  ;;  %v8970_v59 = vpop.f32.mrf.mxu3  ;;  %v8856_v7 = vpop.f32.mrf.mxu1 }
 0xa19   : > { %v8981_v2 = vadd.f32 %v8970_v59, %v8902_v30  ;;  %v8904_v58 = vadd.f32 %v8903_v17, %v8856_v7 }
 0xa1a   : > { %10490 = vst.msk [vmem:[%s13123_s16 + $0x3c8] sm:$0xff] %vm15892_vm9, %v9057_v1 }
 0xa1d   : > { %v9029_v51 = vpop.f32.mrf.mxu0 }
 0xa1e   : > { %v9046_v50 = vadd.f32 %v9029_v51, %v8977_v8 }
 0xa20   : > { %v9058_v15 = vadd.f32 %v15303_v45, %v9046_v50  ;;  %v8972_v32 = vpop.f32.mrf.mxu3 }
 0xa21   : > { %v8982_v42 = vadd.f32 %v8972_v32, %v8904_v58 }
 0xa22   : > { %10491 = vst.msk [vmem:[%s13123_s16 + $0x3d0] sm:$0xff] %vm15893_vm6, %v9058_v15 }
 0xa25   : > { %v9031_v49 = vpop.f32.mrf.mxu0 }
 0xa26   : > { %v9047_v23 = vadd.f32 %v9031_v49, %v8978_v5 }
 0xa28   : > { %v9059_v10 = vadd.f32 %v15303_v45, %v9047_v23 }
 0xa2a   : > { %10492 = vst.msk [vmem:[%s13123_s16 + $0x3d8] sm:$0xff] %vm15894_vm11, %v9059_v10 }
 0xa2d   : > { %v9034_v56 = vpop.f32.mrf.mxu0 }
 0xa2e   : > { %v9048_v55 = vadd.f32 %v9034_v56, %v8979_v21 }
 0xa30   : > { %v9060_v14 = vadd.f32 %v15303_v45, %v9048_v55 }
 0xa32   : > { %10493 = vst.msk [vmem:[%s13123_s16 + $0x3e0] sm:$0xff] %vm15895_vm14, %v9060_v14 }
 0xa35   : > { %v9036_v12 = vpop.f32.mrf.mxu0 }
 0xa36   : > { %v9049_v16 = vadd.f32 %v9036_v12, %v8980_v0 }
 0xa38   : > { %v9061_v29 = vadd.f32 %v15303_v45, %v9049_v16 }
 0xa3a   : > { %10494 = vst.msk [vmem:[%s13123_s16 + $0x3e8] sm:$0xff] %vm15896_vm7, %v9061_v29 }
 0xa3d   : > { %v9039_v37 = vpop.f32.mrf.mxu0 }
 0xa3e   : > { %v9050_v48 = vadd.f32 %v9039_v37, %v8981_v2 }
 0xa40   : > { %v9062_v33 = vadd.f32 %v15303_v45, %v9050_v48 }
 0xa42   : > { %10495 = vst.msk [vmem:[%s13123_s16 + $0x3f0] sm:$0xff] %vm15897_vm4, %v9062_v33 }
 0xa45   : > { %v9041_v40 = vpop.f32.mrf.mxu0 }
 0xa46   : > { %v9051_v9 = vadd.f32 %v9041_v40, %v8982_v42 }
 0xa48   : > { %v9063_v18 = vadd.f32 %v15303_v45, %v9051_v9 }
 0xa4a   : > { %10496 = vst.msk [vmem:[%s13123_s16 + $0x3f8] sm:$0xff] %vm15898_vm1, %v9063_v18 }
 0xa4b PF: > { %s22_s17 = sadd.s32 1, %s10708_s17  }
 0xa4c   : > { %p19_p7 = scmp.ge.s32.totalorder %s22_s17, 4  }
 0xa4e   :  { %21 = sbr.rel (!%p19_p7) target bundleno = 1 (0x1), region = 163 }
 0xa53   :  { %9094 = vsyncpa [#allocation7], 1 }
 0xa54   :  { %9096 = vsyncpa [#allocation7 + $0x1], 1 }

</bundles_post_ra>
